<compile_context>
chip_gen: v7x
topology: tpu7x:2x2x1
jax: 0.10.0
libtpu: 0.0.40
codegen_flags: <defaults>
</compile_context>

<pallas_src>
import math

import jax
import jax.numpy as jnp
from jax.experimental import pallas as pl
from jax.experimental.pallas import tpu as pltpu

# ----------------------------------------------------------------------------
# Architecture constants (VanillaCNN(q=False), 64x64x5 inputs, actions = 3)
# ----------------------------------------------------------------------------
ACTION_DIM = 3
HIDDEN = 256
FLAT_FEATURES = 128          # conv4 out channels * 1 * 1
MLP_IN = FLAT_FEATURES + 3   # + speed, gear, rpm
ACTION_LIMIT = 1.0           # action_space.high[0]; unused in forward (spec)

_LOG_2PI = math.log(2.0 * math.pi)
_LOG2 = math.log(2.0)

# Stride-4 phase grid of the conv1 output that conv2 consumes (cropped to the
# receptive field of the final 1x1 conv4 output).
X4_W = 6                       # flat width of the (m, n) stride-4 grid
X4_MN = 36                     # 6 x 6 valid (m, n) positions per phase
X4_BLK = 40                    # rows per conv1 phase block (padded, mult. of 8)
X4_ROWS = 40                   # rows of the stride-4-packed conv1 scratch
P1_ROWS = 16 * X4_BLK          # 640 conv1 im2col rows per image
Q2 = 5 * X4_W                  # 30 conv2 output rows per phase
S2D3_ROWS = 32                 # conv2->conv3 s2d scratch rows (30 written)
Q3 = 4 * X4_W                  # 24 conv3 output rows (4x4 valid crop inside)


def _conv2_terms():
    """Static schedule of conv2 as phase-direct matmuls on the stride-4-packed
    conv1 output.  Each term is one (row-shift, lane-slice) MXU dot; all-zero
    kernel-tap blocks are dropped and the p-axis is lane-sliced."""
    terms = []
    w_off = 0
    for r in (0, 1):
        for s in (0, 1):
            for a in (0, 1):
                ps = [p for p in range(4) if 0 <= 4 * a + p - 2 * r < 4]
                if not ps:
                    continue
                for b in (0, 1):
                    qs = [q for q in range(4) if 0 <= 4 * b + q - 2 * s < 4]
                    if not qs:
                        continue
                    p_lo, p_hi = min(ps), max(ps) + 1
                    k = (p_hi - p_lo) * 4 * 64
                    terms.append(dict(
                        phase=r * 2 + s, r=r, s=s, a=a, b=b,
                        shift=a * X4_W + b,
                        p_lo=p_lo, p_hi=p_hi,
                        lane_lo=p_lo * 256, lane_hi=p_hi * 256,
                        w_lo=w_off, w_hi=w_off + k))
                    w_off += k
    return terms, w_off


CONV2_TERMS, CONV2_K = _conv2_terms()   # 9 terms, K_total = 6144


# ----------------------------------------------------------------------------
# The fused kernel: conv trunk + MLP + heads + rsample + log-prob (one image
# per grid step; batch split across TensorCores via "parallel").
# ----------------------------------------------------------------------------
def _actor_kernel(p1_ref, spd_ref, gear_ref, rpm_ref, eps_ref,
                  w1_ref, b1_ref, w2_ref, b2_ref, w3_ref, b3_ref,
                  w4_ref, b4_ref, wm1_ref, wext_ref, bm1_ref,
                  wm2_ref, bm2_ref, wh_ref, bh_ref,
                  act_ref, logp_ref,
                  x4_ref, s2d3_ref):
    f32 = jnp.float32
    bf16 = jnp.bfloat16

    # ---- conv1: ONE K=320 MXU matmul on the pre-packed im2col rows ----------
    y1 = jnp.dot(p1_ref[...], w1_ref[...], preferred_element_type=f32)
    y1 = jnp.maximum(y1 + b1_ref[...], 0.0).astype(bf16)            # [640, 64]
    # scatter the 16 stride-4 phase blocks of conv1's output into the lane axis
    for t in range(16):
        x4_ref[:, t * 64:(t + 1) * 64] = y1[t * X4_BLK:(t + 1) * X4_BLK, :]

    # ---- conv2: phase-direct K=512/1024 matmuls, output already s2d-packed ---
    b2v = b2_ref[...]
    for phase in range(4):
        acc = None
        for t in CONV2_TERMS:
            if t["phase"] != phase:
                continue
            lhs = x4_ref[t["shift"]:t["shift"] + Q2, t["lane_lo"]:t["lane_hi"]]
            rhs = w2_ref[t["w_lo"]:t["w_hi"], :]
            c = jnp.dot(lhs, rhs, preferred_element_type=f32)
            acc = c if acc is None else acc + c
        y2 = jnp.maximum(acc + b2v, 0.0).astype(bf16)                # [30, 64]
        s2d3_ref[0:Q2, phase * 64:(phase + 1) * 64] = y2
    s2d3_ref[Q2:S2D3_ROWS, :] = jnp.zeros((S2D3_ROWS - Q2, 256), bf16)

    # ---- conv3: 4 shifted K=256 matmuls on the s2d-packed conv2 output -------
    acc3 = None
    for a in (0, 1):
        for b in (0, 1):
            t = a * 2 + b
            c = jnp.dot(s2d3_ref[a * X4_W + b:a * X4_W + b + Q3, :],
                        w3_ref[t * 256:(t + 1) * 256, :],
                        preferred_element_type=f32)
            acc3 = c if acc3 is None else acc3 + c
    y3 = jnp.maximum(acc3 + b3_ref[...], 0.0).astype(bf16)           # [24, 128]

    # ---- conv4 (single 1x1 output): 16 taps over the 4x4 crop of conv3 -------
    acc4 = None
    for i in range(4):
        for j in range(4):
            t = i * 4 + j
            c = jnp.dot(y3[i * X4_W + j:i * X4_W + j + 1, :],
                        w4_ref[t * 128:(t + 1) * 128, :],
                        preferred_element_type=f32)
            acc4 = c if acc4 is None else acc4 + c
    h = jnp.maximum(acc4 + b4_ref[...], 0.0).astype(bf16)            # [1, 128]

    # ---- MLP (131 -> 256 -> 256, ReLU incl. output activation) ---------------
    wext = wext_ref[...]                                             # [3, 256] f32
    extra = (spd_ref[...] * wext[0:1, :]
             + gear_ref[...] * wext[1:2, :]
             + rpm_ref[...] * wext[2:3, :])                          # rank-1 VPU
    h1 = jnp.dot(h, wm1_ref[...], preferred_element_type=f32) + extra + bm1_ref[...]
    h1 = jnp.maximum(h1, 0.0).astype(bf16)
    h2 = jnp.dot(h1, wm2_ref[...], preferred_element_type=f32) + bm2_ref[...]
    h2 = jnp.maximum(h2, 0.0).astype(bf16)

    # ---- packed mean|log_std head + rsample + tanh-corrected log-prob --------
    head = jnp.dot(h2, wh_ref[...], preferred_element_type=f32) + bh_ref[...]
    mean = head[:, :ACTION_DIM]
    log_std = jnp.clip(head[:, ACTION_DIM:], -20.0, 2.0)
    std = jnp.exp(log_std)
    eps = eps_ref[...]
    action = mean + std * eps                                        # rsample
    # Normal(mean, std).log_prob(action).sum(-1); z == eps analytically.
    logp = jnp.sum(-0.5 * eps * eps - log_std - 0.5 * _LOG_2PI,
                   axis=-1, keepdims=True)
    # tanh-squash correction: sum 2*(log 2 - a - softplus(-2a)); stable softplus.
    x = -2.0 * action
    softplus = jnp.maximum(x, 0.0) + jnp.log(1.0 + jnp.exp(-jnp.abs(x)))
    logp = logp - jnp.sum(2.0 * (_LOG2 - action - softplus),
                          axis=-1, keepdims=True)

    act_ref[...] = action
    logp_ref[...] = logp


# ----------------------------------------------------------------------------
# Wrapper: one XLA fusion builds conv1's im2col (rows ordered so conv1's output
# drops directly into the stride-4 phase layout), then ONE pallas_call.
# ----------------------------------------------------------------------------
def _conv1_patches(images):
    B = images.shape[0]
    x = jnp.transpose(images.astype(jnp.float32), (0, 2, 3, 1)).astype(jnp.bfloat16)
    # conv1 output positions (y, x) in [0,24)^2 (receptive field of the final
    # 1x1 output, with padding margin); patch channel order = (kh, kw, ci).
    cols = [x[:, kh:kh + 47:2, kw:kw + 47:2, :]
            for kh in range(8) for kw in range(8)]                 # 64 x [B,24,24,5]
    p = jnp.stack(cols, axis=3).reshape(B, 24, 24, 320)
    # reorder rows to (phase p, phase q, m, n):  y = 4m+p, x = 4n+q
    p = p.reshape(B, 6, 4, 6, 4, 320)                              # (m, p, n, q)
    p = jnp.transpose(p, (0, 2, 4, 1, 3, 5))                       # (p, q, m, n)
    p = p.reshape(B, 16, X4_MN, 320)
    p = jnp.pad(p, ((0, 0), (0, 0), (0, X4_BLK - X4_MN), (0, 0)))  # pad to 40 rows
    return p.reshape(B, P1_ROWS, 320)


def actor_forward(params, images, speed, gear, rpm, eps):
    B = images.shape[0]
    f32 = jnp.float32
    p1 = _conv1_patches(images)
    spd = speed.reshape(B, 1, 1).astype(f32)
    gr = gear.reshape(B, 1, 1).astype(f32)
    rp = rpm.reshape(B, 1, 1).astype(f32)
    ep = eps.reshape(B, 1, ACTION_DIM).astype(f32)

    def wspec(arr):        # weights: full-array block, VMEM-resident across grid
        return pl.BlockSpec(arr.shape, lambda i, _n=arr.ndim: (0,) * _n)

    def bspec(inner):      # per-image block, leading batch dim squeezed
        return pl.BlockSpec((None,) + inner,
                            lambda i, _k=len(inner): (i,) + (0,) * _k)

    weights = (
        params["w1"], params["b1"].reshape(1, -1),
        params["w2"], params["b2"].reshape(1, -1),
        params["w3"], params["b3"].reshape(1, -1),
        params["w4"], params["b4"].reshape(1, -1),
        params["wm1"], params["wext"], params["bm1"].reshape(1, -1),
        params["wm2"], params["bm2"].reshape(1, -1),
        params["wh"], params["bh"].reshape(1, -1),
    )

    in_specs = ([bspec((P1_ROWS, 320)), bspec((1, 1)), bspec((1, 1)),
                 bspec((1, 1)), bspec((1, ACTION_DIM))]
                + [wspec(w) for w in weights])

    action, logp = pl.pallas_call(
        _actor_kernel,
        out_shape=(jax.ShapeDtypeStruct((B, 1, ACTION_DIM), f32),
                   jax.ShapeDtypeStruct((B, 1, 1), f32)),
        grid_spec=pltpu.PrefetchScalarGridSpec(
            num_scalar_prefetch=0,
            grid=(B,),
            in_specs=in_specs,
            out_specs=(bspec((1, ACTION_DIM)), bspec((1, 1))),
            scratch_shapes=[pltpu.VMEM((X4_ROWS, 1024), jnp.bfloat16),
                            pltpu.VMEM((S2D3_ROWS, 256), jnp.bfloat16)]),
        compiler_params=pltpu.CompilerParams(
            dimension_semantics=("parallel",)),      # batch across TCs on v7x
    )(p1, spd, gr, rp, ep, *weights)
    return action[:, 0, :], logp[:, 0, 0]


# ----------------------------------------------------------------------------
# Deterministic parameter init (PyTorch-like uniform(-1/sqrt(fan_in), +)),
# pre-arranged in the packed layouts the fused kernel consumes.
# ----------------------------------------------------------------------------
def init_params(key):
    f32 = jnp.float32
    bf16 = jnp.bfloat16
    keys = jax.random.split(key, 16)

    def uinit(k, shape, fan_in):
        lim = 1.0 / math.sqrt(fan_in)
        return jax.random.uniform(k, shape, f32, -lim, lim)

    params = {}

    # conv1 (5 -> 64, 8x8, stride 2) as a single [320, 64] im2col matmul weight.
    # TODO(synk): to load real torch conv weights [Cout,Cin,KH,KW], permute to
    # [KH,KW,Cin,Cout] before these reshapes/packings.
    w1 = uinit(keys[0], (8, 8, 5, 64), 320)
    params["w1"] = w1.reshape(320, 64).astype(bf16)
    params["b1"] = uinit(keys[1], (64,), 320)

    # conv2 (64 -> 64, 4x4, stride 2): phase-direct packed weight blocks.
    w2 = uinit(keys[2], (4, 4, 64, 64), 1024)
    blocks = []
    for t in CONV2_TERMS:
        npb = t["p_hi"] - t["p_lo"]
        blk = jnp.zeros((npb, 4, 64, 64), f32)
        for p in range(t["p_lo"], t["p_hi"]):
            kh = 4 * t["a"] + p - 2 * t["r"]
            for q in range(4):
                kw = 4 * t["b"] + q - 2 * t["s"]
                if 0 <= kw < 4:
                    blk = blk.at[p - t["p_lo"], q].set(w2[kh, kw])
        blocks.append(blk.reshape(npb * 256, 64))
    w2cat = jnp.concatenate(blocks, axis=0)
    assert w2cat.shape[0] == CONV2_K
    params["w2"] = w2cat.astype(bf16)
    params["b2"] = uinit(keys[3], (64,), 1024)

    # conv3 (64 -> 128, 4x4, stride 2): 4 s2d taps of K=256.
    w3 = uinit(keys[4], (4, 4, 64, 128), 1024)
    taps = []
    for a in (0, 1):
        for b in (0, 1):
            taps.append(jnp.concatenate(
                [w3[2 * a + r, 2 * b + s] for r in (0, 1) for s in (0, 1)], axis=0))
    params["w3"] = jnp.concatenate(taps, axis=0).astype(bf16)       # [1024, 128]
    params["b3"] = uinit(keys[5], (128,), 1024)

    # conv4 (128 -> 128, 4x4, stride 2, single 1x1 output): flattened taps.
    w4 = uinit(keys[6], (4, 4, 128, 128), 2048)
    params["w4"] = w4.reshape(2048, 128).astype(bf16)
    params["b4"] = uinit(keys[7], (128,), 2048)

    # MLP layer 1 (131 -> 256): 128-aligned matmul + 3 rank-1 scalar extras.
    wm1 = uinit(keys[8], (MLP_IN, HIDDEN), MLP_IN)
    params["wm1"] = wm1[:FLAT_FEATURES].astype(bf16)
    params["wext"] = wm1[FLAT_FEATURES:]                            # [3, 256] f32
    params["bm1"] = uinit(keys[9], (HIDDEN,), MLP_IN)

    # MLP layer 2 (256 -> 256).
    params["wm2"] = uinit(keys[10], (HIDDEN, HIDDEN), HIDDEN).astype(bf16)
    params["bm2"] = uinit(keys[11], (HIDDEN,), HIDDEN)

    # packed mean | log_std head (256 -> 2*A).
    wm = uinit(keys[12], (HIDDEN, ACTION_DIM), HIDDEN)
    bm = uinit(keys[13], (ACTION_DIM,), HIDDEN)
    ws = uinit(keys[14], (HIDDEN, ACTION_DIM), HIDDEN)
    bs = uinit(keys[15], (ACTION_DIM,), HIDDEN)
    params["wh"] = jnp.concatenate([wm, ws], axis=1).astype(bf16)
    params["bh"] = jnp.concatenate([bm, bs], axis=0)
    return params


# ----------------------------------------------------------------------------
if __name__ == "__main__":
    key = jax.random.PRNGKey(0)
    k_img, k_spd, k_gear, k_rpm, k_par, k_eps = jax.random.split(key, 6)

    B = 2
    images = jax.random.normal(k_img, (B, 5, 64, 64), jnp.float32)
    speed = jax.random.uniform(k_spd, (B, 1), jnp.float32)
    gear = jax.random.uniform(k_gear, (B, 1), jnp.float32)
    rpm = jax.random.uniform(k_rpm, (B, 1), jnp.float32)
    # TODO(synk): torch.distributions.Normal.rsample is tied to torch's RNG;
    # the standard-normal eps is supplied externally instead.
    eps = jax.random.normal(k_eps, (B, ACTION_DIM), jnp.float32)

    params = init_params(k_par)

    fwd = jax.jit(actor_forward)
    action, probability = fwd(params, images, speed, gear, rpm, eps)
    jax.block_until_ready((action, probability))

    assert action.shape == (B, ACTION_DIM)
    assert probability.shape == (B,)
    assert bool(jnp.all(jnp.isfinite(action)))
    assert bool(jnp.all(jnp.isfinite(probability)))
    print("KERNEL_OK")
</pallas_src>

<mosaic_0001>
module attributes {stable_mosaic.version = 11 : i64} {
  func.func @_actor_kernel(%arg0: i32, %arg1: memref<1x640x320xbf16, #tpu.memory_space<vmem>>, %arg2: memref<1x1x1xf32, #tpu.memory_space<vmem>>, %arg3: memref<1x1x1xf32, #tpu.memory_space<vmem>>, %arg4: memref<1x1x1xf32, #tpu.memory_space<vmem>>, %arg5: memref<1x1x3xf32, #tpu.memory_space<vmem>>, %arg6: memref<320x64xbf16, #tpu.memory_space<vmem>>, %arg7: memref<1x64xf32, #tpu.memory_space<vmem>>, %arg8: memref<6144x64xbf16, #tpu.memory_space<vmem>>, %arg9: memref<1x64xf32, #tpu.memory_space<vmem>>, %arg10: memref<1024x128xbf16, #tpu.memory_space<vmem>>, %arg11: memref<1x128xf32, #tpu.memory_space<vmem>>, %arg12: memref<2048x128xbf16, #tpu.memory_space<vmem>>, %arg13: memref<1x128xf32, #tpu.memory_space<vmem>>, %arg14: memref<128x256xbf16, #tpu.memory_space<vmem>>, %arg15: memref<3x256xf32, #tpu.memory_space<vmem>>, %arg16: memref<1x256xf32, #tpu.memory_space<vmem>>, %arg17: memref<256x256xbf16, #tpu.memory_space<vmem>>, %arg18: memref<1x256xf32, #tpu.memory_space<vmem>>, %arg19: memref<256x6xbf16, #tpu.memory_space<vmem>>, %arg20: memref<1x6xf32, #tpu.memory_space<vmem>>, %arg21: memref<1x1x3xf32, #tpu.memory_space<vmem>>, %arg22: memref<1x1x1xf32, #tpu.memory_space<vmem>>, %arg23: memref<40x1024xbf16, #tpu.memory_space<vmem>>, %arg24: memref<32x256xbf16, #tpu.memory_space<vmem>>) attributes {dimension_semantics = [#tpu.dimension_semantics<parallel>], iteration_bounds = array<i64: 2>, scalar_prefetch = 0 : i64, scratch_operands = 2 : i64, tpu.core_type = #tpu.core_type<tc>, window_params = [{transform_indices = @transform_0, window_bounds = array<i64: 1, 640, 320>}, {transform_indices = @transform_1, window_bounds = array<i64: 1, 1, 1>}, {transform_indices = @transform_2, window_bounds = array<i64: 1, 1, 1>}, {transform_indices = @transform_3, window_bounds = array<i64: 1, 1, 1>}, {transform_indices = @transform_4, window_bounds = array<i64: 1, 1, 3>}, {pipeline_mode = #tpu.pipeline_mode<synchronous>, transform_indices = @transform_5, window_bounds = array<i64: 320, 64>}, {pipeline_mode = #tpu.pipeline_mode<synchronous>, transform_indices = @transform_6, window_bounds = array<i64: 1, 64>}, {pipeline_mode = #tpu.pipeline_mode<synchronous>, transform_indices = @transform_7, window_bounds = array<i64: 6144, 64>}, {pipeline_mode = #tpu.pipeline_mode<synchronous>, transform_indices = @transform_8, window_bounds = array<i64: 1, 64>}, {pipeline_mode = #tpu.pipeline_mode<synchronous>, transform_indices = @transform_9, window_bounds = array<i64: 1024, 128>}, {pipeline_mode = #tpu.pipeline_mode<synchronous>, transform_indices = @transform_10, window_bounds = array<i64: 1, 128>}, {pipeline_mode = #tpu.pipeline_mode<synchronous>, transform_indices = @transform_11, window_bounds = array<i64: 2048, 128>}, {pipeline_mode = #tpu.pipeline_mode<synchronous>, transform_indices = @transform_12, window_bounds = array<i64: 1, 128>}, {pipeline_mode = #tpu.pipeline_mode<synchronous>, transform_indices = @transform_13, window_bounds = array<i64: 128, 256>}, {pipeline_mode = #tpu.pipeline_mode<synchronous>, transform_indices = @transform_14, window_bounds = array<i64: 3, 256>}, {pipeline_mode = #tpu.pipeline_mode<synchronous>, transform_indices = @transform_15, window_bounds = array<i64: 1, 256>}, {pipeline_mode = #tpu.pipeline_mode<synchronous>, transform_indices = @transform_16, window_bounds = array<i64: 256, 256>}, {pipeline_mode = #tpu.pipeline_mode<synchronous>, transform_indices = @transform_17, window_bounds = array<i64: 1, 256>}, {pipeline_mode = #tpu.pipeline_mode<synchronous>, transform_indices = @transform_18, window_bounds = array<i64: 256, 6>}, {pipeline_mode = #tpu.pipeline_mode<synchronous>, transform_indices = @transform_19, window_bounds = array<i64: 1, 6>}, {transform_indices = @transform_20, window_bounds = array<i64: 1, 1, 3>}, {transform_indices = @transform_21, window_bounds = array<i64: 1, 1, 1>}]} {
    %c0 = arith.constant 0 : index
    %c0_0 = arith.constant 0 : index
    %c0_1 = arith.constant 0 : index
    %0 = vector.load %arg1[%c0, %c0_0, %c0_1] : memref<1x640x320xbf16, #tpu.memory_space<vmem>>, vector<1x640x320xbf16>
    %1 = vector.shape_cast %0 : vector<1x640x320xbf16> to vector<640x320xbf16>
    %c0_2 = arith.constant 0 : index
    %c0_3 = arith.constant 0 : index
    %2 = vector.load %arg6[%c0_2, %c0_3] : memref<320x64xbf16, #tpu.memory_space<vmem>>, vector<320x64xbf16>
    %cst = arith.constant dense<0.000000e+00> : vector<640x64xf32>
    %3 = tpu.matmul %1, %2, %cst {dimension_numbers = #tpu.dot_dimension_numbers<[1], [0], [0], [1], [0, 0, 1, 1], [], []>} : vector<640x320xbf16>, vector<320x64xbf16>, vector<640x64xf32> -> vector<640x64xf32>
    %c0_4 = arith.constant 0 : index
    %c0_5 = arith.constant 0 : index
    %4 = vector.load %arg7[%c0_4, %c0_5] : memref<1x64xf32, #tpu.memory_space<vmem>>, vector<1x64xf32>
    %5 = vector.broadcast %4 : vector<1x64xf32> to vector<640x64xf32>
    %6 = arith.addf %3, %5 : vector<640x64xf32>
    %cst_6 = arith.constant 0.000000e+00 : f32
    %7 = vector.broadcast %cst_6 : f32 to vector<640x64xf32>
    %8 = arith.maximumf %6, %7 : vector<640x64xf32>
    %9 = arith.truncf %8 : vector<640x64xf32> to vector<640x64xbf16>
    %10 = vector.extract_strided_slice %9 {offsets = [0, 0], sizes = [40, 64], strides = [1, 1]} : vector<640x64xbf16> to vector<40x64xbf16>
    %c0_7 = arith.constant 0 : index
    %c0_8 = arith.constant 0 : index
    %11 = vector.load %arg23[%c0_7, %c0_8] : memref<40x1024xbf16, #tpu.memory_space<vmem>>, vector<40x64xbf16>
    tpu.vector_store %arg23[%c0_7, %c0_8], %10 {strides = array<i32>} : memref<40x1024xbf16, #tpu.memory_space<vmem>>, vector<40x64xbf16>,
    %12 = vector.extract_strided_slice %9 {offsets = [40, 0], sizes = [40, 64], strides = [1, 1]} : vector<640x64xbf16> to vector<40x64xbf16>
    %c0_9 = arith.constant 0 : index
    %c64 = arith.constant 64 : index
    %13 = vector.load %arg23[%c0_9, %c64] : memref<40x1024xbf16, #tpu.memory_space<vmem>>, vector<40x64xbf16>
    tpu.vector_store %arg23[%c0_9, %c64], %12 {strides = array<i32>} : memref<40x1024xbf16, #tpu.memory_space<vmem>>, vector<40x64xbf16>,
    %14 = vector.extract_strided_slice %9 {offsets = [80, 0], sizes = [40, 64], strides = [1, 1]} : vector<640x64xbf16> to vector<40x64xbf16>
    %c0_10 = arith.constant 0 : index
    %c128 = arith.constant 128 : index
    %15 = vector.load %arg23[%c0_10, %c128] : memref<40x1024xbf16, #tpu.memory_space<vmem>>, vector<40x64xbf16>
    tpu.vector_store %arg23[%c0_10, %c128], %14 {strides = array<i32>} : memref<40x1024xbf16, #tpu.memory_space<vmem>>, vector<40x64xbf16>,
    %16 = vector.extract_strided_slice %9 {offsets = [120, 0], sizes = [40, 64], strides = [1, 1]} : vector<640x64xbf16> to vector<40x64xbf16>
    %c0_11 = arith.constant 0 : index
    %c192 = arith.constant 192 : index
    %17 = vector.load %arg23[%c0_11, %c192] : memref<40x1024xbf16, #tpu.memory_space<vmem>>, vector<40x64xbf16>
    tpu.vector_store %arg23[%c0_11, %c192], %16 {strides = array<i32>} : memref<40x1024xbf16, #tpu.memory_space<vmem>>, vector<40x64xbf16>,
    %18 = vector.extract_strided_slice %9 {offsets = [160, 0], sizes = [40, 64], strides = [1, 1]} : vector<640x64xbf16> to vector<40x64xbf16>
    %c0_12 = arith.constant 0 : index
    %c256 = arith.constant 256 : index
    %19 = vector.load %arg23[%c0_12, %c256] : memref<40x1024xbf16, #tpu.memory_space<vmem>>, vector<40x64xbf16>
    tpu.vector_store %arg23[%c0_12, %c256], %18 {strides = array<i32>} : memref<40x1024xbf16, #tpu.memory_space<vmem>>, vector<40x64xbf16>,
    %20 = vector.extract_strided_slice %9 {offsets = [200, 0], sizes = [40, 64], strides = [1, 1]} : vector<640x64xbf16> to vector<40x64xbf16>
    %c0_13 = arith.constant 0 : index
    %c320 = arith.constant 320 : index
    %21 = vector.load %arg23[%c0_13, %c320] : memref<40x1024xbf16, #tpu.memory_space<vmem>>, vector<40x64xbf16>
    tpu.vector_store %arg23[%c0_13, %c320], %20 {strides = array<i32>} : memref<40x1024xbf16, #tpu.memory_space<vmem>>, vector<40x64xbf16>,
    %22 = vector.extract_strided_slice %9 {offsets = [240, 0], sizes = [40, 64], strides = [1, 1]} : vector<640x64xbf16> to vector<40x64xbf16>
    %c0_14 = arith.constant 0 : index
    %c384 = arith.constant 384 : index
    %23 = vector.load %arg23[%c0_14, %c384] : memref<40x1024xbf16, #tpu.memory_space<vmem>>, vector<40x64xbf16>
    tpu.vector_store %arg23[%c0_14, %c384], %22 {strides = array<i32>} : memref<40x1024xbf16, #tpu.memory_space<vmem>>, vector<40x64xbf16>,
    %24 = vector.extract_strided_slice %9 {offsets = [280, 0], sizes = [40, 64], strides = [1, 1]} : vector<640x64xbf16> to vector<40x64xbf16>
    %c0_15 = arith.constant 0 : index
    %c448 = arith.constant 448 : index
    %25 = vector.load %arg23[%c0_15, %c448] : memref<40x1024xbf16, #tpu.memory_space<vmem>>, vector<40x64xbf16>
    tpu.vector_store %arg23[%c0_15, %c448], %24 {strides = array<i32>} : memref<40x1024xbf16, #tpu.memory_space<vmem>>, vector<40x64xbf16>,
    %26 = vector.extract_strided_slice %9 {offsets = [320, 0], sizes = [40, 64], strides = [1, 1]} : vector<640x64xbf16> to vector<40x64xbf16>
    %c0_16 = arith.constant 0 : index
    %c512 = arith.constant 512 : index
    %27 = vector.load %arg23[%c0_16, %c512] : memref<40x1024xbf16, #tpu.memory_space<vmem>>, vector<40x64xbf16>
    tpu.vector_store %arg23[%c0_16, %c512], %26 {strides = array<i32>} : memref<40x1024xbf16, #tpu.memory_space<vmem>>, vector<40x64xbf16>,
    %28 = vector.extract_strided_slice %9 {offsets = [360, 0], sizes = [40, 64], strides = [1, 1]} : vector<640x64xbf16> to vector<40x64xbf16>
    %c0_17 = arith.constant 0 : index
    %c576 = arith.constant 576 : index
    %29 = vector.load %arg23[%c0_17, %c576] : memref<40x1024xbf16, #tpu.memory_space<vmem>>, vector<40x64xbf16>
    tpu.vector_store %arg23[%c0_17, %c576], %28 {strides = array<i32>} : memref<40x1024xbf16, #tpu.memory_space<vmem>>, vector<40x64xbf16>,
    %30 = vector.extract_strided_slice %9 {offsets = [400, 0], sizes = [40, 64], strides = [1, 1]} : vector<640x64xbf16> to vector<40x64xbf16>
    %c0_18 = arith.constant 0 : index
    %c640 = arith.constant 640 : index
    %31 = vector.load %arg23[%c0_18, %c640] : memref<40x1024xbf16, #tpu.memory_space<vmem>>, vector<40x64xbf16>
    tpu.vector_store %arg23[%c0_18, %c640], %30 {strides = array<i32>} : memref<40x1024xbf16, #tpu.memory_space<vmem>>, vector<40x64xbf16>,
    %32 = vector.extract_strided_slice %9 {offsets = [440, 0], sizes = [40, 64], strides = [1, 1]} : vector<640x64xbf16> to vector<40x64xbf16>
    %c0_19 = arith.constant 0 : index
    %c704 = arith.constant 704 : index
    %33 = vector.load %arg23[%c0_19, %c704] : memref<40x1024xbf16, #tpu.memory_space<vmem>>, vector<40x64xbf16>
    tpu.vector_store %arg23[%c0_19, %c704], %32 {strides = array<i32>} : memref<40x1024xbf16, #tpu.memory_space<vmem>>, vector<40x64xbf16>,
    %34 = vector.extract_strided_slice %9 {offsets = [480, 0], sizes = [40, 64], strides = [1, 1]} : vector<640x64xbf16> to vector<40x64xbf16>
    %c0_20 = arith.constant 0 : index
    %c768 = arith.constant 768 : index
    %35 = vector.load %arg23[%c0_20, %c768] : memref<40x1024xbf16, #tpu.memory_space<vmem>>, vector<40x64xbf16>
    tpu.vector_store %arg23[%c0_20, %c768], %34 {strides = array<i32>} : memref<40x1024xbf16, #tpu.memory_space<vmem>>, vector<40x64xbf16>,
    %36 = vector.extract_strided_slice %9 {offsets = [520, 0], sizes = [40, 64], strides = [1, 1]} : vector<640x64xbf16> to vector<40x64xbf16>
    %c0_21 = arith.constant 0 : index
    %c832 = arith.constant 832 : index
    %37 = vector.load %arg23[%c0_21, %c832] : memref<40x1024xbf16, #tpu.memory_space<vmem>>, vector<40x64xbf16>
    tpu.vector_store %arg23[%c0_21, %c832], %36 {strides = array<i32>} : memref<40x1024xbf16, #tpu.memory_space<vmem>>, vector<40x64xbf16>,
    %38 = vector.extract_strided_slice %9 {offsets = [560, 0], sizes = [40, 64], strides = [1, 1]} : vector<640x64xbf16> to vector<40x64xbf16>
    %c0_22 = arith.constant 0 : index
    %c896 = arith.constant 896 : index
    %39 = vector.load %arg23[%c0_22, %c896] : memref<40x1024xbf16, #tpu.memory_space<vmem>>, vector<40x64xbf16>
    tpu.vector_store %arg23[%c0_22, %c896], %38 {strides = array<i32>} : memref<40x1024xbf16, #tpu.memory_space<vmem>>, vector<40x64xbf16>,
    %40 = vector.extract_strided_slice %9 {offsets = [600, 0], sizes = [40, 64], strides = [1, 1]} : vector<640x64xbf16> to vector<40x64xbf16>
    %c0_23 = arith.constant 0 : index
    %c960 = arith.constant 960 : index
    %41 = vector.load %arg23[%c0_23, %c960] : memref<40x1024xbf16, #tpu.memory_space<vmem>>, vector<40x64xbf16>
    tpu.vector_store %arg23[%c0_23, %c960], %40 {strides = array<i32>} : memref<40x1024xbf16, #tpu.memory_space<vmem>>, vector<40x64xbf16>,
    %c0_24 = arith.constant 0 : index
    %c0_25 = arith.constant 0 : index
    %42 = vector.load %arg9[%c0_24, %c0_25] : memref<1x64xf32, #tpu.memory_space<vmem>>, vector<1x64xf32>
    %c0_26 = arith.constant 0 : index
    %c0_27 = arith.constant 0 : index
    %43 = vector.load %arg23[%c0_26, %c0_27] : memref<40x1024xbf16, #tpu.memory_space<vmem>>, vector<30x1024xbf16>
    %c0_28 = arith.constant 0 : index
    %c0_29 = arith.constant 0 : index
    %44 = vector.load %arg8[%c0_28, %c0_29] : memref<6144x64xbf16, #tpu.memory_space<vmem>>, vector<1024x64xbf16>
    %cst_30 = arith.constant dense<0.000000e+00> : vector<30x64xf32>
    %45 = tpu.matmul %43, %44, %cst_30 {dimension_numbers = #tpu.dot_dimension_numbers<[1], [0], [0], [1], [0, 0, 1, 1], [], []>} : vector<30x1024xbf16>, vector<1024x64xbf16>, vector<30x64xf32> -> vector<30x64xf32>
    %46 = vector.broadcast %42 : vector<1x64xf32> to vector<30x64xf32>
    %47 = arith.addf %45, %46 : vector<30x64xf32>
    %cst_31 = arith.constant 0.000000e+00 : f32
    %48 = vector.broadcast %cst_31 : f32 to vector<30x64xf32>
    %49 = arith.maximumf %47, %48 : vector<30x64xf32>
    %50 = arith.truncf %49 : vector<30x64xf32> to vector<30x64xbf16>
    %c0_32 = arith.constant 0 : index
    %c0_33 = arith.constant 0 : index
    %51 = vector.load %arg24[%c0_32, %c0_33] : memref<32x256xbf16, #tpu.memory_space<vmem>>, vector<30x64xbf16>
    tpu.vector_store %arg24[%c0_32, %c0_33], %50 {strides = array<i32>} : memref<32x256xbf16, #tpu.memory_space<vmem>>, vector<30x64xbf16>,
    %c0_34 = arith.constant 0 : index
    %c0_35 = arith.constant 0 : index
    %52 = vector.load %arg23[%c0_34, %c0_35] : memref<40x1024xbf16, #tpu.memory_space<vmem>>, vector<30x1024xbf16>
    %c1024 = arith.constant 1024 : index
    %c0_36 = arith.constant 0 : index
    %53 = vector.load %arg8[%c1024, %c0_36] : memref<6144x64xbf16, #tpu.memory_space<vmem>>, vector<1024x64xbf16>
    %cst_37 = arith.constant dense<0.000000e+00> : vector<30x64xf32>
    %54 = tpu.matmul %52, %53, %cst_37 {dimension_numbers = #tpu.dot_dimension_numbers<[1], [0], [0], [1], [0, 0, 1, 1], [], []>} : vector<30x1024xbf16>, vector<1024x64xbf16>, vector<30x64xf32> -> vector<30x64xf32>
    %c1 = arith.constant 1 : index
    %c0_38 = arith.constant 0 : index
    %55 = vector.load %arg23[%c1, %c0_38] : memref<40x1024xbf16, #tpu.memory_space<vmem>>, vector<30x1024xbf16>
    %c2048 = arith.constant 2048 : index
    %c0_39 = arith.constant 0 : index
    %56 = vector.load %arg8[%c2048, %c0_39] : memref<6144x64xbf16, #tpu.memory_space<vmem>>, vector<1024x64xbf16>
    %cst_40 = arith.constant dense<0.000000e+00> : vector<30x64xf32>
    %57 = tpu.matmul %55, %56, %cst_40 {dimension_numbers = #tpu.dot_dimension_numbers<[1], [0], [0], [1], [0, 0, 1, 1], [], []>} : vector<30x1024xbf16>, vector<1024x64xbf16>, vector<30x64xf32> -> vector<30x64xf32>
    %58 = arith.addf %54, %57 : vector<30x64xf32>
    %59 = vector.broadcast %42 : vector<1x64xf32> to vector<30x64xf32>
    %60 = arith.addf %58, %59 : vector<30x64xf32>
    %cst_41 = arith.constant 0.000000e+00 : f32
    %61 = vector.broadcast %cst_41 : f32 to vector<30x64xf32>
    %62 = arith.maximumf %60, %61 : vector<30x64xf32>
    %63 = arith.truncf %62 : vector<30x64xf32> to vector<30x64xbf16>
    %c0_42 = arith.constant 0 : index
    %c64_43 = arith.constant 64 : index
    %64 = vector.load %arg24[%c0_42, %c64_43] : memref<32x256xbf16, #tpu.memory_space<vmem>>, vector<30x64xbf16>
    tpu.vector_store %arg24[%c0_42, %c64_43], %63 {strides = array<i32>} : memref<32x256xbf16, #tpu.memory_space<vmem>>, vector<30x64xbf16>,
    %c0_44 = arith.constant 0 : index
    %c512_45 = arith.constant 512 : index
    %65 = vector.load %arg23[%c0_44, %c512_45] : memref<40x1024xbf16, #tpu.memory_space<vmem>>, vector<30x512xbf16>
    %c3072 = arith.constant 3072 : index
    %c0_46 = arith.constant 0 : index
    %66 = vector.load %arg8[%c3072, %c0_46] : memref<6144x64xbf16, #tpu.memory_space<vmem>>, vector<512x64xbf16>
    %cst_47 = arith.constant dense<0.000000e+00> : vector<30x64xf32>
    %67 = tpu.matmul %65, %66, %cst_47 {dimension_numbers = #tpu.dot_dimension_numbers<[1], [0], [0], [1], [0, 0, 1, 1], [], []>} : vector<30x512xbf16>, vector<512x64xbf16>, vector<30x64xf32> -> vector<30x64xf32>
    %c6 = arith.constant 6 : index
    %c0_48 = arith.constant 0 : index
    %68 = vector.load %arg23[%c6, %c0_48] : memref<40x1024xbf16, #tpu.memory_space<vmem>>, vector<30x512xbf16>
    %c3584 = arith.constant 3584 : index
    %c0_49 = arith.constant 0 : index
    %69 = vector.load %arg8[%c3584, %c0_49] : memref<6144x64xbf16, #tpu.memory_space<vmem>>, vector<512x64xbf16>
    %cst_50 = arith.constant dense<0.000000e+00> : vector<30x64xf32>
    %70 = tpu.matmul %68, %69, %cst_50 {dimension_numbers = #tpu.dot_dimension_numbers<[1], [0], [0], [1], [0, 0, 1, 1], [], []>} : vector<30x512xbf16>, vector<512x64xbf16>, vector<30x64xf32> -> vector<30x64xf32>
    %71 = arith.addf %67, %70 : vector<30x64xf32>
    %72 = vector.broadcast %42 : vector<1x64xf32> to vector<30x64xf32>
    %73 = arith.addf %71, %72 : vector<30x64xf32>
    %cst_51 = arith.constant 0.000000e+00 : f32
    %74 = vector.broadcast %cst_51 : f32 to vector<30x64xf32>
    %75 = arith.maximumf %73, %74 : vector<30x64xf32>
    %76 = arith.truncf %75 : vector<30x64xf32> to vector<30x64xbf16>
    %c0_52 = arith.constant 0 : index
    %c128_53 = arith.constant 128 : index
    %77 = vector.load %arg24[%c0_52, %c128_53] : memref<32x256xbf16, #tpu.memory_space<vmem>>, vector<30x64xbf16>
    tpu.vector_store %arg24[%c0_52, %c128_53], %76 {strides = array<i32>} : memref<32x256xbf16, #tpu.memory_space<vmem>>, vector<30x64xbf16>,
    %c0_54 = arith.constant 0 : index
    %c512_55 = arith.constant 512 : index
    %78 = vector.load %arg23[%c0_54, %c512_55] : memref<40x1024xbf16, #tpu.memory_space<vmem>>, vector<30x512xbf16>
    %c4096 = arith.constant 4096 : index
    %c0_56 = arith.constant 0 : index
    %79 = vector.load %arg8[%c4096, %c0_56] : memref<6144x64xbf16, #tpu.memory_space<vmem>>, vector<512x64xbf16>
    %cst_57 = arith.constant dense<0.000000e+00> : vector<30x64xf32>
    %80 = tpu.matmul %78, %79, %cst_57 {dimension_numbers = #tpu.dot_dimension_numbers<[1], [0], [0], [1], [0, 0, 1, 1], [], []>} : vector<30x512xbf16>, vector<512x64xbf16>, vector<30x64xf32> -> vector<30x64xf32>
    %c1_58 = arith.constant 1 : index
    %c512_59 = arith.constant 512 : index
    %81 = vector.load %arg23[%c1_58, %c512_59] : memref<40x1024xbf16, #tpu.memory_space<vmem>>, vector<30x512xbf16>
    %c4608 = arith.constant 4608 : index
    %c0_60 = arith.constant 0 : index
    %82 = vector.load %arg8[%c4608, %c0_60] : memref<6144x64xbf16, #tpu.memory_space<vmem>>, vector<512x64xbf16>
    %cst_61 = arith.constant dense<0.000000e+00> : vector<30x64xf32>
    %83 = tpu.matmul %81, %82, %cst_61 {dimension_numbers = #tpu.dot_dimension_numbers<[1], [0], [0], [1], [0, 0, 1, 1], [], []>} : vector<30x512xbf16>, vector<512x64xbf16>, vector<30x64xf32> -> vector<30x64xf32>
    %84 = arith.addf %80, %83 : vector<30x64xf32>
    %c6_62 = arith.constant 6 : index
    %c0_63 = arith.constant 0 : index
    %85 = vector.load %arg23[%c6_62, %c0_63] : memref<40x1024xbf16, #tpu.memory_space<vmem>>, vector<30x512xbf16>
    %c5120 = arith.constant 5120 : index
    %c0_64 = arith.constant 0 : index
    %86 = vector.load %arg8[%c5120, %c0_64] : memref<6144x64xbf16, #tpu.memory_space<vmem>>, vector<512x64xbf16>
    %cst_65 = arith.constant dense<0.000000e+00> : vector<30x64xf32>
    %87 = tpu.matmul %85, %86, %cst_65 {dimension_numbers = #tpu.dot_dimension_numbers<[1], [0], [0], [1], [0, 0, 1, 1], [], []>} : vector<30x512xbf16>, vector<512x64xbf16>, vector<30x64xf32> -> vector<30x64xf32>
    %88 = arith.addf %84, %87 : vector<30x64xf32>
    %c7 = arith.constant 7 : index
    %c0_66 = arith.constant 0 : index
    %89 = vector.load %arg23[%c7, %c0_66] : memref<40x1024xbf16, #tpu.memory_space<vmem>>, vector<30x512xbf16>
    %c5632 = arith.constant 5632 : index
    %c0_67 = arith.constant 0 : index
    %90 = vector.load %arg8[%c5632, %c0_67] : memref<6144x64xbf16, #tpu.memory_space<vmem>>, vector<512x64xbf16>
    %cst_68 = arith.constant dense<0.000000e+00> : vector<30x64xf32>
    %91 = tpu.matmul %89, %90, %cst_68 {dimension_numbers = #tpu.dot_dimension_numbers<[1], [0], [0], [1], [0, 0, 1, 1], [], []>} : vector<30x512xbf16>, vector<512x64xbf16>, vector<30x64xf32> -> vector<30x64xf32>
    %92 = arith.addf %88, %91 : vector<30x64xf32>
    %93 = vector.broadcast %42 : vector<1x64xf32> to vector<30x64xf32>
    %94 = arith.addf %92, %93 : vector<30x64xf32>
    %cst_69 = arith.constant 0.000000e+00 : f32
    %95 = vector.broadcast %cst_69 : f32 to vector<30x64xf32>
    %96 = arith.maximumf %94, %95 : vector<30x64xf32>
    %97 = arith.truncf %96 : vector<30x64xf32> to vector<30x64xbf16>
    %c0_70 = arith.constant 0 : index
    %c192_71 = arith.constant 192 : index
    %98 = vector.load %arg24[%c0_70, %c192_71] : memref<32x256xbf16, #tpu.memory_space<vmem>>, vector<30x64xbf16>
    tpu.vector_store %arg24[%c0_70, %c192_71], %97 {strides = array<i32>} : memref<32x256xbf16, #tpu.memory_space<vmem>>, vector<30x64xbf16>,
    %cst_72 = arith.constant 0.000000e+00 : bf16
    %99 = vector.broadcast %cst_72 : bf16 to vector<2x256xbf16>
    %c30 = arith.constant 30 : index
    %c0_73 = arith.constant 0 : index
    %100 = vector.load %arg24[%c30, %c0_73] : memref<32x256xbf16, #tpu.memory_space<vmem>>, vector<2x256xbf16>
    tpu.vector_store %arg24[%c30, %c0_73], %99 {strides = array<i32>} : memref<32x256xbf16, #tpu.memory_space<vmem>>, vector<2x256xbf16>,
    %c0_74 = arith.constant 0 : index
    %c0_75 = arith.constant 0 : index
    %101 = vector.load %arg24[%c0_74, %c0_75] : memref<32x256xbf16, #tpu.memory_space<vmem>>, vector<24x256xbf16>
    %c0_76 = arith.constant 0 : index
    %c0_77 = arith.constant 0 : index
    %102 = vector.load %arg10[%c0_76, %c0_77] : memref<1024x128xbf16, #tpu.memory_space<vmem>>, vector<256x128xbf16>
    %cst_78 = arith.constant dense<0.000000e+00> : vector<24x128xf32>
    %103 = tpu.matmul %101, %102, %cst_78 {dimension_numbers = #tpu.dot_dimension_numbers<[1], [0], [0], [1], [0, 0, 1, 1], [], []>} : vector<24x256xbf16>, vector<256x128xbf16>, vector<24x128xf32> -> vector<24x128xf32>
    %c1_79 = arith.constant 1 : index
    %c0_80 = arith.constant 0 : index
    %104 = vector.load %arg24[%c1_79, %c0_80] : memref<32x256xbf16, #tpu.memory_space<vmem>>, vector<24x256xbf16>
    %c256_81 = arith.constant 256 : index
    %c0_82 = arith.constant 0 : index
    %105 = vector.load %arg10[%c256_81, %c0_82] : memref<1024x128xbf16, #tpu.memory_space<vmem>>, vector<256x128xbf16>
    %cst_83 = arith.constant dense<0.000000e+00> : vector<24x128xf32>
    %106 = tpu.matmul %104, %105, %cst_83 {dimension_numbers = #tpu.dot_dimension_numbers<[1], [0], [0], [1], [0, 0, 1, 1], [], []>} : vector<24x256xbf16>, vector<256x128xbf16>, vector<24x128xf32> -> vector<24x128xf32>
    %107 = arith.addf %103, %106 : vector<24x128xf32>
    %c6_84 = arith.constant 6 : index
    %c0_85 = arith.constant 0 : index
    %108 = vector.load %arg24[%c6_84, %c0_85] : memref<32x256xbf16, #tpu.memory_space<vmem>>, vector<24x256xbf16>
    %c512_86 = arith.constant 512 : index
    %c0_87 = arith.constant 0 : index
    %109 = vector.load %arg10[%c512_86, %c0_87] : memref<1024x128xbf16, #tpu.memory_space<vmem>>, vector<256x128xbf16>
    %cst_88 = arith.constant dense<0.000000e+00> : vector<24x128xf32>
    %110 = tpu.matmul %108, %109, %cst_88 {dimension_numbers = #tpu.dot_dimension_numbers<[1], [0], [0], [1], [0, 0, 1, 1], [], []>} : vector<24x256xbf16>, vector<256x128xbf16>, vector<24x128xf32> -> vector<24x128xf32>
    %111 = arith.addf %107, %110 : vector<24x128xf32>
    %c7_89 = arith.constant 7 : index
    %c0_90 = arith.constant 0 : index
    %112 = vector.load %arg24[%c7_89, %c0_90] : memref<32x256xbf16, #tpu.memory_space<vmem>>, vector<24x256xbf16>
    %c768_91 = arith.constant 768 : index
    %c0_92 = arith.constant 0 : index
    %113 = vector.load %arg10[%c768_91, %c0_92] : memref<1024x128xbf16, #tpu.memory_space<vmem>>, vector<256x128xbf16>
    %cst_93 = arith.constant dense<0.000000e+00> : vector<24x128xf32>
    %114 = tpu.matmul %112, %113, %cst_93 {dimension_numbers = #tpu.dot_dimension_numbers<[1], [0], [0], [1], [0, 0, 1, 1], [], []>} : vector<24x256xbf16>, vector<256x128xbf16>, vector<24x128xf32> -> vector<24x128xf32>
    %115 = arith.addf %111, %114 : vector<24x128xf32>
    %c0_94 = arith.constant 0 : index
    %c0_95 = arith.constant 0 : index
    %116 = vector.load %arg11[%c0_94, %c0_95] : memref<1x128xf32, #tpu.memory_space<vmem>>, vector<1x128xf32>
    %117 = vector.broadcast %116 : vector<1x128xf32> to vector<24x128xf32>
    %118 = arith.addf %115, %117 : vector<24x128xf32>
    %cst_96 = arith.constant 0.000000e+00 : f32
    %119 = vector.broadcast %cst_96 : f32 to vector<24x128xf32>
    %120 = arith.maximumf %118, %119 : vector<24x128xf32>
    %121 = arith.truncf %120 : vector<24x128xf32> to vector<24x128xbf16>
    %122 = vector.extract_strided_slice %121 {offsets = [0, 0], sizes = [1, 128], strides = [1, 1]} : vector<24x128xbf16> to vector<1x128xbf16>
    %c0_97 = arith.constant 0 : index
    %c0_98 = arith.constant 0 : index
    %123 = vector.load %arg12[%c0_97, %c0_98] : memref<2048x128xbf16, #tpu.memory_space<vmem>>, vector<128x128xbf16>
    %cst_99 = arith.constant dense<0.000000e+00> : vector<1x128xf32>
    %124 = tpu.matmul %122, %123, %cst_99 {dimension_numbers = #tpu.dot_dimension_numbers<[1], [0], [0], [1], [0, 0, 1, 1], [], []>} : vector<1x128xbf16>, vector<128x128xbf16>, vector<1x128xf32> -> vector<1x128xf32>
    %125 = vector.extract_strided_slice %121 {offsets = [1, 0], sizes = [1, 128], strides = [1, 1]} : vector<24x128xbf16> to vector<1x128xbf16>
    %c128_100 = arith.constant 128 : index
    %c0_101 = arith.constant 0 : index
    %126 = vector.load %arg12[%c128_100, %c0_101] : memref<2048x128xbf16, #tpu.memory_space<vmem>>, vector<128x128xbf16>
    %cst_102 = arith.constant dense<0.000000e+00> : vector<1x128xf32>
    %127 = tpu.matmul %125, %126, %cst_102 {dimension_numbers = #tpu.dot_dimension_numbers<[1], [0], [0], [1], [0, 0, 1, 1], [], []>} : vector<1x128xbf16>, vector<128x128xbf16>, vector<1x128xf32> -> vector<1x128xf32>
    %128 = arith.addf %124, %127 : vector<1x128xf32>
    %129 = vector.extract_strided_slice %121 {offsets = [2, 0], sizes = [1, 128], strides = [1, 1]} : vector<24x128xbf16> to vector<1x128xbf16>
    %c256_103 = arith.constant 256 : index
    %c0_104 = arith.constant 0 : index
    %130 = vector.load %arg12[%c256_103, %c0_104] : memref<2048x128xbf16, #tpu.memory_space<vmem>>, vector<128x128xbf16>
    %cst_105 = arith.constant dense<0.000000e+00> : vector<1x128xf32>
    %131 = tpu.matmul %129, %130, %cst_105 {dimension_numbers = #tpu.dot_dimension_numbers<[1], [0], [0], [1], [0, 0, 1, 1], [], []>} : vector<1x128xbf16>, vector<128x128xbf16>, vector<1x128xf32> -> vector<1x128xf32>
    %132 = arith.addf %128, %131 : vector<1x128xf32>
    %133 = vector.extract_strided_slice %121 {offsets = [3, 0], sizes = [1, 128], strides = [1, 1]} : vector<24x128xbf16> to vector<1x128xbf16>
    %c384_106 = arith.constant 384 : index
    %c0_107 = arith.constant 0 : index
    %134 = vector.load %arg12[%c384_106, %c0_107] : memref<2048x128xbf16, #tpu.memory_space<vmem>>, vector<128x128xbf16>
    %cst_108 = arith.constant dense<0.000000e+00> : vector<1x128xf32>
    %135 = tpu.matmul %133, %134, %cst_108 {dimension_numbers = #tpu.dot_dimension_numbers<[1], [0], [0], [1], [0, 0, 1, 1], [], []>} : vector<1x128xbf16>, vector<128x128xbf16>, vector<1x128xf32> -> vector<1x128xf32>
    %136 = arith.addf %132, %135 : vector<1x128xf32>
    %137 = vector.extract_strided_slice %121 {offsets = [6, 0], sizes = [1, 128], strides = [1, 1]} : vector<24x128xbf16> to vector<1x128xbf16>
    %c512_109 = arith.constant 512 : index
    %c0_110 = arith.constant 0 : index
    %138 = vector.load %arg12[%c512_109, %c0_110] : memref<2048x128xbf16, #tpu.memory_space<vmem>>, vector<128x128xbf16>
    %cst_111 = arith.constant dense<0.000000e+00> : vector<1x128xf32>
    %139 = tpu.matmul %137, %138, %cst_111 {dimension_numbers = #tpu.dot_dimension_numbers<[1], [0], [0], [1], [0, 0, 1, 1], [], []>} : vector<1x128xbf16>, vector<128x128xbf16>, vector<1x128xf32> -> vector<1x128xf32>
    %140 = arith.addf %136, %139 : vector<1x128xf32>
    %141 = vector.extract_strided_slice %121 {offsets = [7, 0], sizes = [1, 128], strides = [1, 1]} : vector<24x128xbf16> to vector<1x128xbf16>
    %c640_112 = arith.constant 640 : index
    %c0_113 = arith.constant 0 : index
    %142 = vector.load %arg12[%c640_112, %c0_113] : memref<2048x128xbf16, #tpu.memory_space<vmem>>, vector<128x128xbf16>
    %cst_114 = arith.constant dense<0.000000e+00> : vector<1x128xf32>
    %143 = tpu.matmul %141, %142, %cst_114 {dimension_numbers = #tpu.dot_dimension_numbers<[1], [0], [0], [1], [0, 0, 1, 1], [], []>} : vector<1x128xbf16>, vector<128x128xbf16>, vector<1x128xf32> -> vector<1x128xf32>
    %144 = arith.addf %140, %143 : vector<1x128xf32>
    %145 = vector.extract_strided_slice %121 {offsets = [8, 0], sizes = [1, 128], strides = [1, 1]} : vector<24x128xbf16> to vector<1x128xbf16>
    %c768_115 = arith.constant 768 : index
    %c0_116 = arith.constant 0 : index
    %146 = vector.load %arg12[%c768_115, %c0_116] : memref<2048x128xbf16, #tpu.memory_space<vmem>>, vector<128x128xbf16>
    %cst_117 = arith.constant dense<0.000000e+00> : vector<1x128xf32>
    %147 = tpu.matmul %145, %146, %cst_117 {dimension_numbers = #tpu.dot_dimension_numbers<[1], [0], [0], [1], [0, 0, 1, 1], [], []>} : vector<1x128xbf16>, vector<128x128xbf16>, vector<1x128xf32> -> vector<1x128xf32>
    %148 = arith.addf %144, %147 : vector<1x128xf32>
    %149 = vector.extract_strided_slice %121 {offsets = [9, 0], sizes = [1, 128], strides = [1, 1]} : vector<24x128xbf16> to vector<1x128xbf16>
    %c896_118 = arith.constant 896 : index
    %c0_119 = arith.constant 0 : index
    %150 = vector.load %arg12[%c896_118, %c0_119] : memref<2048x128xbf16, #tpu.memory_space<vmem>>, vector<128x128xbf16>
    %cst_120 = arith.constant dense<0.000000e+00> : vector<1x128xf32>
    %151 = tpu.matmul %149, %150, %cst_120 {dimension_numbers = #tpu.dot_dimension_numbers<[1], [0], [0], [1], [0, 0, 1, 1], [], []>} : vector<1x128xbf16>, vector<128x128xbf16>, vector<1x128xf32> -> vector<1x128xf32>
    %152 = arith.addf %148, %151 : vector<1x128xf32>
    %153 = vector.extract_strided_slice %121 {offsets = [12, 0], sizes = [1, 128], strides = [1, 1]} : vector<24x128xbf16> to vector<1x128xbf16>
    %c1024_121 = arith.constant 1024 : index
    %c0_122 = arith.constant 0 : index
    %154 = vector.load %arg12[%c1024_121, %c0_122] : memref<2048x128xbf16, #tpu.memory_space<vmem>>, vector<128x128xbf16>
    %cst_123 = arith.constant dense<0.000000e+00> : vector<1x128xf32>
    %155 = tpu.matmul %153, %154, %cst_123 {dimension_numbers = #tpu.dot_dimension_numbers<[1], [0], [0], [1], [0, 0, 1, 1], [], []>} : vector<1x128xbf16>, vector<128x128xbf16>, vector<1x128xf32> -> vector<1x128xf32>
    %156 = arith.addf %152, %155 : vector<1x128xf32>
    %157 = vector.extract_strided_slice %121 {offsets = [13, 0], sizes = [1, 128], strides = [1, 1]} : vector<24x128xbf16> to vector<1x128xbf16>
    %c1152 = arith.constant 1152 : index
    %c0_124 = arith.constant 0 : index
    %158 = vector.load %arg12[%c1152, %c0_124] : memref<2048x128xbf16, #tpu.memory_space<vmem>>, vector<128x128xbf16>
    %cst_125 = arith.constant dense<0.000000e+00> : vector<1x128xf32>
    %159 = tpu.matmul %157, %158, %cst_125 {dimension_numbers = #tpu.dot_dimension_numbers<[1], [0], [0], [1], [0, 0, 1, 1], [], []>} : vector<1x128xbf16>, vector<128x128xbf16>, vector<1x128xf32> -> vector<1x128xf32>
    %160 = arith.addf %156, %159 : vector<1x128xf32>
    %161 = vector.extract_strided_slice %121 {offsets = [14, 0], sizes = [1, 128], strides = [1, 1]} : vector<24x128xbf16> to vector<1x128xbf16>
    %c1280 = arith.constant 1280 : index
    %c0_126 = arith.constant 0 : index
    %162 = vector.load %arg12[%c1280, %c0_126] : memref<2048x128xbf16, #tpu.memory_space<vmem>>, vector<128x128xbf16>
    %cst_127 = arith.constant dense<0.000000e+00> : vector<1x128xf32>
    %163 = tpu.matmul %161, %162, %cst_127 {dimension_numbers = #tpu.dot_dimension_numbers<[1], [0], [0], [1], [0, 0, 1, 1], [], []>} : vector<1x128xbf16>, vector<128x128xbf16>, vector<1x128xf32> -> vector<1x128xf32>
    %164 = arith.addf %160, %163 : vector<1x128xf32>
    %165 = vector.extract_strided_slice %121 {offsets = [15, 0], sizes = [1, 128], strides = [1, 1]} : vector<24x128xbf16> to vector<1x128xbf16>
    %c1408 = arith.constant 1408 : index
    %c0_128 = arith.constant 0 : index
    %166 = vector.load %arg12[%c1408, %c0_128] : memref<2048x128xbf16, #tpu.memory_space<vmem>>, vector<128x128xbf16>
    %cst_129 = arith.constant dense<0.000000e+00> : vector<1x128xf32>
    %167 = tpu.matmul %165, %166, %cst_129 {dimension_numbers = #tpu.dot_dimension_numbers<[1], [0], [0], [1], [0, 0, 1, 1], [], []>} : vector<1x128xbf16>, vector<128x128xbf16>, vector<1x128xf32> -> vector<1x128xf32>
    %168 = arith.addf %164, %167 : vector<1x128xf32>
    %169 = vector.extract_strided_slice %121 {offsets = [18, 0], sizes = [1, 128], strides = [1, 1]} : vector<24x128xbf16> to vector<1x128xbf16>
    %c1536 = arith.constant 1536 : index
    %c0_130 = arith.constant 0 : index
    %170 = vector.load %arg12[%c1536, %c0_130] : memref<2048x128xbf16, #tpu.memory_space<vmem>>, vector<128x128xbf16>
    %cst_131 = arith.constant dense<0.000000e+00> : vector<1x128xf32>
    %171 = tpu.matmul %169, %170, %cst_131 {dimension_numbers = #tpu.dot_dimension_numbers<[1], [0], [0], [1], [0, 0, 1, 1], [], []>} : vector<1x128xbf16>, vector<128x128xbf16>, vector<1x128xf32> -> vector<1x128xf32>
    %172 = arith.addf %168, %171 : vector<1x128xf32>
    %173 = vector.extract_strided_slice %121 {offsets = [19, 0], sizes = [1, 128], strides = [1, 1]} : vector<24x128xbf16> to vector<1x128xbf16>
    %c1664 = arith.constant 1664 : index
    %c0_132 = arith.constant 0 : index
    %174 = vector.load %arg12[%c1664, %c0_132] : memref<2048x128xbf16, #tpu.memory_space<vmem>>, vector<128x128xbf16>
    %cst_133 = arith.constant dense<0.000000e+00> : vector<1x128xf32>
    %175 = tpu.matmul %173, %174, %cst_133 {dimension_numbers = #tpu.dot_dimension_numbers<[1], [0], [0], [1], [0, 0, 1, 1], [], []>} : vector<1x128xbf16>, vector<128x128xbf16>, vector<1x128xf32> -> vector<1x128xf32>
    %176 = arith.addf %172, %175 : vector<1x128xf32>
    %177 = vector.extract_strided_slice %121 {offsets = [20, 0], sizes = [1, 128], strides = [1, 1]} : vector<24x128xbf16> to vector<1x128xbf16>
    %c1792 = arith.constant 1792 : index
    %c0_134 = arith.constant 0 : index
    %178 = vector.load %arg12[%c1792, %c0_134] : memref<2048x128xbf16, #tpu.memory_space<vmem>>, vector<128x128xbf16>
    %cst_135 = arith.constant dense<0.000000e+00> : vector<1x128xf32>
    %179 = tpu.matmul %177, %178, %cst_135 {dimension_numbers = #tpu.dot_dimension_numbers<[1], [0], [0], [1], [0, 0, 1, 1], [], []>} : vector<1x128xbf16>, vector<128x128xbf16>, vector<1x128xf32> -> vector<1x128xf32>
    %180 = arith.addf %176, %179 : vector<1x128xf32>
    %181 = vector.extract_strided_slice %121 {offsets = [21, 0], sizes = [1, 128], strides = [1, 1]} : vector<24x128xbf16> to vector<1x128xbf16>
    %c1920 = arith.constant 1920 : index
    %c0_136 = arith.constant 0 : index
    %182 = vector.load %arg12[%c1920, %c0_136] : memref<2048x128xbf16, #tpu.memory_space<vmem>>, vector<128x128xbf16>
    %cst_137 = arith.constant dense<0.000000e+00> : vector<1x128xf32>
    %183 = tpu.matmul %181, %182, %cst_137 {dimension_numbers = #tpu.dot_dimension_numbers<[1], [0], [0], [1], [0, 0, 1, 1], [], []>} : vector<1x128xbf16>, vector<128x128xbf16>, vector<1x128xf32> -> vector<1x128xf32>
    %184 = arith.addf %180, %183 : vector<1x128xf32>
    %c0_138 = arith.constant 0 : index
    %c0_139 = arith.constant 0 : index
    %185 = vector.load %arg13[%c0_138, %c0_139] : memref<1x128xf32, #tpu.memory_space<vmem>>, vector<1x128xf32>
    %186 = arith.addf %184, %185 : vector<1x128xf32>
    %cst_140 = arith.constant 0.000000e+00 : f32
    %187 = vector.broadcast %cst_140 : f32 to vector<1x128xf32>
    %188 = arith.maximumf %186, %187 : vector<1x128xf32>
    %189 = arith.truncf %188 : vector<1x128xf32> to vector<1x128xbf16>
    %c0_141 = arith.constant 0 : index
    %c0_142 = arith.constant 0 : index
    %190 = vector.load %arg15[%c0_141, %c0_142] : memref<3x256xf32, #tpu.memory_space<vmem>>, vector<3x256xf32>
    %c0_143 = arith.constant 0 : index
    %c0_144 = arith.constant 0 : index
    %c0_145 = arith.constant 0 : index
    %191 = vector.load %arg2[%c0_143, %c0_144, %c0_145] : memref<1x1x1xf32, #tpu.memory_space<vmem>>, vector<1x1x1xf32>
    %192 = vector.shape_cast %191 : vector<1x1x1xf32> to vector<1x1xf32>
    %193 = vector.extract_strided_slice %190 {offsets = [0, 0], sizes = [1, 256], strides = [1, 1]} : vector<3x256xf32> to vector<1x256xf32>
    %194 = vector.broadcast %192 : vector<1x1xf32> to vector<1x256xf32>
    %195 = arith.mulf %194, %193 : vector<1x256xf32>
    %c0_146 = arith.constant 0 : index
    %c0_147 = arith.constant 0 : index
    %c0_148 = arith.constant 0 : index
    %196 = vector.load %arg3[%c0_146, %c0_147, %c0_148] : memref<1x1x1xf32, #tpu.memory_space<vmem>>, vector<1x1x1xf32>
    %197 = vector.shape_cast %196 : vector<1x1x1xf32> to vector<1x1xf32>
    %198 = vector.extract_strided_slice %190 {offsets = [1, 0], sizes = [1, 256], strides = [1, 1]} : vector<3x256xf32> to vector<1x256xf32>
    %199 = vector.broadcast %197 : vector<1x1xf32> to vector<1x256xf32>
    %200 = arith.mulf %199, %198 : vector<1x256xf32>
    %201 = arith.addf %195, %200 : vector<1x256xf32>
    %c0_149 = arith.constant 0 : index
    %c0_150 = arith.constant 0 : index
    %c0_151 = arith.constant 0 : index
    %202 = vector.load %arg4[%c0_149, %c0_150, %c0_151] : memref<1x1x1xf32, #tpu.memory_space<vmem>>, vector<1x1x1xf32>
    %203 = vector.shape_cast %202 : vector<1x1x1xf32> to vector<1x1xf32>
    %204 = vector.extract_strided_slice %190 {offsets = [2, 0], sizes = [1, 256], strides = [1, 1]} : vector<3x256xf32> to vector<1x256xf32>
    %205 = vector.broadcast %203 : vector<1x1xf32> to vector<1x256xf32>
    %206 = arith.mulf %205, %204 : vector<1x256xf32>
    %207 = arith.addf %201, %206 : vector<1x256xf32>
    %c0_152 = arith.constant 0 : index
    %c0_153 = arith.constant 0 : index
    %208 = vector.load %arg14[%c0_152, %c0_153] : memref<128x256xbf16, #tpu.memory_space<vmem>>, vector<128x256xbf16>
    %cst_154 = arith.constant dense<0.000000e+00> : vector<1x256xf32>
    %209 = tpu.matmul %189, %208, %cst_154 {dimension_numbers = #tpu.dot_dimension_numbers<[1], [0], [0], [1], [0, 0, 1, 1], [], []>} : vector<1x128xbf16>, vector<128x256xbf16>, vector<1x256xf32> -> vector<1x256xf32>
    %210 = arith.addf %209, %207 : vector<1x256xf32>
    %c0_155 = arith.constant 0 : index
    %c0_156 = arith.constant 0 : index
    %211 = vector.load %arg16[%c0_155, %c0_156] : memref<1x256xf32, #tpu.memory_space<vmem>>, vector<1x256xf32>
    %212 = arith.addf %210, %211 : vector<1x256xf32>
    %cst_157 = arith.constant 0.000000e+00 : f32
    %213 = vector.broadcast %cst_157 : f32 to vector<1x256xf32>
    %214 = arith.maximumf %212, %213 : vector<1x256xf32>
    %215 = arith.truncf %214 : vector<1x256xf32> to vector<1x256xbf16>
    %c0_158 = arith.constant 0 : index
    %c0_159 = arith.constant 0 : index
    %216 = vector.load %arg17[%c0_158, %c0_159] : memref<256x256xbf16, #tpu.memory_space<vmem>>, vector<256x256xbf16>
    %cst_160 = arith.constant dense<0.000000e+00> : vector<1x256xf32>
    %217 = tpu.matmul %215, %216, %cst_160 {dimension_numbers = #tpu.dot_dimension_numbers<[1], [0], [0], [1], [0, 0, 1, 1], [], []>} : vector<1x256xbf16>, vector<256x256xbf16>, vector<1x256xf32> -> vector<1x256xf32>
    %c0_161 = arith.constant 0 : index
    %c0_162 = arith.constant 0 : index
    %218 = vector.load %arg18[%c0_161, %c0_162] : memref<1x256xf32, #tpu.memory_space<vmem>>, vector<1x256xf32>
    %219 = arith.addf %217, %218 : vector<1x256xf32>
    %cst_163 = arith.constant 0.000000e+00 : f32
    %220 = vector.broadcast %cst_163 : f32 to vector<1x256xf32>
    %221 = arith.maximumf %219, %220 : vector<1x256xf32>
    %222 = arith.truncf %221 : vector<1x256xf32> to vector<1x256xbf16>
    %c0_164 = arith.constant 0 : index
    %c0_165 = arith.constant 0 : index
    %223 = vector.load %arg19[%c0_164, %c0_165] : memref<256x6xbf16, #tpu.memory_space<vmem>>, vector<256x6xbf16>
    %cst_166 = arith.constant dense<0.000000e+00> : vector<1x6xf32>
    %224 = tpu.matmul %222, %223, %cst_166 {dimension_numbers = #tpu.dot_dimension_numbers<[1], [0], [0], [1], [0, 0, 1, 1], [], []>} : vector<1x256xbf16>, vector<256x6xbf16>, vector<1x6xf32> -> vector<1x6xf32>
    %c0_167 = arith.constant 0 : index
    %c0_168 = arith.constant 0 : index
    %225 = vector.load %arg20[%c0_167, %c0_168] : memref<1x6xf32, #tpu.memory_space<vmem>>, vector<1x6xf32>
    %226 = arith.addf %224, %225 : vector<1x6xf32>
    %227 = vector.extract_strided_slice %226 {offsets = [0, 0], sizes = [1, 3], strides = [1, 1]} : vector<1x6xf32> to vector<1x3xf32>
    %228 = vector.extract_strided_slice %226 {offsets = [0, 3], sizes = [1, 3], strides = [1, 1]} : vector<1x6xf32> to vector<1x3xf32>
    %cst_169 = arith.constant -2.000000e+01 : f32
    %cst_170 = arith.constant 2.000000e+00 : f32
    %229 = vector.broadcast %cst_169 : f32 to vector<1x3xf32>
    %230 = arith.maximumf %229, %228 : vector<1x3xf32>
    %231 = vector.broadcast %cst_170 : f32 to vector<1x3xf32>
    %232 = arith.minimumf %231, %230 : vector<1x3xf32>
    %233 = math.exp %232 : vector<1x3xf32>
    %c0_171 = arith.constant 0 : index
    %c0_172 = arith.constant 0 : index
    %c0_173 = arith.constant 0 : index
    %234 = vector.load %arg5[%c0_171, %c0_172, %c0_173] : memref<1x1x3xf32, #tpu.memory_space<vmem>>, vector<1x1x3xf32>
    %235 = vector.shape_cast %234 : vector<1x1x3xf32> to vector<1x3xf32>
    %236 = arith.mulf %233, %235 : vector<1x3xf32>
    %237 = arith.addf %227, %236 : vector<1x3xf32>
    %cst_174 = arith.constant -5.000000e-01 : f32
    %238 = vector.broadcast %cst_174 : f32 to vector<1x3xf32>
    %239 = arith.mulf %238, %235 : vector<1x3xf32>
    %240 = arith.mulf %239, %235 : vector<1x3xf32>
    %241 = arith.subf %240, %232 : vector<1x3xf32>
    %cst_175 = arith.constant 0.918938517 : f32
    %242 = vector.broadcast %cst_175 : f32 to vector<1x3xf32>
    %243 = arith.subf %241, %242 : vector<1x3xf32>
    %cst_176 = arith.constant dense<0.000000e+00> : vector<1xf32>
    %244 = vector.multi_reduction <add>, %243, %cst_176 [1] : vector<1x3xf32> to vector<1xf32>
    %245 = vector.shape_cast %244 : vector<1xf32> to vector<1x1xf32>
    %cst_177 = arith.constant -2.000000e+00 : f32
    %246 = vector.broadcast %cst_177 : f32 to vector<1x3xf32>
    %247 = arith.mulf %246, %237 : vector<1x3xf32>
    %cst_178 = arith.constant 0.000000e+00 : f32
    %248 = vector.broadcast %cst_178 : f32 to vector<1x3xf32>
    %249 = arith.maximumf %247, %248 : vector<1x3xf32>
    %250 = math.absf %247 : vector<1x3xf32>
    %cst_179 = arith.constant 0.000000e+00 : f32
    %251 = vector.broadcast %cst_179 : f32 to vector<1x3xf32>
    %252 = arith.subf %251, %250 : vector<1x3xf32>
    %253 = math.exp %252 : vector<1x3xf32>
    %cst_180 = arith.constant 1.000000e+00 : f32
    %254 = vector.broadcast %cst_180 : f32 to vector<1x3xf32>
    %255 = arith.addf %254, %253 : vector<1x3xf32>
    %256 = math.log %255 : vector<1x3xf32>
    %257 = arith.addf %249, %256 : vector<1x3xf32>
    %cst_181 = arith.constant 0.693147182 : f32
    %258 = vector.broadcast %cst_181 : f32 to vector<1x3xf32>
    %259 = arith.subf %258, %237 : vector<1x3xf32>
    %260 = arith.subf %259, %257 : vector<1x3xf32>
    %cst_182 = arith.constant 2.000000e+00 : f32
    %261 = vector.broadcast %cst_182 : f32 to vector<1x3xf32>
    %262 = arith.mulf %261, %260 : vector<1x3xf32>
    %cst_183 = arith.constant dense<0.000000e+00> : vector<1xf32>
    %263 = vector.multi_reduction <add>, %262, %cst_183 [1] : vector<1x3xf32> to vector<1xf32>
    %264 = vector.shape_cast %263 : vector<1xf32> to vector<1x1xf32>
    %265 = arith.subf %245, %264 : vector<1x1xf32>
    %c0_184 = arith.constant 0 : index
    %c0_185 = arith.constant 0 : index
    %c0_186 = arith.constant 0 : index
    %266 = vector.load %arg21[%c0_184, %c0_185, %c0_186] : memref<1x1x3xf32, #tpu.memory_space<vmem>>, vector<1x1x3xf32>
    %267 = vector.shape_cast %266 : vector<1x1x3xf32> to vector<1x3xf32>
    %268 = vector.shape_cast %237 : vector<1x3xf32> to vector<1x1x3xf32>
    tpu.vector_store %arg21[%c0_184, %c0_185, %c0_186], %268 {strides = array<i32>} : memref<1x1x3xf32, #tpu.memory_space<vmem>>, vector<1x1x3xf32>,
    %c0_187 = arith.constant 0 : index
    %c0_188 = arith.constant 0 : index
    %c0_189 = arith.constant 0 : index
    %269 = vector.load %arg22[%c0_187, %c0_188, %c0_189] : memref<1x1x1xf32, #tpu.memory_space<vmem>>, vector<1x1x1xf32>
    %270 = vector.shape_cast %269 : vector<1x1x1xf32> to vector<1x1xf32>
    %271 = vector.shape_cast %265 : vector<1x1xf32> to vector<1x1x1xf32>
    tpu.vector_store %arg22[%c0_187, %c0_188, %c0_189], %271 {strides = array<i32>} : memref<1x1x1xf32, #tpu.memory_space<vmem>>, vector<1x1x1xf32>,
    return
  }
  func.func @transform_0(%arg0: i32) -> (i32, i32, i32) {
    %c0_i32 = arith.constant 0 : i32
    %c0_i32_0 = arith.constant 0 : i32
    %c0_i32_1 = arith.constant 0 : i32
    return %arg0, %c0_i32, %c0_i32_0 : i32, i32, i32
  }
  func.func @transform_1(%arg0: i32) -> (i32, i32, i32) {
    %c0_i32 = arith.constant 0 : i32
    %c0_i32_0 = arith.constant 0 : i32
    %c0_i32_1 = arith.constant 0 : i32
    return %arg0, %c0_i32, %c0_i32_0 : i32, i32, i32
  }
  func.func @transform_2(%arg0: i32) -> (i32, i32, i32) {
    %c0_i32 = arith.constant 0 : i32
    %c0_i32_0 = arith.constant 0 : i32
    %c0_i32_1 = arith.constant 0 : i32
    return %arg0, %c0_i32, %c0_i32_0 : i32, i32, i32
  }
  func.func @transform_3(%arg0: i32) -> (i32, i32, i32) {
    %c0_i32 = arith.constant 0 : i32
    %c0_i32_0 = arith.constant 0 : i32
    %c0_i32_1 = arith.constant 0 : i32
    return %arg0, %c0_i32, %c0_i32_0 : i32, i32, i32
  }
  func.func @transform_4(%arg0: i32) -> (i32, i32, i32) {
    %c0_i32 = arith.constant 0 : i32
    %c0_i32_0 = arith.constant 0 : i32
    %c0_i32_1 = arith.constant 0 : i32
    return %arg0, %c0_i32, %c0_i32_0 : i32, i32, i32
  }
  func.func @transform_5(%arg0: i32) -> (i32, i32) {
    %c0_i32 = arith.constant 0 : i32
    %c0_i32_0 = arith.constant 0 : i32
    %c0_i32_1 = arith.constant 0 : i32
    return %c0_i32, %c0_i32_0 : i32, i32
  }
  func.func @transform_6(%arg0: i32) -> (i32, i32) {
    %c0_i32 = arith.constant 0 : i32
    %c0_i32_0 = arith.constant 0 : i32
    %c0_i32_1 = arith.constant 0 : i32
    return %c0_i32, %c0_i32_0 : i32, i32
  }
  func.func @transform_7(%arg0: i32) -> (i32, i32) {
    %c0_i32 = arith.constant 0 : i32
    %c0_i32_0 = arith.constant 0 : i32
    %c0_i32_1 = arith.constant 0 : i32
    return %c0_i32, %c0_i32_0 : i32, i32
  }
  func.func @transform_8(%arg0: i32) -> (i32, i32) {
    %c0_i32 = arith.constant 0 : i32
    %c0_i32_0 = arith.constant 0 : i32
    %c0_i32_1 = arith.constant 0 : i32
    return %c0_i32, %c0_i32_0 : i32, i32
  }
  func.func @transform_9(%arg0: i32) -> (i32, i32) {
    %c0_i32 = arith.constant 0 : i32
    %c0_i32_0 = arith.constant 0 : i32
    %c0_i32_1 = arith.constant 0 : i32
    return %c0_i32, %c0_i32_0 : i32, i32
  }
  func.func @transform_10(%arg0: i32) -> (i32, i32) {
    %c0_i32 = arith.constant 0 : i32
    %c0_i32_0 = arith.constant 0 : i32
    %c0_i32_1 = arith.constant 0 : i32
    return %c0_i32, %c0_i32_0 : i32, i32
  }
  func.func @transform_11(%arg0: i32) -> (i32, i32) {
    %c0_i32 = arith.constant 0 : i32
    %c0_i32_0 = arith.constant 0 : i32
    %c0_i32_1 = arith.constant 0 : i32
    return %c0_i32, %c0_i32_0 : i32, i32
  }
  func.func @transform_12(%arg0: i32) -> (i32, i32) {
    %c0_i32 = arith.constant 0 : i32
    %c0_i32_0 = arith.constant 0 : i32
    %c0_i32_1 = arith.constant 0 : i32
    return %c0_i32, %c0_i32_0 : i32, i32
  }
  func.func @transform_13(%arg0: i32) -> (i32, i32) {
    %c0_i32 = arith.constant 0 : i32
    %c0_i32_0 = arith.constant 0 : i32
    %c0_i32_1 = arith.constant 0 : i32
    return %c0_i32, %c0_i32_0 : i32, i32
  }
  func.func @transform_14(%arg0: i32) -> (i32, i32) {
    %c0_i32 = arith.constant 0 : i32
    %c0_i32_0 = arith.constant 0 : i32
    %c0_i32_1 = arith.constant 0 : i32
    return %c0_i32, %c0_i32_0 : i32, i32
  }
  func.func @transform_15(%arg0: i32) -> (i32, i32) {
    %c0_i32 = arith.constant 0 : i32
    %c0_i32_0 = arith.constant 0 : i32
    %c0_i32_1 = arith.constant 0 : i32
    return %c0_i32, %c0_i32_0 : i32, i32
  }
  func.func @transform_16(%arg0: i32) -> (i32, i32) {
    %c0_i32 = arith.constant 0 : i32
    %c0_i32_0 = arith.constant 0 : i32
    %c0_i32_1 = arith.constant 0 : i32
    return %c0_i32, %c0_i32_0 : i32, i32
  }
  func.func @transform_17(%arg0: i32) -> (i32, i32) {
    %c0_i32 = arith.constant 0 : i32
    %c0_i32_0 = arith.constant 0 : i32
    %c0_i32_1 = arith.constant 0 : i32
    return %c0_i32, %c0_i32_0 : i32, i32
  }
  func.func @transform_18(%arg0: i32) -> (i32, i32) {
    %c0_i32 = arith.constant 0 : i32
    %c0_i32_0 = arith.constant 0 : i32
    %c0_i32_1 = arith.constant 0 : i32
    return %c0_i32, %c0_i32_0 : i32, i32
  }
  func.func @transform_19(%arg0: i32) -> (i32, i32) {
    %c0_i32 = arith.constant 0 : i32
    %c0_i32_0 = arith.constant 0 : i32
    %c0_i32_1 = arith.constant 0 : i32
    return %c0_i32, %c0_i32_0 : i32, i32
  }
  func.func @transform_20(%arg0: i32) -> (i32, i32, i32) {
    %c0_i32 = arith.constant 0 : i32
    %c0_i32_0 = arith.constant 0 : i32
    %c0_i32_1 = arith.constant 0 : i32
    return %arg0, %c0_i32, %c0_i32_0 : i32, i32, i32
  }
  func.func @transform_21(%arg0: i32) -> (i32, i32, i32) {
    %c0_i32 = arith.constant 0 : i32
    %c0_i32_0 = arith.constant 0 : i32
    %c0_i32_1 = arith.constant 0 : i32
    return %arg0, %c0_i32, %c0_i32_0 : i32, i32, i32
  }
}

</mosaic_0001>

<bundles_post_ra>
// kernel: actor_forward.1
= control target key start
LH: loop header
LB: loop body
LE: loop exit
PB: predicated region body
PF: predicated region fallthrough
CT: control target
= control target key end

     0   :  { %s18699_s0 = inlined_call_operand.vmem [shape: bf16[2,640,320], index: 0, kind: input, shape index: {}]   ;;  %s18700_s1 = inlined_call_operand.vmem [shape: f32[2,1,1], index: 1, kind: input, shape index: {}]   ;;  %s18701_s2 = inlined_call_operand.vmem [shape: f32[2,1,1], index: 2, kind: input, shape index: {}]   ;;  %s18702_s3 = inlined_call_operand.vmem [shape: f32[2,1,1], index: 3, kind: input, shape index: {}]   ;;  %s18703_s4 = inlined_call_operand.vmem [shape: f32[2,1,3], index: 4, kind: input, shape index: {}]   ;;  %s18704_s5 = inlined_call_operand.vmem [shape: bf16[320,64], index: 5, kind: input, shape index: {}]   ;;  %s18705_s6 = inlined_call_operand.vmem [shape: f32[1,64], index: 6, kind: input, shape index: {}]   ;;  %s18706_s7 = inlined_call_operand.vmem [shape: bf16[6144,64], index: 7, kind: input, shape index: {}]   ;;  %s18707_s8 = inlined_call_operand.vmem [shape: f32[1,64], index: 8, kind: input, shape index: {}]   ;;  %s18708_s9 = inlined_call_operand.vmem [shape: bf16[1024,128], index: 9, kind: input, shape index: {}]   ;;  %s18709_s10 = inlined_call_operand.vmem [shape: f32[1,128], index: 10, kind: input, shape index: {}]   ;;  %s18710_s11 = inlined_call_operand.vmem [shape: bf16[2048,128], index: 11, kind: input, shape index: {}]   ;;  %s18711_s12 = inlined_call_operand.vmem [shape: f32[1,128], index: 12, kind: input, shape index: {}]   ;;  %s18712_s13 = inlined_call_operand.vmem [shape: bf16[128,256], index: 13, kind: input, shape index: {}]   ;;  %s18713_s14 = inlined_call_operand.vmem [shape: f32[3,256], index: 14, kind: input, shape index: {}]   ;;  %s18714_s15 = inlined_call_operand.vmem [shape: f32[1,256], index: 15, kind: input, shape index: {}]   ;;  %s18715_s16 = inlined_call_operand.vmem [shape: bf16[256,256], index: 16, kind: input, shape index: {}]   ;;  %s18716_s17 = inlined_call_operand.vmem [shape: f32[1,256], index: 17, kind: input, shape index: {}]   ;;  %s18717_s18 = inlined_call_operand.vmem [shape: bf16[256,6], index: 18, kind: input, shape index: {}]   ;;  %s18718_s19 = inlined_call_operand.vmem [shape: f32[1,6], index: 19, kind: input, shape index: {}]   ;;  %s18719_s20 = inlined_call_operand.hbm [shape: f32[2,1,3], index: 20, kind: output, shape index: {0}]   ;;  %s18720_s21 = inlined_call_operand.vmem [shape: f32[2,1,1], index: 21, kind: output, shape index: {1}]  }
   0x1   :  { %18730 = sst [smem:[#allocation13_spill]] %s18699_s0 }
   0x2   :  { %18731 = sst [smem:[#allocation14_spill]] %s18700_s1 }
   0x3   :  { %18732 = sst [smem:[#allocation15_spill]] %s18701_s2 }
   0x4   :  { %18733 = sst [smem:[#allocation16_spill]] %s18702_s3 }
   0x5   :  { %18734 = sst [smem:[#allocation17_spill]] %s18703_s4 }
   0x6   :  { %18735 = sst [smem:[#allocation18_spill]] %s18704_s5 }
   0x7   :  { %18736 = sst [smem:[#allocation19_spill]] %s18705_s6 }
   0x8   :  { %18737 = sst [smem:[#allocation20_spill]] %s18706_s7 }
   0x9   :  { %18738 = sst [smem:[#allocation21_spill]] %s18707_s8 }
   0xa   :  { %18739 = sst [smem:[#allocation22_spill]] %s18708_s9 }
   0xb   :  { %18740 = sst [smem:[#allocation23_spill]] %s18720_s21 }
   0xc   :  { %27 = vsyncpa [#allocation5], 0 }
   0xd   :  { %29 = vsyncpa [#allocation5 + $0x1], 0  ;;  %s15120_s2 = smov 0   ;;  %s15122_s25 = smov 0  }
   0xe   :  { %s15124_s26 = smov 0   ;;  %s15126_s27 = smov 0  }
   0xf LB: > { %18741 = sst [smem:[#allocation7_spill]] %s14988_s2  ;;  %s15141_s3 = sadd.s32 4294967295, %s15000_s27   ;;  %s15000_s27 = sphi %s15126_s27, %s18764_s27   ;;  %s14996_s26 = sphi %s15124_s26, %s18766_s26   ;;  %s14992_s25 = sphi %s15122_s25, %s18768_s25   ;;  %s14988_s2 = sphi %s15120_s2, %s18767_s2  }
  0x10   : > { %18742 = sst [smem:[#allocation8_spill]] %s14996_s26  ;;  %s11543_s28 = sadd.s32 4294967294, %s15000_s27  }
  0x11   : > { %18743 = sst [smem:[#allocation9_spill]] %s15000_s27  ;;  %s15145_s29 = sadd.s32 1, %s15000_s27  }
  0x12   : > { %18744 = sst [smem:[#allocation10_spill]] %s15145_s29  ;;  %s487_s0 = sadd.s32 1, %s14996_s26 }
  0x13   : > { %s484_s4 = ssub.s32 %s15000_s27, %s15145_s29  ;;  %p497_p0 = scmp.ne.s32.totalorder %s14996_s26, %s14992_s25 }
  0x14   : > { %p485_p1 = scmp.eq.s32.totalorder %s484_s4, 0  ;;  %p498_p2 = scmp.eq.s32.totalorder %s15141_s3, 1 }
  0x15   : > { %p503_p3 = scmp.ne.s32.totalorder %s14992_s25, %s14988_s2  ;;  %p504_p4 = scmp.eq.s32.totalorder %s11543_s28, 1 }
  0x16   : > { %s15156_s30 = scalar_select %p485_p1, %s14996_s26, %s487_s0  }
  0x17   : > { %p15158_p5 = por %p498_p2, %p497_p0  ;;  %p15162_p6 = por %p504_p4, %p503_p3 }
  0x18   : > { %18745 = sst [smem:[#allocation11_spill]] %s15156_s30  ;;  %p11546_p7 = scmp.ge.s32.totalorder %s15000_s27, 1 }
  0x19   : > { %s18747_s22 = scalar_select %p15162_p6, 1, 0 }
  0x1a   : > { %p625_p8 = scmp.lt.s32.totalorder %s15000_s27, 3 }
  0x1b   : > { %18748 = sst [smem:[#allocation12_spill]] %s18747_s22 }
  0x1c   : > { %p626_p9 = pnand %p11546_p7, %p625_p8 }
  0x1d   : > { %s18749_s24 = sld [smem:[#allocation18_spill]] (!%p626_p9)  ;;  %v15002_v1 = vmov (!%p626_p9), 0   ;;  %p699_p10 = scmp.lt.s32.totalorder (!%p626_p9), %s15141_s3, 1  ;;  %vm1647_vm0 = vcmask (!%p626_p9), 523264   ;;  %vm2612_vm1 = vcmask (!%p626_p9), 519168   ;;  %vm2645_vm2 = vcmask (!%p626_p9), 1043968  }
  0x1e   : > { %629 = sbr.rel (%p626_p9) target bundleno = 3155 (0xc53), region = 100  ;;  %1768 = vmatprep.subr.bf16.mxu0 (!%p626_p9), %v15002_v1  ;;  %8177 = vst [vmem:[#allocation3 + $0x10] sm:$0x80] (!%p626_p9), %v15002_v1  ;;  %8178 = vst [vmem:[#allocation3 + $0x18] sm:$0x80] (!%p626_p9), %v15002_v1  ;;  %14075 = vset.pattern.permute.xlu1 (!%p626_p9), %v15002_v1  ;;  %s18750_s27 = sld [smem:[#allocation13_spill]] (!%p626_p9) }
  0x1f   : > { %14074 = vset.pattern.permute.xlu0 (!%p626_p9), %v15002_v1  ;;  %s18751_s6 = sld [smem:[#allocation19_spill]] (!%p626_p9)  ;;  %s18752_s7 = sld [smem:[#allocation20_spill]] (!%p626_p9)  ;;  %vm4196_vm3 = vsmask.f32 (!%p626_p9), 7424  ;;  %vm5739_vm4 = vcmask (!%p626_p9), 1044480   ;;  %vm3854_vm5 = vcmask (!%p626_p9), 522240  }
  0x20   : > { %s18753_s8 = sld [smem:[#allocation21_spill]] (!%p626_p9)  ;;  %vm7750_vm6 = vsmask.f32 (!%p626_p9), 4352  ;;  %s18754_s9 = sld [smem:[#allocation22_spill]] (!%p626_p9)  ;;  %vm5547_vm7 = vcmask (!%p626_p9), 1048064   ;;  %vm5549_vm8 = vcmask (!%p626_p9), 1047040  }
  0x21   : > { %vm15005_vm9 = vmmov (!%p626_p9), 0   ;;  %s18756_s28 = sld [smem:[#allocation15_spill]] (!%p626_p9)  ;;  %s18757_s1 = sld [smem:[#allocation16_spill]] (!%p626_p9)  ;;  %vm11390_vm10 = vcmask (!%p626_p9), 16384  }
  0x22   : > { %s18758_s4 = sld [smem:[#allocation17_spill]] (!%p626_p9)  ;;  %s15006_s30 = smov (!%p626_p9), 3  }
  0x23   : > { %v14076_v0 = vld [vmem:[%s18749_s24] sm:$0xff] (!%p626_p9)   ;;  %v14077_v2 = vld [vmem:[%s18749_s24 + $0x8] sm:$0xff] (!%p626_p9)   ;;  %v14078_v3 = vld [vmem:[%s18749_s24 + $0x10] sm:$0xff] (!%p626_p9)  }
  0x24   : > { %1769 = vmatpush1.bf16.msra.mxu0 (!%p626_p9), %v14076_v0  ;;  %v14079_v4 = vld [vmem:[%s18749_s24 + $0x18] sm:$0xff] (!%p626_p9)   ;;  %v14089_v5 = vld [vmem:[%s18749_s24 + $0x80] sm:$0xff] (!%p626_p9)   ;;  %v14091_v7 = vld [vmem:[%s18749_s24 + $0x88] sm:$0xff] (!%p626_p9)  }
  0x25   : > { %1770 = vmatprep.subr.bf16.mxu0 %v15002_v1  ;;  %s15189_s26 = scalar_select %p699_p10, %s15141_s3, 1  ;;  %v14080_v6 = vld [vmem:[%s18749_s24 + $0x20] sm:$0xff]   ;;  %13619 = vmatprep.subr.bf16.mxu1 %v14089_v5  ;;  %v14093_v8 = vld [vmem:[%s18749_s24 + $0x90] sm:$0xff]   ;;  %v14081_v9 = vld [vmem:[%s18749_s24 + $0x28] sm:$0xff]  }
  0x26   : > { %13620 = vmatpush3.bf16.msra.mxu1 %v14089_v5  ;;  %v14082_v10 = vld [vmem:[%s18749_s24 + $0x30] sm:$0xff]   ;;  %v14095_v11 = vld [vmem:[%s18749_s24 + $0x98] sm:$0xff]   ;;  %v14084_v17 = vld [vmem:[%s18749_s24 + $0x40] sm:$0xff]  }
  0x27   : > { %s14027_s29 = smul.u32 960, %s15189_s26  ;;  %13621 = vmatprep.subr.bf16.mxu1 %v14091_v7  ;;  %v14083_v14 = vld [vmem:[%s18749_s24 + $0x38] sm:$0xff]   ;;  %v14085_v18 = vld [vmem:[%s18749_s24 + $0x48] sm:$0xff]   ;;  %v14086_v21 = vld [vmem:[%s18749_s24 + $0x50] sm:$0xff]   ;;  %s712_s2 = scalar_lea.vmem %s18757_s1, %s15189_s26 }
  0x28   : > { %1771 = vmatpush1.bf16.msra.mxu0 %v14077_v2  ;;  %v14087_v22 = vld [vmem:[%s18749_s24 + $0x58] sm:$0xff]   ;;  %v14088_v25 = vld [vmem:[%s18749_s24 + $0x60] sm:$0xff]   ;;  %v14090_v26 = vld [vmem:[%s18749_s24 + $0x68] sm:$0xff]   ;;  %s715_s23 = scalar_lea.vmem %s18758_s4, %s15189_s26  ;;  %s15009_s1 = smov [#allocation4]  }
  0x29   : > { %1772 = vmatprep.subr.bf16.mxu0 %v15002_v1  ;;  %s15212_s21 = scalar_lea.vmem %s18750_s27, %s14027_s29  ;;  %v14092_v29 = vld [vmem:[%s18749_s24 + $0x70] sm:$0xff]   ;;  %v14094_v30 = vld [vmem:[%s18749_s24 + $0x78] sm:$0xff]   ;;  %s18728_s27 = smov 64  }
  0x2a   : > { %13622 = vmatpush3.bf16.msra.mxu1 %v14091_v7  ;;  %v14098_v12 = vld [vmem:[%s15212_s21 + $0x4] ss:$12 sps:$4 sm:$0xff]   ;;  %v14099_v13 = vld [vmem:[%s15212_s21 + $0x8] ss:$12 sps:$4 sm:$0xff]   ;;  %v14100_v15 = vld [vmem:[%s15212_s21 + $0x20] ss:$12 sps:$4 sm:$0xff]  }
  0x2b   : > { %13623 = vmatprep.subr.bf16.mxu1 %v14093_v8  ;;  %1800 = vmatprep.mubr.bf16.mxu0 %v14098_v12  ;;  %v14107_v16 = vld [vmem:[%s15212_s21 + $0x38] ss:$12 sps:$4 sm:$0xff]   ;;  %v14108_v19 = vld [vmem:[%s15212_s21 + $0x50] ss:$12 sps:$4 sm:$0xff]   ;;  %v14115_v20 = vld [vmem:[%s15212_s21 + $0x68] ss:$12 sps:$4 sm:$0xff]  }
  0x2c   : > { %1773 = vmatpush1.bf16.msra.mxu0 %v14078_v3  ;;  %13627 = vmatprep.mubr.msk.bf16.mxu1 %vm1647_vm0, %v14099_v13  ;;  %v14116_v23 = vld [vmem:[%s15212_s21 + $0x80] ss:$12 sps:$4 sm:$0xff]   ;;  %v14123_v24 = vld [vmem:[%s15212_s21 + $0x98] ss:$12 sps:$4 sm:$0xff]   ;;  %v14124_v27 = vld [vmem:[%s15212_s21 + $0xb0] ss:$12 sps:$4 sm:$0xff]  }
  0x2d   : > { %1774 = vmatprep.subr.bf16.mxu0 %v15002_v1  ;;  %v14131_v28 = vld [vmem:[%s15212_s21 + $0xc8] ss:$12 sps:$4 sm:$0xff]   ;;  %v14132_v31 = vld [vmem:[%s15212_s21 + $0xe0] ss:$12 sps:$4 sm:$0xff]   ;;  %v14139_v32 = vld [vmem:[%s15212_s21 + $0xf8] ss:$12 sps:$4 sm:$0xff]  }
  0x2e   : > { %13624 = vmatpush3.bf16.msra.mxu1 %v14093_v8  ;;  %v14096_v33 = vld [vmem:[%s15212_s21] ss:$12 sps:$4 sm:$0xff]   ;;  %v14101_v34 = vld [vmem:[%s15212_s21 + $0x1c] ss:$12 sps:$4 sm:$0xff]   ;;  %v14103_v37 = vld [vmem:[%s15212_s21 + $0x18] ss:$12 sps:$4 sm:$0xff]  }
  0x2f   : > { %13625 = vmatprep.subr.bf16.mxu1 %v14095_v11  ;;  %v14140_v35 = vld [vmem:[%s15212_s21 + $0x110] ss:$12 sps:$4 sm:$0xff]   ;;  %v14147_v36 = vld [vmem:[%s15212_s21 + $0x128] ss:$12 sps:$4 sm:$0xff]   ;;  %v14148_v39 = vld [vmem:[%s15212_s21 + $0x140] ss:$12 sps:$4 sm:$0xff]  }
  0x30   : > { %1775 = vmatpush1.bf16.msra.mxu0 %v14079_v4  ;;  %v14104_v38 = vld [vmem:[%s15212_s21 + $0x34] ss:$12 sps:$4 sm:$0xff]   ;;  %v14155_v40 = vld [vmem:[%s15212_s21 + $0x158] ss:$12 sps:$4 sm:$0xff]   ;;  %v14106_v41 = vld [vmem:[%s15212_s21 + $0x30] ss:$12 sps:$4 sm:$0xff]  }
  0x31   : > { %1776 = vmatprep.subr.bf16.mxu0 %v15002_v1  ;;  %v14109_v42 = vld [vmem:[%s15212_s21 + $0x4c] ss:$12 sps:$4 sm:$0xff]   ;;  %v14156_v43 = vld [vmem:[%s15212_s21 + $0x170] ss:$12 sps:$4 sm:$0xff]   ;;  %v14163_v44 = vld [vmem:[%s15212_s21 + $0x188] ss:$12 sps:$4 sm:$0xff]  }
  0x32   : > { %13626 = vmatpush3.bf16.msra.mxu1 %v14095_v11  ;;  %v14111_v45 = vld [vmem:[%s15212_s21 + $0x48] ss:$12 sps:$4 sm:$0xff]   ;;  %v14112_v46 = vld [vmem:[%s15212_s21 + $0x64] ss:$12 sps:$4 sm:$0xff]   ;;  %v14164_v47 = vld [vmem:[%s15212_s21 + $0x1a0] ss:$12 sps:$4 sm:$0xff]  }
  0x33   : > { %v14171_v48 = vld [vmem:[%s15212_s21 + $0x1b8] ss:$12 sps:$4 sm:$0xff]   ;;  %v14114_v49 = vld [vmem:[%s15212_s21 + $0x60] ss:$12 sps:$4 sm:$0xff]   ;;  %v14117_v50 = vld [vmem:[%s15212_s21 + $0x7c] ss:$12 sps:$4 sm:$0xff]  }
  0x34   : > { %1777 = vmatpush1.bf16.msra.mxu0 %v14080_v6  ;;  %v14172_v51 = vld [vmem:[%s15212_s21 + $0x1d0] ss:$12 sps:$4 sm:$0xff]   ;;  %v14179_v52 = vld [vmem:[%s15212_s21 + $0x1e8] ss:$12 sps:$4 sm:$0xff]   ;;  %v14119_v53 = vld [vmem:[%s15212_s21 + $0x78] ss:$12 sps:$4 sm:$0xff]  }
  0x35   : > { %1778 = vmatprep.subr.bf16.mxu0 %v15002_v1  ;;  %13628 = vmatmul.mubr.msk.bf16.vlgmr.msra.gmra.mrb[0].mxu1 %vm1647_vm0, %v14100_v15  ;;  %v14120_v54 = vld [vmem:[%s15212_s21 + $0x94] ss:$12 sps:$4 sm:$0xff]   ;;  %v14122_v56 = vld [vmem:[%s15212_s21 + $0x90] ss:$12 sps:$4 sm:$0xff]   ;;  %v14125_v57 = vld [vmem:[%s15212_s21 + $0xac] ss:$12 sps:$4 sm:$0xff]  }
  0x36   : > { %13631 = vmatprep.mubr.msk.bf16.mxu1 %vm1647_vm0, %v14107_v16  ;;  %v14180_v55 = vld [vmem:[%s15212_s21 + $0x200] ss:$12 sps:$4 sm:$0xff]   ;;  %v14187_v58 = vld [vmem:[%s15212_s21 + $0x218] ss:$12 sps:$4 sm:$0xff]   ;;  %v14188_v59 = vld [vmem:[%s15212_s21 + $0x230] ss:$12 sps:$4 sm:$0xff]  }
  0x37   : > { %v14127_v60 = vld [vmem:[%s15212_s21 + $0xa8] ss:$12 sps:$4 sm:$0xff]   ;;  %v14128_v61 = vld [vmem:[%s15212_s21 + $0xc4] ss:$12 sps:$4 sm:$0xff]   ;;  %v14130_v62 = vld [vmem:[%s15212_s21 + $0xc0] ss:$12 sps:$4 sm:$0xff]  }
  0x38   : > { %1779 = vmatpush1.bf16.msra.mxu0 %v14081_v9  ;;  %v14133_v63 = vld [vmem:[%s15212_s21 + $0xdc] ss:$12 sps:$4 sm:$0xff]   ;;  %v14196_v2 = vld [vmem:[%s15212_s21 + $0x260] ss:$12 sps:$4 sm:$0xff]   ;;  %v14135_v3 = vld [vmem:[%s15212_s21 + $0xd8] ss:$12 sps:$4 sm:$0xff]  }
  0x39   : > { %1780 = vmatprep.subr.bf16.mxu0 %v15002_v1  ;;  %v14195_v0 = vld [vmem:[%s15212_s21 + $0x248] ss:$12 sps:$4 sm:$0xff]   ;;  %v14138_v5 = vld [vmem:[%s15212_s21 + $0xf0] ss:$12 sps:$4 sm:$0xff]   ;;  %v14141_v6 = vld [vmem:[%s15212_s21 + $0x10c] ss:$12 sps:$4 sm:$0xff]  }
  0x3a   : > { %v14136_v4 = vld [vmem:[%s15212_s21 + $0xf4] ss:$12 sps:$4 sm:$0xff]   ;;  %v14203_v7 = vld [vmem:[%s15212_s21 + $0x278] ss:$12 sps:$4 sm:$0xff]   ;;  %v14204_v8 = vld [vmem:[%s15212_s21 + $0x290] ss:$12 sps:$4 sm:$0xff]  }
  0x3b   : > { %v14143_v9 = vld [vmem:[%s15212_s21 + $0x108] ss:$12 sps:$4 sm:$0xff]   ;;  %v14146_v11 = vld [vmem:[%s15212_s21 + $0x120] ss:$12 sps:$4 sm:$0xff]   ;;  %v14151_v15 = vld [vmem:[%s15212_s21 + $0x138] ss:$12 sps:$4 sm:$0xff]  }
  0x3c   : > { %1781 = vmatpush1.bf16.msra.mxu0 %v14082_v10  ;;  %v14144_v10 = vld [vmem:[%s15212_s21 + $0x124] ss:$12 sps:$4 sm:$0xff]   ;;  %v14149_v12 = vld [vmem:[%s15212_s21 + $0x13c] ss:$12 sps:$4 sm:$0xff]   ;;  %v14152_v16 = vld [vmem:[%s15212_s21 + $0x154] ss:$12 sps:$4 sm:$0xff]  }
  0x3d   : > { %1782 = vmatprep.subr.bf16.mxu0 %v15002_v1  ;;  %13632 = vmatmul.mubr.msk.bf16.gmra.mrb[4].mxu1 %vm1647_vm0, %v14108_v19  ;;  %v14210_v13 = vld [vmem:[%s15212_s21 + $0x2a8] ss:$12 sps:$4 sm:$0xff]   ;;  %v14218_v19 = vld [vmem:[%s15212_s21 + $0x2d8] ss:$12 sps:$4 sm:$0xff]   ;;  %s12542_s29 = sshll.u32 %s15141_s3, 4 }
  0x3e   : > { %13635 = vmatprep.mubr.msk.bf16.mxu1 %vm1647_vm0, %v14115_v20  ;;  %v14219_v20 = vld [vmem:[%s15212_s21 + $0x2f0] ss:$12 sps:$4 sm:$0xff]   ;;  %s18656_s0 = scalar_lea.hbm %s18719_s20, %s12542_s29 }
  0x40   : > { %1783 = vmatpush1.bf16.msra.mxu0 %v14083_v14  ;;  %v14211_v14 = vld [vmem:[%s15212_s21 + $0x2c0] ss:$12 sps:$4 sm:$0xff]  }
  0x41   : > { %1784 = vmatprep.subr.bf16.mxu0 %v15002_v1 }
  0x44   : > { %1785 = vmatpush1.bf16.msra.mxu0 %v14084_v17  ;;  %v14154_v17 = vld [vmem:[%s15212_s21 + $0x150] ss:$12 sps:$4 sm:$0xff]  }
  0x45   : > { %1786 = vmatprep.subr.bf16.mxu0 %v15002_v1  ;;  %13636 = vmatmul.mubr.msk.bf16.gmra.mrb[8].mxu1 %vm1647_vm0, %v14116_v23  ;;  %v14162_v23 = vld [vmem:[%s15212_s21 + $0x180] ss:$12 sps:$4 sm:$0xff]  }
  0x46   : > { %13639 = vmatprep.mubr.msk.bf16.mxu1 %vm1647_vm0, %v14123_v24  ;;  %v14165_v24 = vld [vmem:[%s15212_s21 + $0x19c] ss:$12 sps:$4 sm:$0xff]  }
  0x48   : > { %1787 = vmatpush1.bf16.msra.mxu0 %v14085_v18  ;;  %v14157_v18 = vld [vmem:[%s15212_s21 + $0x16c] ss:$12 sps:$4 sm:$0xff]  }
  0x49   : > { %1788 = vmatprep.subr.bf16.mxu0 %v15002_v1 }
  0x4c   : > { %1789 = vmatpush1.bf16.msra.mxu0 %v14086_v21  ;;  %v14159_v21 = vld [vmem:[%s15212_s21 + $0x168] ss:$12 sps:$4 sm:$0xff]  }
  0x4d   : > { %1790 = vmatprep.subr.bf16.mxu0 %v15002_v1  ;;  %13640 = vmatmul.mubr.msk.bf16.gmra.mrb[12].mxu1 %vm1647_vm0, %v14124_v27  ;;  %v14167_v27 = vld [vmem:[%s15212_s21 + $0x198] ss:$12 sps:$4 sm:$0xff]  }
  0x4e   : > { %13643 = vmatprep.mubr.msk.bf16.mxu1 %vm1647_vm0, %v14131_v28  ;;  %v14168_v28 = vld [vmem:[%s15212_s21 + $0x1b4] ss:$12 sps:$4 sm:$0xff]  }
  0x50   : > { %1791 = vmatpush1.bf16.msra.mxu0 %v14087_v22  ;;  %v14160_v22 = vld [vmem:[%s15212_s21 + $0x184] ss:$12 sps:$4 sm:$0xff]  }
  0x51   : > { %1792 = vmatprep.subr.bf16.mxu0 %v15002_v1 }
  0x54   : > { %1793 = vmatpush1.bf16.msra.mxu0 %v14088_v25  ;;  %v14226_v25 = vld [vmem:[%s15212_s21 + $0x308] ss:$12 sps:$4 sm:$0xff]  }
  0x55   : > { %1794 = vmatprep.subr.bf16.mxu0 %v15002_v1  ;;  %13644 = vmatmul.mubr.msk.bf16.gmra.mrb[16].mxu1 %vm1647_vm0, %v14132_v31  ;;  %v14233_v31 = vld [vmem:[%s15212_s21 + $0x338] ss:$12 sps:$4 sm:$0xff]  }
  0x56   : > { %13647 = vmatprep.mubr.msk.bf16.mxu1 %vm1647_vm0, %v14139_v32  ;;  %v14234_v32 = vld [vmem:[%s15212_s21 + $0x350] ss:$12 sps:$4 sm:$0xff]  }
  0x58   : > { %1795 = vmatpush1.bf16.msra.mxu0 %v14090_v26  ;;  %v14227_v26 = vld [vmem:[%s15212_s21 + $0x320] ss:$12 sps:$4 sm:$0xff]  }
  0x59   : > { %1796 = vmatprep.subr.bf16.mxu0 %v15002_v1 }
  0x5c   : > { %1797 = vmatpush1.bf16.msra.mxu0 %v14092_v29  ;;  %v14170_v29 = vld [vmem:[%s15212_s21 + $0x1b0] ss:$12 sps:$4 sm:$0xff]  }
  0x5d   : > { %1798 = vmatprep.subr.bf16.mxu0 %v15002_v1  ;;  %13648 = vmatmul.mubr.msk.bf16.gmra.mrb[20].mxu1 %vm1647_vm0, %v14140_v35  ;;  %v14178_v35 = vld [vmem:[%s15212_s21 + $0x1e0] ss:$12 sps:$4 sm:$0xff]  }
  0x5e   : > { %13651 = vmatprep.mubr.msk.bf16.mxu1 %vm1647_vm0, %v14147_v36  ;;  %v14181_v36 = vld [vmem:[%s15212_s21 + $0x1fc] ss:$12 sps:$4 sm:$0xff]  }
  0x60   : > { %1799 = vmatpush1.bf16.msra.mxu0 %v14094_v30  ;;  %v14173_v30 = vld [vmem:[%s15212_s21 + $0x1cc] ss:$12 sps:$4 sm:$0xff]  }
  0x63   : > { %1801 = vmatmul.mubr.bf16.vlgmr.msra.gmra.mrb[0].mxu0 %v14096_v33  ;;  %v14175_v33 = vld [vmem:[%s15212_s21 + $0x1c8] ss:$12 sps:$4 sm:$0xff]  }
  0x64   : > { %1808 = vmatprep.mubr.bf16.mxu0 %v14101_v34  ;;  %v14176_v34 = vld [vmem:[%s15212_s21 + $0x1e4] ss:$12 sps:$4 sm:$0xff]  }
  0x65   : > { %13652 = vmatmul.mubr.msk.bf16.gmra.mrb[24].mxu1 %vm1647_vm0, %v14148_v39  ;;  %v14183_v39 = vld [vmem:[%s15212_s21 + $0x1f8] ss:$12 sps:$4 sm:$0xff]  }
  0x66   : > { %13655 = vmatprep.mubr.msk.bf16.mxu1 %vm1647_vm0, %v14155_v40  ;;  %v14184_v40 = vld [vmem:[%s15212_s21 + $0x214] ss:$12 sps:$4 sm:$0xff]  }
  0x6b   : > { %1809 = vmatmul.mubr.bf16.gmra.mrb[4].mxu0 %v14103_v37  ;;  %v14241_v37 = vld [vmem:[%s15212_s21 + $0x368] ss:$12 sps:$4 sm:$0xff]  }
  0x6c   : > { %1816 = vmatprep.mubr.bf16.mxu0 %v14104_v38  ;;  %v14242_v38 = vld [vmem:[%s15212_s21 + $0x380] ss:$12 sps:$4 sm:$0xff]  }
  0x6d   : > { %13656 = vmatmul.mubr.msk.bf16.gmra.mrb[28].mxu1 %vm1647_vm0, %v14156_v43  ;;  %v14246_v43 = vld [vmem:[%s15212_s21 + $0x3b0] ss:$12 sps:$4 sm:$0xff]  }
  0x6e   : > { %13659 = vmatprep.mubr.msk.bf16.mxu1 %vm1647_vm0, %v14163_v44  ;;  %v14189_v44 = vld [vmem:[%s15212_s21 + $0x22c] ss:$12 sps:$4 sm:$0xff]  }
  0x73   : > { %1817 = vmatmul.mubr.bf16.gmra.mrb[8].mxu0 %v14106_v41  ;;  %v14186_v41 = vld [vmem:[%s15212_s21 + $0x210] ss:$12 sps:$4 sm:$0xff]  }
  0x74   : > { %1824 = vmatprep.mubr.bf16.mxu0 %v14109_v42  ;;  %v14245_v42 = vld [vmem:[%s15212_s21 + $0x398] ss:$12 sps:$4 sm:$0xff]  }
  0x75   : > { %13660 = vmatmul.mubr.msk.bf16.gmra.mrb[32].mxu1 %vm1647_vm0, %v14164_v47 }
  0x76   : > { %13663 = vmatprep.mubr.msk.bf16.mxu1 %vm1647_vm0, %v14171_v48 }
  0x7b   : > { %1825 = vmatmul.mubr.bf16.gmra.mrb[12].mxu0 %v14111_v45 }
  0x7c   : > { %1832 = vmatprep.mubr.bf16.mxu0 %v14112_v46  ;;  %v14191_v46 = vld [vmem:[%s15212_s21 + $0x228] ss:$12 sps:$4 sm:$0xff]  }
  0x7d   : > { %13664 = vmatmul.mubr.msk.bf16.gmra.mrb[36].mxu1 %vm1647_vm0, %v14172_v51 }
  0x7e   : > { %13667 = vmatprep.mubr.msk.bf16.mxu1 %vm1647_vm0, %v14179_v52  ;;  %v14194_v52 = vld [vmem:[%s15212_s21 + $0x240] ss:$12 sps:$4 sm:$0xff]  }
  0x83   : > { %1833 = vmatmul.mubr.bf16.gmra.mrb[16].mxu0 %v14114_v49 }
  0x84   : > { %1840 = vmatprep.mubr.bf16.mxu0 %v14117_v50  ;;  %v14192_v50 = vld [vmem:[%s15212_s21 + $0x244] ss:$12 sps:$4 sm:$0xff]  }
  0x85   : > { %13668 = vmatmul.mubr.msk.bf16.gmra.mrb[40].mxu1 %vm1647_vm0, %v14180_v55 }
  0x86   : > { %13671 = vmatprep.mubr.msk.bf16.mxu1 %vm1647_vm0, %v14187_v58  ;;  %v14199_v58 = vld [vmem:[%s15212_s21 + $0x258] ss:$12 sps:$4 sm:$0xff]  }
  0x8b   : > { %1841 = vmatmul.mubr.bf16.gmra.mrb[20].mxu0 %v14119_v53 }
  0x8c   : > { %1848 = vmatprep.mubr.bf16.mxu0 %v14120_v54  ;;  %v14197_v54 = vld [vmem:[%s15212_s21 + $0x25c] ss:$12 sps:$4 sm:$0xff]  }
  0x8d   : > { %13672 = vmatmul.mubr.msk.bf16.gmra.mrb[44].mxu1 %vm1647_vm0, %v14188_v59 }
  0x8e   : > { %13675 = vmatprep.mubr.msk.bf16.mxu1 %vm1647_vm0, %v14195_v0  ;;  %v14202_v0 = vld [vmem:[%s15212_s21 + $0x270] ss:$12 sps:$4 sm:$0xff]  }
  0x93   : > { %1849 = vmatmul.mubr.bf16.gmra.mrb[24].mxu0 %v14122_v56 }
  0x94   : > { %1856 = vmatprep.mubr.bf16.mxu0 %v14125_v57 }
  0x95   : > { %13676 = vmatmul.mubr.msk.bf16.gmra.mrb[48].mxu1 %vm1647_vm0, %v14196_v2 }
  0x96   : > { %13679 = vmatprep.mubr.msk.bf16.mxu1 %vm1647_vm0, %v14203_v7  ;;  %v828_v7 = vld [vmem:[%s15212_s21 + $0x288] sm:$0xff] }
  0x9b   : > { %1857 = vmatmul.mubr.bf16.gmra.mrb[28].mxu0 %v14127_v60  ;;  %v14200_v60 = vld [vmem:[%s15212_s21 + $0x274] ss:$12 sps:$4 sm:$0xff]  }
  0x9c   : > { %1864 = vmatprep.mubr.bf16.mxu0 %v14128_v61 }
  0x9d   : > { %13680 = vmatmul.mubr.msk.bf16.gmra.mrb[52].mxu1 %vm1647_vm0, %v14204_v8  ;;  %v830_v8 = vld [vmem:[%s15212_s21 + $0x294] sm:$0xff] }
  0x9e   : > { %13683 = vmatprep.mubr.msk.bf16.mxu1 %vm1647_vm0, %v14210_v13 }
  0xa3   : > { %1865 = vmatmul.mubr.bf16.gmra.mrb[32].mxu0 %v14130_v62 }
  0xa4   : > { %1872 = vmatprep.mubr.bf16.mxu0 %v14133_v63 }
  0xa5   : > { %13684 = vmatmul.mubr.msk.bf16.gmra.mrb[56].mxu1 %vm1647_vm0, %v14211_v14 }
  0xa6   : > { %13687 = vmatprep.mubr.msk.bf16.mxu1 %vm1647_vm0, %v14218_v19 }
  0xab   : > { %1873 = vmatmul.mubr.bf16.gmra.mrb[36].mxu0 %v14135_v3  ;;  %v14205_v3 = vld [vmem:[%s15212_s21 + $0x28c] ss:$12 sps:$4 sm:$0xff]  }
  0xac   : > { %1880 = vmatprep.mubr.bf16.mxu0 %v14136_v4 }
  0xad   : > { %13688 = vmatmul.mubr.msk.bf16.gmra.mrb[60].mxu1 %vm1647_vm0, %v14219_v20 }
  0xae   : > { %13691 = vmatprep.mubr.msk.bf16.mxu1 %vm1647_vm0, %v14226_v25 }
  0xb3   : > { %1881 = vmatmul.mubr.bf16.gmra.mrb[40].mxu0 %v14138_v5 }
  0xb4   : > { %1888 = vmatprep.mubr.bf16.mxu0 %v14141_v6  ;;  %v15424_v6 = vld [vmem:[%s18751_s6] ss:$0 sm:$0xff] }
  0xb5   : > { %13692 = vmatmul.mubr.msk.bf16.gmra.mrb[64].mxu1 %vm1647_vm0, %v14227_v26 }
  0xb6   : > { %13695 = vmatprep.mubr.msk.bf16.mxu1 %vm1647_vm0, %v14233_v31 }
  0xbb   : > { %1889 = vmatmul.mubr.bf16.gmra.mrb[44].mxu0 %v14143_v9 }
  0xbc   : > { %1896 = vmatprep.mubr.bf16.mxu0 %v14144_v10 }
  0xbd   : > { %13696 = vmatmul.mubr.msk.bf16.gmra.mrb[68].mxu1 %vm1647_vm0, %v14234_v32 }
  0xbe   : > { %13699 = vmatprep.mubr.msk.bf16.mxu1 %vm1647_vm0, %v14241_v37 }
  0xc3   : > { %1897 = vmatmul.mubr.bf16.gmra.mrb[48].mxu0 %v14146_v11 }
  0xc4   : > { %1904 = vmatprep.mubr.bf16.mxu0 %v14149_v12  ;;  %v14207_v12 = vld [vmem:[%s15212_s21 + $0x2a4] ss:$12 sps:$4 sm:$0xff]  }
  0xc5   : > { %13700 = vmatmul.mubr.msk.bf16.gmra.mrb[72].mxu1 %vm1647_vm0, %v14242_v38 }
  0xc6   : > { %13703 = vmatprep.mubr.msk.bf16.mxu1 %vm1647_vm0, %v14245_v42 }
  0xcb   : > { %1905 = vmatmul.mubr.bf16.gmra.mrb[52].mxu0 %v14151_v15 }
  0xcc   : > { %1912 = vmatprep.mubr.bf16.mxu0 %v14152_v16  ;;  %v11630_v16 = vcombine.low %v828_v7, %v830_v8 }
  0xcd   : > { %13704 = vmatmul.mubr.msk.bf16.gmra.mrb[76].mxu1 %vm1647_vm0, %v14246_v43 }
  0xd3   : > { %1913 = vmatmul.mubr.bf16.gmra.mrb[56].mxu0 %v14154_v17 }
  0xd4   : > { %1920 = vmatprep.mubr.bf16.mxu0 %v14157_v18 }
  0xdb   : > { %1921 = vmatmul.mubr.bf16.gmra.mrb[60].mxu0 %v14159_v21 }
  0xdc   : > { %1928 = vmatprep.mubr.bf16.mxu0 %v14160_v22 }
  0xe3   : > { %1929 = vmatmul.mubr.bf16.gmra.mrb[64].mxu0 %v14162_v23 }
  0xe4   : > { %1936 = vmatprep.mubr.bf16.mxu0 %v14165_v24 }
  0xeb   : > { %1937 = vmatmul.mubr.bf16.gmra.mrb[68].mxu0 %v14167_v27  ;;  %v14209_v27 = vld [vmem:[%s15212_s21 + $0x2a0] ss:$12 sps:$4 sm:$0xff]  }
  0xec   : > { %1944 = vmatprep.mubr.bf16.mxu0 %v14168_v28 }
  0xf3   : > { %1945 = vmatmul.mubr.bf16.gmra.mrb[72].mxu0 %v14170_v29 }
  0xf4   : > { %1952 = vmatprep.mubr.bf16.mxu0 %v14173_v30  ;;  %v14212_v30 = vld [vmem:[%s15212_s21 + $0x2bc] ss:$12 sps:$4 sm:$0xff]  }
  0xfb   : > { %1953 = vmatmul.mubr.bf16.gmra.mrb[76].mxu0 %v14175_v33 }
  0xfc   : > { %1960 = vmatprep.mubr.bf16.mxu0 %v14176_v34 }
 0x103   : > { %1961 = vmatmul.mubr.bf16.gmra.mrb[80].mxu0 %v14178_v35 }
 0x104   : > { %1968 = vmatprep.mubr.bf16.mxu0 %v14181_v36 }
 0x108   : > { %v15385_v45 = vpop.f32.mrb[0].mxu1 }
 0x109   : > { %v2155_v47 = vpop.f32.mrb[1].mxu1 }
 0x10a   : > { %v15388_v48 = vpop.f32.mrb[2].mxu1 }
 0x10b   : > { %1969 = vmatmul.mubr.bf16.gmra.mrb[84].mxu0 %v14183_v39  ;;  %v2158_v49 = vpop.f32.mrb[3].mxu1 }
 0x10c   : > { %1976 = vmatprep.mubr.bf16.mxu0 %v14184_v40 }
 0x110   : > { %v15391_v51 = vpop.f32.mrb[4].mxu1 }
 0x111   : > { %v15394_v53 = vpop.f32.mrb[5].mxu1 }
 0x112   : > { %v15397_v55 = vpop.f32.mrb[6].mxu1 }
 0x113   : > { %1977 = vmatmul.mubr.bf16.gmra.mrb[88].mxu0 %v14186_v41  ;;  %v15399_v56 = vpop.f32.mrb[7].mxu1 }
 0x114   : > { %1984 = vmatprep.mubr.bf16.mxu0 %v14189_v44  ;;  %v14214_v44 = vld [vmem:[%s15212_s21 + $0x2b8] ss:$12 sps:$4 sm:$0xff]  }
 0x118   : > { %v15401_v57 = vpop.f32.mrb[8].mxu1 }
 0x119   : > { %v15404_v59 = vpop.f32.mrb[9].mxu1 }
 0x11a   : > { %v15407_v61 = vpop.f32.mrb[10].mxu1 }
 0x11b   : > { %1985 = vmatmul.mubr.bf16.gmra.mrb[92].mxu0 %v14191_v46  ;;  %v15409_v62 = vpop.f32.mrb[11].mxu1 }
 0x11c   : > { %1992 = vmatprep.mubr.bf16.mxu0 %v14192_v50  ;;  %v14215_v50 = vld [vmem:[%s15212_s21 + $0x2d4] ss:$12 sps:$4 sm:$0xff]  }
 0x120   : > { %v15411_v63 = vpop.f32.mrb[12].mxu1 }
 0x121   : > { %v15414_v2 = vpop.f32.mrb[13].mxu1 }
 0x122   : > { %v15417_v4 = vpop.f32.mrb[14].mxu1 }
 0x123   : > { %1993 = vmatmul.mubr.bf16.gmra.mrb[96].mxu0 %v14194_v52  ;;  %v15419_v5 = vpop.f32.mrb[15].mxu1 }
 0x124   : > { %2000 = vmatprep.mubr.bf16.mxu0 %v14197_v54 }
 0x128   : > { %v15428_v9 = vpop.f32.mrb[16].mxu1 }
 0x129   : > { %v15430_v10 = vpop.f32.mrb[17].mxu1 }
 0x12a   : > { %v15433_v13 = vpop.f32.mrb[18].mxu1 }
 0x12b   : > { %2001 = vmatmul.mubr.bf16.gmra.mrb[100].mxu0 %v14199_v58  ;;  %v15436_v17 = vpop.f32.mrb[19].mxu1 }
 0x12c   : > { %2008 = vmatprep.mubr.bf16.mxu0 %v14200_v60 }
 0x130   : > { %v15439_v24 = vpop.f32.mrb[20].mxu1 }
 0x131   : > { %v15442_v28 = vpop.f32.mrb[21].mxu1 }
 0x132   : > { %v15445_v31 = vpop.f32.mrb[22].mxu1 }
 0x133   : > { %2009 = vmatmul.mubr.bf16.gmra.mrb[104].mxu0 %v14202_v0  ;;  %v15449_v35 = vpop.f32.mrb[23].mxu1 }
 0x134   : > { %2016 = vmatprep.mubr.bf16.mxu0 %v14205_v3 }
 0x136   : > { %v1802_v11 = vpop.f32.mrb[0].mxu0 }
 0x137   : > { %v1804_v14 = vpop.f32.mrb[1].mxu0  ;;  %v1803_v15 = vadd.f32 %v15424_v6, %v1802_v11 }
 0x138   : > { %v1805_v18 = vpop.f32.mrb[2].mxu0  ;;  %v15455_v42 = vpop.f32.mrb[24].mxu1 }
 0x139   : > { %v2156_v19 = vadd.f32 %v2155_v47, %v1803_v15  ;;  %v1807_v20 = vpop.f32.mrb[3].mxu0  ;;  %v1806_v21 = vadd.f32 %v15424_v6, %v1805_v18  ;;  %v15458_v46 = vpop.f32.mrb[25].mxu1 }
 0x13a   : > { %v15461_v52 = vpop.f32.mrb[26].mxu1  ;;  %v14220_v20 = vld [vmem:[%s15212_s21 + $0x2ec] ss:$12 sps:$4 sm:$0xff]  }
 0x13b   : > { %v2474_v22 = vmax.f32 %v2156_v19, 0.0  ;;  %v2159_v23 = vadd.f32 %v2158_v49, %v1806_v21  ;;  %2017 = vmatmul.mubr.bf16.gmra.mrb[108].mxu0 %v11630_v16  ;;  %v15464_v58 = vpop.f32.mrb[27].mxu1  ;;  %v14217_v16 = vld [vmem:[%s15212_s21 + $0x2d0] ss:$12 sps:$4 sm:$0xff]  }
 0x13c   : > { %2024 = vmatprep.mubr.bf16.mxu0 %v14207_v12 }
 0x13d   : > { %v12545_v25 = vpack.c.bf16 %v2474_v22, %v2474_v22  ;;  %v2475_v26 = vmax.f32 %v2159_v23, 0.0 }
 0x13e   : > { %v1810_v29 = vpop.f32.mrb[4].mxu0 }
 0x13f   : > { %2613 = vst.msk [vmem:[#allocation2] sm:$0xf] %vm2612_vm1, %v12545_v25  ;;  %v12546_v32 = vpack.c.bf16 %v2475_v26, %v2475_v26  ;;  %v1811_v33 = vadd.f32 %v15424_v6, %v1810_v29  ;;  %v1812_v34 = vpop.f32.mrb[5].mxu0 }
 0x140   : > { %v1813_v36 = vpop.f32.mrb[6].mxu0  ;;  %v15471_v12 = vpop.f32.mrb[28].mxu1 }
 0x141   : > { %2614 = vst.msk [vmem:[#allocation2 + $0x20] sm:$0xf] %vm2612_vm1, %v12546_v32  ;;  %v2164_v37 = vadd.f32 %v15385_v45, %v1811_v33  ;;  %v1814_v38 = vadd.f32 %v15424_v6, %v1813_v36  ;;  %v1815_v39 = vpop.f32.mrb[7].mxu0  ;;  %v15474_v18 = vpop.f32.mrb[29].mxu1  ;;  %v14222_v36 = vld [vmem:[%s15212_s21 + $0x2e8] ss:$12 sps:$4 sm:$0xff]  }
 0x143   : > { %v2476_v40 = vmax.f32 %v2164_v37, 0.0  ;;  %v2167_v41 = vadd.f32 %v15388_v48, %v1814_v38  ;;  %2025 = vmatmul.mubr.bf16.gmra.mrb[112].mxu0 %v14209_v27 }
 0x144   : > { %2032 = vmatprep.mubr.bf16.mxu0 %v14212_v30 }
 0x145   : > { %v2477_v43 = vmax.f32 %v2167_v41, 0.0  ;;  %v12547_v47 = vpack.c.bf16 %v2476_v40, %v2476_v40  ;;  %v14223_v40 = vld [vmem:[%s15212_s21 + $0x304] ss:$12 sps:$4 sm:$0xff]  }
 0x146   : > { %v1818_v49 = vpop.f32.mrb[8].mxu0 }
 0x147   : > { %v1820_v45 = vpop.f32.mrb[9].mxu0  ;;  %v1819_v54 = vadd.f32 %v15424_v6, %v1818_v49  ;;  %2615 = vst.msk [vmem:[#allocation2 + $0x40] sm:$0xf] %vm2612_vm1, %v12547_v47  ;;  %v12548_v48 = vpack.c.bf16 %v2477_v43, %v2477_v43 }
 0x148   : > { %v1821_v60 = vpop.f32.mrb[10].mxu0 }
 0x149   : > { %v2172_v0 = vadd.f32 %v15394_v53, %v1819_v54  ;;  %v1823_v3 = vpop.f32.mrb[11].mxu0  ;;  %v1822_v7 = vadd.f32 %v15424_v6, %v1821_v60  ;;  %2616 = vst.msk [vmem:[#allocation2 + $0x60] sm:$0xf] %vm2612_vm1, %v12548_v48  ;;  %v15477_v53 = vpop.f32.mrb[30].mxu1  ;;  %v14253_v48 = vld [vmem:[%s18752_s7 + $0x40] sm:$0xff]  }
 0x14a   : > { %v15481_v23 = vpop.f32.mrb[31].mxu1  ;;  %12669 = vmatprep.subr.bf16.mxu1 %v14253_v48 }
 0x14b   : > { %v2478_v8 = vmax.f32 %v2172_v0, 0.0  ;;  %v2175_v11 = vadd.f32 %v15399_v56, %v1822_v7  ;;  %2033 = vmatmul.mubr.bf16.gmra.mrb[116].mxu0 %v14214_v44  ;;  %v15487_v33 = vpop.f32.mrb[32].mxu1  ;;  %v14225_v0 = vld [vmem:[%s15212_s21 + $0x300] ss:$12 sps:$4 sm:$0xff]   ;;  %v14228_v7 = vld [vmem:[%s15212_s21 + $0x31c] ss:$12 sps:$4 sm:$0xff]  }
 0x14c   : > { %2040 = vmatprep.mubr.bf16.mxu0 %v14215_v50  ;;  %v15490_v38 = vpop.f32.mrb[33].mxu1 }
 0x14d   : > { %v12549_v14 = vpack.c.bf16 %v2478_v8, %v2478_v8  ;;  %v2479_v15 = vmax.f32 %v2175_v11, 0.0  ;;  %v15493_v41 = vpop.f32.mrb[34].mxu1 }
 0x14e   : > { %v1826_v19 = vpop.f32.mrb[12].mxu0  ;;  %v15497_v44 = vpop.f32.mrb[35].mxu1 }
 0x14f   : > { %2617 = vst.msk [vmem:[#allocation2 + $0x80] sm:$0xf] %vm2612_vm1, %v12549_v14  ;;  %v1827_v21 = vadd.f32 %v15424_v6, %v1826_v19  ;;  %v1828_v22 = vpop.f32.mrb[13].mxu0  ;;  %v12550_v56 = vpack.c.bf16 %v2479_v15, %v2479_v15 }
 0x150   : > { %v1829_v25 = vpop.f32.mrb[14].mxu0  ;;  %v15510_v60 = vpop.f32.mrb[36].mxu1 }
 0x151   : > { %v1830_v26 = vadd.f32 %v15424_v6, %v1829_v25  ;;  %v1831_v27 = vpop.f32.mrb[15].mxu0  ;;  %2630 = vrot.lane.b32.xlu0 %v12550_v56, %s18728_s27  ;;  %v2180_v29 = vadd.f32 %v15391_v51, %v1827_v21  ;;  %v15516_v3 = vpop.f32.mrb[37].mxu1  ;;  %v852_v25 = vld [vmem:[%s15212_s21 + $0x318] sm:$0xff] }
 0x152   : > { %v15519_v8 = vpop.f32.mrb[38].mxu1 }
 0x153   : > { %2041 = vmatmul.mubr.bf16.gmra.mrb[120].mxu0 %v14217_v16  ;;  %v2480_v30 = vmax.f32 %v2180_v29, 0.0  ;;  %v2183_v32 = vadd.f32 %v15397_v55, %v1830_v26  ;;  %v15522_v15 = vpop.f32.mrb[39].mxu1  ;;  %v14255_v16 = vld [vmem:[%s18752_s7 + $0x48] sm:$0xff]  }
 0x154   : > { %2048 = vmatprep.mubr.bf16.mxu0 %v14220_v20  ;;  %v14256_v20 = vld [vmem:[%s18752_s7 + $0x8] sm:$0xff]  }
 0x155   : > { %v12551_v34 = vpack.c.bf16 %v2480_v30, %v2480_v30  ;;  %v2481_v37 = vmax.f32 %v2183_v32, 0.0  ;;  %v854_v26 = vld [vmem:[%s15212_s21 + $0x324] sm:$0xff]  ;;  %v14257_v30 = vld [vmem:[%s18752_s7 + $0x50] sm:$0xff]  }
 0x156   : > { %v1834_v39 = vpop.f32.mrb[16].mxu0 }
 0x157   : > { %v1836_v43 = vpop.f32.mrb[17].mxu0  ;;  %2632 = vrot.lane.b32.xlu0 %v12551_v34, %s18728_s27  ;;  %v1835_v51 = vadd.f32 %v15424_v6, %v1834_v39  ;;  %v12552_v45 = vpack.c.bf16 %v2481_v37, %v2481_v37 }
 0x158   : > { %v1837_v55 = vpop.f32.mrb[18].mxu0  ;;  %v15538_v32 = vpop.f32.mrb[40].mxu1 }
 0x159   : > { %v15500_v47 = vadd.f32 %v15404_v59, %v1835_v51  ;;  %v1839_v49 = vpop.f32.mrb[19].mxu0  ;;  %v1838_v50 = vadd.f32 %v15424_v6, %v1837_v55  ;;  %v14254_v59 = vld [vmem:[%s18752_s7] sm:$0xff]   ;;  %v11648_v55 = vcombine.low %v852_v25, %v854_v26  ;;  %v14235_v26 = vld [vmem:[%s15212_s21 + $0x34c] ss:$12 sps:$4 sm:$0xff]  }
 0x15a   : > { %12670 = vmatpush3.bf16.msra.mxu1 %v14254_v59  ;;  %v14260_v59 = vld [vmem:[%s18752_s7 + $0x18] sm:$0xff]  }
 0x15b   : > { %v15504_v54 = vadd.f32 %v15409_v62, %v1838_v50  ;;  %2049 = vmatmul.mubr.bf16.gmra.mrb[124].mxu0 %v14222_v36  ;;  %2634 = vrot.lane.b32.xlu0 %v12552_v45, %s18728_s27  ;;  %v15543_v36 = vpop.f32.mrb[41].mxu1  ;;  %v14259_v50 = vld [vmem:[%s18752_s7 + $0x58] sm:$0xff]  }
 0x15c   : > { %2056 = vmatprep.mubr.bf16.mxu0 %v14223_v40  ;;  %12671 = vmatprep.subr.bf16.mxu1 %v14255_v16  ;;  %v14230_v40 = vld [vmem:[%s15212_s21 + $0x334] ss:$12 sps:$4 sm:$0xff]  }
 0x15d   : > { %v14261_v16 = vld [vmem:[%s18752_s7 + $0x60] sm:$0xff]  }
 0x15e   : > { %v1842_v62 = vpop.f32.mrb[20].mxu0  ;;  %12672 = vmatpush3.bf16.msra.mxu1 %v14256_v20 }
 0x15f   : > { %v1843_v11 = vadd.f32 %v15424_v6, %v1842_v62  ;;  %v1844_v14 = vpop.f32.mrb[21].mxu0  ;;  %12673 = vmatprep.subr.bf16.mxu1 %v14257_v30 }
 0x160   : > { %v1845_v19 = vpop.f32.mrb[22].mxu0 }
 0x161   : > { %v2196_v21 = vadd.f32 %v15401_v57, %v1843_v11  ;;  %v1846_v22 = vadd.f32 %v15424_v6, %v1845_v19  ;;  %v1847_v56 = vpop.f32.mrb[23].mxu0  ;;  %v14258_v57 = vld [vmem:[%s18752_s7 + $0x10] sm:$0xff]  }
 0x162   : > { %12674 = vmatpush3.bf16.msra.mxu1 %v14258_v57 }
 0x163   : > { %v2484_v27 = vmax.f32 %v2196_v21, 0.0  ;;  %v2199_v29 = vadd.f32 %v15407_v61, %v1846_v22  ;;  %2057 = vmatmul.mubr.bf16.gmra.mrb[128].mxu0 %v14225_v0  ;;  %v15546_v61 = vpop.f32.mrb[42].mxu1  ;;  %12675 = vmatprep.subr.bf16.mxu1 %v14259_v50  ;;  %v14232_v22 = vld [vmem:[%s15212_s21 + $0x330] ss:$12 sps:$4 sm:$0xff]  }
 0x164   : > { %2064 = vmatprep.mubr.bf16.mxu0 %v14228_v7  ;;  %v15549_v49 = vpop.f32.mrb[43].mxu1 }
 0x165   : > { %v2485_v34 = vmax.f32 %v2199_v29, 0.0  ;;  %v12555_v37 = vpack.c.bf16 %v2484_v27, %v2484_v27  ;;  %v15565_v19 = vpop.f32.mrb[44].mxu1 }
 0x166   : > { %v1850_v39 = vpop.f32.mrb[24].mxu0  ;;  %12676 = vmatpush3.bf16.msra.mxu1 %v14260_v59  ;;  %v2331_v56 = vpop.f32.mrb[45].mxu1 }
 0x167   : > { %v1852_v43 = vpop.f32.mrb[25].mxu0  ;;  %v1851_v51 = vadd.f32 %v15424_v6, %v1850_v39  ;;  %2669 = vst.msk [vmem:[#allocation2 + $0x4] sm:$0xf] %vm2612_vm1, %v12555_v37  ;;  %v12556_v45 = vpack.c.bf16 %v2485_v34, %v2485_v34  ;;  %12677 = vmatprep.subr.bf16.mxu1 %v14261_v16  ;;  %v14263_v34 = vld [vmem:[%s18752_s7 + $0x68] sm:$0xff]  }
 0x168   : > { %v1853_v48 = vpop.f32.mrb[26].mxu0  ;;  %v14264_v39 = vld [vmem:[%s18752_s7 + $0x28] sm:$0xff]  }
 0x169   : > { %v2204_v0 = vadd.f32 %v15414_v2, %v1851_v51  ;;  %v1855_v62 = vpop.f32.mrb[27].mxu0  ;;  %v1854_v7 = vadd.f32 %v15424_v6, %v1853_v48  ;;  %2670 = vst.msk [vmem:[#allocation2 + $0x24] sm:$0xf] %vm2612_vm1, %v12556_v45  ;;  %v14262_v2 = vld [vmem:[%s18752_s7 + $0x20] sm:$0xff]   ;;  %v14265_v45 = vld [vmem:[%s18752_s7 + $0x70] sm:$0xff]  }
 0x16a   : > { %12678 = vmatpush3.bf16.msra.mxu1 %v14262_v2  ;;  %v14266_v48 = vld [vmem:[%s18752_s7 + $0x30] sm:$0xff]   ;;  %v14267_v2 = vld [vmem:[%s18752_s7 + $0x78] sm:$0xff]  }
 0x16b   : > { %v2486_v11 = vmax.f32 %v2204_v0, 0.0  ;;  %v2207_v14 = vadd.f32 %v15419_v5, %v1854_v7  ;;  %2065 = vmatmul.mubr.bf16.gmra.mrb[132].mxu0 %v11648_v55  ;;  %v15572_v5 = vpop.f32.mrb[46].mxu1  ;;  %12679 = vmatprep.subr.bf16.mxu1 %v14263_v34  ;;  %v14237_v0 = vld [vmem:[%s15212_s21 + $0x348] ss:$12 sps:$4 sm:$0xff]   ;;  %v14238_v7 = vld [vmem:[%s15212_s21 + $0x364] ss:$12 sps:$4 sm:$0xff]  }
 0x16c   : > { %2072 = vmatprep.mubr.bf16.mxu0 %v14230_v40  ;;  %v15576_v57 = vpop.f32.mrb[47].mxu1 }
 0x16d   : > { %v12557_v20 = vpack.c.bf16 %v2486_v11, %v2486_v11  ;;  %v2487_v21 = vmax.f32 %v2207_v14, 0.0  ;;  %v15598_v16 = vpop.f32.mrb[48].mxu1 }
 0x16e   : > { %v1858_v25 = vpop.f32.mrb[28].mxu0  ;;  %12680 = vmatpush3.bf16.msra.mxu1 %v14264_v39 }
 0x16f   : > { %2671 = vst.msk [vmem:[#allocation2 + $0x44] sm:$0xf] %vm2612_vm1, %v12557_v20  ;;  %v12558_v27 = vpack.c.bf16 %v2487_v21, %v2487_v21  ;;  %v1859_v29 = vadd.f32 %v15424_v6, %v1858_v25  ;;  %v1860_v30 = vpop.f32.mrb[29].mxu0  ;;  %12681 = vmatprep.subr.bf16.mxu1 %v14265_v45  ;;  %v15603_v21 = vpop.f32.mrb[49].mxu1 }
 0x170   : > { %v1861_v37 = vpop.f32.mrb[30].mxu0 }
 0x171   : > { %2672 = vst.msk [vmem:[#allocation2 + $0x64] sm:$0xf] %vm2612_vm1, %v12558_v27  ;;  %v2212_v40 = vadd.f32 %v15411_v63, %v1859_v29  ;;  %v1862_v43 = vadd.f32 %v15424_v6, %v1861_v37  ;;  %v1863_v51 = vpop.f32.mrb[31].mxu0  ;;  %v15611_v27 = vpop.f32.mrb[50].mxu1  ;;  %v2482_v37 = vmax.f32 %v15500_v47, 0.0 }
 0x172   : > { %12682 = vmatpush3.bf16.msra.mxu1 %v14266_v48  ;;  %v15613_v29 = vpop.f32.mrb[51].mxu1  ;;  %v14243_v51 = vld [vmem:[%s15212_s21 + $0x37c] ss:$12 sps:$4 sm:$0xff]  }
 0x173   : > { %v2488_v55 = vmax.f32 %v2212_v40, 0.0  ;;  %2073 = vmatmul.mubr.bf16.gmra.mrb[136].mxu0 %v14232_v22  ;;  %v2215_v50 = vadd.f32 %v15417_v4, %v1862_v43  ;;  %v14268_v22 = vld [vmem:[%s18752_s7 + $0x38] sm:$0xff]   ;;  %12683 = vmatprep.subr.bf16.mxu1 %v14267_v2  ;;  %v14240_v40 = vld [vmem:[%s15212_s21 + $0x360] ss:$12 sps:$4 sm:$0xff]  }
 0x174   : > { %2080 = vmatprep.mubr.bf16.mxu0 %v14235_v26 }
 0x175   : > { %v12559_v63 = vpack.c.bf16 %v2488_v55, %v2488_v55  ;;  %v2489_v59 = vmax.f32 %v2215_v50, 0.0 }
 0x176   : > { %v1866_v62 = vpop.f32.mrb[32].mxu0  ;;  %12684 = vmatpush3.bf16.msra.mxu1 %v14268_v22  ;;  %v13681_v22 = vpop.f32.mrb[52].mxu1 }
 0x177   : > { %2673 = vst.msk [vmem:[#allocation2 + $0x84] sm:$0xf] %vm2612_vm1, %v12559_v63  ;;  %v1867_v4 = vadd.f32 %v15424_v6, %v1866_v62  ;;  %v1868_v11 = vpop.f32.mrb[33].mxu0  ;;  %v12560_v14 = vpack.c.bf16 %v2489_v59, %v2489_v59  ;;  %v12553_v63 = vpack.c.bf16 %v2482_v37, %v2482_v37 }
 0x178   : > { %v1869_v20 = vpop.f32.mrb[34].mxu0 }
 0x179   : > { %v1870_v56 = vadd.f32 %v15424_v6, %v1869_v20  ;;  %v2220_v25 = vadd.f32 %v15430_v10, %v1867_v4  ;;  %v1871_v26 = vpop.f32.mrb[35].mxu0  ;;  %2686 = vrot.lane.b32.xlu1 %v12560_v14, %s18728_s27  ;;  %v870_v4 = vld [vmem:[%s15212_s21 + $0x384] sm:$0xff] }
 0x17a   : > { %v15633_v26 = vpop.f32.mrb[53].mxu1 }
 0x17b   : > { %v2490_v30 = vmax.f32 %v2220_v25, 0.0  ;;  %v2223_v34 = vadd.f32 %v15436_v17, %v1870_v56  ;;  %2081 = vmatmul.mubr.bf16.gmra.mrb[140].mxu0 %v14237_v0  ;;  %v868_v0 = vld [vmem:[%s15212_s21 + $0x378] sm:$0xff]  ;;  %v14247_v25 = vld [vmem:[%s15212_s21 + $0x394] ss:$12 sps:$4 sm:$0xff]   ;;  %v15637_v37 = vpop.f32.mrb[54].mxu1 }
 0x17c   : > { %2088 = vmatprep.mubr.bf16.mxu0 %v14238_v7  ;;  %v11660_v20 = vcombine.low %v868_v0, %v870_v4  ;;  %v14269_v0 = vld [vmem:[%s18752_s7 + $0x5c0] sm:$0xff]  }
 0x17d   : > { %v12561_v39 = vpack.c.bf16 %v2490_v30, %v2490_v30  ;;  %v2491_v10 = vmax.f32 %v2223_v34, 0.0  ;;  %12865 = vmatprep.subr.bf16.mxu0 %v14269_v0 }
 0x17e   : > { %v1874_v43 = vpop.f32.mrb[36].mxu0 }
 0x17f   : > { %v12562_v55 = vpack.c.bf16 %v2491_v10, %v2491_v10  ;;  %v1875_v50 = vadd.f32 %v15424_v6, %v1874_v43  ;;  %v1876_v45 = vpop.f32.mrb[37].mxu0  ;;  %2688 = vrot.lane.b32.xlu1 %v12561_v39, %s18728_s27  ;;  %v15639_v39 = vpop.f32.mrb[55].mxu1 }
 0x180   : > { %v1877_v48 = vpop.f32.mrb[38].mxu0 }
 0x181   : > { %v2228_v17 = vadd.f32 %v15428_v9, %v1875_v50  ;;  %v1878_v59 = vadd.f32 %v15424_v6, %v1877_v48  ;;  %v1879_v47 = vpop.f32.mrb[39].mxu0  ;;  %2690 = vrot.lane.b32.xlu0 %v12562_v55, %s18728_s27  ;;  %v14249_v55 = vld [vmem:[%s15212_s21 + $0x390] ss:$12 sps:$4 sm:$0xff]  }
 0x183   : > { %v2492_v62 = vmax.f32 %v2228_v17, 0.0  ;;  %v15626_v7 = vadd.f32 %v15433_v13, %v1878_v59  ;;  %2089 = vmatmul.mubr.bf16.gmra.mrb[144].mxu0 %v14240_v40  ;;  %2636 = vrot.lane.b32.xlu1 %v12553_v63, %s18728_s27  ;;  %v14250_v17 = vld [vmem:[%s15212_s21 + $0x3ac] ss:$12 sps:$4 sm:$0xff]  }
 0x184   : > { %2096 = vmatprep.mubr.bf16.mxu0 %v14243_v51 }
 0x185   : > { %v12563_v11 = vpack.c.bf16 %v2492_v62, %v2492_v62  ;;  %v14270_v62 = vld [vmem:[%s18752_s7 + $0x580] sm:$0xff]  }
 0x186   : > { %v1882_v14 = vpop.f32.mrb[40].mxu0  ;;  %12866 = vmatpush3.bf16.msra.mxu0 %v14270_v62 }
 0x187   : > { %v1883_v9 = vadd.f32 %v15424_v6, %v1882_v14  ;;  %v1884_v2 = vpop.f32.mrb[41].mxu0  ;;  %2692 = vrot.lane.b32.xlu1 %v12563_v11, %s18728_s27 }
 0x188   : > { %v1885_v56 = vpop.f32.mrb[42].mxu0 }
 0x189   : > { %v1886_v13 = vadd.f32 %v15424_v6, %v1885_v56  ;;  %v2236_v30 = vadd.f32 %v15442_v28, %v1883_v9  ;;  %v1887_v34 = vpop.f32.mrb[43].mxu0  ;;  %v14252_v9 = vld [vmem:[%s15212_s21 + $0x3a8] ss:$12 sps:$4 sm:$0xff]  }
 0x18b   : > { %v2494_v10 = vmax.f32 %v2236_v30, 0.0  ;;  %v2239_v40 = vadd.f32 %v15449_v35, %v1886_v13  ;;  %2097 = vmatmul.mubr.bf16.gmra.mrb[148].mxu0 %v11660_v20  ;;  %v15661_v20 = vld [vmem:[%s18751_s6] ss:$0 sm:$0xff] }
 0x18c   : > { %2104 = vmatprep.mubr.bf16.mxu0 %v14247_v25 }
 0x18d   : > { %v12565_v43 = vpack.c.bf16 %v2494_v10, %v2494_v10  ;;  %v2495_v51 = vmax.f32 %v2239_v40, 0.0 }
 0x18e   : > { %v1890_v50 = vpop.f32.mrb[44].mxu0 }
 0x18f   : > { %2724 = vst.msk [vmem:[#allocation2 + $0x8] sm:$0xf] %vm2612_vm1, %v12565_v43  ;;  %v12566_v45 = vpack.c.bf16 %v2495_v51, %v2495_v51  ;;  %v1891_v28 = vadd.f32 %v15424_v6, %v1890_v50  ;;  %v1892_v48 = vpop.f32.mrb[45].mxu0 }
 0x190   : > { %v1893_v63 = vpop.f32.mrb[46].mxu0 }
 0x191   : > { %2725 = vst.msk [vmem:[#allocation2 + $0x28] sm:$0xf] %vm2612_vm1, %v12566_v45  ;;  %v2244_v59 = vadd.f32 %v15439_v24, %v1891_v28  ;;  %v1894_v35 = vadd.f32 %v15424_v6, %v1893_v63  ;;  %v1895_v47 = vpop.f32.mrb[47].mxu0 }
 0x193   : > { %v2496_v4 = vmax.f32 %v2244_v59, 0.0  ;;  %v2247_v11 = vadd.f32 %v15445_v31, %v1894_v35  ;;  %2105 = vmatmul.mubr.bf16.gmra.mrb[152].mxu0 %v14249_v55  ;;  %v15664_v31 = vpop.f32.mrb[56].mxu1 }
 0x194   : > { %2112 = vmatprep.mubr.bf16.mxu0 %v14250_v17  ;;  %v15666_v13 = vpop.f32.mrb[57].mxu1 }
 0x195   : > { %v12567_v14 = vpack.c.bf16 %v2496_v4, %v2496_v4  ;;  %v2497_v24 = vmax.f32 %v2247_v11, 0.0  ;;  %v15671_v40 = vpop.f32.mrb[58].mxu1 }
 0x196   : > { %v1898_v6 = vpop.f32.mrb[48].mxu0  ;;  %v15673_v43 = vpop.f32.mrb[59].mxu1 }
 0x197   : > { %2726 = vst.msk [vmem:[#allocation2 + $0x48] sm:$0xf] %vm2612_vm1, %v12567_v14  ;;  %v12568_v2 = vpack.c.bf16 %v2497_v24, %v2497_v24  ;;  %v1899_v22 = vadd.f32 %v15661_v20, %v1898_v6  ;;  %v1900_v56 = vpop.f32.mrb[49].mxu0  ;;  %v15686_v24 = vpop.f32.mrb[60].mxu1 }
 0x198   : > { %v1901_v25 = vpop.f32.mrb[50].mxu0 }
 0x199   : > { %2727 = vst.msk [vmem:[#allocation2 + $0x68] sm:$0xf] %vm2612_vm1, %v12568_v2  ;;  %v1902_v30 = vadd.f32 %v15661_v20, %v1901_v25  ;;  %v2252_v34 = vadd.f32 %v15458_v46, %v1899_v22  ;;  %v1903_v10 = vpop.f32.mrb[51].mxu0 }
 0x19b   : > { %v2498_v51 = vmax.f32 %v2252_v34, 0.0  ;;  %v2255_v55 = vadd.f32 %v15464_v58, %v1902_v30  ;;  %2113 = vmatmul.mubr.bf16.gmra.mrb[156].mxu0 %v14252_v9  ;;  %v14271_v30 = vld [vmem:[%s18752_s7 + $0xc0] sm:$0xff]  }
 0x19c   : > { %12697 = vmatprep.subr.bf16.mxu1 %v14271_v30 }
 0x19d   : > { %v12569_v50 = vpack.c.bf16 %v2498_v51, %v2498_v51  ;;  %v2499_v45 = vmax.f32 %v2255_v55, 0.0 }
 0x19e   : > { %v1906_v28 = vpop.f32.mrb[52].mxu0 }
 0x19f   : > { %2728 = vst.msk [vmem:[#allocation2 + $0x88] sm:$0xf] %vm2612_vm1, %v12569_v50  ;;  %v12570_v48 = vpack.c.bf16 %v2499_v45, %v2499_v45  ;;  %v1907_v63 = vadd.f32 %v15661_v20, %v1906_v28  ;;  %v1908_v17 = vpop.f32.mrb[53].mxu0 }
 0x1a0   : > { %v1909_v59 = vpop.f32.mrb[54].mxu0 }
 0x1a1   : > { %v2260_v46 = vadd.f32 %v15455_v42, %v1907_v63  ;;  %v1910_v35 = vadd.f32 %v15661_v20, %v1909_v59  ;;  %v1911_v47 = vpop.f32.mrb[55].mxu0  ;;  %2741 = vrot.lane.b32.xlu0 %v12570_v48, %s18728_s27  ;;  %v15688_v42 = vpop.f32.mrb[61].mxu1 }
 0x1a3   : > { %v2500_v0 = vmax.f32 %v2260_v46, 0.0  ;;  %v15682_v58 = vadd.f32 %v15461_v52, %v1910_v35  ;;  %v15694_v52 = vpop.f32.mrb[62].mxu1 }
 0x1a4   : > { %v15696_v56 = vpop.f32.mrb[63].mxu1 }
 0x1a5   : > { %v12571_v62 = vpack.c.bf16 %v2500_v0, %v2500_v0  ;;  %v15710_v47 = vpop.f32.mrb[64].mxu1 }
 0x1a6   : > { %v1914_v4 = vpop.f32.mrb[56].mxu0 }
 0x1a7   : > { %v1915_v11 = vadd.f32 %v15661_v20, %v1914_v4  ;;  %v1916_v14 = vpop.f32.mrb[57].mxu0  ;;  %2743 = vrot.lane.b32.xlu1 %v12571_v62, %s18728_s27  ;;  %v2411_v62 = vpop.f32.mrb[65].mxu1 }
 0x1a8   : > { %v1917_v9 = vpop.f32.mrb[58].mxu0  ;;  %v14277_v14 = vld [vmem:[%s18752_s7 + $0x588] sm:$0xff]  }
 0x1a9   : > { %v1918_v6 = vadd.f32 %v15661_v20, %v1917_v9  ;;  %v15692_v2 = vadd.f32 %v15474_v18, %v1915_v11  ;;  %v1919_v22 = vpop.f32.mrb[59].mxu0  ;;  %v14275_v11 = vld [vmem:[%s18752_s7 + $0x5c8] sm:$0xff]   ;;  %v15721_v9 = vpop.f32.mrb[66].mxu1 }
 0x1aa   : > { %12867 = vmatprep.subr.bf16.mxu0 %v14275_v11 }
 0x1ab   : > { %v15699_v25 = vadd.f32 %v15481_v23, %v1918_v6  ;;  %v15723_v6 = vpop.f32.mrb[67].mxu1  ;;  %12868 = vmatpush3.bf16.msra.mxu0 %v14277_v14 }
 0x1ae   : > { %v1922_v34 = vpop.f32.mrb[60].mxu0 }
 0x1af   : > { %v1923_v10 = vadd.f32 %v15661_v20, %v1922_v34  ;;  %v1924_v51 = vpop.f32.mrb[61].mxu0 }
 0x1b0   : > { %v1925_v55 = vpop.f32.mrb[62].mxu0 }
 0x1b1   : > { %v2276_v18 = vadd.f32 %v15471_v12, %v1923_v10  ;;  %v1926_v50 = vadd.f32 %v15661_v20, %v1925_v55  ;;  %v1927_v45 = vpop.f32.mrb[63].mxu0 }
 0x1b3   : > { %v2504_v28 = vmax.f32 %v2276_v18, 0.0  ;;  %v2279_v48 = vadd.f32 %v15477_v53, %v1926_v50 }
 0x1b5   : > { %v12575_v23 = vpack.c.bf16 %v2504_v28, %v2504_v28  ;;  %v2505_v63 = vmax.f32 %v2279_v48, 0.0 }
 0x1b6   : > { %v1930_v17 = vpop.f32.mrb[64].mxu0 }
 0x1b7   : > { %2779 = vst.msk [vmem:[#allocation2 + $0xc] sm:$0xf] %vm2612_vm1, %v12575_v23  ;;  %v12576_v59 = vpack.c.bf16 %v2505_v63, %v2505_v63  ;;  %v1931_v46 = vadd.f32 %v15661_v20, %v1930_v17  ;;  %v1932_v35 = vpop.f32.mrb[65].mxu0 }
 0x1b8   : > { %v1933_v0 = vpop.f32.mrb[66].mxu0  ;;  %v2501_v35 = vmax.f32 %v15682_v58, 0.0 }
 0x1b9   : > { %2780 = vst.msk [vmem:[#allocation2 + $0x2c] sm:$0xf] %vm2612_vm1, %v12576_v59  ;;  %v1934_v12 = vadd.f32 %v15661_v20, %v1933_v0  ;;  %v2284_v4 = vadd.f32 %v15490_v38, %v1931_v46  ;;  %v1935_v53 = vpop.f32.mrb[67].mxu0 }
 0x1bb   : > { %v2506_v22 = vmax.f32 %v2284_v4, 0.0  ;;  %v2287_v30 = vadd.f32 %v15497_v44, %v1934_v12  ;;  %v15736_v12 = vpop.f32.mrb[68].mxu1 }
 0x1bc   : > { %v15738_v53 = vpop.f32.mrb[69].mxu1 }
 0x1bd   : > { %v12577_v34 = vpack.c.bf16 %v2506_v22, %v2506_v22  ;;  %v2507_v38 = vmax.f32 %v2287_v30, 0.0  ;;  %v15744_v58 = vpop.f32.mrb[70].mxu1  ;;  %v12572_v30 = vpack.c.bf16 %v2501_v35, %v2501_v35 }
 0x1be   : > { %v1938_v10 = vpop.f32.mrb[68].mxu0 }
 0x1bf   : > { %2781 = vst.msk [vmem:[#allocation2 + $0x4c] sm:$0xf] %vm2612_vm1, %v12577_v34  ;;  %v12578_v51 = vpack.c.bf16 %v2507_v38, %v2507_v38  ;;  %v1939_v55 = vadd.f32 %v15661_v20, %v1938_v10  ;;  %v1940_v18 = vpop.f32.mrb[69].mxu0  ;;  %v15747_v10 = vpop.f32.mrb[71].mxu1 }
 0x1c0   : > { %v1941_v50 = vpop.f32.mrb[70].mxu0 }
 0x1c1   : > { %2782 = vst.msk [vmem:[#allocation2 + $0x6c] sm:$0xf] %vm2612_vm1, %v12578_v51  ;;  %v2292_v45 = vadd.f32 %v15487_v33, %v1939_v55  ;;  %v1942_v28 = vadd.f32 %v15661_v20, %v1941_v50  ;;  %v1943_v48 = vpop.f32.mrb[71].mxu0  ;;  %v2502_v51 = vmax.f32 %v15692_v2, 0.0 }
 0x1c3   : > { %v2508_v44 = vmax.f32 %v2292_v45, 0.0  ;;  %v2295_v23 = vadd.f32 %v15493_v41, %v1942_v28  ;;  %v2631_v63 = vpop.permute.xlu0 %2630 }
 0x1c4   : > { %2646 = vst.msk [vmem:[#allocation2] sm:$0xf] %vm2645_vm2, %v2631_v63 }
 0x1c5   : > { %v12579_v17 = vpack.c.bf16 %v2508_v44, %v2508_v44  ;;  %v2509_v59 = vmax.f32 %v2295_v23, 0.0 }
 0x1c6   : > { %v1946_v46 = vpop.f32.mrb[72].mxu0 }
 0x1c7   : > { %2783 = vst.msk [vmem:[#allocation2 + $0x8c] sm:$0xf] %vm2612_vm1, %v12579_v17  ;;  %v12580_v0 = vpack.c.bf16 %v2509_v59, %v2509_v59  ;;  %v1947_v33 = vadd.f32 %v15661_v20, %v1946_v46  ;;  %v1948_v62 = vpop.f32.mrb[73].mxu0 }
 0x1c8   : > { %v1949_v4 = vpop.f32.mrb[74].mxu0  ;;  %v13701_v62 = vpop.f32.mrb[72].mxu1 }
 0x1c9   : > { %v1950_v41 = vadd.f32 %v15661_v20, %v1949_v4  ;;  %v2300_v11 = vadd.f32 %v15516_v3, %v1947_v33  ;;  %v1951_v14 = vpop.f32.mrb[75].mxu0  ;;  %2796 = vrot.lane.b32.xlu0 %v12580_v0, %s18728_s27  ;;  %v2633_v22 = vpop.permute.xlu0 %2632 }
 0x1ca   : > { %2647 = vst.msk [vmem:[#allocation2 + $0x20] sm:$0xf] %vm2645_vm2, %v2633_v22  ;;  %v15763_v4 = vpop.f32.mrb[73].mxu1 }
 0x1cb   : > { %v2510_v34 = vmax.f32 %v2300_v11, 0.0  ;;  %v2303_v38 = vadd.f32 %v15522_v15, %v1950_v41  ;;  %v12573_v15 = vpack.c.bf16 %v2502_v51, %v2502_v51 }
 0x1cd   : > { %v12581_v55 = vpack.c.bf16 %v2510_v34, %v2510_v34  ;;  %v2511_v18 = vmax.f32 %v2303_v38, 0.0  ;;  %2745 = vrot.lane.b32.xlu0 %v12572_v30, %s18728_s27  ;;  %v2635_v3 = vpop.permute.xlu0 %2634 }
 0x1ce   : > { %2648 = vst.msk [vmem:[#allocation2 + $0x40] sm:$0xf] %vm2645_vm2, %v2635_v3  ;;  %v1954_v50 = vpop.f32.mrb[76].mxu0 }
 0x1cf   : > { %v12582_v45 = vpack.c.bf16 %v2511_v18, %v2511_v18  ;;  %v1955_v28 = vadd.f32 %v15661_v20, %v1954_v50  ;;  %v1956_v48 = vpop.f32.mrb[77].mxu0  ;;  %2798 = vrot.lane.b32.xlu1 %v12581_v55, %s18728_s27 }
 0x1d0   : > { %v1957_v44 = vpop.f32.mrb[78].mxu0 }
 0x1d1   : > { %v2308_v23 = vadd.f32 %v15510_v60, %v1955_v28  ;;  %v1958_v2 = vadd.f32 %v15661_v20, %v1957_v44  ;;  %v1959_v63 = vpop.f32.mrb[79].mxu0  ;;  %2800 = vrot.lane.b32.xlu0 %v12582_v45, %s18728_s27  ;;  %v14290_v44 = vld [vmem:[%s18752_s7 + $0x590] sm:$0xff]  }
 0x1d3   : > { %v2512_v17 = vmax.f32 %v2308_v23, 0.0  ;;  %v15758_v59 = vadd.f32 %v15519_v8, %v1958_v2  ;;  %2747 = vrot.lane.b32.xlu1 %v12573_v15, %s18728_s27  ;;  %v15767_v8 = vpop.f32.mrb[74].mxu1 }
 0x1d4   : > { %v15769_v22 = vpop.f32.mrb[75].mxu1 }
 0x1d5   : > { %v12583_v46 = vpack.c.bf16 %v2512_v17, %v2512_v17  ;;  %v15784_v2 = vpop.f32.mrb[76].mxu1 }
 0x1d6   : > { %v1962_v35 = vpop.f32.mrb[80].mxu0  ;;  %v15786_v17 = vpop.f32.mrb[77].mxu1 }
 0x1d7   : > { %v1963_v0 = vadd.f32 %v15661_v20, %v1962_v35  ;;  %v1964_v33 = vpop.f32.mrb[81].mxu0  ;;  %2802 = vrot.lane.b32.xlu1 %v12583_v46, %s18728_s27  ;;  %v15788_v35 = vpop.f32.mrb[78].mxu1 }
 0x1d8   : > { %v1965_v60 = vpop.f32.mrb[82].mxu0  ;;  %v15791_v62 = vpop.f32.mrb[79].mxu1 }
 0x1d9   : > { %v1966_v41 = vadd.f32 %v15661_v20, %v1965_v60  ;;  %v2316_v11 = vadd.f32 %v15543_v36, %v1963_v0  ;;  %v1967_v14 = vpop.f32.mrb[83].mxu0 }
 0x1db   : > { %v2514_v30 = vmax.f32 %v2316_v11, 0.0  ;;  %v2319_v34 = vadd.f32 %v15549_v49, %v1966_v41  ;;  %v14289_v49 = vld [vmem:[%s18752_s7 + $0x5d0] sm:$0xff]  }
 0x1dc   : > { %12869 = vmatprep.subr.bf16.mxu0 %v14289_v49 }
 0x1dd   : > { %v12585_v38 = vpack.c.bf16 %v2514_v30, %v2514_v30  ;;  %v2515_v51 = vmax.f32 %v2319_v34, 0.0  ;;  %12870 = vmatpush3.bf16.msra.mxu0 %v14290_v44 }
 0x1de   : > { %v1970_v55 = vpop.f32.mrb[84].mxu0 }
 0x1df   : > { %2834 = vst.msk [vmem:[#allocation2 + $0x10] sm:$0xf] %vm2612_vm1, %v12585_v38  ;;  %v12586_v18 = vpack.c.bf16 %v2515_v51, %v2515_v51  ;;  %v1971_v3 = vadd.f32 %v15661_v20, %v1970_v55  ;;  %v1972_v50 = vpop.f32.mrb[85].mxu0 }
 0x1e0   : > { %v1973_v45 = vpop.f32.mrb[86].mxu0 }
 0x1e1   : > { %2835 = vst.msk [vmem:[#allocation2 + $0x30] sm:$0xf] %vm2612_vm1, %v12586_v18  ;;  %v2324_v36 = vadd.f32 %v15538_v32, %v1971_v3  ;;  %v1974_v28 = vadd.f32 %v15661_v20, %v1973_v45  ;;  %v1975_v48 = vpop.f32.mrb[87].mxu0 }
 0x1e3   : > { %v2516_v15 = vmax.f32 %v2324_v36, 0.0  ;;  %v2327_v23 = vadd.f32 %v15546_v61, %v1974_v28 }
 0x1e5   : > { %v12587_v63 = vpack.c.bf16 %v2516_v15, %v2516_v15  ;;  %v2517_v32 = vmax.f32 %v2327_v23, 0.0 }
 0x1e6   : > { %v1978_v46 = vpop.f32.mrb[88].mxu0 }
 0x1e7   : > { %2836 = vst.msk [vmem:[#allocation2 + $0x50] sm:$0xf] %vm2612_vm1, %v12587_v63  ;;  %v12588_v0 = vpack.c.bf16 %v2517_v32, %v2517_v32  ;;  %v1980_v33 = vpop.f32.mrb[89].mxu0 }
 0x1e8   : > { %v1981_v60 = vpop.f32.mrb[90].mxu0 }
 0x1e9   : > { %2837 = vst.msk [vmem:[#allocation2 + $0x70] sm:$0xf] %vm2612_vm1, %v12588_v0  ;;  %v1982_v61 = vadd.f32 %v15661_v20, %v1981_v60  ;;  %v1983_v41 = vpop.f32.mrb[91].mxu0 }
 0x1eb   : > { %v2335_v11 = vadd.f32 %v15576_v57, %v1982_v61  ;;  %v2687_v14 = vpop.permute.xlu1 %2686 }
 0x1ec   : > { %2701 = vst.msk [vmem:[#allocation2 + $0x4] sm:$0xf] %vm2645_vm2, %v2687_v14 }
 0x1ed   : > { %v2519_v30 = vmax.f32 %v2335_v11, 0.0  ;;  %v14272_v11 = vld [vmem:[%s18752_s7 + $0x80] sm:$0xff]  }
 0x1ee   : > { %v1986_v34 = vpop.f32.mrb[92].mxu0 }
 0x1ef   : > { %v12590_v38 = vpack.c.bf16 %v2519_v30, %v2519_v30  ;;  %v1987_v51 = vadd.f32 %v15661_v20, %v1986_v34  ;;  %v1988_v55 = vpop.f32.mrb[93].mxu0  ;;  %v14274_v34 = vld [vmem:[%s18752_s7 + $0x88] sm:$0xff]  }
 0x1f0   : > { %v1989_v18 = vpop.f32.mrb[94].mxu0  ;;  %v14295_v55 = vld [vmem:[%s18752_s7 + $0x5d8] sm:$0xff]  }
 0x1f1   : > { %v2340_v3 = vadd.f32 %v15565_v19, %v1987_v51  ;;  %v1990_v50 = vadd.f32 %v15661_v20, %v1989_v18  ;;  %v1991_v45 = vpop.f32.mrb[95].mxu0  ;;  %v2689_v36 = vpop.permute.xlu1 %2688  ;;  %2851 = vrot.lane.b32.xlu0 %v12590_v38, %s18728_s27  ;;  %12871 = vmatprep.subr.bf16.mxu0 %v14295_v55 }
 0x1f2   : > { %2702 = vst.msk [vmem:[#allocation2 + $0x24] sm:$0xf] %vm2645_vm2, %v2689_v36 }
 0x1f3   : > { %v2520_v57 = vmax.f32 %v2340_v3, 0.0  ;;  %v15803_v28 = vadd.f32 %v15572_v5, %v1990_v50  ;;  %v2691_v48 = vpop.permute.xlu0 %2690  ;;  %v3037_v33 = vld [vmem:[#allocation2] sm:$0xff]  ;;  %v14297_v3 = vld [vmem:[%s18752_s7 + $0x598] sm:$0xff]  }
 0x1f4   : > { %2703 = vst.msk [vmem:[#allocation2 + $0x44] sm:$0xf] %vm2645_vm2, %v2691_v48  ;;  %12872 = vmatpush3.bf16.msra.mxu0 %v14297_v3 }
 0x1f5   : > { %v12591_v49 = vpack.c.bf16 %v2520_v57, %v2520_v57  ;;  %v2637_v44 = vpop.permute.xlu1 %2636 }
 0x1f6   : > { %2649 = vst.msk [vmem:[#allocation2 + $0x60] sm:$0xf] %vm2645_vm2, %v2637_v44  ;;  %v1994_v19 = vpop.f32.mrb[96].mxu0 }
 0x1f7   : > { %v1995_v15 = vadd.f32 %v15661_v20, %v1994_v19  ;;  %v1996_v23 = vpop.f32.mrb[97].mxu0  ;;  %2853 = vrot.lane.b32.xlu1 %v12591_v49, %s18728_s27  ;;  %v14278_v19 = vld [vmem:[%s18752_s7 + $0x90] sm:$0xff]  }
 0x1f8   : > { %v1997_v63 = vpop.f32.mrb[98].mxu0 }
 0x1f9   : > { %v1998_v32 = vadd.f32 %v15661_v20, %v1997_v63  ;;  %v15811_v46 = vadd.f32 %v15603_v21, %v1995_v15  ;;  %v1999_v5 = vpop.f32.mrb[99].mxu0  ;;  %v2693_v0 = vpop.permute.xlu1 %2692  ;;  %v3041_v60 = vld [vmem:[#allocation2 + $0x20] sm:$0xff]  ;;  %v14273_v21 = vld [vmem:[%s18752_s7 + $0xc8] sm:$0xff]  }
 0x1fa   : > { %2704 = vst.msk [vmem:[#allocation2 + $0x64] sm:$0xf] %vm2645_vm2, %v2693_v0  ;;  %v11810_v61 = vcombine.low %v3037_v33, %v3041_v60  ;;  %v11811_v41 = vcombine.high %v3037_v33, %v3041_v60  ;;  %v14280_v0 = vld [vmem:[%s18752_s7 + $0x98] sm:$0xff]  }
 0x1fb   : > { %v15818_v14 = vadd.f32 %v15613_v29, %v1998_v32  ;;  %v14276_v29 = vld [vmem:[%s18752_s7 + $0xd0] sm:$0xff]   ;;  %v3045_v57 = vld [vmem:[#allocation2 + $0x40] sm:$0xff] }
 0x1fc   : > { %3683 = vmatprep.mubr.bf16.mxu1 %v11811_v41 }
 0x1fd   : > { %3684 = vmatmul.mubr.bf16.vlgmr.msra.gmra.mrb[80].mxu1 %v11810_v61  ;;  %v14281_v61 = vld [vmem:[%s18752_s7 + $0xe0] sm:$0xff]  }
 0x1fe   : > { %v2002_v30 = vpop.f32.mrb[100].mxu0  ;;  %12698 = vmatpush3.bf16.msra.mxu1 %v14272_v11 }
 0x1ff   : > { %v2003_v38 = vadd.f32 %v15661_v20, %v2002_v30  ;;  %v2004_v51 = vpop.f32.mrb[101].mxu0  ;;  %12699 = vmatprep.subr.bf16.mxu1 %v14273_v21 }
 0x200   : > { %v2005_v18 = vpop.f32.mrb[102].mxu0 }
 0x201   : > { %v2356_v50 = vadd.f32 %v15598_v16, %v2003_v38  ;;  %v2006_v45 = vadd.f32 %v15661_v20, %v2005_v18  ;;  %v2007_v36 = vpop.f32.mrb[103].mxu0  ;;  %v3049_v48 = vld [vmem:[#allocation2 + $0x60] sm:$0x77]  ;;  %v14279_v16 = vld [vmem:[%s18752_s7 + $0xd8] sm:$0xff]  }
 0x202   : > { %v11819_v49 = vcombine.high %v3045_v57, %v3049_v48  ;;  %v11818_v44 = vcombine.low %v3045_v57, %v3049_v48  ;;  %12700 = vmatpush3.bf16.msra.mxu1 %v14274_v34  ;;  %v14282_v34 = vld [vmem:[%s18752_s7 + $0xa0] sm:$0xff]  }
 0x203   : > { %v2524_v15 = vmax.f32 %v2356_v50, 0.0  ;;  %v2359_v23 = vadd.f32 %v15611_v27, %v2006_v45  ;;  %12701 = vmatprep.subr.bf16.mxu1 %v14276_v29  ;;  %v14283_v29 = vld [vmem:[%s18752_s7 + $0xe8] sm:$0xff]   ;;  %v15874_v36 = vld [vmem:[%s18751_s6] ss:$0 sm:$0xff] }
 0x204   : > { %3691 = vmatprep.mubr.bf16.mxu1 %v11819_v49  ;;  %v14286_v49 = vld [vmem:[%s18752_s7 + $0xb0] sm:$0xff]  }
 0x205   : > { %v12595_v63 = vpack.c.bf16 %v2524_v15, %v2524_v15  ;;  %v2525_v32 = vmax.f32 %v2359_v23, 0.0  ;;  %3692 = vmatmul.mubr.bf16.gmra.mrb[84].mxu1 %v11818_v44  ;;  %v14287_v15 = vld [vmem:[%s18752_s7 + $0xf8] sm:$0xff]  }
 0x206   : > { %v2010_v5 = vpop.f32.mrb[104].mxu0  ;;  %12702 = vmatpush3.bf16.msra.mxu1 %v14278_v19 }
 0x207   : > { %2889 = vst.msk [vmem:[#allocation2 + $0x14] sm:$0xf] %vm2612_vm1, %v12595_v63  ;;  %v12596_v33 = vpack.c.bf16 %v2525_v32, %v2525_v32  ;;  %v2011_v27 = vadd.f32 %v15661_v20, %v2010_v5  ;;  %v2012_v60 = vpop.f32.mrb[105].mxu0  ;;  %12703 = vmatprep.subr.bf16.mxu1 %v14279_v16  ;;  %v14288_v16 = vld [vmem:[%s18752_s7 + $0xb8] sm:$0xff]   ;;  %v2521_v63 = vmax.f32 %v15803_v28, 0.0 }
 0x208   : > { %v2013_v41 = vpop.f32.mrb[106].mxu0 }
 0x209   : > { %2890 = vst.msk [vmem:[#allocation2 + $0x34] sm:$0xf] %vm2612_vm1, %v12596_v33  ;;  %v2014_v11 = vadd.f32 %v15661_v20, %v2013_v41  ;;  %v2364_v21 = vadd.f32 %v15633_v26, %v2011_v27  ;;  %v2015_v30 = vpop.f32.mrb[107].mxu0  ;;  %v14284_v26 = vld [vmem:[%s18752_s7 + $0xa8] sm:$0xff]   ;;  %v14291_v33 = vld [vmem:[%s18752_s7 + $0x140] sm:$0xff]   ;;  %v12592_v28 = vpack.c.bf16 %v2521_v63, %v2521_v63 }
 0x20a   : > { %12704 = vmatpush3.bf16.msra.mxu1 %v14280_v0 }
 0x20b   : > { %v2526_v38 = vmax.f32 %v2364_v21, 0.0  ;;  %v2367_v51 = vadd.f32 %v15639_v39, %v2014_v11  ;;  %12705 = vmatprep.subr.bf16.mxu1 %v14281_v61  ;;  %v14285_v39 = vld [vmem:[%s18752_s7 + $0xf0] sm:$0xff]  }
 0x20d   : > { %v12597_v55 = vpack.c.bf16 %v2526_v38, %v2526_v38  ;;  %v2527_v18 = vmax.f32 %v2367_v51, 0.0 }
 0x20e   : > { %v2018_v3 = vpop.f32.mrb[108].mxu0  ;;  %12706 = vmatpush3.bf16.msra.mxu1 %v14282_v34  ;;  %v2522_v34 = vmax.f32 %v15811_v46, 0.0 }
 0x20f   : > { %2891 = vst.msk [vmem:[#allocation2 + $0x54] sm:$0xf] %vm2612_vm1, %v12597_v55  ;;  %v12598_v20 = vpack.c.bf16 %v2527_v18, %v2527_v18  ;;  %v2020_v50 = vpop.f32.mrb[109].mxu0  ;;  %12707 = vmatprep.subr.bf16.mxu1 %v14283_v29 }
 0x210   : > { %v2021_v45 = vpop.f32.mrb[110].mxu0 }
 0x211   : > { %2892 = vst.msk [vmem:[#allocation2 + $0x74] sm:$0xf] %vm2612_vm1, %v12598_v20  ;;  %v2022_v57 = vadd.f32 %v15874_v36, %v2021_v45  ;;  %v2023_v48 = vpop.f32.mrb[111].mxu0 }
 0x212   : > { %12708 = vmatpush3.bf16.msra.mxu1 %v14284_v26  ;;  %v12593_v26 = vpack.c.bf16 %v2522_v34, %v2522_v34 }
 0x213   : > { %v2375_v44 = vadd.f32 %v15637_v37, %v2022_v57  ;;  %v2742_v19 = vpop.permute.xlu0 %2741  ;;  %12709 = vmatprep.subr.bf16.mxu1 %v14285_v39  ;;  %v14309_v57 = vld [vmem:[%s18752_s7 + $0x5e0] sm:$0xff]  }
 0x214   : > { %2756 = vst.msk [vmem:[#allocation2 + $0x8] sm:$0xf] %vm2645_vm2, %v2742_v19  ;;  %12873 = vmatprep.subr.bf16.mxu0 %v14309_v57 }
 0x215   : > { %v2529_v23 = vmax.f32 %v2375_v44, 0.0 }
 0x216   : > { %v2026_v32 = vpop.f32.mrb[112].mxu0  ;;  %12710 = vmatpush3.bf16.msra.mxu1 %v14286_v49 }
 0x217   : > { %v12600_v5 = vpack.c.bf16 %v2529_v23, %v2529_v23  ;;  %v2027_v37 = vadd.f32 %v15874_v36, %v2026_v32  ;;  %v2028_v0 = vpop.f32.mrb[113].mxu0  ;;  %12711 = vmatprep.subr.bf16.mxu1 %v14287_v15 }
 0x218   : > { %v2029_v27 = vpop.f32.mrb[114].mxu0 }
 0x219   : > { %v2030_v60 = vadd.f32 %v15874_v36, %v2029_v27  ;;  %v2380_v61 = vadd.f32 %v15666_v13, %v2027_v37  ;;  %v2031_v41 = vpop.f32.mrb[115].mxu0  ;;  %v2744_v11 = vpop.permute.xlu1 %2743  ;;  %2906 = vrot.lane.b32.xlu0 %v12600_v5, %s18728_s27 }
 0x21a   : > { %2757 = vst.msk [vmem:[#allocation2 + $0x28] sm:$0xf] %vm2645_vm2, %v2744_v11  ;;  %12712 = vmatpush3.bf16.msra.mxu1 %v14288_v16 }
 0x21b   : > { %v2530_v21 = vmax.f32 %v2380_v61, 0.0  ;;  %v2383_v30 = vadd.f32 %v15673_v43, %v2030_v60  ;;  %12725 = vmatprep.subr.bf16.mxu1 %v14291_v33 }
 0x21d   : > { %v12601_v38 = vpack.c.bf16 %v2530_v21, %v2530_v21  ;;  %v2531_v51 = vmax.f32 %v2383_v30, 0.0  ;;  %2855 = vrot.lane.b32.xlu0 %v12592_v28, %s18728_s27 }
 0x21e   : > { %v2034_v29 = vpop.f32.mrb[116].mxu0 }
 0x21f   : > { %v12602_v13 = vpack.c.bf16 %v2531_v51, %v2531_v51  ;;  %v2035_v55 = vadd.f32 %v15874_v36, %v2034_v29  ;;  %v2036_v18 = vpop.f32.mrb[117].mxu0  ;;  %2908 = vrot.lane.b32.xlu1 %v12601_v38, %s18728_s27 }
 0x220   : > { %v2037_v3 = vpop.f32.mrb[118].mxu0 }
 0x221   : > { %v2388_v20 = vadd.f32 %v15664_v31, %v2035_v55  ;;  %v2038_v43 = vadd.f32 %v15874_v36, %v2037_v3  ;;  %v2039_v50 = vpop.f32.mrb[119].mxu0  ;;  %2910 = vrot.lane.b32.xlu0 %v12602_v13, %s18728_s27  ;;  %v14310_v31 = vld [vmem:[%s18752_s7 + $0x5a0] sm:$0xff]  }
 0x222   : > { %12874 = vmatpush3.bf16.msra.mxu0 %v14310_v31 }
 0x223   : > { %v2532_v46 = vmax.f32 %v2388_v20, 0.0  ;;  %v15906_v39 = vadd.f32 %v15671_v40, %v2038_v43  ;;  %2857 = vrot.lane.b32.xlu1 %v12593_v26, %s18728_s27 }
 0x225   : > { %v12603_v45 = vpack.c.bf16 %v2532_v46, %v2532_v46 }
 0x226   : > { %v2042_v48 = vpop.f32.mrb[120].mxu0 }
 0x227   : > { %v2043_v49 = vadd.f32 %v15874_v36, %v2042_v48  ;;  %v2044_v44 = vpop.f32.mrb[121].mxu0  ;;  %2912 = vrot.lane.b32.xlu1 %v12603_v45, %s18728_s27 }
 0x228   : > { %v2045_v40 = vpop.f32.mrb[122].mxu0 }
 0x229   : > { %v2046_v19 = vadd.f32 %v15874_v36, %v2045_v40  ;;  %v2396_v15 = vadd.f32 %v15688_v42, %v2043_v49  ;;  %v2047_v23 = vpop.f32.mrb[123].mxu0 }
 0x22b   : > { %v2534_v16 = vmax.f32 %v2396_v15, 0.0  ;;  %v2399_v63 = vadd.f32 %v15696_v56, %v2046_v19 }
 0x22d   : > { %v12605_v32 = vpack.c.bf16 %v2534_v16, %v2534_v16  ;;  %v2535_v5 = vmax.f32 %v2399_v63, 0.0 }
 0x22e   : > { %v2050_v37 = vpop.f32.mrb[124].mxu0 }
 0x22f   : > { %2944 = vst.msk [vmem:[#allocation2 + $0x18] sm:$0xf] %vm2612_vm1, %v12605_v32  ;;  %v12606_v0 = vpack.c.bf16 %v2535_v5, %v2535_v5  ;;  %v2051_v33 = vadd.f32 %v15874_v36, %v2050_v37  ;;  %v2052_v27 = vpop.f32.mrb[125].mxu0 }
 0x230   : > { %v2053_v60 = vpop.f32.mrb[126].mxu0 }
 0x231   : > { %2945 = vst.msk [vmem:[#allocation2 + $0x38] sm:$0xf] %vm2612_vm1, %v12606_v0  ;;  %v2404_v61 = vadd.f32 %v15686_v24, %v2051_v33  ;;  %v2054_v42 = vadd.f32 %v15874_v36, %v2053_v60  ;;  %v2055_v41 = vpop.f32.mrb[127].mxu0  ;;  %v14292_v0 = vld [vmem:[%s18752_s7 + $0x100] sm:$0xff]  }
 0x233   : > { %v2536_v11 = vmax.f32 %v2404_v61, 0.0  ;;  %v2407_v56 = vadd.f32 %v15694_v52, %v2054_v42  ;;  %v14294_v42 = vld [vmem:[%s18752_s7 + $0x108] sm:$0xff]  }
 0x235   : > { %v12607_v28 = vpack.c.bf16 %v2536_v11, %v2536_v11  ;;  %v2537_v21 = vmax.f32 %v2407_v56, 0.0 }
 0x236   : > { %v2058_v30 = vpop.f32.mrb[128].mxu0 }
 0x237   : > { %2946 = vst.msk [vmem:[#allocation2 + $0x58] sm:$0xf] %vm2612_vm1, %v12607_v28  ;;  %v12608_v34 = vpack.c.bf16 %v2537_v21, %v2537_v21  ;;  %v2060_v38 = vpop.f32.mrb[129].mxu0 }
 0x238   : > { %v2061_v51 = vpop.f32.mrb[130].mxu0 }
 0x239   : > { %2947 = vst.msk [vmem:[#allocation2 + $0x78] sm:$0xf] %vm2612_vm1, %v12608_v34  ;;  %v2062_v29 = vadd.f32 %v15874_v36, %v2061_v51  ;;  %v2063_v13 = vpop.f32.mrb[131].mxu0 }
 0x23a   : > { %v14298_v13 = vld [vmem:[%s18752_s7 + $0x110] sm:$0xff]  }
 0x23b   : > { %v2415_v24 = vadd.f32 %v15723_v6, %v2062_v29  ;;  %v2797_v55 = vpop.permute.xlu0 %2796 }
 0x23c   : > { %2811 = vst.msk [vmem:[#allocation2 + $0xc] sm:$0xf] %vm2645_vm2, %v2797_v55 }
 0x23d   : > { %v2539_v18 = vmax.f32 %v2415_v24, 0.0 }
 0x23e   : > { %v2066_v52 = vpop.f32.mrb[132].mxu0 }
 0x23f   : > { %v12610_v3 = vpack.c.bf16 %v2539_v18, %v2539_v18  ;;  %v2067_v26 = vadd.f32 %v15874_v36, %v2066_v52  ;;  %v2068_v20 = vpop.f32.mrb[133].mxu0  ;;  %v2746_v43 = vpop.permute.xlu0 %2745 }
 0x240   : > { %2758 = vst.msk [vmem:[#allocation2 + $0x48] sm:$0xf] %vm2645_vm2, %v2746_v43  ;;  %v2069_v50 = vpop.f32.mrb[134].mxu0  ;;  %v14316_v20 = vld [vmem:[%s18752_s7 + $0x5e8] sm:$0xff]  }
 0x241   : > { %v2420_v46 = vadd.f32 %v15710_v47, %v2067_v26  ;;  %v2070_v45 = vadd.f32 %v15874_v36, %v2069_v50  ;;  %v2071_v57 = vpop.f32.mrb[135].mxu0  ;;  %v2799_v31 = vpop.permute.xlu1 %2798  ;;  %2961 = vrot.lane.b32.xlu0 %v12610_v3, %s18728_s27  ;;  %v14300_v26 = vld [vmem:[%s18752_s7 + $0x118] sm:$0xff]   ;;  %12875 = vmatprep.subr.bf16.mxu0 %v14316_v20 }
 0x242   : > { %2812 = vst.msk [vmem:[#allocation2 + $0x2c] sm:$0xf] %vm2645_vm2, %v2799_v31 }
 0x243   : > { %v2540_v6 = vmax.f32 %v2420_v46, 0.0  ;;  %v15938_v48 = vadd.f32 %v15721_v9, %v2070_v45  ;;  %v2801_v49 = vpop.permute.xlu0 %2800  ;;  %v3038_v5 = vld [vmem:[#allocation2 + $0x8] sm:$0xff]  ;;  %v14301_v45 = vld [vmem:[%s18752_s7 + $0x160] sm:$0xff]  }
 0x244   : > { %2813 = vst.msk [vmem:[#allocation2 + $0x4c] sm:$0xf] %vm2645_vm2, %v2801_v49 }
 0x245   : > { %v12611_v44 = vpack.c.bf16 %v2540_v6, %v2540_v6  ;;  %v2748_v40 = vpop.permute.xlu1 %2747 }
 0x246   : > { %2759 = vst.msk [vmem:[#allocation2 + $0x68] sm:$0xf] %vm2645_vm2, %v2748_v40  ;;  %v2074_v47 = vpop.f32.mrb[136].mxu0 }
 0x247   : > { %v2075_v19 = vadd.f32 %v15874_v36, %v2074_v47  ;;  %v2076_v15 = vpop.f32.mrb[137].mxu0  ;;  %2963 = vrot.lane.b32.xlu1 %v12611_v44, %s18728_s27  ;;  %v14302_v44 = vld [vmem:[%s18752_s7 + $0x120] sm:$0xff]  }
 0x248   : > { %v2077_v23 = vpop.f32.mrb[138].mxu0 }
 0x249   : > { %v2078_v16 = vadd.f32 %v15874_v36, %v2077_v23  ;;  %v15946_v63 = vadd.f32 %v15738_v53, %v2075_v19  ;;  %v2079_v9 = vpop.f32.mrb[139].mxu0  ;;  %v2803_v32 = vpop.permute.xlu1 %2802  ;;  %v3042_v37 = vld [vmem:[#allocation2 + $0x28] sm:$0xff] }
 0x24a   : > { %2814 = vst.msk [vmem:[#allocation2 + $0x6c] sm:$0xf] %vm2645_vm2, %v2803_v32  ;;  %v15952_v33 = vcombine.low %v3038_v5, %v3042_v37  ;;  %v15954_v27 = vcombine.high %v3038_v5, %v3042_v37  ;;  %v14293_v53 = vld [vmem:[%s18752_s7 + $0x148] sm:$0xff]  }
 0x24b   : > { %v15957_v60 = vadd.f32 %v15747_v10, %v2078_v16  ;;  %v14296_v10 = vld [vmem:[%s18752_s7 + $0x150] sm:$0xff]   ;;  %v3046_v34 = vld [vmem:[#allocation2 + $0x48] sm:$0xff] }
 0x24c   : > { %3732 = vmatprep.mubr.bf16.mxu1 %v15954_v27  ;;  %v14303_v19 = vld [vmem:[%s18752_s7 + $0x168] sm:$0xff]  }
 0x24d   : > { %3733 = vmatmul.mubr.bf16.vlgmr.msra.gmra.mrb[88].mxu1 %v15952_v33 }
 0x24e   : > { %v2082_v61 = vpop.f32.mrb[140].mxu0  ;;  %12726 = vmatpush3.bf16.msra.mxu1 %v14292_v0 }
 0x24f   : > { %v2083_v41 = vadd.f32 %v15874_v36, %v2082_v61  ;;  %v2084_v11 = vpop.f32.mrb[141].mxu0  ;;  %12727 = vmatprep.subr.bf16.mxu1 %v14293_v53  ;;  %v14306_v53 = vld [vmem:[%s18752_s7 + $0x130] sm:$0xff]  }
 0x250   : > { %v2085_v56 = vpop.f32.mrb[142].mxu0 }
 0x251   : > { %v2436_v28 = vadd.f32 %v15736_v12, %v2083_v41  ;;  %v2086_v21 = vadd.f32 %v15874_v36, %v2085_v56  ;;  %v2087_v30 = vpop.f32.mrb[143].mxu0  ;;  %v3050_v38 = vld [vmem:[#allocation2 + $0x68] sm:$0x77]  ;;  %v14299_v12 = vld [vmem:[%s18752_s7 + $0x158] sm:$0xff]  }
 0x252   : > { %v11821_v51 = vcombine.high %v3046_v34, %v3050_v38  ;;  %v11820_v29 = vcombine.low %v3046_v34, %v3050_v38  ;;  %12728 = vmatpush3.bf16.msra.mxu1 %v14294_v42  ;;  %v14307_v41 = vld [vmem:[%s18752_s7 + $0x178] sm:$0xff]  }
 0x253   : > { %v2544_v24 = vmax.f32 %v2436_v28, 0.0  ;;  %v2439_v55 = vadd.f32 %v15744_v58, %v2086_v21  ;;  %12729 = vmatprep.subr.bf16.mxu1 %v14296_v10  ;;  %v14318_v58 = vld [vmem:[%s18752_s7 + $0x5a8] sm:$0xff]   ;;  %v14308_v10 = vld [vmem:[%s18752_s7 + $0x138] sm:$0xff]   ;;  %v14311_v28 = vld [vmem:[%s18752_s7 + $0x1c0] sm:$0xff]  }
 0x254   : > { %3740 = vmatprep.mubr.bf16.mxu1 %v11821_v51  ;;  %12876 = vmatpush3.bf16.msra.mxu0 %v14318_v58 }
 0x255   : > { %v12615_v18 = vpack.c.bf16 %v2544_v24, %v2544_v24  ;;  %v2545_v52 = vmax.f32 %v2439_v55, 0.0  ;;  %3741 = vmatmul.mubr.bf16.gmra.mrb[92].mxu1 %v11820_v29 }
 0x256   : > { %v2090_v3 = vpop.f32.mrb[144].mxu0  ;;  %12730 = vmatpush3.bf16.msra.mxu1 %v14298_v13 }
 0x257   : > { %2999 = vst.msk [vmem:[#allocation2 + $0x1c] sm:$0xf] %vm2612_vm1, %v12615_v18  ;;  %v12616_v43 = vpack.c.bf16 %v2545_v52, %v2545_v52  ;;  %v2091_v50 = vadd.f32 %v15874_v36, %v2090_v3  ;;  %v2092_v46 = vpop.f32.mrb[145].mxu0  ;;  %12731 = vmatprep.subr.bf16.mxu1 %v14299_v12  ;;  %v2542_v18 = vmax.f32 %v15946_v63, 0.0 }
 0x258   : > { %v2093_v57 = vpop.f32.mrb[146].mxu0 }
 0x259   : > { %3000 = vst.msk [vmem:[#allocation2 + $0x3c] sm:$0xf] %vm2612_vm1, %v12616_v43  ;;  %v2094_v31 = vadd.f32 %v15874_v36, %v2093_v57  ;;  %v2444_v6 = vadd.f32 %v15763_v4, %v2091_v50  ;;  %v2095_v49 = vpop.f32.mrb[147].mxu0  ;;  %v14304_v4 = vld [vmem:[%s18752_s7 + $0x128] sm:$0xff]   ;;  %v12613_v46 = vpack.c.bf16 %v2542_v18, %v2542_v18  ;;  %v14334_v57 = vld [vmem:[%s18752_s7 + $0x5b0] sm:$0xff]   ;;  %v14329_v18 = vld [vmem:[%s18752_s7 + $0x440] sm:$0xff]  }
 0x25a   : > { %12732 = vmatpush3.bf16.msra.mxu1 %v14300_v26 }
 0x25b   : > { %v2546_v40 = vmax.f32 %v2444_v6, 0.0  ;;  %v2447_v47 = vadd.f32 %v15769_v22, %v2094_v31  ;;  %12733 = vmatprep.subr.bf16.mxu1 %v14301_v45  ;;  %v14305_v22 = vld [vmem:[%s18752_s7 + $0x170] sm:$0xff]   ;;  %v2503_v6 = vmax.f32 %v15699_v25, 0.0  ;;  %v14338_v25 = vld [vmem:[%s18752_s7 + $0x5b8] sm:$0xff]  }
 0x25d   : > { %v12617_v15 = vpack.c.bf16 %v2546_v40, %v2546_v40  ;;  %v2547_v23 = vmax.f32 %v2447_v47, 0.0  ;;  %v12574_v47 = vpack.c.bf16 %v2503_v6, %v2503_v6 }
 0x25e   : > { %v2098_v16 = vpop.f32.mrb[148].mxu0  ;;  %12734 = vmatpush3.bf16.msra.mxu1 %v14302_v44 }
 0x25f   : > { %3001 = vst.msk [vmem:[#allocation2 + $0x5c] sm:$0xf] %vm2612_vm1, %v12617_v15  ;;  %v12618_v9 = vpack.c.bf16 %v2547_v23, %v2547_v23  ;;  %v2100_v32 = vpop.f32.mrb[149].mxu0  ;;  %12735 = vmatprep.subr.bf16.mxu1 %v14303_v19  ;;  %v2513_v15 = vmax.f32 %v15758_v59, 0.0 }
 0x260   : > { %v2101_v5 = vpop.f32.mrb[150].mxu0 }
 0x261   : > { %3002 = vst.msk [vmem:[#allocation2 + $0x7c] sm:$0xf] %vm2612_vm1, %v12618_v9  ;;  %v2102_v37 = vadd.f32 %v15874_v36, %v2101_v5  ;;  %v2103_v0 = vpop.f32.mrb[151].mxu0 }
 0x262   : > { %12736 = vmatpush3.bf16.msra.mxu1 %v14304_v4 }
 0x263   : > { %v2455_v61 = vadd.f32 %v15767_v8, %v2102_v37  ;;  %v2852_v42 = vpop.permute.xlu0 %2851  ;;  %12737 = vmatprep.subr.bf16.mxu1 %v14305_v22  ;;  %v2541_v8 = vmax.f32 %v15938_v48, 0.0 }
 0x264   : > { %2866 = vst.msk [vmem:[#allocation2 + $0x10] sm:$0xf] %vm2645_vm2, %v2852_v42  ;;  %v14314_v42 = vld [vmem:[%s18752_s7 + $0x188] sm:$0xff]  }
 0x265   : > { %v2549_v11 = vmax.f32 %v2455_v61, 0.0  ;;  %v12612_v55 = vpack.c.bf16 %v2541_v8, %v2541_v8  ;;  %v14313_v61 = vld [vmem:[%s18752_s7 + $0x1c8] sm:$0xff]   ;;  %v14317_v8 = vld [vmem:[%s18752_s7 + $0x190] sm:$0xff]  }
 0x266   : > { %v2106_v56 = vpop.f32.mrb[152].mxu0  ;;  %12738 = vmatpush3.bf16.msra.mxu1 %v14306_v53  ;;  %v14312_v53 = vld [vmem:[%s18752_s7 + $0x180] sm:$0xff]  }
 0x267   : > { %v12620_v21 = vpack.c.bf16 %v2549_v11, %v2549_v11  ;;  %v2107_v30 = vadd.f32 %v15874_v36, %v2106_v56  ;;  %v2108_v34 = vpop.f32.mrb[153].mxu0  ;;  %12739 = vmatprep.subr.bf16.mxu1 %v14307_v41  ;;  %v14315_v41 = vld [vmem:[%s18752_s7 + $0x1d0] sm:$0xff]  }
 0x268   : > { %v2109_v38 = vpop.f32.mrb[154].mxu0  ;;  %v14321_v34 = vld [vmem:[%s18752_s7 + $0x1e0] sm:$0xff]  }
 0x269   : > { %v2460_v51 = vadd.f32 %v15786_v17, %v2107_v30  ;;  %v2110_v29 = vadd.f32 %v15874_v36, %v2109_v38  ;;  %v2111_v13 = vpop.f32.mrb[155].mxu0  ;;  %v2854_v24 = vpop.permute.xlu1 %2853  ;;  %3016 = vrot.lane.b32.xlu0 %v12620_v21, %s18728_s27  ;;  %v2483_v17 = vmax.f32 %v15504_v54, 0.0  ;;  %v14319_v21 = vld [vmem:[%s18752_s7 + $0x1d8] sm:$0xff]   ;;  %v14322_v38 = vld [vmem:[%s18752_s7 + $0x1a0] sm:$0xff]  }
 0x26a   : > { %2867 = vst.msk [vmem:[#allocation2 + $0x30] sm:$0xf] %vm2645_vm2, %v2854_v24  ;;  %12740 = vmatpush3.bf16.msra.mxu1 %v14308_v10  ;;  %v14320_v30 = vld [vmem:[%s18752_s7 + $0x198] sm:$0xff]   ;;  %v14325_v13 = vld [vmem:[%s18752_s7 + $0x1f0] sm:$0xff]  }
 0x26b   : > { %v2550_v12 = vmax.f32 %v2460_v51, 0.0  ;;  %v2463_v48 = vadd.f32 %v15791_v62, %v2110_v29  ;;  %12753 = vmatprep.subr.bf16.mxu1 %v14311_v28  ;;  %v14332_v62 = vld [vmem:[%s18752_s7 + $0x5f0] sm:$0xff]   ;;  %v12554_v31 = vpack.c.bf16 %v2483_v17, %v2483_v17  ;;  %v14323_v51 = vld [vmem:[%s18752_s7 + $0x1e8] sm:$0xff]  }
 0x26c   : > { %12877 = vmatprep.subr.bf16.mxu0 %v14332_v62  ;;  %v14324_v29 = vld [vmem:[%s18752_s7 + $0x1a8] sm:$0xff]   ;;  %v14326_v24 = vld [vmem:[%s18752_s7 + $0x1b0] sm:$0xff]  }
 0x26d   : > { %v12621_v52 = vpack.c.bf16 %v2550_v12, %v2550_v12  ;;  %v2551_v3 = vmax.f32 %v2463_v48, 0.0  ;;  %2965 = vrot.lane.b32.xlu0 %v12612_v55, %s18728_s27  ;;  %12878 = vmatpush3.bf16.msra.mxu0 %v14334_v57  ;;  %v14327_v55 = vld [vmem:[%s18752_s7 + $0x1f8] sm:$0xff]  }
 0x26e   : > { %v2114_v26 = vpop.f32.mrb[156].mxu0  ;;  %v14328_v48 = vld [vmem:[%s18752_s7 + $0x1b8] sm:$0xff]  }
 0x26f   : > { %v12622_v20 = vpack.c.bf16 %v2551_v3, %v2551_v3  ;;  %v2115_v58 = vadd.f32 %v15874_v36, %v2114_v26  ;;  %v2116_v43 = vpop.f32.mrb[157].mxu0  ;;  %3018 = vrot.lane.b32.xlu1 %v12621_v52, %s18728_s27 }
 0x270   : > { %v2117_v50 = vpop.f32.mrb[158].mxu0 }
 0x271   : > { %v2468_v63 = vadd.f32 %v15784_v2, %v2115_v58  ;;  %v2118_v45 = vadd.f32 %v15874_v36, %v2117_v50  ;;  %3020 = vrot.lane.b32.xlu0 %v12622_v20, %s18728_s27  ;;  %v2119_v54 = vpop.f32.mrb[159].mxu0  ;;  %v14337_v2 = vld [vmem:[%s18752_s7 + $0x5f8] sm:$0xff]   ;;  %v2493_v36 = vmax.f32 %v15626_v7, 0.0  ;;  %v12584_v7 = vpack.c.bf16 %v2513_v15, %v2513_v15 }
 0x272   : > { %12879 = vmatprep.subr.bf16.mxu0 %v14337_v2  ;;  %v16137_v2 = vld [vmem:[#allocation2 + $0x20] sm:$0xff] }
 0x273   : > { %v2552_v49 = vmax.f32 %v2468_v63, 0.0  ;;  %v16050_v44 = vadd.f32 %v15788_v35, %v2118_v45  ;;  %2967 = vrot.lane.b32.xlu1 %v12613_v46, %s18728_s27  ;;  %12880 = vmatpush3.bf16.msra.mxu0 %v14338_v25  ;;  %v14341_v35 = vld [vmem:[%s18752_s7 + $0x2c0] sm:$0xff]   ;;  %v12564_v19 = vpack.c.bf16 %v2493_v36, %v2493_v36 }
 0x274   : > { %12921 = vmatprep.subr.bf16.mxu0 %v14341_v35  ;;  %v16142_v25 = vld [vmem:[#allocation2] sm:$0xff] }
 0x275   : > { %v12623_v40 = vpack.c.bf16 %v2552_v49, %v2552_v49  ;;  %2638 = vrot.lane.b32.xlu0 %v12554_v31, %s18728_s27  ;;  %v16144_v35 = vld [vmem:[#allocation2 + $0x40] sm:$0xff] }
 0x277   : > { %3022 = vrot.lane.b32.xlu1 %v12623_v40, %s18728_s27  ;;  %v16139_v40 = vld [vmem:[#allocation2 + $0x60] sm:$0xff] }
 0x278   : > { %v16153_v15 = vcombine.high %v16144_v35, %v16139_v40 }
 0x279   : > { %2749 = vrot.lane.b32.xlu0 %v12574_v47, %s18728_s27 }
 0x27b   : > { %2694 = vrot.lane.b32.xlu1 %v12564_v19, %s18728_s27  ;;  %v16148_v19 = vcombine.high %v16142_v25, %v16137_v2 }
 0x27f   : > { %2804 = vrot.lane.b32.xlu1 %v12584_v7, %s18728_s27 }
 0x28b   : > { %v2907_v23 = vpop.permute.xlu0 %2906 }
 0x28c   : > { %2921 = vst.msk [vmem:[#allocation2 + $0x14] sm:$0xf] %vm2645_vm2, %v2907_v23 }
 0x28f   : > { %v2856_v16 = vpop.permute.xlu0 %2855 }
 0x290   : > { %2868 = vst.msk [vmem:[#allocation2 + $0x50] sm:$0xf] %vm2645_vm2, %v2856_v16 }
 0x291   : > { %v2909_v4 = vpop.permute.xlu1 %2908 }
 0x292   : > { %2922 = vst.msk [vmem:[#allocation2 + $0x34] sm:$0xf] %vm2645_vm2, %v2909_v4 }
 0x293   : > { %v2911_v9 = vpop.permute.xlu0 %2910  ;;  %v3039_v22 = vld [vmem:[#allocation2 + $0x10] sm:$0xff] }
 0x294   : > { %2923 = vst.msk [vmem:[#allocation2 + $0x54] sm:$0xf] %vm2645_vm2, %v2911_v9 }
 0x295   : > { %v2858_v59 = vpop.permute.xlu1 %2857 }
 0x296   : > { %2869 = vst.msk [vmem:[#allocation2 + $0x70] sm:$0xf] %vm2645_vm2, %v2858_v59  ;;  %v14330_v59 = vld [vmem:[%s18752_s7 + $0x400] sm:$0xff]  }
 0x299   : > { %v2913_v32 = vpop.permute.xlu1 %2912  ;;  %v3043_v5 = vld [vmem:[#allocation2 + $0x30] sm:$0xff] }
 0x29a   : > { %2924 = vst.msk [vmem:[#allocation2 + $0x74] sm:$0xf] %vm2645_vm2, %v2913_v32  ;;  %v11814_v37 = vcombine.low %v3039_v22, %v3043_v5  ;;  %v11815_v0 = vcombine.high %v3039_v22, %v3043_v5  ;;  %v14331_v22 = vld [vmem:[%s18752_s7 + $0x448] sm:$0xff]   ;;  %v4212_v5 = vshll.u32 %v16148_v19, 16 }
 0x29b   : > { %v3047_v11 = vld [vmem:[#allocation2 + $0x50] sm:$0xff] }
 0x29c   : > { %3781 = vmatprep.mubr.bf16.mxu1 %v11815_v0 }
 0x29d   : > { %3782 = vmatmul.mubr.bf16.vlgmr.msra.gmra.mrb[96].mxu1 %v11814_v37  ;;  %v4217_v37 = vshll.u32 %v16153_v15, 16 }
 0x29e   : > { %12754 = vmatpush3.bf16.msra.mxu1 %v14312_v53 }
 0x29f   : > { %12755 = vmatprep.subr.bf16.mxu1 %v14313_v61 }
 0x2a1   : > { %v3051_v10 = vld [vmem:[#allocation2 + $0x70] sm:$0x77] }
 0x2a2   : > { %v11823_v56 = vcombine.high %v3047_v11, %v3051_v10  ;;  %v11822_v28 = vcombine.low %v3047_v11, %v3051_v10  ;;  %12756 = vmatpush3.bf16.msra.mxu1 %v14314_v42  ;;  %v14333_v42 = vld [vmem:[%s18752_s7 + $0x408] sm:$0xff]   ;;  %v4214_v11 = vrot.slane %v4212_v5, 1  ;;  %v4210_v10 = vshrl.u32 %v16148_v19, 16 }
 0x2a3   : > { %12757 = vmatprep.subr.bf16.mxu1 %v14315_v41  ;;  %v14335_v41 = vld [vmem:[%s18752_s7 + $0x450] sm:$0xff]   ;;  %v14348_v5 = vld [vmem:[%s18752_s7 + $0x428] sm:$0xff]  }
 0x2a4   : > { %3789 = vmatprep.mubr.bf16.mxu1 %v11823_v56  ;;  %v16181_v56 = vrot.slane %v4217_v37, 1 }
 0x2a5   : > { %3790 = vmatmul.mubr.bf16.gmra.mrb[100].mxu1 %v11822_v28 }
 0x2a6   : > { %12758 = vmatpush3.bf16.msra.mxu1 %v14317_v8 }
 0x2a7   : > { %12759 = vmatprep.subr.bf16.mxu1 %v14319_v21 }
 0x2aa   : > { %12760 = vmatpush3.bf16.msra.mxu1 %v14320_v30 }
 0x2ab   : > { %12761 = vmatprep.subr.bf16.mxu1 %v14321_v34 }
 0x2ae   : > { %12762 = vmatpush3.bf16.msra.mxu1 %v14322_v38 }
 0x2af   : > { %12763 = vmatprep.subr.bf16.mxu1 %v14323_v51 }
 0x2b2   : > { %12764 = vmatpush3.bf16.msra.mxu1 %v14324_v29 }
 0x2b3   : > { %v2962_v12 = vpop.permute.xlu0 %2961  ;;  %12765 = vmatprep.subr.bf16.mxu1 %v14325_v13  ;;  %v14336_v13 = vld [vmem:[%s18752_s7 + $0x410] sm:$0xff]  }
 0x2b4   : > { %2976 = vst.msk [vmem:[#allocation2 + $0x18] sm:$0xf] %vm2645_vm2, %v2962_v12  ;;  %v4215_v12 = vor.u32 %v4214_v11, %v4210_v10  ;;  %v14355_v11 = vld [vmem:[%s18752_s7 + $0x478] sm:$0xff]   ;;  %v14357_v10 = vld [vmem:[%s18752_s7 + $0x2e0] sm:$0xff]  }
 0x2b6   : > { %12766 = vmatpush3.bf16.msra.mxu1 %v14326_v24 }
 0x2b7   : > { %12767 = vmatprep.subr.bf16.mxu1 %v14327_v55 }
 0x2b9   : > { %v2964_v52 = vpop.permute.xlu1 %2963 }
 0x2ba   : > { %2977 = vst.msk [vmem:[#allocation2 + $0x38] sm:$0xf] %vm2645_vm2, %v2964_v52  ;;  %12768 = vmatpush3.bf16.msra.mxu1 %v14328_v48  ;;  %v14339_v48 = vld [vmem:[%s18752_s7 + $0x458] sm:$0xff]  }
 0x2bb   : > { %12781 = vmatprep.subr.bf16.mxu1 %v14329_v18 }
 0x2d0   : > { %v12685_v3 = vpop.f32.mrb[80].mxu1 }
 0x2d1   : > { %v12686_v17 = vpop.f32.mrb[81].mxu1 }
 0x2d2   : > { %v16125_v26 = vadd.f32 %v12686_v17, %v12685_v3  ;;  %v12688_v20 = vpop.f32.mrb[82].mxu1 }
 0x2d3   : > { %v12689_v58 = vpop.f32.mrb[83].mxu1 }
 0x2d4   : > { %v16127_v43 = vadd.f32 %v12689_v58, %v12688_v20  ;;  %v4220_v20 = vsel %vm4196_vm3, %v4215_v12, %v16181_v56 }
 0x2d8   : > { %v12691_v62 = vpop.f32.mrb[84].mxu1 }
 0x2d9   : > { %v12692_v50 = vpop.f32.mrb[85].mxu1 }
 0x2da   : > { %v16129_v46 = vadd.f32 %v12692_v50, %v12691_v62  ;;  %v12694_v63 = vpop.f32.mrb[86].mxu1  ;;  %v14340_v62 = vld [vmem:[%s18752_s7 + $0x418] sm:$0xff]  }
 0x2db   : > { %v3017_v45 = vpop.permute.xlu0 %3016  ;;  %v12695_v54 = vpop.f32.mrb[87].mxu1 }
 0x2dc   : > { %3031 = vst.msk [vmem:[#allocation2 + $0x1c] sm:$0xf] %vm2645_vm2, %v3017_v45  ;;  %v16132_v57 = vadd.f32 %v12695_v54, %v12694_v63 }
 0x2df   : > { %v2966_v31 = vpop.permute.xlu0 %2965 }
 0x2e0   : > { %2978 = vst.msk [vmem:[#allocation2 + $0x58] sm:$0xf] %vm2645_vm2, %v2966_v31  ;;  %v14342_v31 = vld [vmem:[%s18752_s7 + $0x280] sm:$0xff]  }
 0x2e1   : > { %v3019_v6 = vpop.permute.xlu1 %3018 }
 0x2e2   : > { %3032 = vst.msk [vmem:[#allocation2 + $0x3c] sm:$0xf] %vm2645_vm2, %v3019_v6 }
 0x2e3   : > { %v3021_v49 = vpop.permute.xlu0 %3020  ;;  %v3040_v23 = vld [vmem:[#allocation2 + $0x18] sm:$0xff] }
 0x2e4   : > { %3033 = vst.msk [vmem:[#allocation2 + $0x5c] sm:$0xf] %vm2645_vm2, %v3021_v49 }
 0x2e5   : > { %v2968_v36 = vpop.permute.xlu1 %2967 }
 0x2e6   : > { %2979 = vst.msk [vmem:[#allocation2 + $0x78] sm:$0xf] %vm2645_vm2, %v2968_v36 }
 0x2e7   : > { %v2639_v47 = vpop.permute.xlu0 %2638 }
 0x2e8   : > { %2650 = vst.msk [vmem:[#allocation2 + $0x80] sm:$0xf] %vm2645_vm2, %v2639_v47  ;;  %v14343_v47 = vld [vmem:[%s18752_s7 + $0x460] sm:$0xff]  }
 0x2e9   : > { %v3023_v7 = vpop.permute.xlu1 %3022  ;;  %v3044_v16 = vld [vmem:[#allocation2 + $0x38] sm:$0xff] }
 0x2ea   : > { %3034 = vst.msk [vmem:[#allocation2 + $0x7c] sm:$0xf] %vm2645_vm2, %v3023_v7  ;;  %v16156_v4 = vcombine.low %v3040_v23, %v3044_v16  ;;  %v16158_v9 = vcombine.high %v3040_v23, %v3044_v16  ;;  %v14345_v7 = vld [vmem:[%s18752_s7 + $0x2c8] sm:$0xff]   ;;  %v14344_v23 = vld [vmem:[%s18752_s7 + $0x420] sm:$0xff]  }
 0x2eb   : > { %v2750_v32 = vpop.permute.xlu0 %2749  ;;  %v16183_v8 = vld [vmem:[#allocation2 + $0x58] sm:$0xff]  ;;  %v14346_v16 = vld [vmem:[%s18752_s7 + $0x288] sm:$0xff]  }
 0x2ec   : > { %2760 = vst.msk [vmem:[#allocation2 + $0x88] sm:$0xf] %vm2645_vm2, %v2750_v32  ;;  %3830 = vmatprep.mubr.bf16.mxu1 %v16158_v9  ;;  %v4284_v53 = vshll.u32 %v16158_v9, 16  ;;  %v4272_v61 = vshll.u32 %v16156_v4, 16  ;;  %v4282_v18 = vshrl.u32 %v16158_v9, 16  ;;  %v4270_v3 = vshrl.u32 %v16156_v4, 16 }
 0x2ed   : > { %v2695_v0 = vpop.permute.xlu1 %2694  ;;  %3831 = vmatmul.mubr.bf16.vlgmr.msra.gmra.mrb[104].mxu1 %v16156_v4  ;;  %v14349_v32 = vld [vmem:[%s18752_s7 + $0x2d0] sm:$0xff]  }
 0x2ee   : > { %2705 = vst.msk [vmem:[#allocation2 + $0x84] sm:$0xf] %vm2645_vm2, %v2695_v0  ;;  %12782 = vmatpush3.bf16.msra.mxu1 %v14330_v59  ;;  %v4286_v34 = vrot.slane %v4284_v53, 1  ;;  %v4274_v38 = vrot.slane %v4272_v61, 1  ;;  %v14347_v59 = vld [vmem:[%s18752_s7 + $0x468] sm:$0xff]   ;;  %v14350_v0 = vld [vmem:[%s18752_s7 + $0x290] sm:$0xff]   ;;  %v16238_v53 = vcombine.low %v16144_v35, %v16139_v40 }
 0x2ef   : > { %12783 = vmatprep.subr.bf16.mxu1 %v14331_v22  ;;  %v16228_v22 = vcombine.low %v16142_v25, %v16137_v2  ;;  %v14351_v2 = vld [vmem:[%s18752_s7 + $0x470] sm:$0xff]   ;;  %v14353_v25 = vld [vmem:[%s18752_s7 + $0x2d8] sm:$0xff]  }
 0x2f0   : > { %v4287_v58 = vor.u32 %v4286_v34, %v4282_v18  ;;  %v4275_v63 = vor.u32 %v4274_v38, %v4270_v3  ;;  %v14354_v40 = vld [vmem:[%s18752_s7 + $0x298] sm:$0xff]   ;;  %v16264_v34 = vld [vmem:[#allocation2 + $0x68] sm:$0xff]  ;;  %v14358_v38 = vld [vmem:[%s18752_s7 + $0x2a0] sm:$0xff]   ;;  %v4296_v18 = vshrl.u32 %v16153_v15, 16  ;;  %v4236_v3 = vshll.u32 %v15954_v27, 16 }
 0x2f1   : > { %v2805_v28 = vpop.permute.xlu1 %2804  ;;  %v3052_v21 = vld [vmem:[#allocation2 + $0x78] sm:$0x77] }
 0x2f2   : > { %v4003_v30 = vld [vmem:[#allocation2 + $0x78] sm:$0xff]  ;;  %2815 = vst.msk [vmem:[#allocation2 + $0x8c] sm:$0xf] %vm2645_vm2, %v2805_v28  ;;  %12784 = vmatpush3.bf16.msra.mxu1 %v14333_v42  ;;  %v11825_v51 = vcombine.high %v16183_v8, %v3052_v21  ;;  %v11824_v29 = vcombine.low %v16183_v8, %v3052_v21  ;;  %v14352_v42 = vld [vmem:[%s18752_s7 + $0x430] sm:$0xff]   ;;  %v4205_v28 = vshll.u32 %v16238_v53, 16  ;;  %v4298_v15 = vor.u32 %v4296_v18, %v16181_v56 }
 0x2f3   : > { %v11904_v24 = vcombine.low %v16183_v8, %v4003_v30  ;;  %v11905_v55 = vcombine.high %v16183_v8, %v4003_v30  ;;  %12785 = vmatprep.subr.bf16.mxu1 %v14335_v41  ;;  %v4200_v41 = vshll.u32 %v16228_v22, 16  ;;  %v14356_v21 = vld [vmem:[%s18752_s7 + $0x438] sm:$0xff]   ;;  %v14366_v56 = vld [vmem:[%s18752_s7 + $0x2b0] sm:$0xff]  }
 0x2f4   : > { %3838 = vmatprep.mubr.bf16.mxu1 %v11825_v51  ;;  %v14359_v51 = vld [vmem:[%s18752_s7 + $0x4c0] sm:$0xff]  }
 0x2f5   : > { %v4289_v52 = vshll.u32 %v11905_v55, 16  ;;  %v4277_v17 = vshll.u32 %v11904_v24, 16  ;;  %3839 = vmatmul.mubr.bf16.gmra.mrb[108].mxu1 %v11824_v29  ;;  %v4314_v54 = vshrl.u32 %v11905_v55, 16  ;;  %v4311_v37 = vshrl.u32 %v11904_v24, 16  ;;  %v14361_v24 = vld [vmem:[%s18752_s7 + $0x2e8] sm:$0xff]  }
 0x2f6   : > { %12786 = vmatpush3.bf16.msra.mxu1 %v14336_v13  ;;  %4749 = vmatprep.mubr.bf16.mxu1 %v4220_v20  ;;  %v4202_v30 = vrot.slane %v4200_v41, 1  ;;  %v4198_v29 = vshrl.u32 %v16228_v22, 16  ;;  %v4207_v13 = vrot.slane %v4205_v28, 1  ;;  %v16276_v55 = vld [vmem:[#allocation2 + $0x48] sm:$0xff] }
 0x2f7   : > { %v4291_v50 = vrot.slane %v4289_v52, 1  ;;  %v4279_v45 = vrot.slane %v4277_v17, 1  ;;  %12787 = vmatprep.subr.bf16.mxu1 %v14339_v48  ;;  %v16280_v12 = vcombine.high %v16276_v55, %v16264_v34  ;;  %v14360_v52 = vld [vmem:[%s18752_s7 + $0x480] sm:$0xff]   ;;  %v14362_v17 = vld [vmem:[%s18752_s7 + $0x2a8] sm:$0xff]   ;;  %v16365_v28 = vcombine.low %v16276_v55, %v16264_v34 }
 0x2f8   : > { %v4203_v48 = vor.u32 %v4202_v30, %v4198_v29  ;;  %v14363_v20 = vld [vmem:[%s18752_s7 + $0x4c8] sm:$0xff]   ;;  %v14385_v29 = vld [vmem:[%s18752_s7 + $0x3d8] sm:$0xff]   ;;  %v4224_v34 = vshll.u32 %v15952_v33, 16 }
 0x2f9   : > { %v4292_v6 = vsel %vm4196_vm3, %v4287_v58, %v4291_v50  ;;  %v4280_v49 = vsel %vm4196_vm3, %v4275_v63, %v4279_v45  ;;  %v4316_v36 = vor.u32 %v4314_v54, %v4291_v50  ;;  %v4313_v61 = vor.u32 %v4311_v37, %v4279_v45  ;;  %v14364_v63 = vld [vmem:[%s18752_s7 + $0x488] sm:$0xff]   ;;  %v14367_v45 = vld [vmem:[%s18752_s7 + $0x4d0] sm:$0xff]  }
 0x2fa   : > { %4896 = vmatprep.mubr.bf16.mxu0 %v4292_v6  ;;  %12788 = vmatpush3.bf16.msra.mxu1 %v14340_v62  ;;  %v4208_v58 = vsel %vm4196_vm3, %v4203_v48, %v4207_v13  ;;  %v14365_v62 = vld [vmem:[%s18752_s7 + $0x2f0] sm:$0xff]   ;;  %v4241_v50 = vshll.u32 %v16280_v12, 16  ;;  %v4238_v54 = vrot.slane %v4236_v3, 1  ;;  %v4293_v6 = vshrl.u32 %v16238_v53, 16  ;;  %v3869_v37 = vld [vmem:[#allocation2 + $0x68] sm:$0x77] }
 0x2fb   : > { %4897 = vmatmul.mubr.bf16.vlgmr.msra.gmra.mrb[160].mxu0 %v4280_v49  ;;  %12789 = vmatprep.subr.bf16.mxu1 %v14343_v47  ;;  %v4234_v49 = vshrl.u32 %v15954_v27, 16  ;;  %v14368_v47 = vld [vmem:[%s18752_s7 + $0x490] sm:$0xff]   ;;  %v14375_v53 = vld [vmem:[%s18752_s7 + $0x4e0] sm:$0xff]   ;;  %v14379_v41 = vld [vmem:[%s18752_s7 + $0x4e8] sm:$0xff]  }
 0x2fc   : > { %12922 = vmatpush3.bf16.msra.mxu0 %v14342_v31  ;;  %4904 = vmatprep.mubr.bf16.mxu0 %v4316_v36  ;;  %v14369_v31 = vld [vmem:[%s18752_s7 + $0x2f8] sm:$0xff]   ;;  %v16313_v36 = vrot.slane %v4241_v50, 1  ;;  %v4226_v50 = vrot.slane %v4224_v34, 1 }
 0x2fd   : > { %12923 = vmatprep.subr.bf16.mxu0 %v14345_v7  ;;  %v4295_v7 = vor.u32 %v4293_v6, %v4207_v13  ;;  %v14386_v3 = vld [vmem:[%s18752_s7 + $0x398] sm:$0xff]  }
 0x2fe   : > { %12790 = vmatpush3.bf16.msra.mxu1 %v14344_v23  ;;  %v4239_v23 = vor.u32 %v4238_v54, %v4234_v49  ;;  %v4222_v54 = vshrl.u32 %v15952_v33, 16  ;;  %v14391_v49 = vld [vmem:[%s18752_s7 + $0x540] sm:$0xff]   ;;  %v14401_v34 = vld [vmem:[%s18752_s7 + $0x3f8] sm:$0xff]  }
 0x2ff   : > { %12791 = vmatprep.subr.bf16.mxu1 %v14347_v59  ;;  %v14371_v59 = vld [vmem:[%s18752_s7 + $0x4d8] sm:$0xff]  }
 0x300   : > { %12924 = vmatpush3.bf16.msra.mxu0 %v14346_v16  ;;  %v14370_v16 = vld [vmem:[%s18752_s7 + $0x2b8] sm:$0xff]  }
 0x301   : > { %12925 = vmatprep.subr.bf16.mxu0 %v14349_v32  ;;  %v4244_v32 = vsel %vm4196_vm3, %v4239_v23, %v16313_v36  ;;  %v16423_v23 = vld [vmem:[#allocation2 + $0x50] sm:$0xff] }
 0x302   : > { %12792 = vmatpush3.bf16.msra.mxu1 %v14348_v5  ;;  %v14372_v5 = vld [vmem:[%s18752_s7 + $0x498] sm:$0xff]  }
 0x303   : > { %4905 = vmatmul.mubr.bf16.gmra.mrb[164].mxu0 %v4313_v61  ;;  %12793 = vmatprep.subr.bf16.mxu1 %v14351_v2  ;;  %v14377_v61 = vld [vmem:[%s18752_s7 + $0x3c8] sm:$0xff]   ;;  %v11973_v2 = vcombine.high %v16276_v55, %v3869_v37 }
 0x304   : > { %12926 = vmatpush3.bf16.msra.mxu0 %v14350_v0  ;;  %5414 = vmatprep.mubr.bf16.mxu0 %v15954_v27  ;;  %v14373_v27 = vld [vmem:[%s18752_s7 + $0x3c0] sm:$0xff]  }
 0x305   : > { %12927 = vmatprep.subr.bf16.mxu0 %v14353_v25  ;;  %v14374_v0 = vld [vmem:[%s18752_s7 + $0x380] sm:$0xff]  }
 0x306   : > { %12794 = vmatpush3.bf16.msra.mxu1 %v14352_v42  ;;  %v14376_v25 = vld [vmem:[%s18752_s7 + $0x4a0] sm:$0xff]   ;;  %v14378_v42 = vld [vmem:[%s18752_s7 + $0x388] sm:$0xff]  }
 0x307   : > { %12795 = vmatprep.subr.bf16.mxu1 %v14355_v11  ;;  %v14380_v11 = vld [vmem:[%s18752_s7 + $0x4a8] sm:$0xff]  }
 0x308   : > { %12928 = vmatpush3.bf16.msra.mxu0 %v14354_v40  ;;  %v14381_v40 = vld [vmem:[%s18752_s7 + $0x3d0] sm:$0xff]  }
 0x309   : > { %12929 = vmatprep.subr.bf16.mxu0 %v14357_v10  ;;  %v16361_v10 = vld [vmem:[%s18753_s8] ss:$0 sm:$0xff] }
 0x30a   : > { %12796 = vmatpush3.bf16.msra.mxu1 %v14356_v21  ;;  %v14382_v21 = vld [vmem:[%s18752_s7 + $0x390] sm:$0xff]  }
 0x30b   : > { %12809 = vmatprep.subr.bf16.mxu1 %v14359_v51  ;;  %v14383_v51 = vld [vmem:[%s18752_s7 + $0x4f0] sm:$0xff]  }
 0x30c   : > { %12930 = vmatpush3.bf16.msra.mxu0 %v14358_v38  ;;  %v11972_v38 = vcombine.low %v16276_v55, %v3869_v37  ;;  %v14384_v55 = vld [vmem:[%s18752_s7 + $0x4b0] sm:$0xff]  }
 0x30d   : > { %12931 = vmatprep.subr.bf16.mxu0 %v14361_v24  ;;  %4750 = vmatmul.mubr.bf16.vlgmr.msra.gmra.mrb[112].mxu1 %v4208_v58  ;;  %v3686_v24 = vadd.f32 %v16125_v26, %v16361_v10  ;;  %v14387_v26 = vld [vmem:[%s18752_s7 + $0x4f8] sm:$0xff]  }
 0x30e   : > { %4757 = vmatprep.mubr.bf16.mxu1 %v4298_v15  ;;  %12810 = vmatpush3.bf16.msra.mxu1 %v14360_v52 }
 0x30f   : > { %12811 = vmatprep.subr.bf16.mxu1 %v14363_v20  ;;  %v3689_v20 = vadd.f32 %v16127_v43, %v16361_v10  ;;  %v16405_v43 = vld [vmem:[#allocation2 + $0x10] sm:$0xff] }
 0x310   : > { %12932 = vmatpush3.bf16.msra.mxu0 %v14362_v17  ;;  %v4229_v17 = vshll.u32 %v16365_v28, 16 }
 0x311   : > { %12933 = vmatprep.subr.bf16.mxu0 %v14365_v62  ;;  %v16398_v62 = vld [vmem:[#allocation2 + $0x30] sm:$0xff] }
 0x312   : > { %12812 = vmatpush3.bf16.msra.mxu1 %v14364_v63  ;;  %v4231_v6 = vrot.slane %v4229_v17, 1  ;;  %v14405_v17 = vld [vmem:[%s18752_s7 + $0x7c0] sm:$0xff]  }
 0x313   : > { %12813 = vmatprep.subr.bf16.mxu1 %v14367_v45  ;;  %v16407_v45 = vld [vmem:[#allocation2 + $0x70] sm:$0xff] }
 0x314   : > { %12934 = vmatpush3.bf16.msra.mxu0 %v14366_v56  ;;  %v14388_v56 = vld [vmem:[%s18752_s7 + $0x4b8] sm:$0xff]  }
 0x315   : > { %12935 = vmatprep.subr.bf16.mxu0 %v14369_v31  ;;  %4758 = vmatmul.mubr.bf16.gmra.mrb[116].mxu1 %v4295_v7  ;;  %v14390_v31 = vld [vmem:[%s18752_s7 + $0x3a0] sm:$0xff]  }
 0x316   : > { %12814 = vmatpush3.bf16.msra.mxu1 %v14368_v47  ;;  %4798 = vmatprep.mubr.bf16.mxu1 %v4244_v32  ;;  %v16418_v47 = vcombine.high %v16405_v43, %v16398_v62  ;;  %v3694_v32 = vadd.f32 %v16129_v46, %v16361_v10  ;;  %v14395_v46 = vld [vmem:[%s18752_s7 + $0x548] sm:$0xff]  }
 0x317   : > { %12815 = vmatprep.subr.bf16.mxu1 %v14371_v59  ;;  %v4227_v59 = vor.u32 %v4226_v50, %v4222_v54  ;;  %v14406_v50 = vld [vmem:[%s18752_s7 + $0x780] sm:$0xff]   ;;  %v14409_v54 = vld [vmem:[%s18752_s7 + $0x7c8] sm:$0xff]  }
 0x318   : > { %12936 = vmatpush3.bf16.msra.mxu0 %v14370_v16 }
 0x319   : > { %12977 = vmatprep.subr.bf16.mxu0 %v14373_v27  ;;  %v16427_v27 = vcombine.high %v16423_v23, %v16407_v45 }
 0x31a   : > { %12816 = vmatpush3.bf16.msra.mxu1 %v14372_v5 }
 0x31b   : > { %5415 = vmatmul.mubr.bf16.vlgmr.msra.gmra.mrb[168].mxu0 %v15952_v33  ;;  %12817 = vmatprep.subr.bf16.mxu1 %v14375_v53  ;;  %v14393_v33 = vld [vmem:[%s18752_s7 + $0x3e8] sm:$0xff]   ;;  %v14392_v53 = vld [vmem:[%s18752_s7 + $0x500] sm:$0xff]  }
 0x31c   : > { %5422 = vmatprep.mubr.bf16.mxu0 %v11973_v2  ;;  %12978 = vmatpush3.bf16.msra.mxu0 %v14374_v0  ;;  %v4302_v0 = vshrl.u32 %v16280_v12, 16  ;;  %v4232_v2 = vsel %vm4196_vm3, %v4227_v59, %v4231_v6 }
 0x31d   : > { %12979 = vmatprep.subr.bf16.mxu0 %v14377_v61 }
 0x31e   : > { %12818 = vmatpush3.bf16.msra.mxu1 %v14376_v25  ;;  %v14394_v25 = vld [vmem:[%s18752_s7 + $0x3a8] sm:$0xff]  }
 0x31f   : > { %12819 = vmatprep.subr.bf16.mxu1 %v14379_v41  ;;  %v3697_v41 = vadd.f32 %v16132_v57, %v16361_v10  ;;  %v14396_v57 = vld [vmem:[%s18752_s7 + $0x508] sm:$0xff]   ;;  %v14399_v10 = vld [vmem:[%s18752_s7 + $0x550] sm:$0xff]  }
 0x320   : > { %12980 = vmatpush3.bf16.msra.mxu0 %v14378_v42  ;;  %v12713_v30 = vpop.f32.mrb[88].mxu1  ;;  %v4260_v42 = vshll.u32 %v16418_v47, 16 }
 0x321   : > { %12981 = vmatprep.subr.bf16.mxu0 %v14381_v40  ;;  %v12714_v13 = vpop.f32.mrb[89].mxu1 }
 0x322   : > { %v12715_v48 = vadd.f32 %v12714_v13, %v12713_v30  ;;  %12820 = vmatpush3.bf16.msra.mxu1 %v14380_v11  ;;  %v12716_v18 = vpop.f32.mrb[90].mxu1  ;;  %v14397_v30 = vld [vmem:[%s18752_s7 + $0x3f0] sm:$0xff]   ;;  %v4299_v13 = vshrl.u32 %v16365_v28, 16 }
 0x323   : > { %5423 = vmatmul.mubr.bf16.gmra.mrb[172].mxu0 %v11972_v38  ;;  %v12717_v52 = vpop.f32.mrb[91].mxu1  ;;  %12821 = vmatprep.subr.bf16.mxu1 %v14383_v51  ;;  %v4265_v38 = vshll.u32 %v16427_v27, 16 }
 0x324   : > { %12982 = vmatpush3.bf16.msra.mxu0 %v14382_v21  ;;  %5512 = vmatprep.mubr.bf16.mxu0 %v16158_v9  ;;  %v16393_v58 = vadd.f32 %v12715_v48, %v3686_v24  ;;  %v12718_v15 = vadd.f32 %v12717_v52, %v12716_v18  ;;  %v14389_v9 = vld [vmem:[%s18752_s7 + $0x3e0] sm:$0xff]   ;;  %v4304_v21 = vor.u32 %v4302_v0, %v16313_v36  ;;  %v14398_v36 = vld [vmem:[%s18752_s7 + $0x3b0] sm:$0xff]   ;;  %v4258_v24 = vshrl.u32 %v16418_v47, 16 }
 0x325   : > { %12983 = vmatprep.subr.bf16.mxu0 %v14385_v29  ;;  %v4262_v29 = vrot.slane %v4260_v42, 1  ;;  %v16468_v48 = vrot.slane %v4265_v38, 1  ;;  %v14400_v18 = vld [vmem:[%s18752_s7 + $0x510] sm:$0xff]   ;;  %v14419_v42 = vld [vmem:[%s18752_s7 + $0x578] sm:$0xff]   ;;  %v14422_v38 = vld [vmem:[%s18752_s7 + $0x7a0] sm:$0xff]  }
 0x326   : > { %v16400_v63 = vadd.f32 %v12718_v15, %v3689_v20  ;;  %12822 = vmatpush3.bf16.msra.mxu1 %v14384_v55  ;;  %v4301_v55 = vor.u32 %v4299_v13, %v4231_v6  ;;  %v14404_v15 = vld [vmem:[%s18752_s7 + $0x518] sm:$0xff]   ;;  %v16497_v6 = vld [vmem:[#allocation2 + $0x28] sm:$0xff]  ;;  %v14414_v0 = vld [vmem:[%s18752_s7 + $0x790] sm:$0xff]   ;;  %v4308_v13 = vshrl.u32 %v16427_v27, 16 }
 0x327   : > { %12823 = vmatprep.subr.bf16.mxu1 %v14387_v26  ;;  %v4263_v52 = vor.u32 %v4262_v29, %v4258_v24  ;;  %v14403_v26 = vld [vmem:[%s18752_s7 + $0x558] sm:$0xff]   ;;  %v14425_v29 = vld [vmem:[%s18752_s7 + $0x7e8] sm:$0xff]   ;;  %v14424_v24 = vld [vmem:[%s18752_s7 + $0x200] sm:$0xff]  }
 0x328   : > { %12984 = vmatpush3.bf16.msra.mxu0 %v14386_v3  ;;  %v12719_v7 = vpop.f32.mrb[92].mxu1  ;;  %v14402_v3 = vld [vmem:[%s18752_s7 + $0x3b8] sm:$0xff]   ;;  %v14429_v27 = vld [vmem:[%s18752_s7 + $0x7f0] sm:$0xff]  }
 0x329   : > { %12985 = vmatprep.subr.bf16.mxu0 %v14389_v9  ;;  %v12720_v16 = vpop.f32.mrb[93].mxu1  ;;  %v4268_v20 = vsel %vm4196_vm3, %v4263_v52, %v16468_v48  ;;  %v3871_v9 = vld [vmem:[#allocation2 + $0x78] sm:$0x77] }
 0x32a   : > { %v12721_v5 = vadd.f32 %v12720_v16, %v12719_v7  ;;  %12824 = vmatpush3.bf16.msra.mxu1 %v14388_v56  ;;  %v12722_v37 = vpop.f32.mrb[94].mxu1  ;;  %v14407_v56 = vld [vmem:[%s18752_s7 + $0x560] sm:$0xff]   ;;  %v14410_v7 = vld [vmem:[%s18752_s7 + $0x788] sm:$0xff]  }
 0x32b   : > { %v12723_v61 = vpop.f32.mrb[95].mxu1  ;;  %12837 = vmatprep.subr.bf16.mxu1 %v14391_v49  ;;  %v14408_v49 = vld [vmem:[%s18752_s7 + $0x520] sm:$0xff]   ;;  %v16509_v16 = vld [vmem:[#allocation2 + $0x8] sm:$0x88] }
 0x32c   : > { %12986 = vmatpush3.bf16.msra.mxu0 %v14390_v31  ;;  %v16445_v40 = vadd.f32 %v12721_v5, %v3694_v32  ;;  %v12724_v11 = vadd.f32 %v12723_v61, %v12722_v37  ;;  %v11977_v31 = vcombine.high %v16183_v8, %v3871_v9  ;;  %v12045_v59 = vcombine.high %v16509_v16, %v16497_v6  ;;  %v14412_v5 = vld [vmem:[%s18752_s7 + $0x528] sm:$0xff]  }
 0x32d   : > { %12987 = vmatprep.subr.bf16.mxu0 %v14393_v33  ;;  %4799 = vmatmul.mubr.bf16.vlgmr.msra.gmra.mrb[120].mxu1 %v4232_v2  ;;  %v14411_v33 = vld [vmem:[%s18752_s7 + $0x568] sm:$0xff]   ;;  %v16518_v32 = vcombine.low %v16405_v43, %v16398_v62  ;;  %v5750_v37 = vrot.slane %v16280_v12, 3  ;;  %v11976_v61 = vcombine.low %v16183_v8, %v3871_v9  ;;  %v14415_v43 = vld [vmem:[%s18752_s7 + $0x570] sm:$0xff]   ;;  %v14417_v2 = vld [vmem:[%s18752_s7 + $0x7d8] sm:$0xff]  }
 0x32e   : > { %v16452_v51 = vadd.f32 %v12724_v11, %v3697_v41  ;;  %4806 = vmatprep.mubr.bf16.mxu1 %v4304_v21  ;;  %12838 = vmatpush3.bf16.msra.mxu1 %v14392_v53  ;;  %v11902_v53 = vcombine.low %v16423_v23, %v16407_v45  ;;  %v5749_v62 = vrot.slane %v12045_v59, 3  ;;  %v14416_v8 = vld [vmem:[%s18752_s7 + $0x530] sm:$0xff]   ;;  %v14421_v41 = vld [vmem:[%s18752_s7 + $0x7e0] sm:$0xff]   ;;  %v14420_v21 = vld [vmem:[%s18752_s7 + $0x538] sm:$0xff]  }
 0x32f   : > { %12839 = vmatprep.subr.bf16.mxu1 %v14395_v46  ;;  %v4248_v45 = vshll.u32 %v16518_v32, 16  ;;  %v14418_v46 = vld [vmem:[%s18752_s7 + $0x798] sm:$0xff]   ;;  %v14447_v12 = vld [vmem:[%s18752_s7 + $0x6d0] sm:$0xff]  }
 0x330   : > { %12988 = vmatpush3.bf16.msra.mxu0 %v14394_v25  ;;  %v5751_v25 = vsel %vm5739_vm4, %v5749_v62, %v5750_v37  ;;  %v4253_v11 = vshll.u32 %v11902_v53, 16  ;;  %v4305_v9 = vshrl.u32 %v11902_v53, 16  ;;  %v14441_v62 = vld [vmem:[%s18752_s7 + $0x220] sm:$0xff]  }
 0x331   : > { %12989 = vmatprep.subr.bf16.mxu0 %v14397_v30  ;;  %v4250_v30 = vrot.slane %v4248_v45, 1  ;;  %v14448_v45 = vld [vmem:[%s18752_s7 + $0x690] sm:$0xff]  }
 0x332   : > { %12840 = vmatpush3.bf16.msra.mxu1 %v14396_v57  ;;  %v14423_v57 = vld [vmem:[%s18752_s7 + $0x240] sm:$0xff]  }
 0x333   : > { %12841 = vmatprep.subr.bf16.mxu1 %v14399_v10  ;;  %v4255_v10 = vrot.slane %v4253_v11, 1 }
 0x334   : > { %12990 = vmatpush3.bf16.msra.mxu0 %v14398_v36  ;;  %v4246_v36 = vshrl.u32 %v16518_v32, 16 }
 0x335   : > { %12991 = vmatprep.subr.bf16.mxu0 %v14401_v34  ;;  %4807 = vmatmul.mubr.bf16.gmra.mrb[124].mxu1 %v4301_v55  ;;  %v14427_v55 = vld [vmem:[%s18752_s7 + $0x248] sm:$0xff]  }
 0x336   : > { %12842 = vmatpush3.bf16.msra.mxu1 %v14400_v18  ;;  %4847 = vmatprep.mubr.bf16.mxu1 %v4268_v20  ;;  %v4251_v34 = vor.u32 %v4250_v30, %v4246_v36  ;;  %v14426_v18 = vld [vmem:[%s18752_s7 + $0x7a8] sm:$0xff]   ;;  %v14450_v30 = vld [vmem:[%s18752_s7 + $0x230] sm:$0xff]   ;;  %v14455_v36 = vld [vmem:[%s18752_s7 + $0x6e0] sm:$0xff]  }
 0x337   : > { %12843 = vmatprep.subr.bf16.mxu1 %v14403_v26  ;;  %v14428_v26 = vld [vmem:[%s18752_s7 + $0x208] sm:$0xff]  }
 0x338   : > { %12992 = vmatpush3.bf16.msra.mxu0 %v14402_v3  ;;  %v4256_v52 = vsel %vm4196_vm3, %v4251_v34, %v4255_v10  ;;  %v4310_v3 = vor.u32 %v4308_v13, %v16468_v48  ;;  %v14431_v48 = vld [vmem:[%s18752_s7 + $0x250] sm:$0xff]   ;;  %v5632_v20 = vld [vmem:[#allocation2 + $0x88] sm:$0x33]  ;;  %v14457_v34 = vld [vmem:[%s18752_s7 + $0x340] sm:$0xff]  }
 0x339   : > { %13033 = vmatprep.subr.bf16.mxu0 %v14405_v17  ;;  %v14430_v17 = vld [vmem:[%s18752_s7 + $0x7b0] sm:$0xff]   ;;  %v12052_v53 = vcombine.low %v5632_v20, %v5632_v20  ;;  %v14459_v13 = vld [vmem:[%s18752_s7 + $0x6e8] sm:$0xff]  }
 0x33a   : > { %12844 = vmatpush3.bf16.msra.mxu1 %v14404_v15  ;;  %v14433_v15 = vld [vmem:[%s18752_s7 + $0x7f8] sm:$0xff]  }
 0x33b   : > { %5513 = vmatmul.mubr.bf16.vlgmr.msra.gmra.mrb[176].mxu0 %v16156_v4  ;;  %12845 = vmatprep.subr.bf16.mxu1 %v14407_v56  ;;  %v14413_v4 = vld [vmem:[%s18752_s7 + $0x7d0] sm:$0xff]   ;;  %v12053_v56 = vcombine.high %v5632_v20, %v5632_v20 }
 0x33c   : > { %5520 = vmatprep.mubr.bf16.mxu0 %v11977_v31  ;;  %13034 = vmatpush3.bf16.msra.mxu0 %v14406_v50  ;;  %v14432_v50 = vld [vmem:[%s18752_s7 + $0x210] sm:$0xff]   ;;  %v4307_v31 = vor.u32 %v4305_v9, %v4255_v10  ;;  %v14454_v10 = vld [vmem:[%s18752_s7 + $0x238] sm:$0xff]  }
 0x33d   : > { %13035 = vmatprep.subr.bf16.mxu0 %v14409_v54  ;;  %v12044_v54 = vcombine.low %v16509_v16, %v16497_v6  ;;  %v14436_v6 = vld [vmem:[%s18752_s7 + $0x218] sm:$0xff]   ;;  %v5758_v16 = vrot.slane %v12053_v56, 3  ;;  %v14466_v56 = vld [vmem:[%s18752_s7 + $0x310] sm:$0xff]  }
 0x33e   : > { %12846 = vmatpush3.bf16.msra.mxu1 %v14408_v49  ;;  %v14434_v49 = vld [vmem:[%s18752_s7 + $0x7b8] sm:$0xff]  }
 0x33f   : > { %12847 = vmatprep.subr.bf16.mxu1 %v14411_v33  ;;  %v14437_v33 = vld [vmem:[%s18752_s7 + $0x6c0] sm:$0xff]   ;;  %v5746_v59 = vrot.slane %v12044_v54, 3 }
 0x340   : > { %13036 = vmatpush3.bf16.msra.mxu0 %v14410_v7  ;;  %v14435_v7 = vld [vmem:[%s18752_s7 + $0x258] sm:$0xff]  }
 0x341   : > { %13037 = vmatprep.subr.bf16.mxu0 %v14413_v4  ;;  %v5747_v4 = vrot.slane %v16365_v28, 3  ;;  %v14440_v28 = vld [vmem:[%s18752_s7 + $0x260] sm:$0xff]  }
 0x342   : > { %12848 = vmatpush3.bf16.msra.mxu1 %v14412_v5  ;;  %v14439_v5 = vld [vmem:[%s18752_s7 + $0x680] sm:$0xff]  }
 0x343   : > { %5521 = vmatmul.mubr.bf16.gmra.mrb[180].mxu0 %v11976_v61  ;;  %12849 = vmatprep.subr.bf16.mxu1 %v14415_v43  ;;  %v5759_v61 = vsel %vm5739_vm4, %v5750_v37, %v5758_v16  ;;  %v14443_v43 = vld [vmem:[%s18752_s7 + $0x688] sm:$0xff]   ;;  %v5756_v37 = vrot.slane %v12052_v53, 3  ;;  %v16726_v16 = vld [vmem:[#allocation2 + $0x58] sm:$0xff] }
 0x344   : > { %13038 = vmatpush3.bf16.msra.mxu0 %v14414_v0  ;;  %6041 = vmatprep.mubr.bf16.mxu0 %v5751_v25  ;;  %v5748_v0 = vsel %vm5739_vm4, %v5746_v59, %v5747_v4  ;;  %v14445_v25 = vld [vmem:[%s18752_s7 + $0x228] sm:$0xff]  }
 0x345   : > { %13039 = vmatprep.subr.bf16.mxu0 %v14417_v2  ;;  %v14444_v2 = vld [vmem:[%s18752_s7 + $0x268] sm:$0xff]   ;;  %v5757_v11 = vsel %vm5739_vm4, %v5747_v4, %v5756_v37  ;;  %v14474_v37 = vld [vmem:[%s18752_s7 + $0x320] sm:$0xff]  }
 0x346   : > { %12850 = vmatpush3.bf16.msra.mxu1 %v14416_v8  ;;  %v16639_v8 = vld [vmem:[#allocation2 + $0x38] sm:$0xff]  ;;  %v14475_v53 = vld [vmem:[%s18752_s7 + $0x9c8] sm:$0xff]  }
 0x347   : > { %12851 = vmatprep.subr.bf16.mxu1 %v14419_v42  ;;  %v14449_v42 = vld [vmem:[%s18752_s7 + $0x270] sm:$0xff]  }
 0x348   : > { %13040 = vmatpush3.bf16.msra.mxu0 %v14418_v46  ;;  %v16644_v46 = vld [vmem:[#allocation2 + $0x18] sm:$0xff] }
 0x349   : > { %13041 = vmatprep.subr.bf16.mxu0 %v14421_v41  ;;  %v14451_v41 = vld [vmem:[%s18752_s7 + $0x6d8] sm:$0xff]  }
 0x34a   : > { %12852 = vmatpush3.bf16.msra.mxu1 %v14420_v21  ;;  %v16655_v21 = vcombine.high %v16644_v46, %v16639_v8 }
 0x34b   : > { %12893 = vmatprep.subr.bf16.mxu1 %v14423_v57  ;;  %v14453_v57 = vld [vmem:[%s18752_s7 + $0x278] sm:$0xff]  }
 0x34c   : > { %13042 = vmatpush3.bf16.msra.mxu0 %v14422_v38  ;;  %v14452_v38 = vld [vmem:[%s18752_s7 + $0x698] sm:$0xff]  }
 0x34d   : > { %13043 = vmatprep.subr.bf16.mxu0 %v14425_v29  ;;  %4848 = vmatmul.mubr.bf16.vlgmr.msra.gmra.mrb[128].mxu1 %v4256_v52  ;;  %v14456_v29 = vld [vmem:[%s18752_s7 + $0x6a0] sm:$0xff]   ;;  %v14461_v52 = vld [vmem:[%s18752_s7 + $0x348] sm:$0xff]  }
 0x34e   : > { %4855 = vmatprep.mubr.bf16.mxu1 %v4310_v3  ;;  %12894 = vmatpush3.bf16.msra.mxu1 %v14424_v24  ;;  %v3868_v24 = vld [vmem:[#allocation2 + $0x60] sm:$0x77] }
 0x34f   : > { %12895 = vmatprep.subr.bf16.mxu1 %v14427_v55  ;;  %v14460_v55 = vld [vmem:[%s18752_s7 + $0x6a8] sm:$0xff]   ;;  %v11971_v3 = vcombine.high %v16144_v35, %v3868_v24 }
 0x350   : > { %13044 = vmatpush3.bf16.msra.mxu0 %v14426_v18  ;;  %v14458_v18 = vld [vmem:[%s18752_s7 + $0x300] sm:$0xff]  }
 0x351   : > { %13045 = vmatprep.subr.bf16.mxu0 %v14429_v27  ;;  %v14463_v27 = vld [vmem:[%s18752_s7 + $0x6f0] sm:$0xff]  }
 0x352   : > { %12896 = vmatpush3.bf16.msra.mxu1 %v14428_v26  ;;  %v14462_v26 = vld [vmem:[%s18752_s7 + $0x308] sm:$0xff]  }
 0x353   : > { %12897 = vmatprep.subr.bf16.mxu1 %v14431_v48  ;;  %v14465_v48 = vld [vmem:[%s18752_s7 + $0x350] sm:$0xff]  }
 0x354   : > { %13046 = vmatpush3.bf16.msra.mxu0 %v14430_v17  ;;  %v14464_v17 = vld [vmem:[%s18752_s7 + $0x6b0] sm:$0xff]  }
 0x355   : > { %13047 = vmatprep.subr.bf16.mxu0 %v14433_v15  ;;  %4856 = vmatmul.mubr.bf16.gmra.mrb[132].mxu1 %v4307_v31  ;;  %v11970_v31 = vcombine.low %v16144_v35, %v3868_v24  ;;  %v14471_v35 = vld [vmem:[%s18752_s7 + $0x9c0] sm:$0xff]  }
 0x356   : > { %12898 = vmatpush3.bf16.msra.mxu1 %v14432_v50  ;;  %5365 = vmatprep.mubr.bf16.mxu1 %v16148_v19  ;;  %v14442_v19 = vld [vmem:[%s18752_s7 + $0x6c8] sm:$0xff]  }
 0x357   : > { %12899 = vmatprep.subr.bf16.mxu1 %v14435_v7  ;;  %v14469_v7 = vld [vmem:[%s18752_s7 + $0x358] sm:$0xff]  }
 0x358   : > { %13048 = vmatpush3.bf16.msra.mxu0 %v14434_v49  ;;  %v14468_v49 = vld [vmem:[%s18752_s7 + $0x6b8] sm:$0xff]  }
 0x359   : > { %13089 = vmatprep.subr.bf16.mxu0 %v14437_v33  ;;  %v16718_v33 = vld [vmem:[#allocation2 + $0x78] sm:$0xff] }
 0x35a   : > { %12900 = vmatpush3.bf16.msra.mxu1 %v14436_v6 }
 0x35b   : > { %6042 = vmatmul.mubr.bf16.vlgmr.msra.gmra.mrb[184].mxu0 %v5748_v0  ;;  %12901 = vmatprep.subr.bf16.mxu1 %v14440_v28  ;;  %v16737_v28 = vcombine.high %v16726_v16, %v16718_v33  ;;  %v14473_v0 = vld [vmem:[%s18752_s7 + $0x360] sm:$0xff]  }
 0x35c   : > { %6049 = vmatprep.mubr.bf16.mxu0 %v5759_v61  ;;  %13090 = vmatpush3.bf16.msra.mxu0 %v14439_v5  ;;  %v5558_v5 = vld [vmem:[#allocation2 + $0x78] sm:$0x77]  ;;  %v6609_v61 = vshll.u32 %v16655_v21, 16 }
 0x35d   : > { %13091 = vmatprep.subr.bf16.mxu0 %v14442_v19  ;;  %v14472_v19 = vld [vmem:[%s18752_s7 + $0x980] sm:$0xff]  }
 0x35e   : > { %12902 = vmatpush3.bf16.msra.mxu1 %v14441_v62 }
 0x35f   : > { %12903 = vmatprep.subr.bf16.mxu1 %v14444_v2 }
 0x360   : > { %13092 = vmatpush3.bf16.msra.mxu0 %v14443_v43  ;;  %v12093_v43 = vcombine.high %v16726_v16, %v5558_v5 }
 0x361   : > { %13093 = vmatprep.subr.bf16.mxu0 %v14447_v12 }
 0x362   : > { %12904 = vmatpush3.bf16.msra.mxu1 %v14445_v25  ;;  %v6614_v25 = vshll.u32 %v16737_v28, 16 }
 0x363   : > { %6050 = vmatmul.mubr.bf16.gmra.mrb[188].mxu0 %v5757_v11  ;;  %12905 = vmatprep.subr.bf16.mxu1 %v14449_v42  ;;  %v14479_v11 = vld [vmem:[%s18752_s7 + $0x9d0] sm:$0xff]  }
 0x364   : > { %13094 = vmatpush3.bf16.msra.mxu0 %v14448_v45  ;;  %6371 = vmatprep.mubr.bf16.mxu0 %v16655_v21  ;;  %v14476_v45 = vld [vmem:[%s18752_s7 + $0x988] sm:$0xff]  }
 0x365   : > { %13095 = vmatprep.subr.bf16.mxu0 %v14451_v41 }
 0x366   : > { %12906 = vmatpush3.bf16.msra.mxu1 %v14450_v30  ;;  %v6611_v30 = vrot.slane %v6609_v61, 1  ;;  %v14498_v61 = vld [vmem:[%s18752_s7 + $0x710] sm:$0xff]  }
 0x367   : > { %12907 = vmatprep.subr.bf16.mxu1 %v14453_v57  ;;  %v14478_v57 = vld [vmem:[%s18752_s7 + $0x328] sm:$0xff]  }
 0x368   : > { %13096 = vmatpush3.bf16.msra.mxu0 %v14452_v38 }
 0x369   : > { %13097 = vmatprep.subr.bf16.mxu0 %v14455_v36  ;;  %v6607_v36 = vshrl.u32 %v16655_v21, 16 }
 0x36a   : > { %12908 = vmatpush3.bf16.msra.mxu1 %v14454_v10  ;;  %v14480_v10 = vld [vmem:[%s18752_s7 + $0x990] sm:$0xff]  }
 0x36b   : > { %12949 = vmatprep.subr.bf16.mxu1 %v14457_v34  ;;  %v14481_v34 = vld [vmem:[%s18752_s7 + $0x370] sm:$0xff]  }
 0x36c   : > { %13098 = vmatpush3.bf16.msra.mxu0 %v14456_v29  ;;  %v12092_v29 = vcombine.low %v16726_v16, %v5558_v5  ;;  %v14496_v5 = vld [vmem:[%s18752_s7 + $0x9b0] sm:$0xff]  }
 0x36d   : > { %13099 = vmatprep.subr.bf16.mxu0 %v14459_v13  ;;  %5366 = vmatmul.mubr.bf16.vlgmr.msra.gmra.mrb[136].mxu1 %v16228_v22  ;;  %v14467_v22 = vld [vmem:[%s18752_s7 + $0x6f8] sm:$0xff]  }
 0x36e   : > { %5373 = vmatprep.mubr.bf16.mxu1 %v11971_v3  ;;  %12950 = vmatpush3.bf16.msra.mxu1 %v14458_v18  ;;  %v14483_v13 = vld [vmem:[%s18752_s7 + $0x9d8] sm:$0xff]   ;;  %v14482_v18 = vld [vmem:[%s18752_s7 + $0x330] sm:$0xff]   ;;  %v14487_v3 = vld [vmem:[%s18752_s7 + $0x9e0] sm:$0xff]  }
 0x36f   : > { %12951 = vmatprep.subr.bf16.mxu1 %v14461_v52  ;;  %v14485_v52 = vld [vmem:[%s18752_s7 + $0x378] sm:$0xff]  }
 0x370   : > { %13100 = vmatpush3.bf16.msra.mxu0 %v14460_v55  ;;  %v12741_v20 = vpop.f32.mrb[96].mxu1  ;;  %v14484_v55 = vld [vmem:[%s18752_s7 + $0x998] sm:$0xff]  }
 0x371   : > { %13101 = vmatprep.subr.bf16.mxu0 %v14463_v27  ;;  %v12742_v15 = vpop.f32.mrb[97].mxu1  ;;  %v14486_v27 = vld [vmem:[%s18752_s7 + $0x338] sm:$0xff]  }
 0x372   : > { %v12743_v9 = vadd.f32 %v12742_v15, %v12741_v20  ;;  %12952 = vmatpush3.bf16.msra.mxu1 %v14462_v26  ;;  %v12744_v50 = vpop.f32.mrb[98].mxu1  ;;  %v14488_v26 = vld [vmem:[%s18752_s7 + $0x9a0] sm:$0xff]   ;;  %v3870_v20 = vld [vmem:[#allocation2 + $0x70] sm:$0x77] }
 0x373   : > { %v12745_v54 = vpop.f32.mrb[99].mxu1  ;;  %12953 = vmatprep.subr.bf16.mxu1 %v14465_v48  ;;  %v14491_v48 = vld [vmem:[%s18752_s7 + $0x9e8] sm:$0xff]   ;;  %v16819_v15 = vld [vmem:[#allocation2 + $0x60] sm:$0xff] }
 0x374   : > { %13102 = vmatpush3.bf16.msra.mxu0 %v14464_v17  ;;  %v16721_v4 = vadd.f32 %v12743_v9, %v16393_v58  ;;  %v12746_v6 = vadd.f32 %v12745_v54, %v12744_v50  ;;  %v14470_v58 = vld [vmem:[%s18752_s7 + $0x318] sm:$0xff]   ;;  %v14489_v17 = vld [vmem:[%s18752_s7 + $0x740] sm:$0xff]   ;;  %v14492_v9 = vld [vmem:[%s18752_s7 + $0x9a8] sm:$0xff]  }
 0x375   : > { %13103 = vmatprep.subr.bf16.mxu0 %v14467_v22  ;;  %5374 = vmatmul.mubr.bf16.gmra.mrb[140].mxu1 %v11970_v31  ;;  %v14490_v22 = vld [vmem:[%s18752_s7 + $0x700] sm:$0xff]   ;;  %v14493_v50 = vld [vmem:[%s18752_s7 + $0x748] sm:$0xff]   ;;  %v14495_v54 = vld [vmem:[%s18752_s7 + $0x9f0] sm:$0xff]  }
 0x376   : > { %v16729_v59 = vadd.f32 %v12746_v6, %v16400_v63  ;;  %12954 = vmatpush3.bf16.msra.mxu1 %v14466_v56  ;;  %5463 = vmatprep.mubr.bf16.mxu1 %v16418_v47  ;;  %v16744_v63 = vcombine.low %v16644_v46, %v16639_v8  ;;  %v14477_v46 = vld [vmem:[%s18752_s7 + $0x368] sm:$0xff]   ;;  %v11975_v56 = vcombine.high %v16423_v23, %v3870_v20  ;;  %v16831_v31 = vld [vmem:[#allocation2 + $0x20] sm:$0xff] }
 0x377   : > { %12955 = vmatprep.subr.bf16.mxu1 %v14469_v7  ;;  %v12132_v7 = vcombine.low %v16726_v16, %v16718_v33 }
 0x378   : > { %13104 = vmatpush3.bf16.msra.mxu0 %v14468_v49  ;;  %v12747_v47 = vpop.f32.mrb[100].mxu1  ;;  %v16833_v49 = vld [vmem:[#allocation2 + $0x40] sm:$0xff] }
 0x379   : > { %13145 = vmatprep.subr.bf16.mxu0 %v14471_v35  ;;  %v12748_v62 = vpop.f32.mrb[101].mxu1  ;;  %v12047_v6 = vcombine.high %v16833_v49, %v16819_v15  ;;  %v14494_v35 = vld [vmem:[%s18752_s7 + $0x708] sm:$0xff]  }
 0x37a   : > { %v12749_v2 = vadd.f32 %v12748_v62, %v12747_v47  ;;  %12956 = vmatpush3.bf16.msra.mxu1 %v14470_v58  ;;  %v12750_v12 = vpop.f32.mrb[102].mxu1  ;;  %v16843_v58 = vld [vmem:[#allocation2] sm:$0x88]  ;;  %v14499_v47 = vld [vmem:[%s18752_s7 + $0x9f8] sm:$0xff]   ;;  %v11974_v62 = vcombine.low %v16423_v23, %v3870_v20  ;;  %v12046_v20 = vcombine.low %v16833_v49, %v16819_v15 }
 0x37b   : > { %6372 = vmatmul.mubr.bf16.vlgmr.msra.gmra.mrb[192].mxu0 %v16744_v63  ;;  %v12751_v8 = vpop.f32.mrb[103].mxu1  ;;  %12957 = vmatprep.subr.bf16.mxu1 %v14473_v0  ;;  %v12043_v33 = vcombine.high %v16843_v58, %v16831_v31  ;;  %v16857_v0 = vrot.slane %v12047_v6, 3  ;;  %v14520_v15 = vld [vmem:[%s18752_s7 + $0x8a0] sm:$0xff]  }
 0x37c   : > { %6379 = vmatprep.mubr.bf16.mxu0 %v12093_v43  ;;  %13146 = vmatpush3.bf16.msra.mxu0 %v14472_v19  ;;  %v16766_v42 = vadd.f32 %v12749_v2, %v16445_v40  ;;  %v12752_v41 = vadd.f32 %v12751_v8, %v12750_v12  ;;  %v16778_v40 = vrot.slane %v6614_v25, 1  ;;  %v6597_v19 = vshll.u32 %v16744_v63, 16  ;;  %v14500_v2 = vld [vmem:[%s18752_s7 + $0x9b8] sm:$0xff]   ;;  %v14503_v25 = vld [vmem:[%s18752_s7 + $0x8c0] sm:$0xff]  }
 0x37d   : > { %13147 = vmatprep.subr.bf16.mxu0 %v14475_v53  ;;  %v6602_v53 = vshll.u32 %v12132_v7, 16  ;;  %v5743_v43 = vrot.slane %v12043_v33, 3  ;;  %v14501_v12 = vld [vmem:[%s18752_s7 + $0x758] sm:$0xff]   ;;  %v6595_v8 = vshrl.u32 %v16744_v63, 16  ;;  %v14523_v6 = vld [vmem:[%s18752_s7 + $0x600] sm:$0xff]  }
 0x37e   : > { %v16772_v38 = vadd.f32 %v12752_v41, %v16452_v51  ;;  %12958 = vmatpush3.bf16.msra.mxu1 %v14474_v37  ;;  %v6612_v51 = vor.u32 %v6611_v30, %v6607_v36  ;;  %v6599_v37 = vrot.slane %v6597_v19, 1  ;;  %v14504_v30 = vld [vmem:[%s18752_s7 + $0x880] sm:$0xff]   ;;  %v14507_v36 = vld [vmem:[%s18752_s7 + $0x8c8] sm:$0xff]  }
 0x37f   : > { %12959 = vmatprep.subr.bf16.mxu1 %v14477_v46  ;;  %v5745_v23 = vsel %vm5739_vm4, %v5743_v43, %v16857_v0  ;;  %v14502_v46 = vld [vmem:[%s18752_s7 + $0x718] sm:$0xff]   ;;  %v16970_v43 = vld [vmem:[#allocation2 + $0x30] sm:$0xff] }
 0x380   : > { %13148 = vmatpush3.bf16.msra.mxu0 %v14476_v45  ;;  %v6617_v24 = vsel %vm4196_vm3, %v6612_v51, %v16778_v40  ;;  %v6604_v45 = vrot.slane %v6602_v53, 1  ;;  %v6600_v41 = vor.u32 %v6599_v37, %v6595_v8  ;;  %v14508_v51 = vld [vmem:[%s18752_s7 + $0x888] sm:$0xff]   ;;  %v14529_v53 = vld [vmem:[%s18752_s7 + $0x8b0] sm:$0xff]   ;;  %v14534_v37 = vld [vmem:[%s18752_s7 + $0x8b8] sm:$0xff]  }
 0x381   : > { %13149 = vmatprep.subr.bf16.mxu0 %v14479_v11  ;;  %v6627_v11 = vshrl.u32 %v16737_v28, 16  ;;  %v14506_v28 = vld [vmem:[%s18752_s7 + $0x720] sm:$0xff]  }
 0x382   : > { %12960 = vmatpush3.bf16.msra.mxu1 %v14478_v57  ;;  %v14505_v57 = vld [vmem:[%s18752_s7 + $0x760] sm:$0xff]  }
 0x383   : > { %6380 = vmatmul.mubr.bf16.gmra.mrb[196].mxu0 %v12092_v29  ;;  %12961 = vmatprep.subr.bf16.mxu1 %v14481_v34  ;;  %v6629_v29 = vor.u32 %v6627_v11, %v16778_v40  ;;  %v14509_v34 = vld [vmem:[%s18752_s7 + $0x768] sm:$0xff]   ;;  %v14511_v40 = vld [vmem:[%s18752_s7 + $0x8d0] sm:$0xff]   ;;  %v14538_v11 = vld [vmem:[%s18752_s7 + $0xa80] sm:$0xff]  }
 0x384   : > { %13150 = vmatpush3.bf16.msra.mxu0 %v14480_v10  ;;  %6911 = vmatprep.mubr.bf16.mxu0 %v6617_v24  ;;  %v6605_v10 = vsel %vm4196_vm3, %v6600_v41, %v6604_v45  ;;  %v6624_v24 = vshrl.u32 %v12132_v7, 16  ;;  %v6407_v41 = vld [vmem:[#allocation2 + $0x78] sm:$0x77] }
 0x385   : > { %13151 = vmatprep.subr.bf16.mxu0 %v14483_v13  ;;  %v14510_v13 = vld [vmem:[%s18752_s7 + $0x728] sm:$0xff]  }
 0x386   : > { %12962 = vmatpush3.bf16.msra.mxu1 %v14482_v18  ;;  %v14512_v18 = vld [vmem:[%s18752_s7 + $0x890] sm:$0xff]  }
 0x387   : > { %12963 = vmatprep.subr.bf16.mxu1 %v14485_v52  ;;  %v14513_v52 = vld [vmem:[%s18752_s7 + $0x770] sm:$0xff]  }
 0x388   : > { %13152 = vmatpush3.bf16.msra.mxu0 %v14484_v55  ;;  %v6626_v55 = vor.u32 %v6624_v24, %v6604_v45  ;;  %v14537_v45 = vld [vmem:[%s18752_s7 + $0xac0] sm:$0xff]   ;;  %v17025_v24 = vld [vmem:[#allocation2 + $0x8] sm:$0x88] }
 0x389   : > { %13153 = vmatprep.subr.bf16.mxu0 %v14487_v3  ;;  %v14515_v3 = vld [vmem:[%s18752_s7 + $0x8d8] sm:$0xff]  }
 0x38a   : > { %12964 = vmatpush3.bf16.msra.mxu1 %v14486_v27  ;;  %v14514_v27 = vld [vmem:[%s18752_s7 + $0x730] sm:$0xff]  }
 0x38b   : > { %13005 = vmatprep.subr.bf16.mxu1 %v14489_v17  ;;  %v14516_v17 = vld [vmem:[%s18752_s7 + $0x898] sm:$0xff]  }
 0x38c   : > { %13154 = vmatpush3.bf16.msra.mxu0 %v14488_v26  ;;  %v5631_v26 = vld [vmem:[#allocation2 + $0x80] sm:$0x33] }
 0x38d   : > { %13155 = vmatprep.subr.bf16.mxu0 %v14491_v48  ;;  %5464 = vmatmul.mubr.bf16.vlgmr.msra.gmra.mrb[144].mxu1 %v16518_v32  ;;  %v14497_v32 = vld [vmem:[%s18752_s7 + $0x750] sm:$0xff]   ;;  %v14517_v48 = vld [vmem:[%s18752_s7 + $0x778] sm:$0xff]   ;;  %v12050_v33 = vcombine.low %v5631_v26, %v5631_v26 }
 0x38e   : > { %5471 = vmatprep.mubr.bf16.mxu1 %v11975_v56  ;;  %13006 = vmatpush3.bf16.msra.mxu1 %v14490_v22  ;;  %v14519_v22 = vld [vmem:[%s18752_s7 + $0x8e0] sm:$0xff]  }
 0x38f   : > { %13007 = vmatprep.subr.bf16.mxu1 %v14493_v50  ;;  %v14518_v50 = vld [vmem:[%s18752_s7 + $0x738] sm:$0xff]   ;;  %v14521_v56 = vld [vmem:[%s18752_s7 + $0x640] sm:$0xff]  }
 0x390   : > { %13156 = vmatpush3.bf16.msra.mxu0 %v14492_v9  ;;  %v12051_v9 = vcombine.high %v5631_v26, %v5631_v26  ;;  %v12168_v26 = vcombine.low %v16726_v16, %v6407_v41 }
 0x391   : > { %13157 = vmatprep.subr.bf16.mxu0 %v14495_v54  ;;  %v5741_v54 = vrot.slane %v12046_v20, 3  ;;  %v14549_v20 = vld [vmem:[%s18752_s7 + $0xad8] sm:$0xff]  }
 0x392   : > { %13008 = vmatpush3.bf16.msra.mxu1 %v14494_v35  ;;  %v5754_v49 = vrot.slane %v12051_v9, 3  ;;  %v14525_v35 = vld [vmem:[%s18752_s7 + $0x8a8] sm:$0xff]  }
 0x393   : > { %13009 = vmatprep.subr.bf16.mxu1 %v14497_v32  ;;  %v14528_v32 = vld [vmem:[%s18752_s7 + $0x8f0] sm:$0xff]  }
 0x394   : > { %13158 = vmatpush3.bf16.msra.mxu0 %v14496_v5  ;;  %v5755_v19 = vsel %vm5739_vm4, %v16857_v0, %v5754_v49  ;;  %v14533_v0 = vld [vmem:[%s18752_s7 + $0x8f8] sm:$0xff]  }
 0x395   : > { %13159 = vmatprep.subr.bf16.mxu0 %v14499_v47  ;;  %5472 = vmatmul.mubr.bf16.gmra.mrb[148].mxu1 %v11974_v62  ;;  %v14527_v47 = vld [vmem:[%s18752_s7 + $0x608] sm:$0xff]   ;;  %v5752_v62 = vrot.slane %v12050_v33, 3 }
 0x396   : > { %13010 = vmatpush3.bf16.msra.mxu1 %v14498_v61  ;;  %5992 = vmatprep.mubr.bf16.mxu1 %v5745_v23  ;;  %v14531_v61 = vld [vmem:[%s18752_s7 + $0x650] sm:$0xff]  }
 0x397   : > { %13011 = vmatprep.subr.bf16.mxu1 %v14501_v12  ;;  %v16975_v12 = vld [vmem:[#allocation2 + $0x10] sm:$0xff]  ;;  %v5753_v23 = vsel %vm5739_vm4, %v5741_v54, %v5752_v62 }
 0x398   : > { %13160 = vmatpush3.bf16.msra.mxu0 %v14500_v2  ;;  %v14532_v2 = vld [vmem:[%s18752_s7 + $0x610] sm:$0xff]   ;;  %v16986_v8 = vcombine.high %v16975_v12, %v16970_v43 }
 0x399   : > { %13201 = vmatprep.subr.bf16.mxu0 %v14503_v25  ;;  %v14535_v25 = vld [vmem:[%s18752_s7 + $0x658] sm:$0xff]  }
 0x39a   : > { %13012 = vmatpush3.bf16.msra.mxu1 %v14502_v46  ;;  %v14536_v46 = vld [vmem:[%s18752_s7 + $0x618] sm:$0xff]  }
 0x39b   : > { %6912 = vmatmul.mubr.bf16.vlgmr.msra.gmra.mrb[200].mxu0 %v6605_v10  ;;  %13013 = vmatprep.subr.bf16.mxu1 %v14505_v57  ;;  %v14539_v57 = vld [vmem:[%s18752_s7 + $0x660] sm:$0xff]   ;;  %v12169_v10 = vcombine.high %v16726_v16, %v6407_v41  ;;  %v14559_v41 = vld [vmem:[%s18752_s7 + $0x948] sm:$0xff]  }
 0x39c   : > { %6919 = vmatprep.mubr.bf16.mxu0 %v6629_v29  ;;  %13202 = vmatpush3.bf16.msra.mxu0 %v14504_v30  ;;  %v16998_v30 = vld [vmem:[#allocation2 + $0x68] sm:$0xff] }
 0x39d   : > { %13203 = vmatprep.subr.bf16.mxu0 %v14507_v36  ;;  %v14541_v36 = vld [vmem:[%s18752_s7 + $0xac8] sm:$0xff]  }
 0x39e   : > { %13014 = vmatpush3.bf16.msra.mxu1 %v14506_v28  ;;  %v17007_v29 = vld [vmem:[#allocation2 + $0x28] sm:$0xff] }
 0x39f   : > { %13015 = vmatprep.subr.bf16.mxu1 %v14509_v34  ;;  %v17009_v28 = vld [vmem:[#allocation2 + $0x48] sm:$0xff] }
 0x3a0   : > { %13204 = vmatpush3.bf16.msra.mxu0 %v14508_v51  ;;  %v14540_v51 = vld [vmem:[%s18752_s7 + $0x620] sm:$0xff]   ;;  %v17017_v34 = vcombine.high %v17009_v28, %v16998_v30 }
 0x3a1   : > { %13205 = vmatprep.subr.bf16.mxu0 %v14511_v40  ;;  %v14542_v40 = vld [vmem:[%s18752_s7 + $0xa88] sm:$0xff]  }
 0x3a2   : > { %13016 = vmatpush3.bf16.msra.mxu1 %v14510_v13  ;;  %v14543_v13 = vld [vmem:[%s18752_s7 + $0x668] sm:$0xff]  }
 0x3a3   : > { %6920 = vmatmul.mubr.bf16.gmra.mrb[204].mxu0 %v6626_v55  ;;  %13017 = vmatprep.subr.bf16.mxu1 %v14513_v52  ;;  %v14544_v55 = vld [vmem:[%s18752_s7 + $0x628] sm:$0xff]   ;;  %v7362_v52 = vrot.slane %v17017_v34, 3 }
 0x3a4   : > { %13206 = vmatpush3.bf16.msra.mxu0 %v14512_v18  ;;  %7219 = vmatprep.mubr.bf16.mxu0 %v16655_v21  ;;  %v12042_v21 = vcombine.low %v16843_v58, %v16831_v31  ;;  %v14524_v31 = vld [vmem:[%s18752_s7 + $0x8e8] sm:$0xff]   ;;  %v17032_v18 = vcombine.high %v17025_v24, %v17007_v29 }
 0x3a5   : > { %13207 = vmatprep.subr.bf16.mxu0 %v14515_v3  ;;  %v14526_v58 = vld [vmem:[%s18752_s7 + $0x648] sm:$0xff]   ;;  %v14546_v3 = vld [vmem:[%s18752_s7 + $0xa90] sm:$0xff]  }
 0x3a6   : > { %13018 = vmatpush3.bf16.msra.mxu1 %v14514_v27  ;;  %v5740_v7 = vrot.slane %v12042_v21, 3 }
 0x3a7   : > { %13019 = vmatprep.subr.bf16.mxu1 %v14517_v48  ;;  %v14547_v48 = vld [vmem:[%s18752_s7 + $0x670] sm:$0xff]  }
 0x3a8   : > { %13208 = vmatpush3.bf16.msra.mxu0 %v14516_v17  ;;  %v5742_v5 = vsel %vm5739_vm4, %v5740_v7, %v5741_v54  ;;  %v7361_v17 = vrot.slane %v17032_v18, 3  ;;  %v14551_v54 = vld [vmem:[%s18752_s7 + $0x678] sm:$0xff]   ;;  %v14553_v7 = vld [vmem:[%s18752_s7 + $0xae0] sm:$0xff]  }
 0x3a9   : > { %13209 = vmatprep.subr.bf16.mxu0 %v14519_v22 }
 0x3aa   : > { %13020 = vmatpush3.bf16.msra.mxu1 %v14518_v50  ;;  %v7363_v16 = vsel %vm5739_vm4, %v7361_v17, %v7362_v52  ;;  %v14548_v50 = vld [vmem:[%s18752_s7 + $0x630] sm:$0xff]   ;;  %v17124_v17 = vcombine.low %v17009_v28, %v16998_v30 }
 0x3ab   : > { %13061 = vmatprep.subr.bf16.mxu1 %v14521_v56  ;;  %v14550_v56 = vld [vmem:[%s18752_s7 + $0xa98] sm:$0xff]   ;;  %v14564_v30 = vld [vmem:[%s18752_s7 + $0x910] sm:$0xff]  }
 0x3ac   : > { %13210 = vmatpush3.bf16.msra.mxu0 %v14520_v15 }
 0x3ad   : > { %13211 = vmatprep.subr.bf16.mxu0 %v14524_v31  ;;  %5993 = vmatmul.mubr.bf16.vlgmr.msra.gmra.mrb[152].mxu1 %v5742_v5  ;;  %v14555_v5 = vld [vmem:[%s18752_s7 + $0x940] sm:$0xff]  }
 0x3ae   : > { %6000 = vmatprep.mubr.bf16.mxu1 %v5755_v19  ;;  %13062 = vmatpush3.bf16.msra.mxu1 %v14523_v6  ;;  %v17077_v19 = vld [vmem:[#allocation2 + $0x50] sm:$0xff] }
 0x3af   : > { %13063 = vmatprep.subr.bf16.mxu1 %v14526_v58  ;;  %v17069_v58 = vld [vmem:[#allocation2 + $0x70] sm:$0xff] }
 0x3b0   : > { %13212 = vmatpush3.bf16.msra.mxu0 %v14525_v35  ;;  %v14552_v35 = vld [vmem:[%s18752_s7 + $0x638] sm:$0xff]   ;;  %v17084_v62 = vcombine.high %v17077_v19, %v17069_v58 }
 0x3b1   : > { %13213 = vmatprep.subr.bf16.mxu0 %v14528_v32 }
 0x3b2   : > { %13064 = vmatpush3.bf16.msra.mxu1 %v14527_v47  ;;  %v14557_v47 = vld [vmem:[%s18752_s7 + $0xae8] sm:$0xff]  }
 0x3b3   : > { %13065 = vmatprep.subr.bf16.mxu1 %v14531_v61  ;;  %v5557_v61 = vld [vmem:[#allocation2 + $0x70] sm:$0x77] }
 0x3b4   : > { %13214 = vmatpush3.bf16.msra.mxu0 %v14529_v53 }
 0x3b5   : > { %13215 = vmatprep.subr.bf16.mxu0 %v14533_v0  ;;  %6001 = vmatmul.mubr.bf16.gmra.mrb[156].mxu1 %v5753_v23  ;;  %v17091_v23 = vcombine.low %v16975_v12, %v16970_v43  ;;  %v12091_v43 = vcombine.high %v17077_v19, %v5557_v61  ;;  %v14561_v12 = vld [vmem:[%s18752_s7 + $0xaf0] sm:$0xff]  }
 0x3b6   : > { %13066 = vmatpush3.bf16.msra.mxu1 %v14532_v2  ;;  %6322 = vmatprep.mubr.bf16.mxu1 %v16986_v8 }
 0x3b7   : > { %13067 = vmatprep.subr.bf16.mxu1 %v14535_v25  ;;  %v14556_v25 = vld [vmem:[%s18752_s7 + $0x900] sm:$0xff]  }
 0x3b8   : > { %13216 = vmatpush3.bf16.msra.mxu0 %v14534_v37 }
 0x3b9   : > { %13257 = vmatprep.subr.bf16.mxu0 %v14537_v45 }
 0x3ba   : > { %13068 = vmatpush3.bf16.msra.mxu1 %v14536_v46  ;;  %v14558_v46 = vld [vmem:[%s18752_s7 + $0xaa8] sm:$0xff]  }
 0x3bb   : > { %7220 = vmatmul.mubr.bf16.vlgmr.msra.gmra.mrb[208].mxu0 %v16744_v63  ;;  %13069 = vmatprep.subr.bf16.mxu1 %v14539_v57  ;;  %v14545_v63 = vld [vmem:[%s18752_s7 + $0xad0] sm:$0xff]  }
 0x3bc   : > { %7227 = vmatprep.mubr.bf16.mxu0 %v12169_v10  ;;  %13258 = vmatpush3.bf16.msra.mxu0 %v14538_v11  ;;  %v6585_v11 = vshll.u32 %v16986_v8, 16 }
 0x3bd   : > { %13259 = vmatprep.subr.bf16.mxu0 %v14541_v36 }
 0x3be   : > { %13070 = vmatpush3.bf16.msra.mxu1 %v14540_v51  ;;  %v6590_v51 = vshll.u32 %v17084_v62, 16 }
 0x3bf   : > { %13071 = vmatprep.subr.bf16.mxu1 %v14543_v13 }
 0x3c0   : > { %13260 = vmatpush3.bf16.msra.mxu0 %v14542_v40  ;;  %v12769_v27 = vpop.f32.mrb[104].mxu1 }
 0x3c1   : > { %13261 = vmatprep.subr.bf16.mxu0 %v14545_v63  ;;  %v12770_v22 = vpop.f32.mrb[105].mxu1 }
 0x3c2   : > { %v12771_v9 = vadd.f32 %v12770_v22, %v12769_v27  ;;  %13072 = vmatpush3.bf16.msra.mxu1 %v14544_v55  ;;  %v12772_v21 = vpop.f32.mrb[106].mxu1  ;;  %v6587_v27 = vrot.slane %v6585_v11, 1 }
 0x3c3   : > { %7228 = vmatmul.mubr.bf16.gmra.mrb[212].mxu0 %v12168_v26  ;;  %v12773_v15 = vpop.f32.mrb[107].mxu1  ;;  %13073 = vmatprep.subr.bf16.mxu1 %v14547_v48  ;;  %v17120_v26 = vld [vmem:[#allocation2 + $0x88] sm:$0x33] }
 0x3c4   : > { %13262 = vmatpush3.bf16.msra.mxu0 %v14546_v3  ;;  %7653 = vmatprep.mubr.bf16.mxu0 %v7363_v16  ;;  %v3833_v31 = vadd.f32 %v12771_v9, %v16721_v4  ;;  %v12774_v49 = vadd.f32 %v12773_v15, %v12772_v21  ;;  %v14554_v4 = vld [vmem:[%s18752_s7 + $0xaa0] sm:$0xff]   ;;  %v14562_v3 = vld [vmem:[%s18752_s7 + $0xab0] sm:$0xff]   ;;  %v14565_v9 = vld [vmem:[%s18752_s7 + $0xaf8] sm:$0xff]   ;;  %v6583_v16 = vshrl.u32 %v16986_v8, 16  ;;  %v12213_v28 = vcombine.high %v17120_v26, %v17120_v26 }
 0x3c5   : > { %13263 = vmatprep.subr.bf16.mxu0 %v14549_v20 }
 0x3c6   : > { %v3836_v6 = vadd.f32 %v12774_v49, %v16729_v59  ;;  %13074 = vmatpush3.bf16.msra.mxu1 %v14548_v50  ;;  %v3847_v32 = vmax.f32 %v3833_v31, 0.0  ;;  %v17132_v50 = vrot.slane %v6590_v51, 1  ;;  %v6588_v31 = vor.u32 %v6587_v27, %v6583_v16  ;;  %v14566_v49 = vld [vmem:[%s18752_s7 + $0xab8] sm:$0xff]   ;;  %v14576_v51 = vld [vmem:[%s18752_s7 + $0x968] sm:$0xff]  }
 0x3c7   : > { %13075 = vmatprep.subr.bf16.mxu1 %v14551_v54  ;;  %v12090_v54 = vcombine.low %v17077_v19, %v5557_v61 }
 0x3c8   : > { %13264 = vmatpush3.bf16.msra.mxu0 %v14550_v56  ;;  %v3848_v33 = vmax.f32 %v3836_v6, 0.0  ;;  %v12775_v59 = vpop.f32.mrb[108].mxu1  ;;  %v17141_v56 = vcombine.low %v17025_v24, %v17007_v29  ;;  %v14569_v6 = vld [vmem:[%s18752_s7 + $0xbc0] sm:$0xff]   ;;  %v6593_v24 = vsel %vm4196_vm3, %v6588_v31, %v17132_v50  ;;  %v14584_v31 = vld [vmem:[%s18752_s7 + $0xb98] sm:$0xff]  }
 0x3c9   : > { %13265 = vmatprep.subr.bf16.mxu0 %v14553_v7  ;;  %v12776_v53 = vpop.f32.mrb[109].mxu1  ;;  %v14567_v7 = vld [vmem:[%s18752_s7 + $0x958] sm:$0xff]  }
 0x3ca   : > { %v3851_v0 = vpack.c.bf16 %v3848_v33, %v3847_v32  ;;  %v12777_v2 = vadd.f32 %v12776_v53, %v12775_v59  ;;  %13076 = vmatpush3.bf16.msra.mxu1 %v14552_v35  ;;  %v12778_v37 = vpop.f32.mrb[110].mxu1  ;;  %v7359_v35 = vrot.slane %v17124_v17, 3  ;;  %v7370_v32 = vrot.slane %v12213_v28, 3 }
 0x3cb   : > { %v12779_v45 = vpop.f32.mrb[111].mxu1  ;;  %13117 = vmatprep.subr.bf16.mxu1 %v14555_v5  ;;  %v14568_v5 = vld [vmem:[%s18752_s7 + $0x918] sm:$0xff]   ;;  %v7811_v33 = vshrl.u32 %v17017_v34, 16  ;;  %v7814_v59 = vshll.u32 %v17017_v34, 16  ;;  %v7358_v61 = vrot.slane %v17141_v56, 3  ;;  %v14579_v34 = vld [vmem:[%s18752_s7 + $0xbd0] sm:$0xff]  }
 0x3cc   : > { %13266 = vmatpush3.bf16.msra.mxu0 %v14554_v4  ;;  %3853 = vst.msk [vmem:[#allocation3] sm:$0xff] %vm1647_vm0, %v3851_v0  ;;  %v3841_v57 = vadd.f32 %v12777_v2, %v16766_v42  ;;  %v12780_v36 = vadd.f32 %v12779_v45, %v12778_v37  ;;  %v14560_v42 = vld [vmem:[%s18752_s7 + $0x908] sm:$0xff]   ;;  %v14571_v0 = vld [vmem:[%s18752_s7 + $0xb80] sm:$0xff]   ;;  %v7803_v45 = vshrl.u32 %v17032_v18, 16  ;;  %v6573_v28 = vshll.u32 %v17091_v23, 16 }
 0x3cd   : > { %13267 = vmatprep.subr.bf16.mxu0 %v14557_v47  ;;  %6323 = vmatmul.mubr.bf16.vlgmr.msra.gmra.mrb[160].mxu1 %v17091_v23  ;;  %v14572_v37 = vld [vmem:[%s18752_s7 + $0x960] sm:$0xff]   ;;  %v7360_v11 = vsel %vm5739_vm4, %v7358_v61, %v7359_v35  ;;  %v14591_v61 = vld [vmem:[%s18752_s7 + $0xbe8] sm:$0xff]  }
 0x3ce   : > { %v12881_v10 = vpop.f32.mrb[160].mxu0  ;;  %v3844_v40 = vadd.f32 %v12780_v36, %v16772_v38  ;;  %6330 = vmatprep.mubr.bf16.mxu1 %v12091_v43  ;;  %13118 = vmatpush3.bf16.msra.mxu1 %v14556_v25  ;;  %v14563_v38 = vld [vmem:[%s18752_s7 + $0x950] sm:$0xff]   ;;  %v3849_v48 = vmax.f32 %v3841_v57, 0.0  ;;  %v14574_v25 = vld [vmem:[%s18752_s7 + $0xbc8] sm:$0xff]   ;;  %v12212_v57 = vcombine.low %v17120_v26, %v17120_v26  ;;  %v7371_v36 = vsel %vm5739_vm4, %v7362_v52, %v7370_v32  ;;  %v14573_v43 = vld [vmem:[%s18752_s7 + $0x920] sm:$0xff]  }
 0x3cf   : > { %v12882_v13 = vpop.f32.mrb[161].mxu0  ;;  %13119 = vmatprep.subr.bf16.mxu1 %v14559_v41  ;;  %v7805_v52 = vrot.slane %v7803_v45, 3  ;;  %v7675_v32 = vld [vmem:[#allocation2 + $0x88] sm:$0x77]  ;;  %v6621_v45 = vshrl.u32 %v17084_v62, 16 }
 0x3d0   : > { %v17112_v63 = vadd.f32 %v12882_v13, %v12881_v10  ;;  %13268 = vmatpush3.bf16.msra.mxu0 %v14558_v46  ;;  %v12884_v55 = vpop.f32.mrb[162].mxu0  ;;  %v3850_v20 = vmax.f32 %v3844_v40, 0.0  ;;  %v7806_v46 = vshll.u32 %v17032_v18, 16  ;;  %v7816_v10 = vrot.slane %v7814_v59, 4  ;;  %v14575_v18 = vld [vmem:[%s18752_s7 + $0xb88] sm:$0xff]  }
 0x3d1   : > { %v12885_v22 = vpop.f32.mrb[163].mxu0  ;;  %13269 = vmatprep.subr.bf16.mxu0 %v14561_v12  ;;  %v7813_v12 = vrot.slane %v7811_v33, 3  ;;  %v7368_v13 = vrot.slane %v12212_v57, 3  ;;  %v6571_v59 = vshrl.u32 %v17091_v23, 16 }
 0x3d2   : > { %v17129_v21 = vadd.f32 %v12885_v22, %v12884_v55  ;;  %v3852_v15 = vpack.c.bf16 %v3850_v20, %v3849_v48  ;;  %13120 = vmatpush3.bf16.msra.mxu1 %v14560_v42  ;;  %v7808_v40 = vrot.slane %v7806_v46, 4  ;;  %v14577_v42 = vld [vmem:[%s18752_s7 + $0x928] sm:$0xff]   ;;  %v14581_v48 = vld [vmem:[%s18752_s7 + $0x970] sm:$0xff]   ;;  %v14583_v20 = vld [vmem:[%s18752_s7 + $0xbd8] sm:$0xff]  }
 0x3d3   : > { %13121 = vmatprep.subr.bf16.mxu1 %v14563_v38  ;;  %v17199_v55 = vor.u32 %v7816_v10, %v7813_v12  ;;  %v17206_v38 = vcombine.low %v17077_v19, %v17069_v58  ;;  %v14590_v46 = vld [vmem:[%s18752_s7 + $0x800] sm:$0xff]   ;;  %v6623_v10 = vor.u32 %v6621_v45, %v17132_v50 }
 0x3d4   : > { %13270 = vmatpush3.bf16.msra.mxu0 %v14562_v3  ;;  %3855 = vst.msk [vmem:[#allocation3 + $0x10] sm:$0x7f] %vm3854_vm5, %v3852_v15  ;;  %v14580_v3 = vld [vmem:[%s18752_s7 + $0xb90] sm:$0xff]   ;;  %v7809_v26 = vor.u32 %v7808_v40, %v7805_v52  ;;  %v7797_v52 = vshll.u32 %v17124_v17, 16  ;;  %v14604_v45 = vld [vmem:[%s18752_s7 + $0x860] sm:$0xff]  }
 0x3d5   : > { %13271 = vmatprep.subr.bf16.mxu0 %v14565_v9  ;;  %6331 = vmatmul.mubr.bf16.gmra.mrb[164].mxu1 %v12090_v54  ;;  %v7369_v9 = vsel %vm5739_vm4, %v7359_v35, %v7368_v13  ;;  %v6575_v35 = vrot.slane %v6573_v28, 1  ;;  %v14594_v13 = vld [vmem:[%s18752_s7 + $0x808] sm:$0xff]  }
 0x3d6   : > { %v12887_v29 = vpop.f32.mrb[164].mxu0  ;;  %13122 = vmatpush3.bf16.msra.mxu1 %v14564_v30  ;;  %6862 = vmatprep.mubr.bf16.mxu1 %v6593_v24  ;;  %v7818_v58 = vsel %vm7750_vm6, %v7809_v26, %v17199_v55  ;;  %v14582_v30 = vld [vmem:[%s18752_s7 + $0x930] sm:$0xff]   ;;  %v14586_v24 = vld [vmem:[%s18752_s7 + $0x938] sm:$0xff]   ;;  %v7799_v28 = vrot.slane %v7797_v52, 4 }
 0x3d7   : > { %v12888_v4 = vpop.f32.mrb[165].mxu0  ;;  %13123 = vmatprep.subr.bf16.mxu1 %v14567_v7  ;;  %v14596_v26 = vld [vmem:[%s18752_s7 + $0xbb0] sm:$0xff]  }
 0x3d8   : > { %v17162_v47 = vadd.f32 %v12888_v4, %v12887_v29  ;;  %13272 = vmatpush3.bf16.msra.mxu0 %v14566_v49  ;;  %v12890_v53 = vpop.f32.mrb[166].mxu0  ;;  %v14585_v49 = vld [vmem:[%s18752_s7 + $0x978] sm:$0xff]   ;;  %v6578_v29 = vshll.u32 %v17206_v38, 16  ;;  %v14588_v4 = vld [vmem:[%s18752_s7 + $0xba0] sm:$0xff]  }
 0x3d9   : > { %v12891_v2 = vpop.f32.mrb[167].mxu0  ;;  %13313 = vmatprep.subr.bf16.mxu0 %v14569_v6  ;;  %v14587_v6 = vld [vmem:[%s18752_s7 + $0xbe0] sm:$0xff]  }
 0x3da   : > { %v17176_v41 = vadd.f32 %v12891_v2, %v12890_v53  ;;  %13124 = vmatpush3.bf16.msra.mxu1 %v14568_v5  ;;  %v14589_v5 = vld [vmem:[%s18752_s7 + $0x840] sm:$0xff]   ;;  %v6580_v53 = vrot.slane %v6578_v29, 1  ;;  %v14600_v29 = vld [vmem:[%s18752_s7 + $0xbb8] sm:$0xff]  }
 0x3db   : > { %7654 = vmatmul.mubr.bf16.vlgmr.msra.gmra.mrb[216].mxu0 %v7360_v11  ;;  %13125 = vmatprep.subr.bf16.mxu1 %v14572_v37  ;;  %v12249_v11 = vcombine.high %v7675_v32, %v7675_v32 }
 0x3dc   : > { %7661 = vmatprep.mubr.bf16.mxu0 %v7371_v36  ;;  %13314 = vmatpush3.bf16.msra.mxu0 %v14571_v0  ;;  %v14592_v36 = vld [vmem:[%s18752_s7 + $0xba8] sm:$0xff]  }
 0x3dd   : > { %13315 = vmatprep.subr.bf16.mxu0 %v14574_v25  ;;  %v6576_v25 = vor.u32 %v6575_v35, %v6571_v59  ;;  %v7850_v50 = vshll.u32 %v12249_v11, 16 }
 0x3de   : > { %13126 = vmatpush3.bf16.msra.mxu1 %v14573_v43  ;;  %v14593_v43 = vld [vmem:[%s18752_s7 + $0x848] sm:$0xff]  }
 0x3df   : > { %13127 = vmatprep.subr.bf16.mxu1 %v14576_v51  ;;  %v6581_v62 = vsel %vm4196_vm3, %v6576_v25, %v6580_v53  ;;  %v7794_v51 = vshrl.u32 %v17124_v17, 16  ;;  %v14597_v17 = vld [vmem:[%s18752_s7 + $0x850] sm:$0xff]  }
 0x3e0   : > { %13316 = vmatpush3.bf16.msra.mxu0 %v14575_v18  ;;  %v12797_v27 = vpop.f32.mrb[112].mxu1  ;;  %v14595_v18 = vld [vmem:[%s18752_s7 + $0xbf0] sm:$0xff]  }
 0x3e1   : > { %13317 = vmatprep.subr.bf16.mxu0 %v14579_v34  ;;  %v12798_v22 = vpop.f32.mrb[113].mxu1 }
 0x3e2   : > { %v17215_v16 = vadd.f32 %v12798_v22, %v12797_v27  ;;  %v12800_v15 = vpop.f32.mrb[114].mxu1  ;;  %13128 = vmatpush3.bf16.msra.mxu1 %v14577_v42  ;;  %v7847_v42 = vshrl.u32 %v12249_v11, 16 }
 0x3e3   : > { %7662 = vmatmul.mubr.bf16.gmra.mrb[220].mxu0 %v7369_v9  ;;  %v12801_v54 = vpop.f32.mrb[115].mxu1  ;;  %13129 = vmatprep.subr.bf16.mxu1 %v14581_v48  ;;  %v7786_v48 = vshrl.u32 %v17141_v56, 16  ;;  %v14599_v9 = vld [vmem:[%s18752_s7 + $0xbf8] sm:$0xff]  }
 0x3e4   : > { %13318 = vmatpush3.bf16.msra.mxu0 %v14580_v3  ;;  %8136 = vmatprep.mubr.bf16.mxu0 %v7818_v58  ;;  %v17229_v7 = vadd.f32 %v12801_v54, %v12800_v15  ;;  %v7796_v15 = vrot.slane %v7794_v51, 3  ;;  %v12248_v54 = vcombine.low %v7675_v32, %v7675_v32  ;;  %v14607_v51 = vld [vmem:[%s18752_s7 + $0x828] sm:$0xff]  }
 0x3e5   : > { %13319 = vmatprep.subr.bf16.mxu0 %v14583_v20  ;;  %v7789_v20 = vshll.u32 %v17141_v56, 16  ;;  %v7852_v56 = vrot.slane %v7850_v50, 4  ;;  %v14610_v50 = vld [vmem:[%s18752_s7 + $0x830] sm:$0xff]  }
 0x3e6   : > { %13130 = vmatpush3.bf16.msra.mxu1 %v14582_v30  ;;  %v6618_v30 = vshrl.u32 %v17206_v38, 16  ;;  %v14601_v38 = vld [vmem:[%s18752_s7 + $0x858] sm:$0xff]   ;;  %v7838_v32 = vshrl.u32 %v12248_v54, 16 }
 0x3e7   : > { %13131 = vmatprep.subr.bf16.mxu1 %v14585_v49  ;;  %v7849_v49 = vrot.slane %v7847_v42, 3  ;;  %v7791_v35 = vrot.slane %v7789_v20, 4 }
 0x3e8   : > { %13320 = vmatpush3.bf16.msra.mxu0 %v14584_v31  ;;  %v12803_v33 = vpop.f32.mrb[116].mxu1  ;;  %v14598_v31 = vld [vmem:[%s18752_s7 + $0x810] sm:$0xff]  }
 0x3e9   : > { %13321 = vmatprep.subr.bf16.mxu0 %v14587_v6  ;;  %v12804_v0 = vpop.f32.mrb[117].mxu1  ;;  %v6620_v6 = vor.u32 %v6618_v30, %v6580_v53  ;;  %v14602_v53 = vld [vmem:[%s18752_s7 + $0x818] sm:$0xff]  }
 0x3ea   : > { %v17248_v2 = vadd.f32 %v12804_v0, %v12803_v33  ;;  %v12806_v37 = vpop.f32.mrb[118].mxu1  ;;  %13132 = vmatpush3.bf16.msra.mxu1 %v14586_v24  ;;  %v7788_v24 = vrot.slane %v7786_v48, 3  ;;  %v7841_v33 = vshll.u32 %v12248_v54, 16 }
 0x3eb   : > { %v12807_v57 = vpop.f32.mrb[119].mxu1  ;;  %13173 = vmatprep.subr.bf16.mxu1 %v14589_v5  ;;  %v7800_v5 = vor.u32 %v7799_v28, %v7796_v15  ;;  %v6406_v28 = vld [vmem:[#allocation2 + $0x70] sm:$0x77] }
 0x3ec   : > { %13322 = vmatpush3.bf16.msra.mxu0 %v14588_v4  ;;  %v17260_v12 = vadd.f32 %v12807_v57, %v12806_v37  ;;  %v7792_v25 = vor.u32 %v7791_v35, %v7788_v24  ;;  %v7840_v57 = vrot.slane %v7838_v32, 3  ;;  %v7238_v24 = vld [vmem:[#allocation2 + $0x20] sm:$0xff] }
 0x3ed   : > { %13323 = vmatprep.subr.bf16.mxu0 %v14591_v61  ;;  %6863 = vmatmul.mubr.bf16.vlgmr.msra.gmra.mrb[168].mxu1 %v6581_v62  ;;  %v7853_v61 = vor.u32 %v7852_v56, %v7849_v49  ;;  %v14605_v62 = vld [vmem:[%s18752_s7 + $0x820] sm:$0xff]   ;;  %v14615_v56 = vld [vmem:[%s18752_s7 + $0xa48] sm:$0xff]  }
 0x3ee   : > { %v12937_v34 = vpop.f32.mrb[168].mxu0  ;;  %6870 = vmatprep.mubr.bf16.mxu1 %v6623_v10  ;;  %13174 = vmatpush3.bf16.msra.mxu1 %v14590_v46  ;;  %v14606_v10 = vld [vmem:[%s18752_s7 + $0x868] sm:$0xff]   ;;  %v7240_v35 = vld [vmem:[#allocation2 + $0x40] sm:$0xff] }
 0x3ef   : > { %v12938_v40 = vpop.f32.mrb[169].mxu0  ;;  %13175 = vmatprep.subr.bf16.mxu1 %v14593_v43  ;;  %v7854_v43 = vsel %vm7750_vm6, %v17199_v55, %v7853_v61  ;;  %v14609_v55 = vld [vmem:[%s18752_s7 + $0x870] sm:$0xff]  }
 0x3f0   : > { %v17272_v3 = vadd.f32 %v12938_v40, %v12937_v34  ;;  %v12940_v27 = vpop.f32.mrb[170].mxu0  ;;  %13324 = vmatpush3.bf16.msra.mxu0 %v14592_v36  ;;  %v7843_v36 = vrot.slane %v7841_v33, 4 }
 0x3f1   : > { %v12941_v22 = vpop.f32.mrb[171].mxu0  ;;  %13325 = vmatprep.subr.bf16.mxu0 %v14595_v18 }
 0x3f2   : > { %v17285_v58 = vadd.f32 %v12941_v22, %v12940_v27  ;;  %13176 = vmatpush3.bf16.msra.mxu1 %v14594_v13  ;;  %v7844_v18 = vor.u32 %v7843_v36, %v7840_v57  ;;  %v14612_v22 = vld [vmem:[%s18752_s7 + $0x838] sm:$0xff]  }
 0x3f3   : > { %13177 = vmatprep.subr.bf16.mxu1 %v14597_v17  ;;  %v14619_v36 = vld [vmem:[%s18752_s7 + $0xa58] sm:$0xff]  }
 0x3f4   : > { %13326 = vmatpush3.bf16.msra.mxu0 %v14596_v26  ;;  %v7845_v40 = vsel %vm7750_vm6, %v7800_v5, %v7844_v18  ;;  %v14611_v26 = vld [vmem:[%s18752_s7 + $0x878] sm:$0xff]  }
 0x3f5   : > { %13327 = vmatprep.subr.bf16.mxu0 %v14599_v9  ;;  %6871 = vmatmul.mubr.bf16.gmra.mrb[172].mxu1 %v6620_v6  ;;  %v14613_v9 = vld [vmem:[%s18752_s7 + $0xa40] sm:$0xff]  }
 0x3f6   : > { %v12943_v4 = vpop.f32.mrb[172].mxu0  ;;  %13178 = vmatpush3.bf16.msra.mxu1 %v14598_v31  ;;  %7170 = vmatprep.mubr.bf16.mxu1 %v16986_v8  ;;  %v7801_v8 = vsel %vm7750_vm6, %v7792_v25, %v7800_v5  ;;  %v17345_v31 = vld [vmem:[#allocation2 + $0x60] sm:$0xff] }
 0x3f7   : > { %v12944_v59 = vpop.f32.mrb[173].mxu0  ;;  %13179 = vmatprep.subr.bf16.mxu1 %v14601_v38  ;;  %v12167_v38 = vcombine.high %v17077_v19, %v6406_v28  ;;  %v17356_v5 = vcombine.high %v7240_v35, %v17345_v31 }
 0x3f8   : > { %v17301_v0 = vadd.f32 %v12944_v59, %v12943_v4  ;;  %v12946_v37 = vpop.f32.mrb[174].mxu0  ;;  %13328 = vmatpush3.bf16.msra.mxu0 %v14600_v29  ;;  %v7236_v59 = vld [vmem:[#allocation2] sm:$0x88] }
 0x3f9   : > { %v12947_v46 = vpop.f32.mrb[175].mxu0 }
 0x3fa   : > { %v17306_v11 = vadd.f32 %v12947_v46, %v12946_v37  ;;  %13180 = vmatpush3.bf16.msra.mxu1 %v14602_v53  ;;  %v17369_v37 = vcombine.high %v7236_v59, %v7238_v24  ;;  %v14618_v46 = vld [vmem:[%s18752_s7 + $0xa10] sm:$0xff]  }
 0x3fb   : > { %8137 = vmatmul.mubr.bf16.vlgmr.msra.gmra.mrb[224].mxu0 %v7801_v8  ;;  %13181 = vmatprep.subr.bf16.mxu1 %v14604_v45  ;;  %v7356_v45 = vrot.slane %v17356_v5, 3  ;;  %v12166_v8 = vcombine.low %v17077_v19, %v6406_v28  ;;  %v14620_v19 = vld [vmem:[%s18752_s7 + $0xa18] sm:$0xff]  }
 0x3fc   : > { %8144 = vmatprep.mubr.bf16.mxu0 %v7854_v43  ;;  %v7355_v57 = vrot.slane %v17369_v37, 3  ;;  %v14627_v28 = vld [vmem:[%s18752_s7 + $0xa78] sm:$0xff]  }
 0x3fe   : > { %13182 = vmatpush3.bf16.msra.mxu1 %v14605_v62  ;;  %v7357_v62 = vsel %vm5739_vm4, %v7355_v57, %v7356_v45  ;;  %v7772_v57 = vshll.u32 %v17369_v37, 16 }
 0x3ff   : > { %13183 = vmatprep.subr.bf16.mxu1 %v14606_v10 }
 0x400   : > { %v12825_v34 = vpop.f32.mrb[120].mxu1 }
 0x401   : > { %v12826_v52 = vpop.f32.mrb[121].mxu1 }
 0x402   : > { %v12827_v13 = vadd.f32 %v12826_v52, %v12825_v34  ;;  %v12828_v42 = vpop.f32.mrb[122].mxu1  ;;  %13184 = vmatpush3.bf16.msra.mxu1 %v14607_v51 }
 0x403   : > { %8145 = vmatmul.mubr.bf16.gmra.mrb[228].mxu0 %v7845_v40  ;;  %v12829_v27 = vpop.f32.mrb[123].mxu1  ;;  %13185 = vmatprep.subr.bf16.mxu1 %v14609_v55  ;;  %v14621_v55 = vld [vmem:[%s18752_s7 + $0xa60] sm:$0xff]  }
 0x404   : > { %v17331_v17 = vadd.f32 %v12827_v13, %v17215_v16  ;;  %v12830_v48 = vadd.f32 %v12829_v27, %v12828_v42  ;;  %v14622_v40 = vld [vmem:[%s18752_s7 + $0xa20] sm:$0xff]   ;;  %v14623_v13 = vld [vmem:[%s18752_s7 + $0xa68] sm:$0xff]  }
 0x405   : > { %v14624_v42 = vld [vmem:[%s18752_s7 + $0xa28] sm:$0xff]  }
 0x406   : > { %v17334_v20 = vadd.f32 %v12830_v48, %v17229_v7  ;;  %13186 = vmatpush3.bf16.msra.mxu1 %v14610_v50  ;;  %v14614_v7 = vld [vmem:[%s18752_s7 + $0xa00] sm:$0xff]   ;;  %v14625_v50 = vld [vmem:[%s18752_s7 + $0xa70] sm:$0xff]  }
 0x407   : > { %13187 = vmatprep.subr.bf16.mxu1 %v14611_v26 }
 0x408   : > { %v12831_v15 = vpop.f32.mrb[124].mxu1 }
 0x409   : > { %v12832_v30 = vpop.f32.mrb[125].mxu1 }
 0x40a   : > { %v12833_v54 = vadd.f32 %v12832_v30, %v12831_v15  ;;  %v12834_v16 = vpop.f32.mrb[126].mxu1  ;;  %13188 = vmatpush3.bf16.msra.mxu1 %v14612_v22  ;;  %v7244_v15 = vld [vmem:[#allocation2 + $0x80] sm:$0x33] }
 0x40b   : > { %v12835_v49 = vpop.f32.mrb[127].mxu1  ;;  %13229 = vmatprep.subr.bf16.mxu1 %v14613_v9  ;;  %v14626_v9 = vld [vmem:[%s18752_s7 + $0xa30] sm:$0xff]  }
 0x40c   : > { %v17351_v6 = vadd.f32 %v12833_v54, %v17248_v2  ;;  %v12836_v29 = vadd.f32 %v12835_v49, %v12834_v16  ;;  %v14616_v2 = vld [vmem:[%s18752_s7 + $0xa08] sm:$0xff]   ;;  %v17414_v54 = vcombine.low %v7240_v35, %v17345_v31  ;;  %v12211_v49 = vcombine.high %v7244_v15, %v7244_v15  ;;  %v14629_v31 = vld [vmem:[%s18752_s7 + $0xb40] sm:$0xff]  }
 0x40d   : > { %7171 = vmatmul.mubr.bf16.vlgmr.msra.gmra.mrb[176].mxu1 %v17091_v23  ;;  %v14617_v23 = vld [vmem:[%s18752_s7 + $0xa50] sm:$0xff]  }
 0x40e   : > { %v12993_v4 = vpop.f32.mrb[176].mxu0  ;;  %v17359_v32 = vadd.f32 %v12836_v29, %v17260_v12  ;;  %7178 = vmatprep.mubr.bf16.mxu1 %v12167_v38  ;;  %13230 = vmatpush3.bf16.msra.mxu1 %v14614_v7  ;;  %v14628_v38 = vld [vmem:[%s18752_s7 + $0xa38] sm:$0xff]   ;;  %v7353_v35 = vrot.slane %v17414_v54, 3 }
 0x40f   : > { %v12994_v33 = vpop.f32.mrb[177].mxu0  ;;  %13231 = vmatprep.subr.bf16.mxu1 %v14615_v56  ;;  %v17417_v56 = vcombine.low %v7236_v59, %v7238_v24  ;;  %v7780_v59 = vshll.u32 %v17356_v5, 16 }
 0x410   : > { %v17364_v53 = vadd.f32 %v12994_v33, %v12993_v4  ;;  %v12996_v61 = vpop.f32.mrb[178].mxu0  ;;  %v7366_v33 = vrot.slane %v12211_v49, 3  ;;  %v14638_v49 = vld [vmem:[%s18752_s7 + $0xb18] sm:$0xff]  }
 0x411   : > { %v12997_v12 = vpop.f32.mrb[179].mxu0 }
 0x412   : > { %v17371_v25 = vadd.f32 %v12997_v12, %v12996_v61  ;;  %13232 = vmatpush3.bf16.msra.mxu1 %v14616_v2  ;;  %v7777_v2 = vshrl.u32 %v17356_v5, 16  ;;  %v14631_v12 = vld [vmem:[%s18752_s7 + $0xb00] sm:$0xff]   ;;  %v14635_v5 = vld [vmem:[%s18752_s7 + $0xb50] sm:$0xff]  }
 0x413   : > { %13233 = vmatprep.subr.bf16.mxu1 %v14617_v23  ;;  %v7352_v23 = vrot.slane %v17417_v56, 3 }
 0x415   : > { %7179 = vmatmul.mubr.bf16.gmra.mrb[180].mxu1 %v12166_v8  ;;  %v7769_v8 = vshrl.u32 %v17369_v37, 16 }
 0x416   : > { %v12999_v43 = vpop.f32.mrb[180].mxu0  ;;  %13234 = vmatpush3.bf16.msra.mxu1 %v14618_v46  ;;  %7604 = vmatprep.mubr.bf16.mxu1 %v7357_v62  ;;  %v7354_v62 = vsel %vm5739_vm4, %v7352_v23, %v7353_v35  ;;  %v7760_v23 = vshrl.u32 %v17414_v54, 16 }
 0x417   : > { %v13000_v10 = vpop.f32.mrb[181].mxu0  ;;  %13235 = vmatprep.subr.bf16.mxu1 %v14619_v36 }
 0x418   : > { %v17388_v18 = vadd.f32 %v13000_v10, %v12999_v43  ;;  %v13002_v51 = vpop.f32.mrb[182].mxu0  ;;  %v12210_v10 = vcombine.low %v7244_v15, %v7244_v15 }
 0x419   : > { %v13003_v34 = vpop.f32.mrb[183].mxu0 }
 0x41a   : > { %v17393_v52 = vadd.f32 %v13003_v34, %v13002_v51  ;;  %13236 = vmatpush3.bf16.msra.mxu1 %v14620_v19  ;;  %v7367_v51 = vsel %vm5739_vm4, %v7356_v45, %v7366_v33  ;;  %v7782_v34 = vrot.slane %v7780_v59, 4  ;;  %v7771_v45 = vrot.slane %v7769_v8, 3  ;;  %v7674_v33 = vld [vmem:[#allocation2 + $0x80] sm:$0x77] }
 0x41b   : > { %13237 = vmatprep.subr.bf16.mxu1 %v14621_v55  ;;  %v7779_v55 = vrot.slane %v7777_v2, 3  ;;  %v14641_v2 = vld [vmem:[%s18752_s7 + $0xb68] sm:$0xff]   ;;  %v12247_v59 = vcombine.high %v7674_v33, %v7674_v33  ;;  %v7752_v8 = vshrl.u32 %v17417_v56, 16 }
 0x41e   : > { %13238 = vmatpush3.bf16.msra.mxu1 %v14622_v40 }
 0x41f   : > { %13239 = vmatprep.subr.bf16.mxu1 %v14623_v13 }
 0x420   : > { %v12853_v27 = vpop.f32.mrb[128].mxu1 }
 0x421   : > { %v12854_v26 = vpop.f32.mrb[129].mxu1 }
 0x422   : > { %v12855_v48 = vadd.f32 %v12854_v26, %v12853_v27  ;;  %v12856_v22 = vpop.f32.mrb[130].mxu1  ;;  %13240 = vmatpush3.bf16.msra.mxu1 %v14624_v42  ;;  %v7364_v26 = vrot.slane %v12210_v10, 3 }
 0x423   : > { %v12857_v30 = vpop.f32.mrb[131].mxu1  ;;  %13241 = vmatprep.subr.bf16.mxu1 %v14625_v50 }
 0x424   : > { %v4850_v16 = vadd.f32 %v12855_v48, %v17331_v17  ;;  %v12858_v7 = vadd.f32 %v12857_v30, %v12856_v22  ;;  %v14637_v30 = vld [vmem:[%s18752_s7 + $0xb58] sm:$0xff]  }
 0x426   : > { %v4853_v29 = vadd.f32 %v12858_v7, %v17334_v20  ;;  %13242 = vmatpush3.bf16.msra.mxu1 %v14626_v9  ;;  %v17424_v4 = vadd.f32 %v17112_v63, %v4850_v16  ;;  %v17466_v9 = vor.u32 %v7782_v34, %v7779_v55  ;;  %v7762_v55 = vrot.slane %v7760_v23, 3 }
 0x427   : > { %13243 = vmatprep.subr.bf16.mxu1 %v14627_v28  ;;  %v7365_v28 = vsel %vm5739_vm4, %v7353_v35, %v7364_v26 }
 0x428   : > { %v12859_v17 = vpop.f32.mrb[132].mxu1  ;;  %v17431_v24 = vadd.f32 %v17129_v21, %v4853_v29  ;;  %v14632_v21 = vld [vmem:[%s18752_s7 + $0xb48] sm:$0xff]  }
 0x429   : > { %v12860_v20 = vpop.f32.mrb[133].mxu1 }
 0x42a   : > { %v12861_v61 = vadd.f32 %v12860_v20, %v12859_v17  ;;  %v12862_v63 = vpop.f32.mrb[134].mxu1  ;;  %13244 = vmatpush3.bf16.msra.mxu1 %v14628_v38  ;;  %v14640_v20 = vld [vmem:[%s18752_s7 + $0xb20] sm:$0xff]  }
 0x42b   : > { %v12863_v46 = vpop.f32.mrb[135].mxu1  ;;  %13285 = vmatprep.subr.bf16.mxu1 %v14629_v31  ;;  %v14639_v31 = vld [vmem:[%s18752_s7 + $0xb60] sm:$0xff]  }
 0x42c   : > { %v4858_v36 = vadd.f32 %v12861_v61, %v17351_v6  ;;  %v12864_v43 = vadd.f32 %v12863_v46, %v12862_v63  ;;  %v14633_v6 = vld [vmem:[%s18752_s7 + $0xb08] sm:$0xff]   ;;  %v14643_v63 = vld [vmem:[%s18752_s7 + $0xb70] sm:$0xff]  }
 0x42d   : > { %7605 = vmatmul.mubr.bf16.vlgmr.msra.gmra.mrb[184].mxu1 %v7354_v62  ;;  %v14642_v61 = vld [vmem:[%s18752_s7 + $0xb28] sm:$0xff]  }
 0x42e   : > { %v13049_v19 = vpop.f32.mrb[184].mxu0  ;;  %v4861_v40 = vadd.f32 %v12864_v43, %v17359_v32  ;;  %7612 = vmatprep.mubr.bf16.mxu1 %v7367_v51  ;;  %13286 = vmatpush3.bf16.msra.mxu1 %v14631_v12  ;;  %v17454_v37 = vadd.f32 %v17162_v47, %v4858_v36  ;;  %v7774_v32 = vrot.slane %v7772_v57, 4  ;;  %v14636_v47 = vld [vmem:[%s18752_s7 + $0xb10] sm:$0xff]   ;;  %v7763_v12 = vshll.u32 %v17414_v54, 16  ;;  %v14645_v54 = vld [vmem:[%s18752_s7 + $0xb78] sm:$0xff]  }
 0x42f   : > { %v13050_v13 = vpop.f32.mrb[185].mxu0  ;;  %13287 = vmatprep.subr.bf16.mxu1 %v14632_v21  ;;  %v7755_v57 = vshll.u32 %v17417_v56, 16  ;;  %v7829_v36 = vshrl.u32 %v12247_v59, 16  ;;  %v7832_v43 = vshll.u32 %v12247_v59, 16 }
 0x430   : > { %v17456_v42 = vadd.f32 %v13050_v13, %v13049_v19  ;;  %v13052_v50 = vpop.f32.mrb[186].mxu0  ;;  %v17462_v48 = vadd.f32 %v17176_v41, %v4861_v40  ;;  %v7775_v15 = vor.u32 %v7774_v32, %v7771_v45  ;;  %v14644_v19 = vld [vmem:[%s18752_s7 + $0xb30] sm:$0xff]   ;;  %v7765_v34 = vrot.slane %v7763_v12, 4 }
 0x431   : > { %v13053_v27 = vpop.f32.mrb[187].mxu0  ;;  %v12246_v13 = vcombine.low %v7674_v33, %v7674_v33  ;;  %v7834_v45 = vrot.slane %v7832_v43, 4 }
 0x432   : > { %v17464_v22 = vadd.f32 %v13053_v27, %v13052_v50  ;;  %13288 = vmatpush3.bf16.msra.mxu1 %v14633_v6  ;;  %v7784_v41 = vsel %vm7750_vm6, %v7775_v15, %v17466_v9  ;;  %v7754_v6 = vrot.slane %v7752_v8, 3  ;;  %v7757_v50 = vrot.slane %v7755_v57, 4  ;;  %v14646_v27 = vld [vmem:[%s18752_s7 + $0xb38] sm:$0xff]   ;;  %s15008_s7 = smov 125  }
 0x433   : > { %13289 = vmatprep.subr.bf16.mxu1 %v14635_v5  ;;  %v7831_v5 = vrot.slane %v7829_v36, 3 }
 0x435   : > { %7613 = vmatmul.mubr.bf16.gmra.mrb[188].mxu1 %v7365_v28 }
 0x436   : > { %v13055_v16 = vpop.f32.mrb[188].mxu0  ;;  %13290 = vmatpush3.bf16.msra.mxu1 %v14636_v47  ;;  %8087 = vmatprep.mubr.bf16.mxu1 %v7784_v41  ;;  %v7766_v47 = vor.u32 %v7765_v34, %v7762_v55  ;;  %v7758_v41 = vor.u32 %v7757_v50, %v7754_v6  ;;  %v17537_v50 = vld [vmem:[%s18753_s8] ss:$0 sm:$0xff]  ;;  %s709_s8 = scalar_lea.vmem %s18756_s28, %s15189_s26 }
 0x437   : > { %v13056_v7 = vpop.f32.mrb[189].mxu0  ;;  %13291 = vmatprep.subr.bf16.mxu1 %v14637_v30  ;;  %v7820_v30 = vshrl.u32 %v12246_v13, 16 }
 0x438   : > { %v17480_v29 = vadd.f32 %v13056_v7, %v13055_v16  ;;  %v13058_v38 = vpop.f32.mrb[190].mxu0  ;;  %v7835_v7 = vor.u32 %v7834_v45, %v7831_v5 }
 0x439   : > { %v13059_v17 = vpop.f32.mrb[191].mxu0 }
 0x43a   : > { %v17485_v35 = vadd.f32 %v13059_v17, %v13058_v38  ;;  %13292 = vmatpush3.bf16.msra.mxu1 %v14638_v49  ;;  %v7836_v59 = vsel %vm7750_vm6, %v17466_v9, %v7835_v7 }
 0x43b   : > { %13293 = vmatprep.subr.bf16.mxu1 %v14639_v31  ;;  %v7767_v31 = vsel %vm7750_vm6, %v7758_v41, %v7766_v47 }
 0x43e   : > { %13294 = vmatpush3.bf16.msra.mxu1 %v14640_v20 }
 0x43f   : > { %13295 = vmatprep.subr.bf16.mxu1 %v14641_v2 }
 0x440   : > { %v12909_v46 = vpop.f32.mrb[136].mxu1 }
 0x441   : > { %v12910_v21 = vpop.f32.mrb[137].mxu1 }
 0x442   : > { %v12911_v62 = vadd.f32 %v12910_v21, %v12909_v46  ;;  %v12912_v10 = vpop.f32.mrb[138].mxu1  ;;  %13296 = vmatpush3.bf16.msra.mxu1 %v14642_v61 }
 0x443   : > { %v12913_v51 = vpop.f32.mrb[139].mxu1  ;;  %13297 = vmatprep.subr.bf16.mxu1 %v14643_v63 }
 0x444   : > { %v5368_v40 = vadd.f32 %v12911_v62, %v17424_v4  ;;  %v12914_v56 = vadd.f32 %v12913_v51, %v12912_v10  ;;  %v7823_v4 = vshll.u32 %v12246_v13, 16 }
 0x446   : > { %v5371_v32 = vadd.f32 %v12914_v56, %v17431_v24  ;;  %13298 = vmatpush3.bf16.msra.mxu1 %v14644_v19  ;;  %v5417_v26 = vadd.f32 %v17272_v3, %v5368_v40  ;;  %v7822_v3 = vrot.slane %v7820_v30, 3  ;;  %v7825_v33 = vrot.slane %v7823_v4, 4 }
 0x447   : > { %13299 = vmatprep.subr.bf16.mxu1 %v14645_v54 }
 0x448   : > { %v12915_v15 = vpop.f32.mrb[140].mxu1  ;;  %v5420_v28 = vadd.f32 %v17285_v58, %v5371_v32  ;;  %v7826_v21 = vor.u32 %v7825_v33, %v7822_v3 }
 0x449   : > { %v12916_v16 = vpop.f32.mrb[141].mxu1 }
 0x44a   : > { %v12917_v49 = vadd.f32 %v12916_v16, %v12915_v15  ;;  %v12918_v38 = vpop.f32.mrb[142].mxu1  ;;  %13300 = vmatpush3.bf16.msra.mxu1 %v14646_v27  ;;  %v7827_v57 = vsel %vm7750_vm6, %v7766_v47, %v7826_v21 }
 0x44b   : > { %v12919_v24 = vpop.f32.mrb[143].mxu1 }
 0x44c   : > { %v5376_v17 = vadd.f32 %v12917_v49, %v17454_v37  ;;  %v12920_v20 = vadd.f32 %v12919_v24, %v12918_v38 }
 0x44d   : > { %8088 = vmatmul.mubr.bf16.vlgmr.msra.gmra.mrb[192].mxu1 %v7767_v31 }
 0x44e   : > { %v13105_v2 = vpop.f32.mrb[192].mxu0  ;;  %v5379_v58 = vadd.f32 %v12920_v20, %v17462_v48  ;;  %8095 = vmatprep.mubr.bf16.mxu1 %v7836_v59  ;;  %v5425_v63 = vadd.f32 %v17301_v0, %v5376_v17 }
 0x44f   : > { %v13106_v61 = vpop.f32.mrb[193].mxu0 }
 0x450   : > { %v17522_v23 = vadd.f32 %v13106_v61, %v13105_v2  ;;  %v13108_v12 = vpop.f32.mrb[194].mxu0  ;;  %v5428_v37 = vadd.f32 %v17306_v11, %v5379_v58 }
 0x451   : > { %v13109_v46 = vpop.f32.mrb[195].mxu0 }
 0x452   : > { %v17525_v8 = vadd.f32 %v13109_v46, %v13108_v12 }
 0x455   : > { %8096 = vmatmul.mubr.bf16.gmra.mrb[196].mxu1 %v7827_v57 }
 0x456   : > { %v13111_v36 = vpop.f32.mrb[196].mxu0 }
 0x457   : > { %v13112_v9 = vpop.f32.mrb[197].mxu0 }
 0x458   : > { %v17528_v43 = vadd.f32 %v13112_v9, %v13111_v36  ;;  %v13114_v48 = vpop.f32.mrb[198].mxu0 }
 0x459   : > { %v13115_v62 = vpop.f32.mrb[199].mxu0 }
 0x45a   : > { %v17530_v10 = vadd.f32 %v13115_v62, %v13114_v48 }
 0x460   : > { %v12965_v0 = vpop.f32.mrb[144].mxu1 }
 0x461   : > { %v12966_v19 = vpop.f32.mrb[145].mxu1 }
 0x462   : > { %v12967_v51 = vadd.f32 %v12966_v19, %v12965_v0  ;;  %v12968_v54 = vpop.f32.mrb[146].mxu1 }
 0x463   : > { %v12969_v55 = vpop.f32.mrb[147].mxu1 }
 0x464   : > { %v5466_v34 = vadd.f32 %v12967_v51, %v5417_v26  ;;  %v12970_v11 = vadd.f32 %v12969_v55, %v12968_v54 }
 0x466   : > { %v5515_v40 = vadd.f32 %v17364_v53, %v5466_v34  ;;  %v5469_v56 = vadd.f32 %v12970_v11, %v5420_v28 }
 0x468   : > { %v5518_v13 = vadd.f32 %v17371_v25, %v5469_v56  ;;  %v12971_v6 = vpop.f32.mrb[148].mxu1  ;;  %v5529_v5 = vadd.f32 %v17537_v50, %v5515_v40 }
 0x469   : > { %v12972_v45 = vpop.f32.mrb[149].mxu1 }
 0x46a   : > { %v12973_v32 = vadd.f32 %v12972_v45, %v12971_v6  ;;  %v12974_v27 = vpop.f32.mrb[150].mxu1  ;;  %v5530_v47 = vadd.f32 %v17537_v50, %v5518_v13  ;;  %v5533_v53 = vmax.f32 %v5529_v5, 0.0 }
 0x46b   : > { %v12975_v26 = vpop.f32.mrb[151].mxu1 }
 0x46c   : > { %v5474_v15 = vadd.f32 %v12973_v32, %v5425_v63  ;;  %v12976_v30 = vadd.f32 %v12975_v26, %v12974_v27  ;;  %v5534_v4 = vmax.f32 %v5530_v47, 0.0 }
 0x46e   : > { %v13161_v28 = vpop.f32.mrb[200].mxu0  ;;  %v5523_v25 = vadd.f32 %v17388_v18, %v5474_v15  ;;  %v5477_v16 = vadd.f32 %v12976_v30, %v5428_v37  ;;  %v5537_v7 = vpack.c.bf16 %v5534_v4, %v5533_v53 }
 0x46f   : > { %v13162_v41 = vpop.f32.mrb[201].mxu0 }
 0x470   : > { %v17542_v49 = vadd.f32 %v13162_v41, %v13161_v28  ;;  %v13164_v38 = vpop.f32.mrb[202].mxu0  ;;  %v5526_v24 = vadd.f32 %v17393_v52, %v5477_v16  ;;  %5541 = vrot.lane.b32.xlu1 %v5537_v7, %s18728_s27  ;;  %v5531_v17 = vadd.f32 %v17537_v50, %v5523_v25 }
 0x471   : > { %v13165_v31 = vpop.f32.mrb[203].mxu0 }
 0x472   : > { %v17547_v20 = vadd.f32 %v13165_v31, %v13164_v38  ;;  %v5532_v3 = vadd.f32 %v17537_v50, %v5526_v24  ;;  %v5535_v33 = vmax.f32 %v5531_v17, 0.0 }
 0x474   : > { %v5536_v2 = vmax.f32 %v5532_v3, 0.0 }
 0x476   : > { %v13167_v18 = vpop.f32.mrb[204].mxu0  ;;  %v5538_v58 = vpack.c.bf16 %v5536_v2, %v5535_v33 }
 0x477   : > { %v13168_v59 = vpop.f32.mrb[205].mxu0 }
 0x478   : > { %v17550_v61 = vadd.f32 %v13168_v59, %v13167_v18  ;;  %v13170_v63 = vpop.f32.mrb[206].mxu0  ;;  %5543 = vrot.lane.b32.xlu1 %v5538_v58, %s18728_s27 }
 0x479   : > { %v13171_v12 = vpop.f32.mrb[207].mxu0 }
 0x47a   : > { %v17553_v52 = vadd.f32 %v13171_v12, %v13170_v63 }
 0x480   : > { %v13021_v46 = vpop.f32.mrb[152].mxu1 }
 0x481   : > { %v13022_v21 = vpop.f32.mrb[153].mxu1 }
 0x482   : > { %v13023_v37 = vadd.f32 %v13022_v21, %v13021_v46  ;;  %v13024_v57 = vpop.f32.mrb[154].mxu1 }
 0x483   : > { %v13025_v36 = vpop.f32.mrb[155].mxu1 }
 0x484   : > { %v6044_v9 = vadd.f32 %v17456_v42, %v13023_v37  ;;  %v13026_v48 = vadd.f32 %v13025_v36, %v13024_v57 }
 0x486   : > { %v6047_v62 = vadd.f32 %v17464_v22, %v13026_v48 }
 0x488   : > { %v13027_v0 = vpop.f32.mrb[156].mxu1 }
 0x489   : > { %v13028_v19 = vpop.f32.mrb[157].mxu1 }
 0x48a   : > { %v13029_v51 = vadd.f32 %v13028_v19, %v13027_v0  ;;  %v13030_v54 = vpop.f32.mrb[158].mxu1 }
 0x48b   : > { %v13031_v55 = vpop.f32.mrb[159].mxu1 }
 0x48c   : > { %v6052_v34 = vadd.f32 %v17480_v29, %v13029_v51  ;;  %v13032_v11 = vadd.f32 %v13031_v55, %v13030_v54 }
 0x48e   : > { %v13217_v40 = vpop.f32.mrb[208].mxu0  ;;  %v6055_v56 = vadd.f32 %v17485_v35, %v13032_v11 }
 0x48f   : > { %v13218_v13 = vpop.f32.mrb[209].mxu0 }
 0x490   : > { %v17559_v6 = vadd.f32 %v13218_v13, %v13217_v40  ;;  %v13220_v5 = vpop.f32.mrb[210].mxu0  ;;  %v14651_v13 = vld [vmem:[%s18754_s9 + $0x48] sm:$0xff]  }
 0x491   : > { %v13221_v45 = vpop.f32.mrb[211].mxu0 }
 0x492   : > { %v17561_v42 = vadd.f32 %v13221_v45, %v13220_v5  ;;  %v14656_v45 = vld [vmem:[%s18754_s9 + $0xc0] sm:$0xff]  }
 0x493   : > { %13341 = vmatprep.subr.bf16.mxu1 %v14656_v45 }
 0x496   : > { %v13223_v32 = vpop.f32.mrb[212].mxu0 }
 0x497   : > { %v13224_v22 = vpop.f32.mrb[213].mxu0 }
 0x498   : > { %v17563_v27 = vadd.f32 %v13224_v22, %v13223_v32  ;;  %v13226_v47 = vpop.f32.mrb[214].mxu0  ;;  %v14652_v32 = vld [vmem:[%s18754_s9 + $0x8] sm:$0xff]   ;;  %v14658_v22 = vld [vmem:[%s18754_s9 + $0x80] sm:$0xff]  }
 0x499   : > { %v13227_v26 = vpop.f32.mrb[215].mxu0  ;;  %13342 = vmatpush3.bf16.msra.mxu1 %v14658_v22 }
 0x49a   : > { %v17565_v15 = vadd.f32 %v13227_v26, %v13226_v47  ;;  %v14660_v47 = vld [vmem:[%s18754_s9 + $0xc8] sm:$0xff]   ;;  %v14653_v26 = vld [vmem:[%s18754_s9 + $0x50] sm:$0xff]  }
 0x49b   : > { %13343 = vmatprep.subr.bf16.mxu1 %v14660_v47 }
 0x4a0   : > { %v13077_v29 = vpop.f32.mrb[160].mxu1 }
 0x4a1   : > { %v13078_v30 = vpop.f32.mrb[161].mxu1 }
 0x4a2   : > { %v13079_v53 = vadd.f32 %v13078_v30, %v13077_v29  ;;  %v13080_v4 = vpop.f32.mrb[162].mxu1  ;;  %v14662_v29 = vld [vmem:[%s18754_s9 + $0x88] sm:$0xff]   ;;  %v14664_v30 = vld [vmem:[%s18754_s9 + $0xd0] sm:$0xff]  }
 0x4a3   : > { %v13081_v35 = vpop.f32.mrb[163].mxu1  ;;  %13344 = vmatpush3.bf16.msra.mxu1 %v14662_v29 }
 0x4a4   : > { %v6325_v28 = vadd.f32 %v13079_v53, %v6044_v9  ;;  %v13082_v25 = vadd.f32 %v13081_v35, %v13080_v4  ;;  %v14654_v53 = vld [vmem:[%s18754_s9 + $0x10] sm:$0xff]   ;;  %v14655_v35 = vld [vmem:[%s18754_s9 + $0x58] sm:$0xff]   ;;  %13345 = vmatprep.subr.bf16.mxu1 %v14664_v30 }
 0x4a6   : > { %v6374_v16 = vadd.f32 %v17522_v23, %v6325_v28  ;;  %v6328_v41 = vadd.f32 %v13082_v25, %v6047_v62  ;;  %v14666_v25 = vld [vmem:[%s18754_s9 + $0x90] sm:$0xff]  }
 0x4a7   : > { %13346 = vmatpush3.bf16.msra.mxu1 %v14666_v25 }
 0x4a8   : > { %v6388_v7 = vadd.f32 %v17537_v50, %v6374_v16  ;;  %v6377_v38 = vadd.f32 %v17525_v8, %v6328_v41  ;;  %v13083_v24 = vpop.f32.mrb[164].mxu1 }
 0x4a9   : > { %v13084_v31 = vpop.f32.mrb[165].mxu1 }
 0x4aa   : > { %v6389_v17 = vadd.f32 %v17537_v50, %v6377_v38  ;;  %v13085_v3 = vadd.f32 %v13084_v31, %v13083_v24  ;;  %v13086_v33 = vpop.f32.mrb[166].mxu1  ;;  %v6392_v18 = vmax.f32 %v6388_v7, 0.0  ;;  %v14657_v38 = vld [vmem:[%s18754_s9 + $0x18] sm:$0xff]  }
 0x4ab   : > { %v13087_v2 = vpop.f32.mrb[167].mxu1 }
 0x4ac   : > { %v6393_v59 = vmax.f32 %v6389_v17, 0.0  ;;  %v6333_v58 = vadd.f32 %v13085_v3, %v6052_v34  ;;  %v13088_v63 = vadd.f32 %v13087_v2, %v13086_v33  ;;  %v14659_v17 = vld [vmem:[%s18754_s9 + $0x60] sm:$0xff]  }
 0x4ad   : > { %v14661_v33 = vld [vmem:[%s18754_s9 + $0x20] sm:$0xff]  }
 0x4ae   : > { %v13273_v12 = vpop.f32.mrb[216].mxu0  ;;  %v6382_v46 = vadd.f32 %v17528_v43, %v6333_v58  ;;  %v6336_v23 = vadd.f32 %v13088_v63, %v6055_v56  ;;  %v6396_v37 = vpack.c.bf16 %v6393_v59, %v6392_v18  ;;  %v14650_v56 = vld [vmem:[%s18754_s9] sm:$0xff]  }
 0x4af   : > { %v13274_v21 = vpop.f32.mrb[217].mxu0 }
 0x4b0   : > { %v17572_v57 = vadd.f32 %v13274_v21, %v13273_v12  ;;  %v13276_v8 = vpop.f32.mrb[218].mxu0  ;;  %v6390_v36 = vadd.f32 %v17537_v50, %v6382_v46  ;;  %v6385_v9 = vadd.f32 %v17530_v10, %v6336_v23  ;;  %6398 = vst.msk [vmem:[#allocation3 + $0x8] sm:$0xff] %vm1647_vm0, %v6396_v37  ;;  %v14649_v10 = vld [vmem:[%s18754_s9 + $0x40] sm:$0xff]  }
 0x4b1   : > { %v13277_v48 = vpop.f32.mrb[219].mxu0  ;;  %13369 = vmatprep.subr.bf16.mxu0 %v14649_v10 }
 0x4b2   : > { %v17577_v62 = vadd.f32 %v13277_v48, %v13276_v8  ;;  %v6391_v0 = vadd.f32 %v17537_v50, %v6385_v9  ;;  %v6394_v19 = vmax.f32 %v6390_v36, 0.0  ;;  %13370 = vmatpush3.bf16.msra.mxu0 %v14650_v56 }
 0x4b3   : > { %13371 = vmatprep.subr.bf16.mxu0 %v14651_v13 }
 0x4b4   : > { %v6395_v51 = vmax.f32 %v6391_v0, 0.0 }
 0x4b6   : > { %v13279_v43 = vpop.f32.mrb[220].mxu0  ;;  %v6397_v55 = vpack.c.bf16 %v6395_v51, %v6394_v19  ;;  %13372 = vmatpush3.bf16.msra.mxu0 %v14652_v32 }
 0x4b7   : > { %v13280_v54 = vpop.f32.mrb[221].mxu0  ;;  %13373 = vmatprep.subr.bf16.mxu0 %v14653_v26 }
 0x4b8   : > { %v17580_v34 = vadd.f32 %v13280_v54, %v13279_v43  ;;  %v13282_v11 = vpop.f32.mrb[222].mxu0  ;;  %6399 = vst.msk [vmem:[#allocation3 + $0x18] sm:$0x7f] %vm3854_vm5, %v6397_v55 }
 0x4b9   : > { %v13283_v40 = vpop.f32.mrb[223].mxu0 }
 0x4ba   : > { %v17592_v5 = vadd.f32 %v13283_v40, %v13282_v11  ;;  %13374 = vmatpush3.bf16.msra.mxu0 %v14654_v53 }
 0x4bb   : > { %13375 = vmatprep.subr.bf16.mxu0 %v14655_v35 }
 0x4be   : > { %13376 = vmatpush3.bf16.msra.mxu0 %v14657_v38 }
 0x4bf   : > { %13377 = vmatprep.subr.bf16.mxu0 %v14659_v17 }
 0x4c0   : > { %v13133_v4 = vpop.f32.mrb[168].mxu1 }
 0x4c1   : > { %v13134_v28 = vpop.f32.mrb[169].mxu1 }
 0x4c2   : > { %v13135_v16 = vadd.f32 %v13134_v28, %v13133_v4  ;;  %v13136_v41 = vpop.f32.mrb[170].mxu1  ;;  %13378 = vmatpush3.bf16.msra.mxu0 %v14661_v33 }
 0x4c3   : > { %v13137_v7 = vpop.f32.mrb[171].mxu1 }
 0x4c4   : > { %v6914_v24 = vadd.f32 %v17542_v49, %v13135_v16  ;;  %v13138_v31 = vadd.f32 %v13137_v7, %v13136_v41  ;;  %v14663_v49 = vld [vmem:[%s18754_s9 + $0x68] sm:$0xff]  }
 0x4c5   : > { %13379 = vmatprep.subr.bf16.mxu0 %v14663_v49 }
 0x4c6   : > { %v6917_v3 = vadd.f32 %v17547_v20, %v13138_v31  ;;  %v14665_v20 = vld [vmem:[%s18754_s9 + $0x28] sm:$0xff]  }
 0x4c7   : > { %13380 = vmatpush3.bf16.msra.mxu0 %v14665_v20 }
 0x4c8   : > { %v13139_v2 = vpop.f32.mrb[172].mxu1 }
 0x4c9   : > { %v13140_v18 = vpop.f32.mrb[173].mxu1 }
 0x4ca   : > { %v13141_v59 = vadd.f32 %v13140_v18, %v13139_v2  ;;  %v13142_v58 = vpop.f32.mrb[174].mxu1 }
 0x4cb   : > { %v13143_v63 = vpop.f32.mrb[175].mxu1 }
 0x4cc   : > { %v6922_v12 = vadd.f32 %v17550_v61, %v13141_v59  ;;  %v13144_v46 = vadd.f32 %v13143_v63, %v13142_v58 }
 0x4ce   : > { %v13329_v23 = vpop.f32.mrb[224].mxu0  ;;  %v6925_v21 = vadd.f32 %v17553_v52, %v13144_v46 }
 0x4cf   : > { %v13330_v37 = vpop.f32.mrb[225].mxu0 }
 0x4d0   : > { %v17643_v8 = vadd.f32 %v13330_v37, %v13329_v23  ;;  %v13332_v36 = vpop.f32.mrb[226].mxu0 }
 0x4d1   : > { %v13333_v9 = vpop.f32.mrb[227].mxu0 }
 0x4d2   : > { %v17645_v48 = vadd.f32 %v13333_v9, %v13332_v36 }
 0x4d6   : > { %v13335_v0 = vpop.f32.mrb[228].mxu0 }
 0x4d7   : > { %v13336_v19 = vpop.f32.mrb[229].mxu0 }
 0x4d8   : > { %v17647_v51 = vadd.f32 %v13336_v19, %v13335_v0  ;;  %v13338_v43 = vpop.f32.mrb[230].mxu0  ;;  %v14668_v0 = vld [vmem:[%s18754_s9 + $0xd8] sm:$0xff]  }
 0x4d9   : > { %v13339_v54 = vpop.f32.mrb[231].mxu0  ;;  %13347 = vmatprep.subr.bf16.mxu1 %v14668_v0  ;;  %v14687_v0 = vld [vmem:[%s18754_s9 + $0x1d8] sm:$0xff]  }
 0x4da   : > { %v17649_v61 = vadd.f32 %v13339_v54, %v13338_v43  ;;  %v14670_v43 = vld [vmem:[%s18754_s9 + $0x98] sm:$0xff]  }
 0x4db   : > { %v14671_v54 = vld [vmem:[%s18754_s9 + $0x78] sm:$0xff]   ;;  %13348 = vmatpush3.bf16.msra.mxu1 %v14670_v43 }
 0x4e0   : > { %v13189_v55 = vpop.f32.mrb[176].mxu1 }
 0x4e1   : > { %v13190_v11 = vpop.f32.mrb[177].mxu1 }
 0x4e2   : > { %v13191_v52 = vadd.f32 %v13190_v11, %v13189_v55  ;;  %v13192_v40 = vpop.f32.mrb[178].mxu1  ;;  %v5542_v10 = vpop.permute.xlu1 %5541  ;;  %v14672_v55 = vld [vmem:[%s18754_s9 + $0xe0] sm:$0xff]  }
 0x4e3   : > { %5548 = vst.msk [vmem:[#allocation3] sm:$0xff] %vm5547_vm7, %v5542_v10  ;;  %v13193_v56 = vpop.f32.mrb[179].mxu1  ;;  %13349 = vmatprep.subr.bf16.mxu1 %v14672_v55 }
 0x4e4   : > { %v7173_v13 = vadd.f32 %v13191_v52, %v6914_v24  ;;  %v13194_v45 = vadd.f32 %v13193_v56, %v13192_v40  ;;  %v14674_v40 = vld [vmem:[%s18754_s9 + $0xa0] sm:$0xff]  }
 0x4e5   : > { %13350 = vmatpush3.bf16.msra.mxu1 %v14674_v40 }
 0x4e6   : > { %v7222_v32 = vadd.f32 %v17559_v6, %v7173_v13  ;;  %v7176_v22 = vadd.f32 %v13194_v45, %v6917_v3 }
 0x4e8   : > { %v7225_v47 = vadd.f32 %v17561_v42, %v7176_v22  ;;  %v13195_v26 = vpop.f32.mrb[180].mxu1 }
 0x4e9   : > { %v13196_v29 = vpop.f32.mrb[181].mxu1 }
 0x4ea   : > { %v13197_v30 = vadd.f32 %v13196_v29, %v13195_v26  ;;  %v13198_v53 = vpop.f32.mrb[182].mxu1  ;;  %v5544_v4 = vpop.permute.xlu1 %5543 }
 0x4eb   : > { %5550 = vst.msk [vmem:[#allocation3 + $0x10] sm:$0x7f] %vm5549_vm8, %v5544_v4  ;;  %v13199_v35 = vpop.f32.mrb[183].mxu1 }
 0x4ec   : > { %v7181_v28 = vadd.f32 %v13197_v30, %v6922_v12  ;;  %v13200_v25 = vadd.f32 %v13199_v35, %v13198_v53 }
 0x4ee   : > { %v7230_v16 = vadd.f32 %v17563_v27, %v7181_v28  ;;  %v7184_v41 = vadd.f32 %v13200_v25, %v6925_v21  ;;  %v14675_v25 = vld [vmem:[%s18754_s9 + $0x1c0] sm:$0xff]  }
 0x4f0   : > { %v7233_v7 = vadd.f32 %v17565_v15, %v7184_v41 }
 0x500   : > { %v13245_v6 = vpop.f32.mrb[184].mxu1 }
 0x501   : > { %v13246_v38 = vpop.f32.mrb[185].mxu1 }
 0x502   : > { %v13247_v24 = vadd.f32 %v13246_v38, %v13245_v6  ;;  %v13248_v42 = vpop.f32.mrb[186].mxu1  ;;  %v14682_v38 = vld [vmem:[%s18754_s9 + $0xb0] sm:$0xff]  }
 0x503   : > { %v13249_v31 = vpop.f32.mrb[187].mxu1 }
 0x504   : > { %v7656_v17 = vadd.f32 %v17572_v57, %v13247_v24  ;;  %v13250_v3 = vadd.f32 %v13249_v31, %v13248_v42  ;;  %v14684_v24 = vld [vmem:[%s18754_s9 + $0xf8] sm:$0xff]  }
 0x506   : > { %v7670_v33 = vadd.f32 %v7656_v17, %v7222_v32  ;;  %v7659_v2 = vadd.f32 %v17577_v62, %v13250_v3  ;;  %v14667_v62 = vld [vmem:[%s18754_s9 + $0x70] sm:$0xff]   ;;  %v14686_v3 = vld [vmem:[%s18754_s9 + $0xb8] sm:$0xff]  }
 0x507   : > { %13381 = vmatprep.subr.bf16.mxu0 %v14667_v62  ;;  %v14685_v62 = vld [vmem:[%s18754_s9 + $0x190] sm:$0xff]  }
 0x508   : > { %v7671_v49 = vadd.f32 %v7659_v2, %v7225_v47  ;;  %v13251_v18 = vpop.f32.mrb[188].mxu1  ;;  %v14677_v2 = vld [vmem:[%s18754_s9 + $0x180] sm:$0xff]  }
 0x509   : > { %v13252_v59 = vpop.f32.mrb[189].mxu1 }
 0x50a   : > { %v13253_v58 = vadd.f32 %v13252_v59, %v13251_v18  ;;  %v13254_v63 = vpop.f32.mrb[190].mxu1  ;;  %v8179_v59 = vld [vmem:[#allocation3] sm:$0xff] }
 0x50b   : > { %v13255_v27 = vpop.f32.mrb[191].mxu1 }
 0x50c   : > { %v7664_v20 = vadd.f32 %v17580_v34, %v13253_v58  ;;  %v13256_v15 = vadd.f32 %v13255_v27, %v13254_v63  ;;  %v14669_v34 = vld [vmem:[%s18754_s9 + $0x30] sm:$0xff]   ;;  %v14679_v58 = vld [vmem:[%s18754_s9 + $0x1c8] sm:$0xff]  }
 0x50d   : > { %13382 = vmatpush3.bf16.msra.mxu0 %v14669_v34 }
 0x50e   : > { %v7672_v12 = vadd.f32 %v7664_v20, %v7230_v16  ;;  %v7667_v46 = vadd.f32 %v17592_v5, %v13256_v15  ;;  %13383 = vmatprep.subr.bf16.mxu0 %v14671_v54  ;;  %v14676_v16 = vld [vmem:[%s18754_s9 + $0xe8] sm:$0xff]   ;;  %v8252_v20 = vshll.u32 %v8179_v59, 16  ;;  %v8181_v54 = vld [vmem:[#allocation3 + $0x10] sm:$0xf] }
 0x50f   : > { %13351 = vmatprep.subr.bf16.mxu1 %v14676_v16  ;;  %v14681_v15 = vld [vmem:[%s18754_s9 + $0x188] sm:$0xff]  }
 0x510   : > { %v7673_v23 = vadd.f32 %v7667_v46, %v7233_v7  ;;  %v14678_v7 = vld [vmem:[%s18754_s9 + $0xa8] sm:$0xff]   ;;  %v14683_v46 = vld [vmem:[%s18754_s9 + $0x1d0] sm:$0xff]  }
 0x511   : > { %13352 = vmatpush3.bf16.msra.mxu1 %v14678_v7  ;;  %v14695_v7 = vld [vmem:[%s18754_s9 + $0x1e8] sm:$0xff]  }
 0x520   : > { %v13301_v21 = vpop.f32.mrb[192].mxu1 }
 0x521   : > { %v13302_v37 = vpop.f32.mrb[193].mxu1 }
 0x522   : > { %v13303_v57 = vadd.f32 %v13302_v37, %v13301_v21  ;;  %v13304_v36 = vpop.f32.mrb[194].mxu1 }
 0x523   : > { %v13305_v9 = vpop.f32.mrb[195].mxu1 }
 0x524   : > { %v8139_v5 = vadd.f32 %v17643_v8, %v13303_v57  ;;  %v13306_v19 = vadd.f32 %v13305_v9, %v13304_v36  ;;  %v14673_v8 = vld [vmem:[%s18754_s9 + $0x38] sm:$0xff]   ;;  %v8254_v9 = vrot.slane %v8252_v20, 1 }
 0x525   : > { %13384 = vmatpush3.bf16.msra.mxu0 %v14673_v8 }
 0x526   : > { %v8153_v11 = vadd.f32 %v8139_v5, %v7670_v33  ;;  %v8142_v52 = vadd.f32 %v17645_v48, %v13306_v19  ;;  %13425 = vmatprep.subr.bf16.mxu0 %v14675_v25  ;;  %v14692_v25 = vld [vmem:[%s18754_s9 + $0x148] sm:$0xff]  }
 0x528   : > { %v8154_v10 = vadd.f32 %v8142_v52, %v7671_v49  ;;  %v13307_v56 = vpop.f32.mrb[196].mxu1  ;;  %v8157_v13 = vadd.f32 %v17537_v50, %v8153_v11 }
 0x529   : > { %v13308_v45 = vpop.f32.mrb[197].mxu1 }
 0x52a   : > { %v13309_v32 = vadd.f32 %v13308_v45, %v13307_v56  ;;  %v13310_v22 = vpop.f32.mrb[198].mxu1  ;;  %v8158_v48 = vadd.f32 %v17537_v50, %v8154_v10  ;;  %v8161_v30 = vmax.f32 %v8157_v13, 0.0  ;;  %v8250_v10 = vshrl.u32 %v8179_v59, 16  ;;  %v14689_v45 = vld [vmem:[%s18754_s9 + $0x198] sm:$0xff]  }
 0x52b   : > { %v13311_v47 = vpop.f32.mrb[199].mxu1 }
 0x52c   : > { %v8147_v26 = vadd.f32 %v17647_v51, %v13309_v32  ;;  %v13312_v29 = vadd.f32 %v13311_v47, %v13310_v22  ;;  %v8162_v53 = vmax.f32 %v8158_v48, 0.0  ;;  %v8255_v47 = vor.u32 %v8254_v9, %v8250_v10  ;;  %v14706_v9 = vld [vmem:[%s18754_s9 + $0x120] sm:$0xff]  }
 0x52e   : > { %v8155_v4 = vadd.f32 %v8147_v26, %v7672_v12  ;;  %v8150_v35 = vadd.f32 %v17649_v61, %v13312_v29  ;;  %v8165_v28 = vpack.c.bf16 %v8162_v53, %v8161_v30  ;;  %v14680_v61 = vld [vmem:[%s18754_s9 + $0xf0] sm:$0xff]   ;;  %v14690_v26 = vld [vmem:[%s18754_s9 + $0x100] sm:$0xff]  }
 0x52f   : > { %13353 = vmatprep.subr.bf16.mxu1 %v14680_v61  ;;  %v17732_v12 = vld [vmem:[#allocation3 + $0x10] sm:$0x1f] }
 0x530   : > { %v8156_v41 = vadd.f32 %v8150_v35, %v7673_v23  ;;  %8169 = vrot.lane.b32.xlu0 %v8165_v28, %s18728_s27  ;;  %v8159_v51 = vadd.f32 %v17537_v50, %v8155_v4  ;;  %13354 = vmatpush3.bf16.msra.mxu1 %v14682_v38  ;;  %v8257_v57 = vshll.u32 %v17732_v12, 16  ;;  %v14691_v35 = vld [vmem:[%s18754_s9 + $0x1e0] sm:$0xff]   ;;  %v8768_v38 = vld [vmem:[#allocation3 + $0x10] sm:$0xff] }
 0x531   : > { %13355 = vmatprep.subr.bf16.mxu1 %v14684_v24  ;;  %v14697_v24 = vld [vmem:[%s18754_s9 + $0x1a8] sm:$0xff]  }
 0x532   : > { %v8160_v6 = vadd.f32 %v17537_v50, %v8156_v41  ;;  %v8163_v42 = vmax.f32 %v8159_v51, 0.0  ;;  %v14688_v50 = vld [vmem:[%s18754_s9 + $0x140] sm:$0xff]   ;;  %v8259_v56 = vrot.slane %v8257_v57, 1  ;;  %v14694_v51 = vld [vmem:[%s18754_s9 + $0x108] sm:$0xff]  }
 0x533   : > { %v14693_v41 = vld [vmem:[%s18754_s9 + $0x1a0] sm:$0xff]  }
 0x534   : > { %v8164_v31 = vmax.f32 %v8160_v6, 0.0  ;;  %13356 = vmatpush3.bf16.msra.mxu1 %v14686_v3  ;;  %v8260_v28 = vsel %vm4196_vm3, %v8255_v47, %v8259_v56  ;;  %v14696_v6 = vld [vmem:[%s18754_s9 + $0x150] sm:$0xff]   ;;  %v8571_v3 = vld [vmem:[#allocation3] sm:$0xf8] }
 0x535   : > { %13397 = vmatprep.subr.bf16.mxu1 %v14688_v50  ;;  %v8803_v20 = vshrl.u32 %v8571_v3, 16  ;;  %v14718_v47 = vld [vmem:[%s18710_s11 + $0x50] sm:$0xff]  }
 0x536   : > { %v8166_v17 = vpack.c.bf16 %v8164_v31, %v8163_v42  ;;  %v8273_v42 = vshrl.u32 %v17732_v12, 16  ;;  %v14703_v12 = vld [vmem:[%s18754_s9 + $0x1f8] sm:$0xff]  }
 0x537   : > { %v8805_v57 = vrot.slane %v8803_v20, 3 }
 0x538   : > { %8171 = vrot.lane.b32.xlu0 %v8166_v17, %s18728_s27  ;;  %v14698_v17 = vld [vmem:[%s18754_s9 + $0x110] sm:$0xff]   ;;  %v8275_v50 = vor.u32 %v8273_v42, %v8259_v56  ;;  %v14713_v56 = vld [vmem:[%s18710_s11] sm:$0xff]   ;;  %s18755_s27 = sld [smem:[#allocation14_spill]] }
 0x53e   : > { %s706_s6 = scalar_lea.vmem %s18755_s27, %s15189_s26 }
 0x5a2   : > { %v8170_v33 = vpop.permute.xlu0 %8169 }
 0x5a3   : > { %8175 = vst.msk [vmem:[#allocation3 + $0x8] sm:$0xff] %vm5547_vm7, %v8170_v33 }
 0x5aa   : > { %v8172_v49 = vpop.permute.xlu0 %8171  ;;  %v8180_v18 = vld [vmem:[#allocation3 + $0x8] sm:$0xff] }
 0x5ab   : > { %8176 = vst.msk [vmem:[#allocation3 + $0x18] sm:$0x7f] %vm5549_vm8, %v8172_v49  ;;  %8555 = vmatprep.mubr.bf16.mxu0 %v8180_v18  ;;  %v17727_v63 = vld [vmem:[#allocation3 + $0x8] sm:$0xf8]  ;;  %v8264_v27 = vshll.u32 %v8180_v18, 16  ;;  %v8262_v36 = vshrl.u32 %v8180_v18, 16 }
 0x5ac   : > { %8556 = vmatmul.mubr.bf16.vlgmr.msra.gmra.mrb[232].mxu0 %v8179_v59  ;;  %v8820_v23 = vshrl.u32 %v17727_v63, 16  ;;  %v8823_v21 = vshll.u32 %v17727_v63, 16  ;;  %v8614_v33 = vrot.slane %v17727_v63, 3  ;;  %v14700_v49 = vld [vmem:[%s18754_s9 + $0x158] sm:$0xff]   ;;  %v8811_v18 = vshrl.u32 %v8768_v38, 16 }
 0x5ad   : > { %13426 = vmatpush3.bf16.msra.mxu0 %v14677_v2  ;;  %v8266_v37 = vrot.slane %v8264_v27, 1  ;;  %v14699_v2 = vld [vmem:[%s18754_s9 + $0x1f0] sm:$0xff]   ;;  %v8814_v59 = vshll.u32 %v8768_v38, 16  ;;  %v8806_v63 = vshll.u32 %v8571_v3, 16 }
 0x5ae   : > { %13427 = vmatprep.subr.bf16.mxu0 %v14679_v58  ;;  %v8822_v43 = vrot.slane %v8820_v23, 3  ;;  %v8825_v11 = vrot.slane %v8823_v21, 4  ;;  %v14701_v27 = vld [vmem:[%s18754_s9 + $0x1b0] sm:$0xff]   ;;  %v8813_v23 = vrot.slane %v8811_v18, 3 }
 0x5af   : > { %v8267_v40 = vor.u32 %v8266_v37, %v8262_v36  ;;  %v8816_v21 = vrot.slane %v8814_v59, 4  ;;  %v14705_v37 = vld [vmem:[%s18754_s9 + $0x1b8] sm:$0xff]   ;;  %v8808_v36 = vrot.slane %v8806_v63, 4 }
 0x5b0   : > { %v8826_v53 = vor.u32 %v8825_v11, %v8822_v43  ;;  %v14709_v43 = vld [vmem:[%s18754_s9 + $0x170] sm:$0xff]  }
 0x5b1   : > { %13428 = vmatpush3.bf16.msra.mxu0 %v14681_v15  ;;  %v14702_v15 = vld [vmem:[%s18754_s9 + $0x118] sm:$0xff]   ;;  %v8573_v11 = vld [vmem:[#allocation3 + $0x10] sm:$0x7f] }
 0x5b2   : > { %v8182_v34 = vld [vmem:[#allocation3 + $0x18] sm:$0xf]  ;;  %13429 = vmatprep.subr.bf16.mxu0 %v14683_v46  ;;  %v14704_v46 = vld [vmem:[%s18754_s9 + $0x160] sm:$0xff]  }
 0x5b3   : > { %v8216_v5 = vld [vmem:[#allocation3 + $0x18] sm:$0x1f]  ;;  %8563 = vmatprep.mubr.bf16.mxu0 %v8182_v34  ;;  %v8809_v34 = vor.u32 %v8808_v36, %v8805_v57 }
 0x5b4   : > { %v8769_v19 = vld [vmem:[#allocation3 + $0x18] sm:$0xff]  ;;  %v8269_v55 = vshll.u32 %v8216_v5, 16  ;;  %8564 = vmatmul.mubr.bf16.gmra.mrb[236].mxu0 %v8181_v54  ;;  %v8276_v32 = vshrl.u32 %v8216_v5, 16  ;;  %v14708_v5 = vld [vmem:[%s18754_s9 + $0x128] sm:$0xff]   ;;  %v14710_v54 = vld [vmem:[%s18754_s9 + $0x130] sm:$0xff]  }
 0x5b5   : > { %v8828_v52 = vshrl.u32 %v8769_v19, 16  ;;  %v8831_v8 = vshll.u32 %v8769_v19, 16  ;;  %13430 = vmatpush3.bf16.msra.mxu0 %v14685_v62  ;;  %v17773_v61 = vld [vmem:[#allocation3 + $0x18] sm:$0x7f]  ;;  %v8817_v62 = vor.u32 %v8816_v21, %v8813_v23 }
 0x5b6   : > { %v8271_v13 = vrot.slane %v8269_v55, 1  ;;  %13431 = vmatprep.subr.bf16.mxu0 %v14687_v0  ;;  %v8615_v31 = vrot.slane %v17773_v61, 3  ;;  %v14707_v0 = vld [vmem:[%s18754_s9 + $0x168] sm:$0xff]   ;;  %v14711_v55 = vld [vmem:[%s18754_s9 + $0x178] sm:$0xff]  }
 0x5b7   : > { %v8830_v22 = vrot.slane %v8828_v52, 3  ;;  %v8833_v48 = vrot.slane %v8831_v8, 4  ;;  %v8818_v19 = vsel %vm7750_vm6, %v8809_v34, %v8817_v62  ;;  %v14712_v52 = vld [vmem:[%s18754_s9 + $0x138] sm:$0xff]   ;;  %v8612_v8 = vrot.slane %v8573_v11, 3  ;;  %s18759_s9 = smov 64  }
 0x5b8   : > { %v8272_v29 = vsel %vm4196_vm3, %v8267_v40, %v8271_v13  ;;  %v8278_v30 = vor.u32 %v8276_v32, %v8271_v13  ;;  %v8616_v58 = vsel %vm5739_vm4, %v8614_v33, %v8615_v31  ;;  %v8611_v40 = vrot.slane %v8571_v3, 3  ;;  %v14714_v13 = vld [vmem:[%s18710_s11 + $0x40] sm:$0xff]   ;;  %v14715_v32 = vld [vmem:[%s18710_s11 + $0x8] sm:$0xff]  }
 0x5b9   : > { %v17753_v4 = vor.u32 %v8833_v48, %v8830_v22  ;;  %8411 = vmatprep.mubr.bf16.mxu1 %v8272_v29  ;;  %13432 = vmatpush3.bf16.msra.mxu0 %v14689_v45  ;;  %v15004_v45 = vmov 0.0   ;;  %v14716_v22 = vld [vmem:[%s18710_s11 + $0x48] sm:$0xff]   ;;  %v14717_v48 = vld [vmem:[%s18710_s11 + $0x10] sm:$0xff]   ;;  %v14720_v29 = vld [vmem:[%s18710_s11 + $0x58] sm:$0xff]  }
 0x5ba   : > { %8412 = vmatmul.mubr.bf16.vlgmr.msra.gmra.mrb[200].mxu1 %v8260_v28  ;;  %13433 = vmatprep.subr.bf16.mxu0 %v14691_v35  ;;  %v8613_v10 = vsel %vm5739_vm4, %v8611_v40, %v8612_v8  ;;  %v14724_v35 = vld [vmem:[%s18710_s11 + $0x68] sm:$0xff]   ;;  %v14725_v28 = vld [vmem:[%s18710_s11 + $0x30] sm:$0xff]  }
 0x5bb   : > { %v8835_v16 = vsel %vm7750_vm6, %v8826_v53, %v17753_v4  ;;  %13398 = vmatpush3.bf16.msra.mxu1 %v14690_v26  ;;  %8419 = vmatprep.mubr.bf16.mxu1 %v8278_v30  ;;  %v14719_v26 = vld [vmem:[%s18710_s11 + $0x18] sm:$0xff]   ;;  %v14721_v30 = vld [vmem:[%s18710_s11 + $0x20] sm:$0xff]  }
 0x5bc   : > { %8968 = vmatprep.mubr.bf16.mxu0 %v8835_v16  ;;  %13399 = vmatprep.subr.bf16.mxu1 %v14692_v25  ;;  %v14722_v53 = vld [vmem:[%s18710_s11 + $0x60] sm:$0xff]   ;;  %v14726_v25 = vld [vmem:[%s18710_s11 + $0x70] sm:$0xff]   ;;  %v14727_v16 = vld [vmem:[%s18710_s11 + $0x38] sm:$0xff]  }
 0x5bd   : > { %13434 = vmatpush3.bf16.msra.mxu0 %v14693_v41  ;;  %v14728_v41 = vld [vmem:[%s18710_s11 + $0x78] sm:$0xff]  }
 0x5be   : > { %13435 = vmatprep.subr.bf16.mxu0 %v14695_v7 }
 0x5bf   : > { %13400 = vmatpush3.bf16.msra.mxu1 %v14694_v51 }
 0x5c0   : > { %13401 = vmatprep.subr.bf16.mxu1 %v14696_v6 }
 0x5c1   : > { %13436 = vmatpush3.bf16.msra.mxu0 %v14697_v24 }
 0x5c2   : > { %8420 = vmatmul.mubr.bf16.gmra.mrb[204].mxu1 %v8275_v50  ;;  %13437 = vmatprep.subr.bf16.mxu0 %v14699_v2 }
 0x5c3   : > { %13402 = vmatpush3.bf16.msra.mxu1 %v14698_v17  ;;  %8749 = vmatprep.mubr.bf16.mxu1 %v8616_v58 }
 0x5c4   : > { %13403 = vmatprep.subr.bf16.mxu1 %v14700_v49 }
 0x5c5   : > { %13438 = vmatpush3.bf16.msra.mxu0 %v14701_v27 }
 0x5c6   : > { %13439 = vmatprep.subr.bf16.mxu0 %v14703_v12 }
 0x5c7   : > { %13404 = vmatpush3.bf16.msra.mxu1 %v14702_v15 }
 0x5c8   : > { %13405 = vmatprep.subr.bf16.mxu1 %v14704_v46 }
 0x5c9   : > { %13440 = vmatpush3.bf16.msra.mxu0 %v14705_v37 }
 0x5ca   : > { %13727 = vmatprep.subr.bf16.mxu0 %v15004_v45 }
 0x5cb   : > { %13406 = vmatpush3.bf16.msra.mxu1 %v14706_v9 }
 0x5cc   : > { %13407 = vmatprep.subr.bf16.mxu1 %v14707_v0  ;;  %8969 = vmatmul.mubr.bf16.vlgmr.msra.gmra.mrb[240].mxu0 %v8818_v19 }
 0x5cd   : > { %8976 = vmatprep.mubr.bf16.mxu0 %v17753_v4  ;;  %13728 = vmatpush3.bf16.msra.mxu0 %v14713_v56  ;;  %v14723_v4 = vld [vmem:[%s18710_s11 + $0x28] sm:$0xff]  }
 0x5ce   : > { %13729 = vmatprep.subr.bf16.mxu0 %v15004_v45 }
 0x5cf   : > { %13408 = vmatpush3.bf16.msra.mxu1 %v14708_v5 }
 0x5d0   : > { %13409 = vmatprep.subr.bf16.mxu1 %v14709_v43 }
 0x5d1   : > { %13730 = vmatpush3.bf16.msra.mxu0 %v14715_v32 }
 0x5d2   : > { %13731 = vmatprep.subr.bf16.mxu0 %v15004_v45 }
 0x5d3   : > { %13410 = vmatpush3.bf16.msra.mxu1 %v14710_v54 }
 0x5d4   : > { %13411 = vmatprep.subr.bf16.mxu1 %v14711_v55  ;;  %8977 = vmatmul.mubr.bf16.gmra.mrb[244].mxu0 %v8817_v62 }
 0x5d5   : > { %13732 = vmatpush3.bf16.msra.mxu0 %v14717_v48  ;;  %13743 = vmatprep.mubr.msk.bf16.mxu0 %vm15005_vm9, %v15004_v45 }
 0x5d6   : > { %13733 = vmatprep.subr.bf16.mxu0 %v15004_v45 }
 0x5d7   : > { %13412 = vmatpush3.bf16.msra.mxu1 %v14712_v52 }
 0x5d8   : > { %13707 = vmatprep.subr.bf16.mxu1 %v15004_v45 }
 0x5d9   : > { %13734 = vmatpush3.bf16.msra.mxu0 %v14719_v26 }
 0x5da   : > { %8750 = vmatmul.mubr.bf16.vlgmr.msra.gmra.mrb[208].mxu1 %v8613_v10  ;;  %13735 = vmatprep.subr.bf16.mxu0 %v15004_v45 }
 0x5db   : > { %8757 = vmatprep.mubr.bf16.mxu1 %v8615_v31  ;;  %13708 = vmatpush3.bf16.msra.mxu1 %v14714_v13  ;;  %v12346_v13 = vld [vmem:[%s18709_s10] ss:$0 sm:$0xff] }
 0x5dc   : > { %13709 = vmatprep.subr.bf16.mxu1 %v15004_v45 }
 0x5dd   : > { %13736 = vmatpush3.bf16.msra.mxu0 %v14721_v30 }
 0x5de   : > { %13737 = vmatprep.subr.bf16.mxu0 %v15004_v45 }
 0x5df   : > { %13710 = vmatpush3.bf16.msra.mxu1 %v14716_v22 }
 0x5e0   : > { %13711 = vmatprep.subr.bf16.mxu1 %v15004_v45 }
 0x5e1   : > { %13738 = vmatpush3.bf16.msra.mxu0 %v14723_v4 }
 0x5e2   : > { %8758 = vmatmul.mubr.bf16.gmra.mrb[212].mxu1 %v8612_v8  ;;  %13739 = vmatprep.subr.bf16.mxu0 %v15004_v45 }
 0x5e3   : > { %13712 = vmatpush3.bf16.msra.mxu1 %v14718_v47  ;;  %13723 = vmatprep.mubr.msk.bf16.mxu1 %vm15005_vm9, %v15004_v45 }
 0x5e4   : > { %13713 = vmatprep.subr.bf16.mxu1 %v15004_v45 }
 0x5e5   : > { %13740 = vmatpush3.bf16.msra.mxu0 %v14725_v28 }
 0x5e6   : > { %13741 = vmatprep.subr.bf16.mxu0 %v15004_v45 }
 0x5e7   : > { %13714 = vmatpush3.bf16.msra.mxu1 %v14720_v29 }
 0x5e8   : > { %13715 = vmatprep.subr.bf16.mxu1 %v15004_v45 }
 0x5e9   : > { %13742 = vmatpush3.bf16.msra.mxu0 %v14727_v16 }
 0x5ea   : > { %13767 = vmatprep.subr.bf16.mxu0 %v15004_v45 }
 0x5eb   : > { %13716 = vmatpush3.bf16.msra.mxu1 %v14722_v53 }
 0x5ec   : > { %13717 = vmatprep.subr.bf16.mxu1 %v15004_v45 }
 0x5ef   : > { %13718 = vmatpush3.bf16.msra.mxu1 %v14724_v35 }
 0x5f0   : > { %13719 = vmatprep.subr.bf16.mxu1 %v15004_v45 }
 0x5f3   : > { %13720 = vmatpush3.bf16.msra.mxu1 %v14726_v25 }
 0x5f4   : > { %13721 = vmatprep.subr.bf16.mxu1 %v15004_v45 }
 0x5f7   : > { %13722 = vmatpush3.bf16.msra.mxu1 %v14728_v41  ;;  %v14729_v41 = vld [vmem:[%s18710_s11 + $0xc0] sm:$0xff]  }
 0x5f8   : > { %13747 = vmatprep.subr.bf16.mxu1 %v15004_v45 }
 0x67f   : > { %v13385_v51 = vpop.f32.mrb[232].mxu0 }
 0x680   : > { %v13386_v7 = vpop.f32.mrb[233].mxu0 }
 0x681   : > { %v13387_v61 = vadd.f32 %v13386_v7, %v13385_v51  ;;  %v13388_v6 = vpop.f32.mrb[234].mxu0 }
 0x682   : > { %v13389_v38 = vpop.f32.mrb[235].mxu0 }
 0x683   : > { %v13390_v24 = vadd.f32 %v13389_v38, %v13388_v6 }
 0x687   : > { %v13391_v42 = vpop.f32.mrb[236].mxu0 }
 0x688   : > { %v13392_v31 = vpop.f32.mrb[237].mxu0 }
 0x689   : > { %v13393_v17 = vadd.f32 %v13392_v31, %v13391_v42  ;;  %v13394_v3 = vpop.f32.mrb[238].mxu0  ;;  %v14732_v42 = vld [vmem:[%s18710_s11 + $0x88] sm:$0xff]   ;;  %v14733_v31 = vld [vmem:[%s18710_s11 + $0xd0] sm:$0xff]  }
 0x68a   : > { %v13395_v50 = vpop.f32.mrb[239].mxu0  ;;  %v14735_v3 = vld [vmem:[%s18710_s11 + $0xd8] sm:$0xff]  }
 0x68b   : > { %v14736_v50 = vld [vmem:[%s18710_s11 + $0x98] sm:$0xff]  }
 0x68d   : > { %v13357_v33 = vpop.f32.mrb[200].mxu1 }
 0x68e   : > { %v13358_v2 = vpop.f32.mrb[201].mxu1 }
 0x68f   : > { %v13359_v49 = vadd.f32 %v13358_v2, %v13357_v33  ;;  %v13360_v18 = vpop.f32.mrb[202].mxu1  ;;  %v14737_v33 = vld [vmem:[%s18710_s11 + $0xe0] sm:$0xff]  }
 0x690   : > { %v13361_v59 = vpop.f32.mrb[203].mxu1  ;;  %v14738_v2 = vld [vmem:[%s18710_s11 + $0xa0] sm:$0xff]  }
 0x691   : > { %v8558_v58 = vadd.f32 %v13387_v61, %v13359_v49  ;;  %v13362_v27 = vadd.f32 %v13361_v59, %v13360_v18  ;;  %v14730_v61 = vld [vmem:[%s18710_s11 + $0x80] sm:$0xff]   ;;  %v14739_v49 = vld [vmem:[%s18710_s11 + $0xe8] sm:$0xff]   ;;  %v14741_v59 = vld [vmem:[%s18710_s11 + $0xf0] sm:$0xff]  }
 0x692   : > { %v14740_v18 = vld [vmem:[%s18710_s11 + $0xa8] sm:$0xff]  }
 0x693   : > { %v8561_v20 = vadd.f32 %v13390_v24, %v13362_v27  ;;  %v14731_v24 = vld [vmem:[%s18710_s11 + $0xc8] sm:$0xff]   ;;  %v14743_v27 = vld [vmem:[%s18710_s11 + $0xf8] sm:$0xff]  }
 0x695   : > { %v13363_v63 = vpop.f32.mrb[204].mxu1 }
 0x696   : > { %v13364_v15 = vpop.f32.mrb[205].mxu1 }
 0x697   : > { %v13365_v12 = vadd.f32 %v13364_v15, %v13363_v63  ;;  %v13366_v46 = vpop.f32.mrb[206].mxu1  ;;  %v14745_v63 = vld [vmem:[%s18710_s11 + $0x140] sm:$0xff]  }
 0x698   : > { %v13367_v23 = vpop.f32.mrb[207].mxu1 }
 0x699   : > { %v8566_v21 = vadd.f32 %v13393_v17, %v13365_v12  ;;  %v14734_v17 = vld [vmem:[%s18710_s11 + $0x90] sm:$0xff]   ;;  %v14746_v12 = vld [vmem:[%s18710_s11 + $0x100] sm:$0xff]   ;;  %v14747_v23 = vld [vmem:[%s18710_s11 + $0x148] sm:$0xff]  }
 0x69f   : > { %v13441_v37 = vpop.f32.mrb[240].mxu0 }
 0x6a0   : > { %v13442_v57 = vpop.f32.mrb[241].mxu0 }
 0x6a1   : > { %v13443_v36 = vadd.f32 %v13442_v57, %v13441_v37  ;;  %v13444_v9 = vpop.f32.mrb[242].mxu0  ;;  %v14749_v37 = vld [vmem:[%s18710_s11 + $0x150] sm:$0xff]  }
 0x6a2   : > { %v13445_v62 = vpop.f32.mrb[243].mxu0  ;;  %v14750_v57 = vld [vmem:[%s18710_s11 + $0x110] sm:$0xff]  }
 0x6a3   : > { %v13446_v0 = vadd.f32 %v13445_v62, %v13444_v9  ;;  %v14752_v9 = vld [vmem:[%s18710_s11 + $0x118] sm:$0xff]   ;;  %v14753_v62 = vld [vmem:[%s18710_s11 + $0x160] sm:$0xff]  }
 0x6a7   : > { %v13447_v34 = vpop.f32.mrb[244].mxu0 }
 0x6a8   : > { %v13448_v5 = vpop.f32.mrb[245].mxu0 }
 0x6a9   : > { %v13449_v19 = vadd.f32 %v13448_v5, %v13447_v34  ;;  %v13450_v43 = vpop.f32.mrb[246].mxu0  ;;  %v14755_v34 = vld [vmem:[%s18710_s11 + $0x168] sm:$0xff]  }
 0x6aa   : > { %v13451_v54 = vpop.f32.mrb[247].mxu0  ;;  %v14756_v5 = vld [vmem:[%s18710_s11 + $0x128] sm:$0xff]   ;;  %v14758_v43 = vld [vmem:[%s18710_s11 + $0x130] sm:$0xff]  }
 0x6ab   : > { %v14759_v54 = vld [vmem:[%s18710_s11 + $0x178] sm:$0xff]  }
 0x6ad   : > { %v13413_v55 = vpop.f32.mrb[208].mxu1 }
 0x6ae   : > { %v13414_v11 = vpop.f32.mrb[209].mxu1 }
 0x6af   : > { %v13415_v52 = vadd.f32 %v13414_v11, %v13413_v55  ;;  %v13416_v8 = vpop.f32.mrb[210].mxu1  ;;  %v14760_v55 = vld [vmem:[%s18710_s11 + $0x138] sm:$0xff]   ;;  %v14761_v11 = vld [vmem:[%s18710_s11 + $0x1c0] sm:$0xff]  }
 0x6b0   : > { %v13417_v40 = vpop.f32.mrb[211].mxu1 }
 0x6b1   : > { %v8765_v10 = vadd.f32 %v13415_v52, %v8558_v58  ;;  %v13418_v56 = vadd.f32 %v13417_v40, %v13416_v8  ;;  %v14742_v58 = vld [vmem:[%s18710_s11 + $0xb0] sm:$0xff]   ;;  %v14762_v8 = vld [vmem:[%s18710_s11 + $0x180] sm:$0xff]  }
 0x6b3   : > { %v8984_v32 = vadd.f32 %v13443_v36, %v8765_v10  ;;  %v8766_v22 = vadd.f32 %v13418_v56, %v8561_v20  ;;  %v14744_v20 = vld [vmem:[%s18710_s11 + $0xb8] sm:$0xff]   ;;  %v14763_v10 = vld [vmem:[%s18710_s11 + $0x1c8] sm:$0xff]  }
 0x6b4   : > { %v14751_v36 = vld [vmem:[%s18710_s11 + $0x158] sm:$0xff]   ;;  %v14764_v56 = vld [vmem:[%s18710_s11 + $0x188] sm:$0xff]  }
 0x6b5   : > { %v8994_v48 = vadd.f32 %v12346_v13, %v8984_v32  ;;  %v8985_v47 = vadd.f32 %v13446_v0, %v8766_v22  ;;  %v13419_v26 = vpop.f32.mrb[212].mxu1  ;;  %v14754_v0 = vld [vmem:[%s18710_s11 + $0x120] sm:$0xff]   ;;  %v14766_v32 = vld [vmem:[%s18710_s11 + $0x190] sm:$0xff]   ;;  %v14767_v22 = vld [vmem:[%s18710_s11 + $0x1d8] sm:$0xff]  }
 0x6b6   : > { %v13420_v29 = vpop.f32.mrb[213].mxu1 }
 0x6b7   : > { %v8995_v30 = vadd.f32 %v12346_v13, %v8985_v47  ;;  %v13421_v53 = vadd.f32 %v13420_v29, %v13419_v26  ;;  %v13422_v4 = vpop.f32.mrb[214].mxu1  ;;  %v8997_v28 = vmax.f32 %v8994_v48, 0.0  ;;  %v14768_v48 = vld [vmem:[%s18710_s11 + $0x198] sm:$0xff]   ;;  %v14769_v47 = vld [vmem:[%s18710_s11 + $0x1e0] sm:$0xff]   ;;  %v14771_v29 = vld [vmem:[%s18710_s11 + $0x1e8] sm:$0xff]  }
 0x6b8   : > { %v13423_v35 = vpop.f32.mrb[215].mxu1  ;;  %v14770_v26 = vld [vmem:[%s18710_s11 + $0x1a0] sm:$0xff]   ;;  %v14774_v4 = vld [vmem:[%s18710_s11 + $0x1b0] sm:$0xff]  }
 0x6b9   : > { %v8998_v25 = vmax.f32 %v8995_v30, 0.0  ;;  %v8767_v16 = vadd.f32 %v13421_v53, %v8566_v21  ;;  %v14748_v21 = vld [vmem:[%s18710_s11 + $0x108] sm:$0xff]   ;;  %v14773_v53 = vld [vmem:[%s18710_s11 + $0x1f0] sm:$0xff]   ;;  %v14775_v35 = vld [vmem:[%s18710_s11 + $0x1f8] sm:$0xff]  }
 0x6ba   : > { %v14772_v30 = vld [vmem:[%s18710_s11 + $0x1a8] sm:$0xff]  }
 0x6bb   : > { %v17909_v51 = vpack.c.bf16 %v8998_v25, %v8997_v28  ;;  %v8986_v7 = vadd.f32 %v13449_v19, %v8767_v16  ;;  %v14757_v19 = vld [vmem:[%s18710_s11 + $0x170] sm:$0xff]   ;;  %v14776_v28 = vld [vmem:[%s18710_s11 + $0x1b8] sm:$0xff]   ;;  %v14777_v25 = vld [vmem:[%s18710_s11 + $0x240] sm:$0xff]  }
 0x6bd   : > { %v17914_v6 = vadd.f32 %v12346_v13, %v8986_v7  ;;  %13744 = vmatmul.mubr.bf16.vlgmr.msra.gmra.mrb[248].mxu0 %v17909_v51  ;;  %v17918_v38 = vshrl.u32 %v17909_v51, 16  ;;  %v9231_v46 = vrot.slane %v17909_v51, 1  ;;  %v9445_v40 = vrot.slane %v17909_v51, 3  ;;  %v14765_v13 = vld [vmem:[%s18710_s11 + $0x1d0] sm:$0xff]  }
 0x6be   : > { %13768 = vmatpush3.bf16.msra.mxu0 %v14729_v41  ;;  %13783 = vmatprep.mubr.msk.bf16.mxu0 %vm15005_vm9, %v15004_v45  ;;  %v14778_v41 = vld [vmem:[%s18710_s11 + $0x200] sm:$0xff]   ;;  %v9659_v7 = vrot.slane %v17909_v51, 4 }
 0x6bf   : > { %13724 = vmatmul.mubr.bf16.vlgmr.msra.gmra.mrb[216].mxu1 %v17918_v38  ;;  %13769 = vmatprep.subr.bf16.mxu0 %v15004_v45  ;;  %v9338_v15 = vrot.slane %v17918_v38, 1  ;;  %v9552_v52 = vrot.slane %v17918_v38, 3  ;;  %v9766_v16 = vrot.slane %v17918_v38, 4 }
 0x6c0   : > { %13748 = vmatpush3.bf16.msra.mxu1 %v14730_v61  ;;  %13763 = vmatprep.mubr.msk.bf16.mxu1 %vm15005_vm9, %v15004_v45  ;;  %v14779_v61 = vld [vmem:[%s18710_s11 + $0x248] sm:$0xff]  }
 0x6c1   : > { %13749 = vmatprep.subr.bf16.mxu1 %v15004_v45 }
 0x6c2   : > { %13770 = vmatpush3.bf16.msra.mxu0 %v14731_v24  ;;  %v14780_v24 = vld [vmem:[%s18710_s11 + $0x208] sm:$0xff]  }
 0x6c3   : > { %13771 = vmatprep.subr.bf16.mxu0 %v15004_v45 }
 0x6c4   : > { %13750 = vmatpush3.bf16.msra.mxu1 %v14732_v42  ;;  %v14781_v42 = vld [vmem:[%s18710_s11 + $0x250] sm:$0xff]  }
 0x6c5   : > { %13751 = vmatprep.subr.bf16.mxu1 %v15004_v45 }
 0x6c6   : > { %13772 = vmatpush3.bf16.msra.mxu0 %v14733_v31  ;;  %v14782_v31 = vld [vmem:[%s18710_s11 + $0x210] sm:$0xff]  }
 0x6c7   : > { %13773 = vmatprep.subr.bf16.mxu0 %v15004_v45 }
 0x6c8   : > { %13752 = vmatpush3.bf16.msra.mxu1 %v14734_v17  ;;  %v14783_v17 = vld [vmem:[%s18710_s11 + $0x258] sm:$0xff]  }
 0x6c9   : > { %13753 = vmatprep.subr.bf16.mxu1 %v15004_v45 }
 0x6ca   : > { %13774 = vmatpush3.bf16.msra.mxu0 %v14735_v3  ;;  %v14784_v3 = vld [vmem:[%s18710_s11 + $0x218] sm:$0xff]  }
 0x6cb   : > { %13775 = vmatprep.subr.bf16.mxu0 %v15004_v45 }
 0x6cc   : > { %13754 = vmatpush3.bf16.msra.mxu1 %v14736_v50  ;;  %v14785_v50 = vld [vmem:[%s18710_s11 + $0x260] sm:$0xff]  }
 0x6cd   : > { %13755 = vmatprep.subr.bf16.mxu1 %v15004_v45 }
 0x6ce   : > { %13776 = vmatpush3.bf16.msra.mxu0 %v14737_v33  ;;  %v14786_v33 = vld [vmem:[%s18710_s11 + $0x220] sm:$0xff]  }
 0x6cf   : > { %13777 = vmatprep.subr.bf16.mxu0 %v15004_v45 }
 0x6d0   : > { %13756 = vmatpush3.bf16.msra.mxu1 %v14738_v2  ;;  %v14787_v2 = vld [vmem:[%s18710_s11 + $0x268] sm:$0xff]  }
 0x6d1   : > { %13757 = vmatprep.subr.bf16.mxu1 %v15004_v45 }
 0x6d2   : > { %13778 = vmatpush3.bf16.msra.mxu0 %v14739_v49  ;;  %v14788_v49 = vld [vmem:[%s18710_s11 + $0x228] sm:$0xff]  }
 0x6d3   : > { %13779 = vmatprep.subr.bf16.mxu0 %v15004_v45 }
 0x6d4   : > { %13758 = vmatpush3.bf16.msra.mxu1 %v14740_v18  ;;  %v14789_v18 = vld [vmem:[%s18710_s11 + $0x270] sm:$0xff]  }
 0x6d5   : > { %13759 = vmatprep.subr.bf16.mxu1 %v15004_v45 }
 0x6d6   : > { %13780 = vmatpush3.bf16.msra.mxu0 %v14741_v59  ;;  %v14790_v59 = vld [vmem:[%s18710_s11 + $0x230] sm:$0xff]  }
 0x6d7   : > { %13781 = vmatprep.subr.bf16.mxu0 %v15004_v45 }
 0x6d8   : > { %13760 = vmatpush3.bf16.msra.mxu1 %v14742_v58  ;;  %v14791_v58 = vld [vmem:[%s18710_s11 + $0x278] sm:$0xff]  }
 0x6d9   : > { %13761 = vmatprep.subr.bf16.mxu1 %v15004_v45 }
 0x6da   : > { %13782 = vmatpush3.bf16.msra.mxu0 %v14743_v27  ;;  %v14792_v27 = vld [vmem:[%s18710_s11 + $0x238] sm:$0xff]  }
 0x6db   : > { %13807 = vmatprep.subr.bf16.mxu0 %v15004_v45 }
 0x6dc   : > { %13762 = vmatpush3.bf16.msra.mxu1 %v14744_v20  ;;  %v14793_v20 = vld [vmem:[%s18710_s11 + $0x2c0] sm:$0xff]  }
 0x6dd   : > { %13784 = vmatmul.mubr.bf16.vlgmr.msra.gmra.mrb[252].mxu0 %v9338_v15  ;;  %13787 = vmatprep.subr.bf16.mxu1 %v15004_v45  ;;  %v14794_v15 = vld [vmem:[%s18710_s11 + $0x280] sm:$0xff]  }
 0x6de   : > { %13808 = vmatpush3.bf16.msra.mxu0 %v14745_v63  ;;  %13823 = vmatprep.mubr.msk.bf16.mxu0 %vm15005_vm9, %v15004_v45  ;;  %v9980_v63 = vrot.slane %v17918_v38, 6 }
 0x6df   : > { %13764 = vmatmul.mubr.bf16.vlgmr.msra.gmra.mrb[220].mxu1 %v9231_v46  ;;  %13809 = vmatprep.subr.bf16.mxu0 %v15004_v45  ;;  %v14795_v46 = vld [vmem:[%s18710_s11 + $0x2c8] sm:$0xff]  }
 0x6e0   : > { %13788 = vmatpush3.bf16.msra.mxu1 %v14746_v12  ;;  %13803 = vmatprep.mubr.msk.bf16.mxu1 %vm15005_vm9, %v15004_v45  ;;  %v9873_v12 = vrot.slane %v17909_v51, 6 }
 0x6e1   : > { %13789 = vmatprep.subr.bf16.mxu1 %v15004_v45 }
 0x6e2   : > { %13810 = vmatpush3.bf16.msra.mxu0 %v14747_v23  ;;  %v14796_v23 = vld [vmem:[%s18710_s11 + $0x288] sm:$0xff]  }
 0x6e3   : > { %13811 = vmatprep.subr.bf16.mxu0 %v15004_v45 }
 0x6e4   : > { %13790 = vmatpush3.bf16.msra.mxu1 %v14748_v21  ;;  %v14797_v21 = vld [vmem:[%s18710_s11 + $0x2d0] sm:$0xff]  }
 0x6e5   : > { %13791 = vmatprep.subr.bf16.mxu1 %v15004_v45 }
 0x6e6   : > { %13812 = vmatpush3.bf16.msra.mxu0 %v14749_v37  ;;  %v14798_v37 = vld [vmem:[%s18710_s11 + $0x290] sm:$0xff]  }
 0x6e7   : > { %13813 = vmatprep.subr.bf16.mxu0 %v15004_v45 }
 0x6e8   : > { %13792 = vmatpush3.bf16.msra.mxu1 %v14750_v57  ;;  %v14799_v57 = vld [vmem:[%s18710_s11 + $0x2d8] sm:$0xff]  }
 0x6e9   : > { %13793 = vmatprep.subr.bf16.mxu1 %v15004_v45 }
 0x6ea   : > { %13814 = vmatpush3.bf16.msra.mxu0 %v14751_v36  ;;  %v14800_v36 = vld [vmem:[%s18710_s11 + $0x298] sm:$0xff]  }
 0x6eb   : > { %13815 = vmatprep.subr.bf16.mxu0 %v15004_v45 }
 0x6ec   : > { %13794 = vmatpush3.bf16.msra.mxu1 %v14752_v9  ;;  %v14801_v9 = vld [vmem:[%s18710_s11 + $0x2e0] sm:$0xff]  }
 0x6ed   : > { %13795 = vmatprep.subr.bf16.mxu1 %v15004_v45 }
 0x6ee   : > { %13816 = vmatpush3.bf16.msra.mxu0 %v14753_v62  ;;  %v14802_v62 = vld [vmem:[%s18710_s11 + $0x2a0] sm:$0xff]  }
 0x6ef   : > { %13817 = vmatprep.subr.bf16.mxu0 %v15004_v45 }
 0x6f0   : > { %13796 = vmatpush3.bf16.msra.mxu1 %v14754_v0  ;;  %v14803_v0 = vld [vmem:[%s18710_s11 + $0x2e8] sm:$0xff]  }
 0x6f1   : > { %13797 = vmatprep.subr.bf16.mxu1 %v15004_v45 }
 0x6f2   : > { %13818 = vmatpush3.bf16.msra.mxu0 %v14755_v34  ;;  %v14804_v34 = vld [vmem:[%s18710_s11 + $0x2a8] sm:$0xff]  }
 0x6f3   : > { %13819 = vmatprep.subr.bf16.mxu0 %v15004_v45 }
 0x6f4   : > { %13798 = vmatpush3.bf16.msra.mxu1 %v14756_v5  ;;  %v14805_v5 = vld [vmem:[%s18710_s11 + $0x2f0] sm:$0xff]  }
 0x6f5   : > { %13799 = vmatprep.subr.bf16.mxu1 %v15004_v45 }
 0x6f6   : > { %13820 = vmatpush3.bf16.msra.mxu0 %v14757_v19  ;;  %v14806_v19 = vld [vmem:[%s18710_s11 + $0x2b0] sm:$0xff]  }
 0x6f7   : > { %13821 = vmatprep.subr.bf16.mxu0 %v15004_v45 }
 0x6f8   : > { %13800 = vmatpush3.bf16.msra.mxu1 %v14758_v43  ;;  %v14807_v43 = vld [vmem:[%s18710_s11 + $0x2f8] sm:$0xff]  }
 0x6f9   : > { %13801 = vmatprep.subr.bf16.mxu1 %v15004_v45 }
 0x6fa   : > { %13822 = vmatpush3.bf16.msra.mxu0 %v14759_v54  ;;  %v14808_v54 = vld [vmem:[%s18710_s11 + $0x2b8] sm:$0xff]  }
 0x6fb   : > { %13847 = vmatprep.subr.bf16.mxu0 %v15004_v45 }
 0x6fc   : > { %13802 = vmatpush3.bf16.msra.mxu1 %v14760_v55  ;;  %v14809_v55 = vld [vmem:[%s18710_s11 + $0x340] sm:$0xff]  }
 0x6fd   : > { %13824 = vmatmul.mubr.bf16.vlgmr.msra.gmra.mrb[0].mxu0 %v9552_v52  ;;  %13827 = vmatprep.subr.bf16.mxu1 %v15004_v45  ;;  %v14810_v52 = vld [vmem:[%s18710_s11 + $0x300] sm:$0xff]  }
 0x6fe   : > { %13848 = vmatpush3.bf16.msra.mxu0 %v14761_v11  ;;  %13863 = vmatprep.mubr.msk.bf16.mxu0 %vm15005_vm9, %v15004_v45  ;;  %v10194_v11 = vrot.slane %v17918_v38, 7  ;;  %v14812_v38 = vld [vmem:[%s18710_s11 + $0x308] sm:$0xff]  }
 0x6ff   : > { %13804 = vmatmul.mubr.bf16.vlgmr.msra.gmra.mrb[224].mxu1 %v9445_v40  ;;  %13849 = vmatprep.subr.bf16.mxu0 %v15004_v45  ;;  %v14811_v40 = vld [vmem:[%s18710_s11 + $0x348] sm:$0xff]  }
 0x700   : > { %13828 = vmatpush3.bf16.msra.mxu1 %v14762_v8  ;;  %13843 = vmatprep.mubr.msk.bf16.mxu1 %vm15005_vm9, %v15004_v45  ;;  %v10087_v8 = vrot.slane %v17909_v51, 7  ;;  %v14813_v51 = vld [vmem:[%s18710_s11 + $0x350] sm:$0xff]  }
 0x701   : > { %13829 = vmatprep.subr.bf16.mxu1 %v15004_v45 }
 0x702   : > { %13850 = vmatpush3.bf16.msra.mxu0 %v14763_v10  ;;  %v14814_v10 = vld [vmem:[%s18710_s11 + $0x310] sm:$0xff]  }
 0x703   : > { %13851 = vmatprep.subr.bf16.mxu0 %v15004_v45 }
 0x704   : > { %13830 = vmatpush3.bf16.msra.mxu1 %v14764_v56  ;;  %v14815_v56 = vld [vmem:[%s18710_s11 + $0x358] sm:$0xff]  }
 0x705   : > { %13831 = vmatprep.subr.bf16.mxu1 %v15004_v45 }
 0x706   : > { %13852 = vmatpush3.bf16.msra.mxu0 %v14765_v13  ;;  %v14816_v13 = vld [vmem:[%s18710_s11 + $0x318] sm:$0xff]  }
 0x707   : > { %13853 = vmatprep.subr.bf16.mxu0 %v15004_v45 }
 0x708   : > { %13832 = vmatpush3.bf16.msra.mxu1 %v14766_v32  ;;  %v14817_v32 = vld [vmem:[%s18710_s11 + $0x360] sm:$0xff]  }
 0x709   : > { %13833 = vmatprep.subr.bf16.mxu1 %v15004_v45 }
 0x70a   : > { %13854 = vmatpush3.bf16.msra.mxu0 %v14767_v22  ;;  %v14818_v22 = vld [vmem:[%s18710_s11 + $0x320] sm:$0xff]  }
 0x70b   : > { %13855 = vmatprep.subr.bf16.mxu0 %v15004_v45 }
 0x70c   : > { %13834 = vmatpush3.bf16.msra.mxu1 %v14768_v48  ;;  %v14819_v48 = vld [vmem:[%s18710_s11 + $0x368] sm:$0xff]  }
 0x70d   : > { %13835 = vmatprep.subr.bf16.mxu1 %v15004_v45 }
 0x70e   : > { %13856 = vmatpush3.bf16.msra.mxu0 %v14769_v47  ;;  %v8999_v47 = vmax.f32 %v17914_v6, 0.0  ;;  %v14822_v6 = vld [vmem:[%s18710_s11 + $0x330] sm:$0xff]  }
 0x70f   : > { %13857 = vmatprep.subr.bf16.mxu0 %v15004_v45 }
 0x710   : > { %13836 = vmatpush3.bf16.msra.mxu1 %v14770_v26  ;;  %v14820_v26 = vld [vmem:[%s18710_s11 + $0x328] sm:$0xff]  }
 0x711   : > { %13837 = vmatprep.subr.bf16.mxu1 %v15004_v45 }
 0x712   : > { %13858 = vmatpush3.bf16.msra.mxu0 %v14771_v29  ;;  %v14821_v29 = vld [vmem:[%s18710_s11 + $0x370] sm:$0xff]  }
 0x713   : > { %13859 = vmatprep.subr.bf16.mxu0 %v15004_v45 }
 0x714   : > { %13838 = vmatpush3.bf16.msra.mxu1 %v14772_v30  ;;  %v18319_v30 = vpack.c.bf16 %v8999_v47, %v8999_v47  ;;  %v14844_v47 = vld [vmem:[%s18712_s13 + $0x10] ss:$8 sps:$4 sm:$0xff]  }
 0x715   : > { %13839 = vmatprep.subr.bf16.mxu1 %v15004_v45 }
 0x716   : > { %13860 = vmatpush3.bf16.msra.mxu0 %v14773_v53  ;;  %v14823_v53 = vld [vmem:[%s18710_s11 + $0x378] sm:$0xff]  }
 0x717   : > { %13861 = vmatprep.subr.bf16.mxu0 %v15004_v45 }
 0x718   : > { %13840 = vmatpush3.bf16.msra.mxu1 %v14774_v4  ;;  %v10410_v4 = vshrl.u32 %v18319_v30, 16 }
 0x719   : > { %13841 = vmatprep.subr.bf16.mxu1 %v15004_v45 }
 0x71a   : > { %13862 = vmatpush3.bf16.msra.mxu0 %v14775_v35  ;;  %v14824_v35 = vld [vmem:[%s18710_s11 + $0x338] sm:$0xff]  }
 0x71b   : > { %13887 = vmatprep.subr.bf16.mxu0 %v15004_v45 }
 0x71c   : > { %13842 = vmatpush3.bf16.msra.mxu1 %v14776_v28  ;;  %v14825_v28 = vld [vmem:[%s18710_s11 + $0x3c0] sm:$0xff]  }
 0x71d   : > { %13864 = vmatmul.mubr.bf16.vlgmr.msra.gmra.mrb[4].mxu0 %v9766_v16  ;;  %13867 = vmatprep.subr.bf16.mxu1 %v15004_v45  ;;  %v14826_v16 = vld [vmem:[%s18710_s11 + $0x380] sm:$0xff]  }
 0x71e   : > { %13888 = vmatpush3.bf16.msra.mxu0 %v14777_v25  ;;  %13903 = vmatprep.mubr.msk.bf16.mxu0 %vm15005_vm9, %v15004_v45  ;;  %v10412_v25 = vrot.slane %v10410_v4, 1 }
 0x71f   : > { %13844 = vmatmul.mubr.bf16.vlgmr.msra.gmra.mrb[228].mxu1 %v9659_v7  ;;  %13889 = vmatprep.subr.bf16.mxu0 %v15004_v45  ;;  %v14827_v7 = vld [vmem:[%s18710_s11 + $0x3c8] sm:$0xff]  }
 0x720   : > { %13868 = vmatpush3.bf16.msra.mxu1 %v14778_v41  ;;  %13883 = vmatprep.mubr.msk.bf16.mxu1 %vm15005_vm9, %v15004_v45  ;;  %v10302_v41 = vrot.slane %v18319_v30, 1 }
 0x721   : > { %13869 = vmatprep.subr.bf16.mxu1 %v15004_v45 }
 0x722   : > { %13890 = vmatpush3.bf16.msra.mxu0 %v14779_v61  ;;  %v14828_v61 = vld [vmem:[%s18710_s11 + $0x388] sm:$0xff]  }
 0x723   : > { %13891 = vmatprep.subr.bf16.mxu0 %v15004_v45 }
 0x724   : > { %13870 = vmatpush3.bf16.msra.mxu1 %v14780_v24  ;;  %v14829_v24 = vld [vmem:[%s18710_s11 + $0x3d0] sm:$0xff]  }
 0x725   : > { %13871 = vmatprep.subr.bf16.mxu1 %v15004_v45 }
 0x726   : > { %13892 = vmatpush3.bf16.msra.mxu0 %v14781_v42  ;;  %v14830_v42 = vld [vmem:[%s18710_s11 + $0x390] sm:$0xff]  }
 0x727   : > { %13893 = vmatprep.subr.bf16.mxu0 %v15004_v45 }
 0x728   : > { %13872 = vmatpush3.bf16.msra.mxu1 %v14782_v31  ;;  %v14831_v31 = vld [vmem:[%s18710_s11 + $0x3d8] sm:$0xff]  }
 0x729   : > { %13873 = vmatprep.subr.bf16.mxu1 %v15004_v45 }
 0x72a   : > { %13894 = vmatpush3.bf16.msra.mxu0 %v14783_v17  ;;  %v14832_v17 = vld [vmem:[%s18710_s11 + $0x398] sm:$0xff]  }
 0x72b   : > { %13895 = vmatprep.subr.bf16.mxu0 %v15004_v45 }
 0x72c   : > { %13874 = vmatpush3.bf16.msra.mxu1 %v14784_v3  ;;  %v14833_v3 = vld [vmem:[%s18710_s11 + $0x3e0] sm:$0xff]  }
 0x72d   : > { %13875 = vmatprep.subr.bf16.mxu1 %v15004_v45 }
 0x72e   : > { %13896 = vmatpush3.bf16.msra.mxu0 %v14785_v50  ;;  %v14834_v50 = vld [vmem:[%s18710_s11 + $0x3a0] sm:$0xff]  }
 0x72f   : > { %13897 = vmatprep.subr.bf16.mxu0 %v15004_v45 }
 0x730   : > { %13876 = vmatpush3.bf16.msra.mxu1 %v14786_v33  ;;  %v14835_v33 = vld [vmem:[%s18710_s11 + $0x3e8] sm:$0xff]  }
 0x731   : > { %13877 = vmatprep.subr.bf16.mxu1 %v15004_v45 }
 0x732   : > { %13898 = vmatpush3.bf16.msra.mxu0 %v14787_v2 }
 0x733   : > { %13899 = vmatprep.subr.bf16.mxu0 %v15004_v45 }
 0x734   : > { %13878 = vmatpush3.bf16.msra.mxu1 %v14788_v49  ;;  %v14836_v49 = vld [vmem:[%s18710_s11 + $0x3a8] sm:$0xff]  }
 0x735   : > { %13879 = vmatprep.subr.bf16.mxu1 %v15004_v45 }
 0x736   : > { %13900 = vmatpush3.bf16.msra.mxu0 %v14789_v18 }
 0x737   : > { %13901 = vmatprep.subr.bf16.mxu0 %v15004_v45 }
 0x738   : > { %13880 = vmatpush3.bf16.msra.mxu1 %v14790_v59 }
 0x739   : > { %13881 = vmatprep.subr.bf16.mxu1 %v15004_v45 }
 0x73a   : > { %13902 = vmatpush3.bf16.msra.mxu0 %v14791_v58 }
 0x73b   : > { %13927 = vmatprep.subr.bf16.mxu0 %v15004_v45 }
 0x73c   : > { %13882 = vmatpush3.bf16.msra.mxu1 %v14792_v27  ;;  %v14837_v27 = vld [vmem:[%s18710_s11 + $0x3f0] sm:$0xff]  }
 0x73d   : > { %13904 = vmatmul.mubr.bf16.vlgmr.msra.gmra.mrb[8].mxu0 %v9980_v63  ;;  %13907 = vmatprep.subr.bf16.mxu1 %v15004_v45 }
 0x73e   : > { %13928 = vmatpush3.bf16.msra.mxu0 %v14793_v20  ;;  %13943 = vmatprep.mubr.msk.bf16.mxu0 %vm15005_vm9, %v15004_v45 }
 0x73f   : > { %13884 = vmatmul.mubr.bf16.vlgmr.msra.gmra.mrb[232].mxu1 %v9873_v12  ;;  %13929 = vmatprep.subr.bf16.mxu0 %v15004_v45 }
 0x740   : > { %13908 = vmatpush3.bf16.msra.mxu1 %v14794_v15  ;;  %13923 = vmatprep.mubr.msk.bf16.mxu1 %vm15005_vm9, %v15004_v45 }
 0x741   : > { %13909 = vmatprep.subr.bf16.mxu1 %v15004_v45 }
 0x742   : > { %13930 = vmatpush3.bf16.msra.mxu0 %v14795_v46  ;;  %v14838_v46 = vld [vmem:[%s18710_s11 + $0x3b0] sm:$0xff]  }
 0x743   : > { %13931 = vmatprep.subr.bf16.mxu0 %v15004_v45 }
 0x744   : > { %13910 = vmatpush3.bf16.msra.mxu1 %v14796_v23 }
 0x745   : > { %13911 = vmatprep.subr.bf16.mxu1 %v15004_v45 }
 0x746   : > { %13932 = vmatpush3.bf16.msra.mxu0 %v14797_v21  ;;  %v14839_v21 = vld [vmem:[%s18710_s11 + $0x3f8] sm:$0xff]  }
 0x747   : > { %13933 = vmatprep.subr.bf16.mxu0 %v15004_v45 }
 0x748   : > { %13912 = vmatpush3.bf16.msra.mxu1 %v14798_v37  ;;  %v14840_v37 = vld [vmem:[%s18710_s11 + $0x3b8] sm:$0xff]  }
 0x749   : > { %13913 = vmatprep.subr.bf16.mxu1 %v15004_v45 }
 0x74a   : > { %13934 = vmatpush3.bf16.msra.mxu0 %v14799_v57  ;;  %v10626_v57 = vrot.slane %v10410_v4, 2  ;;  %v14853_v4 = vld [vmem:[%s18712_s13 + $0x40] ss:$8 sps:$4 sm:$0xff]  }
 0x74b   : > { %13935 = vmatprep.subr.bf16.mxu0 %v15004_v45 }
 0x74c   : > { %13914 = vmatpush3.bf16.msra.mxu1 %v14800_v36  ;;  %v10519_v36 = vrot.slane %v18319_v30, 2  ;;  %v14852_v30 = vld [vmem:[%s18712_s13 + $0x34] ss:$8 sps:$4 sm:$0xff]  }
 0x74d   : > { %13915 = vmatprep.subr.bf16.mxu1 %v15004_v45 }
 0x74e   : > { %13936 = vmatpush3.bf16.msra.mxu0 %v14801_v9 }
 0x74f   : > { %13937 = vmatprep.subr.bf16.mxu0 %v15004_v45 }
 0x750   : > { %13916 = vmatpush3.bf16.msra.mxu1 %v14802_v62 }
 0x751   : > { %13917 = vmatprep.subr.bf16.mxu1 %v15004_v45 }
 0x752   : > { %13938 = vmatpush3.bf16.msra.mxu0 %v14803_v0 }
 0x753   : > { %13939 = vmatprep.subr.bf16.mxu0 %v15004_v45 }
 0x754   : > { %13918 = vmatpush3.bf16.msra.mxu1 %v14804_v34 }
 0x755   : > { %13919 = vmatprep.subr.bf16.mxu1 %v15004_v45 }
 0x756   : > { %13940 = vmatpush3.bf16.msra.mxu0 %v14805_v5 }
 0x757   : > { %13941 = vmatprep.subr.bf16.mxu0 %v15004_v45 }
 0x758   : > { %13920 = vmatpush3.bf16.msra.mxu1 %v14806_v19 }
 0x759   : > { %13921 = vmatprep.subr.bf16.mxu1 %v15004_v45 }
 0x75a   : > { %13942 = vmatpush3.bf16.msra.mxu0 %v14807_v43 }
 0x75b   : > { %13967 = vmatprep.subr.bf16.mxu0 %v15004_v45 }
 0x75c   : > { %13922 = vmatpush3.bf16.msra.mxu1 %v14808_v54 }
 0x75d   : > { %13944 = vmatmul.mubr.bf16.vlgmr.msra.gmra.mrb[12].mxu0 %v10194_v11  ;;  %13947 = vmatprep.subr.bf16.mxu1 %v15004_v45 }
 0x75e   : > { %13968 = vmatpush3.bf16.msra.mxu0 %v14809_v55  ;;  %13983 = vmatprep.mubr.msk.bf16.mxu0 %vm15005_vm9, %v15004_v45 }
 0x75f   : > { %13924 = vmatmul.mubr.bf16.vlgmr.msra.gmra.mrb[236].mxu1 %v10087_v8  ;;  %13969 = vmatprep.subr.bf16.mxu0 %v15004_v45 }
 0x760   : > { %13948 = vmatpush3.bf16.msra.mxu1 %v14810_v52  ;;  %13963 = vmatprep.mubr.msk.bf16.mxu1 %vm15005_vm9, %v15004_v45 }
 0x761   : > { %13949 = vmatprep.subr.bf16.mxu1 %v15004_v45 }
 0x762   : > { %13970 = vmatpush3.bf16.msra.mxu0 %v14811_v40 }
 0x763   : > { %13971 = vmatprep.subr.bf16.mxu0 %v15004_v45 }
 0x764   : > { %13950 = vmatpush3.bf16.msra.mxu1 %v14812_v38 }
 0x765   : > { %13951 = vmatprep.subr.bf16.mxu1 %v15004_v45 }
 0x766   : > { %13972 = vmatpush3.bf16.msra.mxu0 %v14813_v51 }
 0x767   : > { %13973 = vmatprep.subr.bf16.mxu0 %v15004_v45 }
 0x768   : > { %13952 = vmatpush3.bf16.msra.mxu1 %v14814_v10 }
 0x769   : > { %13953 = vmatprep.subr.bf16.mxu1 %v15004_v45 }
 0x76a   : > { %13974 = vmatpush3.bf16.msra.mxu0 %v14815_v56 }
 0x76b   : > { %13975 = vmatprep.subr.bf16.mxu0 %v15004_v45 }
 0x76c   : > { %13954 = vmatpush3.bf16.msra.mxu1 %v14816_v13 }
 0x76d   : > { %13955 = vmatprep.subr.bf16.mxu1 %v15004_v45 }
 0x76e   : > { %13976 = vmatpush3.bf16.msra.mxu0 %v14817_v32  ;;  %v14841_v32 = vld [vmem:[%s18712_s13] ss:$8 sps:$4 sm:$0xff]  }
 0x76f   : > { %13977 = vmatprep.subr.bf16.mxu0 %v15004_v45 }
 0x770   : > { %13956 = vmatpush3.bf16.msra.mxu1 %v14818_v22  ;;  %v14843_v22 = vld [vmem:[%s18712_s13 + $0x4] ss:$8 sps:$4 sm:$0xff]  }
 0x771   : > { %13957 = vmatprep.subr.bf16.mxu1 %v15004_v45 }
 0x772   : > { %13978 = vmatpush3.bf16.msra.mxu0 %v14819_v48  ;;  %v14846_v48 = vld [vmem:[%s18712_s13 + $0x14] ss:$8 sps:$4 sm:$0xff]  }
 0x773   : > { %13979 = vmatprep.subr.bf16.mxu0 %v15004_v45 }
 0x774   : > { %13958 = vmatpush3.bf16.msra.mxu1 %v14820_v26  ;;  %v14849_v26 = vld [vmem:[%s18712_s13 + $0x24] ss:$8 sps:$4 sm:$0xff]  }
 0x775   : > { %13959 = vmatprep.subr.bf16.mxu1 %v15004_v45 }
 0x776   : > { %13980 = vmatpush3.bf16.msra.mxu0 %v14821_v29  ;;  %v14847_v29 = vld [vmem:[%s18712_s13 + $0x20] ss:$8 sps:$4 sm:$0xff]  }
 0x777   : > { %13981 = vmatprep.subr.bf16.mxu0 %v15004_v45 }
 0x778   : > { %13960 = vmatpush3.bf16.msra.mxu1 %v14822_v6  ;;  %v14850_v6 = vld [vmem:[%s18712_s13 + $0x30] ss:$8 sps:$4 sm:$0xff]  }
 0x779   : > { %13961 = vmatprep.subr.bf16.mxu1 %v15004_v45 }
 0x77a   : > { %13982 = vmatpush3.bf16.msra.mxu0 %v14823_v53  ;;  %v14855_v53 = vld [vmem:[%s18712_s13 + $0x44] ss:$8 sps:$4 sm:$0xff]  }
 0x77b   : > { %14007 = vmatprep.subr.bf16.mxu0 %v15004_v45 }
 0x77c   : > { %13962 = vmatpush3.bf16.msra.mxu1 %v14824_v35 }
 0x77d   : > { %13984 = vmatmul.mubr.bf16.vlgmr.msra.gmra.mrb[16].mxu0 %v10412_v25  ;;  %13987 = vmatprep.subr.bf16.mxu1 %v15004_v45  ;;  %v14856_v25 = vld [vmem:[%s18712_s13 + $0x50] ss:$8 sps:$4 sm:$0xff]  }
 0x77e   : > { %14008 = vmatpush3.bf16.msra.mxu0 %v14825_v28  ;;  %14023 = vmatprep.mubr.msk.bf16.mxu0 %vm15005_vm9, %v15004_v45 }
 0x77f   : > { %13964 = vmatmul.mubr.bf16.vlgmr.msra.gmra.mrb[240].mxu1 %v10302_v41  ;;  %14009 = vmatprep.subr.bf16.mxu0 %v15004_v45 }
 0x780   : > { %13988 = vmatpush3.bf16.msra.mxu1 %v14826_v16  ;;  %14003 = vmatprep.mubr.msk.bf16.mxu1 %vm15005_vm9, %v15004_v45  ;;  %v14858_v16 = vld [vmem:[%s18712_s13 + $0x54] ss:$8 sps:$4 sm:$0xff]  }
 0x781   : > { %13989 = vmatprep.subr.bf16.mxu1 %v15004_v45 }
 0x782   : > { %14010 = vmatpush3.bf16.msra.mxu0 %v14827_v7 }
 0x783   : > { %14011 = vmatprep.subr.bf16.mxu0 %v15004_v45 }
 0x784   : > { %13990 = vmatpush3.bf16.msra.mxu1 %v14828_v61 }
 0x785   : > { %13991 = vmatprep.subr.bf16.mxu1 %v15004_v45 }
 0x786   : > { %14012 = vmatpush3.bf16.msra.mxu0 %v14829_v24 }
 0x787   : > { %14013 = vmatprep.subr.bf16.mxu0 %v15004_v45 }
 0x788   : > { %13992 = vmatpush3.bf16.msra.mxu1 %v14830_v42 }
 0x789   : > { %13993 = vmatprep.subr.bf16.mxu1 %v15004_v45 }
 0x78a   : > { %14014 = vmatpush3.bf16.msra.mxu0 %v14831_v31 }
 0x78b   : > { %14015 = vmatprep.subr.bf16.mxu0 %v15004_v45 }
 0x78c   : > { %13994 = vmatpush3.bf16.msra.mxu1 %v14832_v17 }
 0x78d   : > { %13995 = vmatprep.subr.bf16.mxu1 %v15004_v45 }
 0x78e   : > { %14016 = vmatpush3.bf16.msra.mxu0 %v14833_v3 }
 0x78f   : > { %14017 = vmatprep.subr.bf16.mxu0 %v15004_v45 }
 0x790   : > { %13996 = vmatpush3.bf16.msra.mxu1 %v14834_v50  ;;  %v9208_v2 = vpop.f32.mrb[248].mxu0  ;;  %v14859_v50 = vld [vmem:[%s18712_s13 + $0x60] ss:$8 sps:$4 sm:$0xff]  }
 0x791   : > { %v13745_v18 = vpop.f32.mrb[249].mxu0  ;;  %13997 = vmatprep.subr.bf16.mxu1 %v15004_v45 }
 0x792   : > { %14018 = vmatpush3.bf16.msra.mxu0 %v14835_v33  ;;  %v9120_v59 = vpop.f32.mrb[216].mxu1  ;;  %v9211_v58 = vpop.f32.mrb[250].mxu0  ;;  %v14861_v33 = vld [vmem:[%s18712_s13 + $0x64] ss:$8 sps:$4 sm:$0xff]   ;;  %v14865_v18 = vld [vmem:[%s18715_s16] ss:$8 sps:$4 sm:$0xff]  }
 0x793   : > { %v9209_v20 = vadd.f32 %v9208_v2, %v9120_v59  ;;  %v13725_v63 = vpop.f32.mrb[217].mxu1  ;;  %v13746_v15 = vpop.f32.mrb[251].mxu0  ;;  %14019 = vmatprep.subr.bf16.mxu0 %v15004_v45  ;;  %v14864_v2 = vld [vmem:[%s18712_s13 + $0x74] ss:$8 sps:$4 sm:$0xff]   ;;  %v14867_v59 = vld [vmem:[%s18715_s16 + $0x4] ss:$8 sps:$4 sm:$0xff]  }
 0x794   : > { %13998 = vmatpush3.bf16.msra.mxu1 %v14836_v49  ;;  %v9123_v12 = vpop.f32.mrb[218].mxu1  ;;  %v14862_v49 = vld [vmem:[%s18712_s13 + $0x70] ss:$8 sps:$4 sm:$0xff]   ;;  %v10722_v58 = vld [vmem:[%s706_s6] sm:$0x1]  ;;  %s692_s6 = sand.u32 1, %s14992_s25  }
 0x795   : > { %v13726_v23 = vpop.f32.mrb[219].mxu1  ;;  %13999 = vmatprep.subr.bf16.mxu1 %v15004_v45  ;;  %10725 = vperm.xlu1 %14075, %v10722_v58   ;;  %v10749_v63 = vld [vmem:[%s712_s2] sm:$0x1]  ;;  %v14868_v15 = vld [vmem:[%s18715_s16 + $0x10] ss:$8 sps:$4 sm:$0xff]   ;;  %s14942_s2 = sshll.u32 %s15009_s1, 4  ;;  %s14943_s2 = int_to_ptr.vmem [resolvable:$false] %s14942_s2 }
 0x796   : > { %14020 = vmatpush3.bf16.msra.mxu0 %v14837_v27  ;;  %v10733_v27 = vld [vmem:[%s709_s8] sm:$0x1]  ;;  %v14873_v12 = vld [vmem:[%s18715_s16 + $0x24] ss:$8 sps:$4 sm:$0xff]   ;;  %v14876_v23 = vld [vmem:[%s18715_s16 + $0x34] ss:$8 sps:$4 sm:$0xff]  }
 0x797   : > { %14021 = vmatprep.subr.bf16.mxu0 %v15004_v45  ;;  %10736 = vperm.xlu0 %14074, %v10733_v27   ;;  %s693_s8 = scalar_lea.vmem [#allocation4], %s692_s6  ;;  %s14944_s27 = scalar_lea.vmem %s14943_s2, 32 }
 0x798   : > { %14000 = vmatpush3.bf16.msra.mxu1 %v14838_v46  ;;  %v14871_v46 = vld [vmem:[%s18715_s16 + $0x20] ss:$8 sps:$4 sm:$0xff]   ;;  %s11430_s4 = sshll.u32 %s693_s8, 4  ;;  %s11431_s4 = int_to_ptr.vmem [resolvable:$true] %s11430_s4 }
 0x799   : > { %14001 = vmatprep.subr.bf16.mxu1 %v15004_v45  ;;  %10752 = vperm.xlu1 %14075, %v10749_v63   ;;  %p14945_p0 = scmp.lt.s32.totalorder %s11431_s4, %s14943_s2 }
 0x79a   : > { %14022 = vmatpush3.bf16.msra.mxu0 %v14839_v21  ;;  %v14874_v21 = vld [vmem:[%s18715_s16 + $0x30] ss:$8 sps:$4 sm:$0xff]  }
 0x79b   : > { %11135 = vmatprep.subr.bf16.mxu0 %v14867_v59 }
 0x79c   : > { %14002 = vmatpush3.bf16.msra.mxu1 %v14840_v37  ;;  %v14879_v37 = vld [vmem:[%s18715_s16 + $0x44] ss:$8 sps:$4 sm:$0xff]  }
 0x79d   : > { %14024 = vmatmul.mubr.bf16.vlgmr.msra.gmra.mrb[20].mxu0 %v10626_v57  ;;  %10872 = vmatprep.subr.bf16.mxu1 %v14843_v22  ;;  %v14877_v57 = vld [vmem:[%s18715_s16 + $0x40] ss:$8 sps:$4 sm:$0xff]   ;;  %v14900_v22 = vld [vmem:[%s18715_s16 + $0xb4] ss:$8 sps:$4 sm:$0xff]  }
 0x79e   : > { %11136 = vmatpush1.bf16.msra.mxu0 %v14865_v18 }
 0x79f   : > { %14004 = vmatmul.mubr.bf16.vlgmr.msra.gmra.mrb[244].mxu1 %v10519_v36  ;;  %v14882_v36 = vld [vmem:[%s18715_s16 + $0x54] ss:$8 sps:$4 sm:$0xff]  }
 0x7a0   : > { %10904 = vmatprep.mubr.bf16.mxu1 %v15002_v1  ;;  %10873 = vmatpush1.bf16.msra.mxu1 %v14841_v32  ;;  %v14895_v32 = vld [vmem:[%s18715_s16 + $0xa0] ss:$8 sps:$4 sm:$0xff]  }
 0x7a1   : > { %10874 = vmatprep.subr.bf16.mxu1 %v14846_v48  ;;  %v14898_v48 = vld [vmem:[%s18715_s16 + $0xb0] ss:$8 sps:$4 sm:$0xff]  }
 0x7a4   : > { %10875 = vmatpush1.bf16.msra.mxu1 %v14844_v47  ;;  %v14903_v47 = vld [vmem:[%s18715_s16 + $0xc4] ss:$8 sps:$4 sm:$0xff]  }
 0x7a5   : > { %10876 = vmatprep.subr.bf16.mxu1 %v14849_v26  ;;  %v14901_v26 = vld [vmem:[%s18715_s16 + $0xc0] ss:$8 sps:$4 sm:$0xff]  }
 0x7a8   : > { %10877 = vmatpush1.bf16.msra.mxu1 %v14847_v29  ;;  %v14906_v29 = vld [vmem:[%s18715_s16 + $0xd4] ss:$8 sps:$4 sm:$0xff]  }
 0x7a9   : > { %10878 = vmatprep.subr.bf16.mxu1 %v14852_v30 }
 0x7ac   : > { %10879 = vmatpush1.bf16.msra.mxu1 %v14850_v6 }
 0x7ad   : > { %10880 = vmatprep.subr.bf16.mxu1 %v14855_v53  ;;  %v14904_v53 = vld [vmem:[%s18715_s16 + $0xd0] ss:$8 sps:$4 sm:$0xff]  }
 0x7b0   : > { %v9422_v9 = vpop.f32.mrb[252].mxu0  ;;  %10881 = vmatpush1.bf16.msra.mxu1 %v14853_v4 }
 0x7b1   : > { %v13785_v62 = vpop.f32.mrb[253].mxu0  ;;  %10882 = vmatprep.subr.bf16.mxu1 %v14858_v16 }
 0x7b2   : > { %v9315_v0 = vpop.f32.mrb[220].mxu1  ;;  %v9425_v34 = vpop.f32.mrb[254].mxu0 }
 0x7b3   : > { %v9321_v5 = vadd.f32 %v9315_v0, %v9209_v20  ;;  %v13765_v19 = vpop.f32.mrb[221].mxu1  ;;  %v13786_v43 = vpop.f32.mrb[255].mxu0  ;;  %v14870_v20 = vld [vmem:[%s18715_s16 + $0x14] ss:$8 sps:$4 sm:$0xff]   ;;  %v14880_v0 = vld [vmem:[%s18715_s16 + $0x50] ss:$8 sps:$4 sm:$0xff]  }
 0x7b4   : > { %v9318_v54 = vpop.f32.mrb[222].mxu1  ;;  %10883 = vmatpush1.bf16.msra.mxu1 %v14856_v25  ;;  %11137 = vmatprep.subr.bf16.mxu0 %v14870_v20  ;;  %v14885_v19 = vld [vmem:[%s18715_s16 + $0x64] ss:$8 sps:$4 sm:$0xff]  }
 0x7b5   : > { %v13766_v45 = vpop.f32.mrb[223].mxu1  ;;  %v9428_v55 = vadd.f32 %v9422_v9, %v9321_v5  ;;  %10884 = vmatprep.subr.bf16.mxu1 %v14861_v33  ;;  %11138 = vmatpush1.bf16.msra.mxu0 %v14868_v15 }
 0x7b6   : > { %11139 = vmatprep.subr.bf16.mxu0 %v14873_v12 }
 0x7b8   : > { %10885 = vmatpush1.bf16.msra.mxu1 %v14859_v50 }
 0x7b9   : > { %10886 = vmatprep.subr.bf16.mxu1 %v14864_v2  ;;  %11140 = vmatpush1.bf16.msra.mxu0 %v14871_v46  ;;  %v10717_v46 = vld [vmem:[%s18711_s12] sm:$0x1] }
 0x7ba   : > { %11141 = vmatprep.subr.bf16.mxu0 %v14876_v23 }
 0x7bc   : > { %10887 = vmatpush1.bf16.msra.mxu1 %v14862_v49 }
 0x7bd   : > { %11142 = vmatpush1.bf16.msra.mxu0 %v14874_v21 }
 0x7be   : > { %11143 = vmatprep.subr.bf16.mxu0 %v14879_v37 }
 0x7c1   : > { %11144 = vmatpush1.bf16.msra.mxu0 %v14877_v57 }
 0x7c2   : > { %11145 = vmatprep.subr.bf16.mxu0 %v14882_v36 }
 0x7c5   : > { %11146 = vmatpush1.bf16.msra.mxu0 %v14880_v0  ;;  %v14909_v0 = vld [vmem:[%s18715_s16 + $0xe4] ss:$8 sps:$4 sm:$0xff]  }
 0x7c6   : > { %11147 = vmatprep.subr.bf16.mxu0 %v14885_v19  ;;  %v14913_v19 = vld [vmem:[%s18717_s18 + $0x40] sm:$0xff]  }
 0x7c7   : > { %13597 = vmatprep.subr.bf16.mxu1 %v14913_v19 }
 0x7d0   : > { %v9636_v11 = vpop.f32.mrb[0].mxu0 }
 0x7d1   : > { %v13825_v52 = vpop.f32.mrb[1].mxu0 }
 0x7d2   : > { %v9529_v8 = vpop.f32.mrb[224].mxu1  ;;  %v9639_v40 = vpop.f32.mrb[2].mxu0 }
 0x7d3   : > { %v9535_v38 = vadd.f32 %v9529_v8, %v9428_v55  ;;  %v13805_v51 = vpop.f32.mrb[225].mxu1  ;;  %v13826_v10 = vpop.f32.mrb[3].mxu0  ;;  %v14883_v8 = vld [vmem:[%s18715_s16 + $0x60] ss:$8 sps:$4 sm:$0xff]   ;;  %v14888_v40 = vld [vmem:[%s18715_s16 + $0x74] ss:$8 sps:$4 sm:$0xff]  }
 0x7d4   : > { %v9532_v56 = vpop.f32.mrb[226].mxu1  ;;  %11148 = vmatpush1.bf16.msra.mxu0 %v14883_v8  ;;  %v14891_v51 = vld [vmem:[%s18715_s16 + $0x84] ss:$8 sps:$4 sm:$0xff]   ;;  %v14889_v10 = vld [vmem:[%s18715_s16 + $0x80] ss:$8 sps:$4 sm:$0xff]   ;;  %v14920_v8 = vld [vmem:[%s18717_s18 + $0x18] sm:$0xff]  }
 0x7d5   : > { %v13806_v13 = vpop.f32.mrb[227].mxu1  ;;  %v9642_v1 = vadd.f32 %v9636_v11, %v9535_v38  ;;  %v14886_v38 = vld [vmem:[%s18715_s16 + $0x70] ss:$8 sps:$4 sm:$0xff]   ;;  %11149 = vmatprep.subr.bf16.mxu0 %v14888_v40  ;;  %v14894_v56 = vld [vmem:[%s18715_s16 + $0x94] ss:$8 sps:$4 sm:$0xff]   ;;  %v14921_v40 = vld [vmem:[%s18717_s18 + $0x60] sm:$0xff]  }
 0x7d6   : > { %v14892_v13 = vld [vmem:[%s18715_s16 + $0x90] ss:$8 sps:$4 sm:$0xff]  }
 0x7d8   : > { %11150 = vmatpush1.bf16.msra.mxu0 %v14886_v38  ;;  %v14922_v38 = vld [vmem:[%s18717_s18 + $0x20] sm:$0xff]  }
 0x7d9   : > { %11151 = vmatprep.subr.bf16.mxu0 %v14891_v51  ;;  %v14923_v51 = vld [vmem:[%s18717_s18 + $0x68] sm:$0xff]  }
 0x7dc   : > { %11152 = vmatpush1.bf16.msra.mxu0 %v14889_v10  ;;  %v14924_v10 = vld [vmem:[%s18717_s18 + $0x28] sm:$0xff]  }
 0x7dd   : > { %11153 = vmatprep.subr.bf16.mxu0 %v14894_v56  ;;  %v10728_v56 = vlaneseq }
 0x7e0   : > { %11154 = vmatpush1.bf16.msra.mxu0 %v14892_v13  ;;  %v18605_v13 = vshrl.u32 %v10728_v56, 7 }
 0x7f0   : > { %v9850_v35 = vpop.f32.mrb[4].mxu0 }
 0x7f1   : > { %v13865_v28 = vpop.f32.mrb[5].mxu0 }
 0x7f2   : > { %v9743_v41 = vpop.f32.mrb[228].mxu1  ;;  %v9853_v7 = vpop.f32.mrb[6].mxu0 }
 0x7f3   : > { %v9749_v61 = vadd.f32 %v9743_v41, %v9642_v1  ;;  %v13845_v24 = vpop.f32.mrb[229].mxu1  ;;  %v13866_v42 = vpop.f32.mrb[7].mxu0  ;;  %v14897_v1 = vld [vmem:[%s18715_s16 + $0xa4] ss:$8 sps:$4 sm:$0xff]  }
 0x7f4   : > { %v9746_v31 = vpop.f32.mrb[230].mxu1  ;;  %11155 = vmatprep.subr.bf16.mxu0 %v14897_v1 }
 0x7f5   : > { %v13846_v17 = vpop.f32.mrb[231].mxu1  ;;  %v9856_v3 = vadd.f32 %v9850_v35, %v9749_v61  ;;  %11156 = vmatpush1.bf16.msra.mxu0 %v14895_v32  ;;  %v10730_v32 = vsub.s32 0, %v18605_v13 }
 0x7f6   : > { %11157 = vmatprep.subr.bf16.mxu0 %v14900_v22 }
 0x7f9   : > { %11158 = vmatpush1.bf16.msra.mxu0 %v14898_v48 }
 0x7fa   : > { %11159 = vmatprep.subr.bf16.mxu0 %v14903_v47  ;;  %v10721_v47 = vld [vmem:[%s18713_s14] sm:$0x77] }
 0x7fd   : > { %11160 = vmatpush1.bf16.msra.mxu0 %v14901_v26 }
 0x7fe   : > { %11161 = vmatprep.subr.bf16.mxu0 %v14906_v29 }
 0x801   : > { %11162 = vmatpush1.bf16.msra.mxu0 %v14904_v53 }
 0x802   : > { %11163 = vmatprep.subr.bf16.mxu0 %v14909_v0 }
 0x810   : > { %v10064_v9 = vpop.f32.mrb[8].mxu0 }
 0x811   : > { %v13905_v62 = vpop.f32.mrb[9].mxu0 }
 0x812   : > { %v9957_v34 = vpop.f32.mrb[232].mxu1  ;;  %v10067_v5 = vpop.f32.mrb[10].mxu0  ;;  %v14907_v62 = vld [vmem:[%s18715_s16 + $0xe0] ss:$8 sps:$4 sm:$0xff]  }
 0x813   : > { %v9963_v43 = vadd.f32 %v9957_v34, %v9856_v3  ;;  %v13885_v54 = vpop.f32.mrb[233].mxu1  ;;  %v13906_v45 = vpop.f32.mrb[11].mxu0  ;;  %v14912_v34 = vld [vmem:[%s18715_s16 + $0xf4] ss:$8 sps:$4 sm:$0xff]   ;;  %v14910_v5 = vld [vmem:[%s18715_s16 + $0xf0] ss:$8 sps:$4 sm:$0xff]   ;;  %11164 = vmatpush1.bf16.msra.mxu0 %v14907_v62 }
 0x814   : > { %v9960_v55 = vpop.f32.mrb[234].mxu1  ;;  %v14915_v54 = vld [vmem:[%s18717_s18 + $0x48] sm:$0xff]   ;;  %11165 = vmatprep.subr.bf16.mxu0 %v14912_v34  ;;  %v10726_v1 = vpop.permute.xlu1 %10725 }
 0x815   : > { %v13886_v11 = vpop.f32.mrb[235].mxu1  ;;  %v10070_v52 = vadd.f32 %v10064_v9, %v9963_v43  ;;  %v14914_v43 = vld [vmem:[%s18717_s18] sm:$0xff]   ;;  %v14916_v45 = vld [vmem:[%s18717_s18 + $0x8] sm:$0xff]   ;;  %v14917_v55 = vld [vmem:[%s18717_s18 + $0x50] sm:$0xff]   ;;  %v10731_v29 = vrot.slane %v10726_v1, %v10730_v32 }
 0x816   : > { %v14918_v11 = vld [vmem:[%s18717_s18 + $0x10] sm:$0xff]   ;;  %v10737_v22 = vpop.permute.xlu0 %10736 }
 0x817   : > { %11166 = vmatpush1.bf16.msra.mxu0 %v14910_v5  ;;  %v10742_v48 = vrot.slane %v10737_v22, %v10730_v32  ;;  %v10732_v53 = vmul.f32 %v10731_v29, %v10721_v47 }
 0x818   : > { %v10753_v26 = vpop.permute.xlu1 %10752 }
 0x830   : > { %v10278_v30 = vpop.f32.mrb[12].mxu0 }
 0x831   : > { %v13945_v6 = vpop.f32.mrb[13].mxu0 }
 0x832   : > { %v10171_v4 = vpop.f32.mrb[236].mxu1  ;;  %v10281_v35 = vpop.f32.mrb[14].mxu0  ;;  %v10758_v6 = vrot.slane %v10753_v26, %v10730_v32 }
 0x833   : > { %v10177_v28 = vadd.f32 %v10171_v4, %v10070_v52  ;;  %v13925_v25 = vpop.f32.mrb[237].mxu1  ;;  %v13946_v16 = vpop.f32.mrb[15].mxu0  ;;  %v14919_v52 = vld [vmem:[%s18717_s18 + $0x58] sm:$0xff]  }
 0x834   : > { %v10174_v41 = vpop.f32.mrb[238].mxu1  ;;  %v10759_v35 = vmul.f32 %v10758_v6, %v10721_v47 }
 0x835   : > { %v13926_v7 = vpop.f32.mrb[239].mxu1  ;;  %v10284_v61 = vadd.f32 %v10278_v30, %v10177_v28  ;;  %v10743_v30 = vmul.f32 %v10742_v48, %v10721_v47  ;;  %v10913_v41 = vld [vmem:[%s18714_s15] sm:$0x3] }
 0x836   : > { %v12476_v25 = vrot.slane %v10759_v35, 10  ;;  %v10868_v7 = vsub.s32 4, %v18605_v13 }
 0x837   : > { %v12475_v4 = vrot.slane %v10743_v30, 9 }
 0x839   : > { %v10748_v28 = vadd.f32 %v12475_v4, %v10732_v53  ;;  %v2523_v53 = vmax.f32 %v15818_v14, 0.0 }
 0x83b   : > { %v10764_v16 = vadd.f32 %v12476_v25, %v10748_v28  ;;  %v12594_v35 = vpack.c.bf16 %v2523_v53, %v2523_v53 }
 0x850   : > { %v10496_v24 = vpop.f32.mrb[16].mxu0 }
 0x851   : > { %v13985_v42 = vpop.f32.mrb[17].mxu0 }
 0x852   : > { %v10386_v31 = vpop.f32.mrb[240].mxu1  ;;  %v10499_v17 = vpop.f32.mrb[18].mxu0  ;;  %v10918_v42 = vrot.slane %v10913_v41, %v10730_v32 }
 0x853   : > { %v10392_v3 = vadd.f32 %v10386_v31, %v10284_v61  ;;  %v13965_v50 = vpop.f32.mrb[241].mxu1  ;;  %v13986_v33 = vpop.f32.mrb[19].mxu0  ;;  %v10921_v61 = vsub.s32 1, %v18605_v13  ;;  %v10869_v17 = vrot.slane %v10764_v16, %v10868_v7 }
 0x854   : > { %v10389_v2 = vpop.f32.mrb[242].mxu1 }
 0x855   : > { %v13966_v49 = vpop.f32.mrb[243].mxu1  ;;  %v10502_v18 = vadd.f32 %v10496_v24, %v10392_v3  ;;  %v10865_v24 = vrot.slane %v10764_v16, %v10730_v32  ;;  %v10922_v3 = vrot.slane %v10913_v41, %v10921_v61  ;;  %v2533_v16 = vmax.f32 %v15906_v39, 0.0 }
 0x870   : > { %v10710_v59 = vpop.f32.mrb[20].mxu0 }
 0x871   : > { %v14025_v58 = vpop.f32.mrb[21].mxu0 }
 0x872   : > { %v10603_v27 = vpop.f32.mrb[244].mxu1  ;;  %v10713_v20 = vpop.f32.mrb[22].mxu0 }
 0x873   : > { %v10609_v63 = vadd.f32 %v10603_v27, %v10502_v18  ;;  %v14005_v15 = vpop.f32.mrb[245].mxu1  ;;  %v14026_v12 = vpop.f32.mrb[23].mxu0 }
 0x874   : > { %v10606_v23 = vpop.f32.mrb[246].mxu1  ;;  %v14925_v12 = vld [vmem:[%s18717_s18 + $0x70] sm:$0xff]  }
 0x875   : > { %v10716_v21 = vadd.f32 %v10710_v59, %v10609_v63  ;;  %v14006_v37 = vpop.f32.mrb[247].mxu1  ;;  %v14927_v23 = vld [vmem:[%s18717_s18 + $0x78] sm:$0xff]  }
 0x876   : > { %v11353_v37 = vld [vmem:[%s715_s23] sm:$0x1]  ;;  %s11415_s23 = scalar_lea.sflag [#allocation5], %s692_s6 }
 0x877   : > { %v10718_v57 = vadd.f32 %v10717_v46, %v10716_v21  ;;  %v14926_v46 = vld [vmem:[%s18717_s18 + $0x30] sm:$0xff]   ;;  %v14928_v21 = vld [vmem:[%s18717_s18 + $0x38] sm:$0xff]   ;;  %v11368_v7 = vmul.f32 -0.5, %v11353_v37 }
 0x879   : > { %v10719_v36 = vmax.f32 %v10718_v57, 0.0  ;;  %v11358_v57 = vrot.slane %v11353_v37, %v10730_v32  ;;  %v11369_v14 = vmul.f32 %v11368_v7, %v11353_v37 }
 0x87b   : > { %v10720_v9 = vpack.c.bf16 %v10719_v36, %v10719_v36  ;;  %11359 = vrot.lane.b32.xlu0 %v11358_v57, %s15006_s30  ;;  %v10963_v36 = vld [vmem:[%s18716_s17] sm:$0x3]  ;;  %v2553_v57 = vmax.f32 %v16050_v44, 0.0  ;;  %s14938_s30 = scalar_lea.vmem %s11431_s4, 16 }
 0x87c   : > { %v11132_v62 = vrot.slane %v10963_v36, %v10921_v61  ;;  %p14939_p11 = scmp.ne.s32.totalorder %s11431_s4, %s14938_s30  ;;  %p14946_p1 = scmp.lt.s32.totalorder %s14944_s27, %s14938_s30 }
 0x87d   : > { %10905 = vmatmul.mubr.bf16.vlgmr.msra.gmra.mrb[248].mxu1 %v10720_v9  ;;  %v11128_v9 = vrot.slane %v10963_v36, %v10730_v32  ;;  %v12624_v36 = vpack.c.bf16 %v2553_v57, %v2553_v57 }
 0x87e   : > { %13598 = vmatpush3.bf16.msra.mxu1 %v14914_v43  ;;  %p14940_p12 = pnand %p14939_p11, %p15158_p5  ;;  %p14947_p2 = por %p14946_p1, %p14945_p0 }
 0x87f   : > { %13599 = vmatprep.subr.bf16.mxu1 %v14915_v54 }
 0x880   : > { %p14941_p13 = pneg %p14940_p12 }
 0x882   : > { %13600 = vmatpush3.bf16.msra.mxu1 %v14916_v45  ;;  %p14948_p3 = pnand %p14947_p2, %p14941_p13 }
 0x883   : > { %13601 = vmatprep.subr.bf16.mxu1 %v14917_v55 }
 0x886   : > { %13602 = vmatpush3.bf16.msra.mxu1 %v14918_v11 }
 0x887   : > { %13603 = vmatprep.subr.bf16.mxu1 %v14919_v52 }
 0x88a   : > { %13604 = vmatpush3.bf16.msra.mxu1 %v14920_v8  ;;  %v15007_v8 = vmov 1966171168  }
 0x88b   : > { %13605 = vmatprep.subr.bf16.mxu1 %v14921_v40  ;;  %v11372_v40 = vunpack.c.l.s4 %v15007_v8 }
 0x88d   : > { %v11373_v32 = vunpack.c.0.s8 %v11372_v40 }
 0x88e   : > { %13606 = vmatpush3.bf16.msra.mxu1 %v14922_v38 }
 0x88f   : > { %13607 = vmatprep.subr.bf16.mxu1 %v14923_v51  ;;  %v11212_v51 = vld [vmem:[%s18718_s19] sm:$0x1]  ;;  %v11376_v26 = vsub.s32 %v11373_v32, %v18605_v13  ;;  %v12604_v13 = vpack.c.bf16 %v2533_v16, %v2533_v16 }
 0x892   : > { %13608 = vmatpush3.bf16.msra.mxu1 %v14924_v10 }
 0x893   : > { %13609 = vmatprep.subr.bf16.mxu1 %v14925_v12 }
 0x896   : > { %13610 = vmatpush3.bf16.msra.mxu1 %v14926_v46 }
 0x897   : > { %13611 = vmatprep.subr.bf16.mxu1 %v14927_v23 }
 0x89a   : > { %13612 = vmatpush3.bf16.msra.mxu1 %v14928_v21 }
 0x8ed   : > { %v11360_v28 = vpop.permute.xlu0 %11359 }
 0x950   : > { %v10906_v31 = vpop.f32.mrb[248].mxu1 }
 0x951   : > { %v10907_v50 = vadd.f32 %v10906_v31, %v10865_v24  ;;  %v10908_v33 = vpop.f32.mrb[249].mxu1 }
 0x952   : > { %v10909_v2 = vadd.f32 %v10908_v33, %v10869_v17  ;;  %v10910_v49 = vpop.f32.mrb[250].mxu1 }
 0x953   : > { %v10925_v18 = vadd.f32 %v10918_v42, %v10907_v50  ;;  %v10911_v59 = vpop.f32.mrb[251].mxu1  ;;  %v2543_v49 = vmax.f32 %v15957_v60, 0.0 }
 0x954   : > { %v10926_v58 = vadd.f32 %v10922_v3, %v10909_v2 }
 0x955   : > { %v10927_v27 = vmax.f32 %v10925_v18, 0.0 }
 0x956   : > { %v10928_v20 = vmax.f32 %v10926_v58, 0.0  ;;  %v12614_v58 = vpack.c.bf16 %v2543_v49, %v2543_v49 }
 0x957   : > { %v10929_v15 = vpack.c.bf16 %v10927_v27, %v10927_v27 }
 0x958   : > { %v10930_v63 = vpack.c.bf16 %v10928_v20, %v10928_v20 }
 0x95a   : > { %11167 = vmatprep.mubr.bf16.mxu0 %v10930_v63 }
 0x95b   : > { %11168 = vmatmul.mubr.bf16.vlgmr.msra.gmra.mrb[24].mxu0 %v10929_v15 }
 0xa2e   : > { %v11169_v0 = vpop.f32.mrb[24].mxu0 }
 0xa2f   : > { %v11170_v34 = vadd.f32 %v11169_v0, %v11128_v9  ;;  %v11171_v5 = vpop.f32.mrb[25].mxu0 }
 0xa30   : > { %v11172_v19 = vadd.f32 %v11171_v5, %v11132_v62  ;;  %v11173_v43 = vpop.f32.mrb[26].mxu0 }
 0xa31   : > { %v11176_v54 = vmax.f32 %v11170_v34, 0.0  ;;  %v11174_v45 = vpop.f32.mrb[27].mxu0 }
 0xa32   : > { %v11177_v55 = vmax.f32 %v11172_v19, 0.0 }
 0xa33   : > { %v11178_v52 = vpack.c.bf16 %v11176_v54, %v11176_v54 }
 0xa34   : > { %v11179_v11 = vpack.c.bf16 %v11177_v55, %v11177_v55 }
 0xa36   : > { %11341 = vmatprep.mubr.bf16.mxu1 %v11179_v11 }
 0xa37   : > { %11342 = vmatmul.mubr.bf16.vlgmr.msra.gmra.mrb[252].mxu1 %v11178_v52 }
 0xb0a   : > { %v13613_v38 = vpop.f32.mrb[252].mxu1 }
 0xb0b   : > { %v13614_v10 = vpop.f32.mrb[253].mxu1 }
 0xb0c   : > { %v13615_v56 = vadd.f32 %v13614_v10, %v13613_v38  ;;  %v13616_v1 = vpop.f32.mrb[254].mxu1 }
 0xb0d   : > { %v13617_v22 = vpop.f32.mrb[255].mxu1 }
 0xb0e   : > { %v11344_v48 = vadd.f32 %v13615_v56, %v11212_v51 }
 0xb10   : > { %v11349_v47 = vmax.f32 %v11344_v48, -20.0 }
 0xb12   : > { %v11350_v29 = vmin.f32 %v11349_v47, 2.0 }
 0xb14   : > { %v11351_v30 = vmul.f32 1.442695, %v11350_v29  ;;  %v11377_v6 = vrot.slane %v11350_v29, %v11376_v26 }
 0xb16   : > { %14929 = vpow2.f32 %v11351_v30  ;;  %v11384_v4 = vrot.slane %v11377_v6, %v11376_v26 }
 0xb18   : > { %11385 = vrot.lane.b32.xlu0 %v11384_v4, %s15008_s7 }
 0xb1c   : > { %2859 = vrot.lane.b32.xlu0 %v12594_v35, %s18759_s9 }
 0xb20   : > { %v14930_v25 = vpop.eup %14929 }
 0xb21   : > { %v11362_v41 = vmul.f32 %v14930_v25, %v11360_v28 }
 0xb23   : > { %11364 = vrot.lane.b32.xlu1 %v11362_v41, %s15008_s7 }
 0xb27   : > { %2914 = vrot.lane.b32.xlu1 %v12604_v13, %s18759_s9 }
 0xb8a   : > { %v11386_v61 = vpop.permute.xlu0 %11385 }
 0xb8b   : > { %v11388_v24 = vsub.f32 %v11369_v14, %v11386_v61 }
 0xb8d   : > { %v12541_v42 = vadd.f32 -0.9189385, %v11388_v24 }
 0xb8e   : > { %v2860_v31 = vpop.permute.xlu0 %2859 }
 0xb8f   : > { %v11391_v17 = vsel %vm11390_vm10, %v12541_v42, 0.0 }
 0xb90   : > { %11392 = vadd.xlane.f32.xlu1 %v11391_v17 }
 0xb95   : > { %v11365_v3 = vpop.permute.xlu1 %11364 }
 0xb96   : > { %v11367_v50 = vadd.f32 %v11365_v3, %v11344_v48 }
 0xb98   : > { %v11394_v39 = vmul.f32 -2.0, %v11367_v50  ;;  %11411 = vst.msk [vmem:[%s693_s8] sm:$0x1] %vm11390_vm10, %v11367_v50  ;;  %v11404_v23 = vsub.f32 0.6931472, %v11367_v50 }
 0xb99   : > { %v2915_v33 = vpop.permute.xlu1 %2914 }
 0xb9a   : > { %v11396_v2 = vand.u32 2147483647, %v11394_v39  ;;  %v11395_v15 = vmax.f32 %v11394_v39, 0.0 }
 0xb9c   : > { %v11397_v18 = vsub.f32 0.0, %v11396_v2 }
 0xb9e   : > { %v11398_v59 = vmul.f32 1.442695, %v11397_v18 }
 0xba0   : > { %14931 = vpow2.f32 %v11398_v59 }
 0xba1   : > { %2969 = vrot.lane.b32.xlu1 %v12614_v58, %s18759_s9 }
 0xbaa   : > { %v14932_v27 = vpop.eup %14931 }
 0xbab   : > { %v11400_v20 = vadd.f32 1.0, %v14932_v27 }
 0xbad   : > { %14933 = vlog2.f32 %v11400_v20 }
 0xbb7   : > { %v14934_v63 = vpop.eup %14933 }
 0xbb8   : > { %v11402_v12 = vmul.f32 0.6931472, %v14934_v63 }
 0xbba   : > { %v11403_v46 = vadd.f32 %v11402_v12, %v11395_v15 }
 0xbbc   : > { %v11405_v21 = vsub.f32 %v11404_v23, %v11403_v46 }
 0xbbe   : > { %v11406_v37 = vmul.f32 2.0, %v11405_v21 }
 0xbc0   : > { %v11407_v60 = vsel %vm11390_vm10, %v11406_v37, 0.0 }
 0xbc1   : > { %11408 = vadd.xlane.f32.xlu0 %v11407_v60 }
 0xbc2   : > { %14951 = shalt.err (!%p14948_p3)
}
 0xbc3   : > { %s14952_s3 = scalar_lea.hbm %s18656_s0, 16  ;;  %s14956_s6 = scalar_lea.hbm %s18719_s20, 32 }
 0xbc4   : > { %p14953_p4 = scmp.ne.s32.totalorder %s18656_s0, %s14952_s3  ;;  %p14957_p9 = scmp.lt.u32.totalorder %s18656_s0, %s18719_s20 }
 0xbc5   : > { %p14958_p10 = scmp.lt.u32.totalorder %s14956_s6, %s14952_s3  ;;  %p14960_p12 = scmp.lt.u32.totalorder %s14952_s3, %s18656_s0 }
 0xbc6   : > { %p14954_p7 = pnand %p14953_p4, %p15158_p5 }
 0xbc7   : > { %p14959_p11 = por %p14958_p10, %p14957_p9 }
 0xbc8   : > { %p14955_p8 = pneg %p14954_p7 }
 0xbc9   : > { %p14961_p13 = por %p14960_p12, %p14959_p11 }
 0xbcb   : > { %p14962_p0 = pnand %p14961_p13, %p14955_p8 }
 0xbcd   : > { %14965 = shalt.err (!%p14962_p0)
}
 0xbce   : > { %14028 = dma.vmem_to_hbm [thread:$0]  (%p15158_p5), %s11431_s4, 16, %s18656_s0, %s11415_s23   ;;  %vm11412_vm11 = vcmask 0  }
 0xbcf   : > { %s18760_s30 = sld [smem:[#allocation23_spill]] }
 0xbd5   : > { %s718_s1 = scalar_lea.vmem %s18760_s30, %s15189_s26 }
 0xbd7   : > { %3024 = vrot.lane.b32.xlu0 %v12624_v36, %s18759_s9 }
 0xc1d   : > { %v11393_v44 = vpop.xlane.xlu1 %11392 }
 0xc21   : > { %v2970_v9 = vpop.permute.xlu1 %2969 }
 0xc4e   : > { %v11409_v62 = vpop.xlane.xlu0 %11408 }
 0xc4f   : > { %v11410_v0 = vsub.f32 %v11393_v44, %v11409_v62 }
 0xc51   : > { %11413 = vst.msk [vmem:[%s718_s1] sm:$0x1] %vm11412_vm11, %v11410_v0 }
 0xc52   : > { %v3025_v34 = vpop.permute.xlu0 %3024 }
 0xc53 PF: > { %s18761_s2 = sld [smem:[#allocation9_spill]]  ;;  %s18762_s27 = sld [smem:[#allocation7_spill]] }
 0xc59   : > { %p14034_p1 = scmp.ge.s32.totalorder %s18761_s2, 2  ;;  %s11445_s3 = sand.u32 1, %s18762_s27  }
 0xc5a   : > { %s11446_s9 = scalar_lea.sflag [#allocation5], %s11445_s3 }
 0xc5b   : > { %p14031_p5 = pnand %p14034_p1, %p15162_p6 }
 0xc5d   : > { %14983 = dma.done.wait (!%p14031_p5), %s11446_s9, 16  }
 0xc5e   : > { %14985 = vsyncadd (!%p14031_p5), %s11446_s9, 4294967280  ;;  %s18764_s27 = sld [smem:[#allocation10_spill]]  ;;  %s18765_s0 = sld [smem:[#allocation8_spill]] }
 0xc5f   : > { %s18766_s26 = sld [smem:[#allocation11_spill]]  ;;  %s18767_s2 = smov %s14992_s25 }
 0xc64   : > { %p32_p2 = scmp.ge.s32.totalorder %s18764_s27, 4   ;;  %s18768_s25 = smov %s18765_s0 }
 0xc66   :  { %34 = sbr.rel (!%p32_p2) target bundleno = 15 (0xf), region = 159 }
 0xc6d   :  { %11456 = vsyncpa [#allocation5], 1 }
 0xc6e   :  { %11458 = vsyncpa [#allocation5 + $0x1], 1 }

</bundles_post_ra>
